<compile_context>
chip_gen: v6e
topology: v6e:2x2x1
jax: 0.10.0
libtpu: 0.0.40
codegen_flags: <defaults>
</compile_context>

<pallas_src>
import numpy as np
import jax
import jax.numpy as jnp
from jax.experimental import pallas as pl
from jax.experimental.pallas import tpu as pltpu

# Problem constants (fixed by the torch module's reshape targets).
O, I, J, N, M, K, PAD = 2, 32, 128, 28, 28, 7, 3
NM = N * M                      # 784 flattened (n, m) columns
NMP = 7 * 128                   # 896: lane-aligned per-o column pitch
HALO = NMP - NM                 # 112 wrap-halo lanes (only <=31 are ever read)
# TODO(synk): torch draws shift_direction = (random.random() > 0.5)*2 - 1 per
# module instantiation; fixed deterministically to +1 here (-1 path is
# implemented below but untested).
SHIFT = 1

# mask[k, c] = 1 iff column c < NM and its m = c % M satisfies 0 <= m+k-PAD < M
# (tap k stays inside its own n-row); the [NM, NMP) pad strip is always 0.
# Built with numpy at trace time -> baked-in constant (~25 KiB f32).
_cols = np.arange(NMP)
_m = _cols % M
_MASKS = np.stack(
    [((_cols < NM) & (_m + k - PAD >= 0) & (_m + k - PAD < M)).astype(np.float32)
     for k in range(K)], axis=0)                               # (K, NMP)


def _make_kernel(n_o, use_hw_roll):
    rows = n_o * I

    def roll_lanes(v, s):
        if use_hw_roll:
            return pltpu.roll(v, s, 1)          # XLU lane rotate (static shift)
        return jnp.roll(v, s, axis=1)           # fallback: slices + concat

    def kernel(x_ref, w_ref, mask_ref, o_ref, xw_ref, col_ref):
        # x_ref   : (rows, NM)        f32   rows = (o, i) flattened for this step
        # w_ref   : (J, K*I)          bf16  w2[j, k*I + i] = w[i, j, k]
        # mask_ref: (K, NMP)          f32   per-tap row-boundary / pad-strip masks
        # o_ref   : (n_o, J, NM)      f32   lane-dense output
        # xw_ref  : (rows, NMP)       f32   scratch: x plus a HALO-lane wrap copy
        # col_ref : (K*I, n_o*NMP)    bf16  scratch: lane-aligned im2col
        xv = x_ref[...]                                   # hoisted single load
        xw_ref[:, :NM] = xv
        # Wrap halo so a circular roll over NMP lanes reproduces the circular
        # roll over NM lanes (the torch n-roll folded onto the input) for every
        # column the mask keeps.
        if SHIFT == 1:
            xw_ref[:, NM:] = xv[:, NM - HALO:]
        else:
            xw_ref[:, NM:] = xv[:, :HALO]
        xw = xw_ref[...]                                  # hoisted: reused by all taps
        mk = mask_ref[...]

        for k in range(K):
            # combined shift = (n-roll by SHIFT rows) + (tap offset PAD - k)
            s = (SHIFT * M + PAD - k) % NMP
            r = roll_lanes(xw, s)                         # (rows, NMP)
            if k != PAD:                                  # mask[PAD] keeps all real cols
                r = r * mk[k:k + 1, :]
            for o in range(n_o):
                col_ref[k * I:(k + 1) * I, o * NMP:(o + 1) * NMP] = (
                    r[o * I:(o + 1) * I, :].astype(jnp.bfloat16))

        # Single bf16 MXU contraction over (k, i): (J, K*I) @ (K*I, n_o*NMP),
        # f32 accumulation.
        acc = jnp.dot(w_ref[...], col_ref[...],
                      preferred_element_type=jnp.float32)
        for o in range(n_o):                              # 896-lane stride: aligned slices
            o_ref[o, :, :] = acc[:, o * NMP:o * NMP + NM]

    return kernel


def _num_o_per_step():
    try:
        kind = jax.devices()[0].device_kind.lower()
    except Exception:
        kind = ""
    # v7x has 2 TensorCores: keep the 2 o-groups as separate "parallel" grid
    # steps so each core takes one.  Single-TC parts fuse both groups into one
    # grid step / one matmul (halves fixed per-step overhead + weight loads).
    return 1 if ("v7" in kind or "7x" in kind) else 2


def _build_call(n_o, use_hw_roll):
    rows = n_o * I
    cost = pl.CostEstimate(
        flops=2 * O * J * K * I * NM,
        transcendentals=0,
        bytes_accessed=(O * I * NM * 4 + J * K * I * 2 + K * NMP * 4
                        + O * J * NM * 4))
    return pl.pallas_call(
        _make_kernel(n_o, use_hw_roll),
        out_shape=jax.ShapeDtypeStruct((O, J, NM), jnp.float32),
        grid=(O // n_o,),
        in_specs=[
            pl.BlockSpec((rows, NM), lambda g: (g, 0)),
            pl.BlockSpec((J, K * I), lambda g: (0, 0)),
            pl.BlockSpec((K, NMP), lambda g: (0, 0)),
        ],
        out_specs=pl.BlockSpec((n_o, J, NM), lambda g: (g, 0, 0)),
        scratch_shapes=[
            pltpu.VMEM((rows, NMP), jnp.float32),
            pltpu.VMEM((K * I, n_o * NMP), jnp.bfloat16),
        ],
        compiler_params=pltpu.CompilerParams(
            dimension_semantics=("parallel",)),
        cost_estimate=cost,
    )


def kernel_generated_4_forward(x, w, n_o=None, use_hw_roll=True):
    """x: any shape with O*I*N*M elements; w: (I, J, K) = (32, 128, 7)."""
    if n_o is None:
        n_o = _num_o_per_step()
    xf = x.reshape(O * I, NM)                                   # free reshape
    w2 = jnp.transpose(w, (1, 2, 0)).reshape(J, K * I).astype(jnp.bfloat16)
    masks = jnp.asarray(_MASKS)                                 # (K, NMP) f32
    out = _build_call(n_o, use_hw_roll)(xf, w2, masks)
    # (o, j, n*m) -> (1, 256, 28, 28): contiguous, free reshape.
    return out.reshape(1, O * J, N, M)


# ----------------------------- references -----------------------------------

def reference_forward(x, w):
    """Pure-JAX f32 reference reproducing the torch forward (SHIFT fixed)."""
    x5 = x.reshape(1, O, I, N, M)
    xpad = jnp.pad(x5, ((0, 0),) * 4 + ((PAD, PAD),))
    xcol = jnp.stack([xpad[..., k:k + M] for k in range(K)], axis=4)  # l,o,i,n,k,m
    t3 = jnp.einsum("loinkm,ijk->lojnm", xcol, w,
                    precision=jax.lax.Precision.HIGHEST)
    return jnp.roll(t3.reshape(1, O * J, N, M), SHIFT, axis=2)


def reference_forward_bf16(x, w):
    """Same graph with operands rounded to bf16 and f32 accumulation (the
    numerics the kernel implements)."""
    x5 = x.reshape(1, O, I, N, M)
    xpad = jnp.pad(x5, ((0, 0),) * 4 + ((PAD, PAD),))
    xcol = jnp.stack([xpad[..., k:k + M] for k in range(K)], axis=4)
    t3 = jnp.einsum("loinkm,ijk->lojnm",
                    xcol.astype(jnp.bfloat16), w.astype(jnp.bfloat16),
                    preferred_element_type=jnp.float32)
    return jnp.roll(t3.reshape(1, O * J, N, M), SHIFT, axis=2)


def _run_and_check(x, w, use_hw_roll):
    fwd = jax.jit(lambda a, b: kernel_generated_4_forward(
        a, b, use_hw_roll=use_hw_roll))
    y = jax.block_until_ready(fwd(x, w))
    if y.shape != (1, O * J, N, M):
        return False, y
    y_bf = reference_forward_bf16(x, w)
    y_32 = reference_forward(x, w)
    structural_ok = bool(jnp.allclose(y, y_bf, atol=2e-2, rtol=5e-3))
    max_err = float(jnp.max(jnp.abs(y - y_32)))
    rel_err = float(jnp.linalg.norm(y - y_32) / jnp.linalg.norm(y_32))
    accuracy_ok = (max_err < 0.5) and (rel_err < 1e-2)
    return structural_ok and accuracy_ok, y


if __name__ == "__main__":
    key = jax.random.PRNGKey(0)
    kx, kw = jax.random.split(key)
    # Module fixes the element count 2*32*28*28; present it as NCHW (1,64,28,28).
    x = jax.random.normal(kx, (1, O * I, N, M), dtype=jnp.float32)
    # Deterministic stand-in for torch.randn([32, 128, 7]).
    w = jax.random.normal(kw, (I, J, K), dtype=jnp.float32)

    ok = False
    try:
        ok, y = _run_and_check(x, w, use_hw_roll=True)
    except Exception:
        ok = False
    if not ok:
        # Fallback im2col path (jnp.roll = slices+concat) with identical math.
        ok, y = _run_and_check(x, w, use_hw_roll=False)

    assert ok, "kernel output does not match the reference"
    print("KERNEL_OK")
</pallas_src>

<mosaic_0001>
module attributes {stable_mosaic.version = 11 : i64} {
  func.func @kernel(%arg0: i32, %arg1: memref<64x784xf32, #tpu.memory_space<vmem>>, %arg2: memref<128x224xbf16, #tpu.memory_space<vmem>>, %arg3: memref<7x896xf32, #tpu.memory_space<vmem>>, %arg4: memref<2x128x784xf32, #tpu.memory_space<vmem>>, %arg5: memref<64x896xf32, #tpu.memory_space<vmem>>, %arg6: memref<224x1792xbf16, #tpu.memory_space<vmem>>) attributes {dimension_semantics = [#tpu.dimension_semantics<parallel>], iteration_bounds = array<i64: 1>, scalar_prefetch = 0 : i64, scratch_operands = 2 : i64, tpu.core_type = #tpu.core_type<tc>, window_params = [{transform_indices = @transform_0, window_bounds = array<i64: 64, 784>}, {pipeline_mode = #tpu.pipeline_mode<synchronous>, transform_indices = @transform_1, window_bounds = array<i64: 128, 224>}, {pipeline_mode = #tpu.pipeline_mode<synchronous>, transform_indices = @transform_2, window_bounds = array<i64: 7, 896>}, {transform_indices = @transform_3, window_bounds = array<i64: 2, 128, 784>}]} {
    %c0 = arith.constant 0 : index
    %c0_0 = arith.constant 0 : index
    %0 = vector.load %arg1[%c0, %c0_0] : memref<64x784xf32, #tpu.memory_space<vmem>>, vector<64x784xf32>
    %c0_1 = arith.constant 0 : index
    %c0_2 = arith.constant 0 : index
    %1 = vector.load %arg5[%c0_1, %c0_2] : memref<64x896xf32, #tpu.memory_space<vmem>>, vector<64x784xf32>
    tpu.vector_store %arg5[%c0_1, %c0_2], %0 {strides = array<i32>} : memref<64x896xf32, #tpu.memory_space<vmem>>, vector<64x784xf32>,
    %2 = vector.extract_strided_slice %0 {offsets = [0, 672], sizes = [64, 112], strides = [1, 1]} : vector<64x784xf32> to vector<64x112xf32>
    %c0_3 = arith.constant 0 : index
    %c784 = arith.constant 784 : index
    %3 = vector.load %arg5[%c0_3, %c784] : memref<64x896xf32, #tpu.memory_space<vmem>>, vector<64x112xf32>
    tpu.vector_store %arg5[%c0_3, %c784], %2 {strides = array<i32>} : memref<64x896xf32, #tpu.memory_space<vmem>>, vector<64x112xf32>,
    %c0_4 = arith.constant 0 : index
    %c0_5 = arith.constant 0 : index
    %4 = vector.load %arg5[%c0_4, %c0_5] : memref<64x896xf32, #tpu.memory_space<vmem>>, vector<64x896xf32>
    %c0_6 = arith.constant 0 : index
    %c0_7 = arith.constant 0 : index
    %5 = vector.load %arg3[%c0_6, %c0_7] : memref<7x896xf32, #tpu.memory_space<vmem>>, vector<7x896xf32>
    %c31_i32 = arith.constant 31 : i32
    %6 = tpu.dynamic_rotate %4 by %c31_i32 dim 1 : vector<64x896xf32>, i32 -> vector<64x896xf32>
    %7 = vector.extract_strided_slice %5 {offsets = [0, 0], sizes = [1, 896], strides = [1, 1]} : vector<7x896xf32> to vector<1x896xf32>
    %8 = vector.broadcast %7 : vector<1x896xf32> to vector<64x896xf32>
    %9 = arith.mulf %6, %8 : vector<64x896xf32>
    %10 = vector.extract_strided_slice %9 {offsets = [0, 0], sizes = [32, 896], strides = [1, 1]} : vector<64x896xf32> to vector<32x896xf32>
    %11 = arith.truncf %10 : vector<32x896xf32> to vector<32x896xbf16>
    %c0_8 = arith.constant 0 : index
    %c0_9 = arith.constant 0 : index
    %12 = vector.load %arg6[%c0_8, %c0_9] : memref<224x1792xbf16, #tpu.memory_space<vmem>>, vector<32x896xbf16>
    tpu.vector_store %arg6[%c0_8, %c0_9], %11 {strides = array<i32>} : memref<224x1792xbf16, #tpu.memory_space<vmem>>, vector<32x896xbf16>,
    %13 = vector.extract_strided_slice %9 {offsets = [32, 0], sizes = [32, 896], strides = [1, 1]} : vector<64x896xf32> to vector<32x896xf32>
    %14 = arith.truncf %13 : vector<32x896xf32> to vector<32x896xbf16>
    %c0_10 = arith.constant 0 : index
    %c896 = arith.constant 896 : index
    %15 = vector.load %arg6[%c0_10, %c896] : memref<224x1792xbf16, #tpu.memory_space<vmem>>, vector<32x896xbf16>
    tpu.vector_store %arg6[%c0_10, %c896], %14 {strides = array<i32>} : memref<224x1792xbf16, #tpu.memory_space<vmem>>, vector<32x896xbf16>,
    %c30_i32 = arith.constant 30 : i32
    %16 = tpu.dynamic_rotate %4 by %c30_i32 dim 1 : vector<64x896xf32>, i32 -> vector<64x896xf32>
    %17 = vector.extract_strided_slice %5 {offsets = [1, 0], sizes = [1, 896], strides = [1, 1]} : vector<7x896xf32> to vector<1x896xf32>
    %18 = vector.broadcast %17 : vector<1x896xf32> to vector<64x896xf32>
    %19 = arith.mulf %16, %18 : vector<64x896xf32>
    %20 = vector.extract_strided_slice %19 {offsets = [0, 0], sizes = [32, 896], strides = [1, 1]} : vector<64x896xf32> to vector<32x896xf32>
    %21 = arith.truncf %20 : vector<32x896xf32> to vector<32x896xbf16>
    %c32 = arith.constant 32 : index
    %c0_11 = arith.constant 0 : index
    %22 = vector.load %arg6[%c32, %c0_11] : memref<224x1792xbf16, #tpu.memory_space<vmem>>, vector<32x896xbf16>
    tpu.vector_store %arg6[%c32, %c0_11], %21 {strides = array<i32>} : memref<224x1792xbf16, #tpu.memory_space<vmem>>, vector<32x896xbf16>,
    %23 = vector.extract_strided_slice %19 {offsets = [32, 0], sizes = [32, 896], strides = [1, 1]} : vector<64x896xf32> to vector<32x896xf32>
    %24 = arith.truncf %23 : vector<32x896xf32> to vector<32x896xbf16>
    %c32_12 = arith.constant 32 : index
    %c896_13 = arith.constant 896 : index
    %25 = vector.load %arg6[%c32_12, %c896_13] : memref<224x1792xbf16, #tpu.memory_space<vmem>>, vector<32x896xbf16>
    tpu.vector_store %arg6[%c32_12, %c896_13], %24 {strides = array<i32>} : memref<224x1792xbf16, #tpu.memory_space<vmem>>, vector<32x896xbf16>,
    %c29_i32 = arith.constant 29 : i32
    %26 = tpu.dynamic_rotate %4 by %c29_i32 dim 1 : vector<64x896xf32>, i32 -> vector<64x896xf32>
    %27 = vector.extract_strided_slice %5 {offsets = [2, 0], sizes = [1, 896], strides = [1, 1]} : vector<7x896xf32> to vector<1x896xf32>
    %28 = vector.broadcast %27 : vector<1x896xf32> to vector<64x896xf32>
    %29 = arith.mulf %26, %28 : vector<64x896xf32>
    %30 = vector.extract_strided_slice %29 {offsets = [0, 0], sizes = [32, 896], strides = [1, 1]} : vector<64x896xf32> to vector<32x896xf32>
    %31 = arith.truncf %30 : vector<32x896xf32> to vector<32x896xbf16>
    %c64 = arith.constant 64 : index
    %c0_14 = arith.constant 0 : index
    %32 = vector.load %arg6[%c64, %c0_14] : memref<224x1792xbf16, #tpu.memory_space<vmem>>, vector<32x896xbf16>
    tpu.vector_store %arg6[%c64, %c0_14], %31 {strides = array<i32>} : memref<224x1792xbf16, #tpu.memory_space<vmem>>, vector<32x896xbf16>,
    %33 = vector.extract_strided_slice %29 {offsets = [32, 0], sizes = [32, 896], strides = [1, 1]} : vector<64x896xf32> to vector<32x896xf32>
    %34 = arith.truncf %33 : vector<32x896xf32> to vector<32x896xbf16>
    %c64_15 = arith.constant 64 : index
    %c896_16 = arith.constant 896 : index
    %35 = vector.load %arg6[%c64_15, %c896_16] : memref<224x1792xbf16, #tpu.memory_space<vmem>>, vector<32x896xbf16>
    tpu.vector_store %arg6[%c64_15, %c896_16], %34 {strides = array<i32>} : memref<224x1792xbf16, #tpu.memory_space<vmem>>, vector<32x896xbf16>,
    %c28_i32 = arith.constant 28 : i32
    %36 = tpu.dynamic_rotate %4 by %c28_i32 dim 1 : vector<64x896xf32>, i32 -> vector<64x896xf32>
    %37 = vector.extract_strided_slice %36 {offsets = [0, 0], sizes = [32, 896], strides = [1, 1]} : vector<64x896xf32> to vector<32x896xf32>
    %38 = arith.truncf %37 : vector<32x896xf32> to vector<32x896xbf16>
    %c96 = arith.constant 96 : index
    %c0_17 = arith.constant 0 : index
    %39 = vector.load %arg6[%c96, %c0_17] : memref<224x1792xbf16, #tpu.memory_space<vmem>>, vector<32x896xbf16>
    tpu.vector_store %arg6[%c96, %c0_17], %38 {strides = array<i32>} : memref<224x1792xbf16, #tpu.memory_space<vmem>>, vector<32x896xbf16>,
    %40 = vector.extract_strided_slice %36 {offsets = [32, 0], sizes = [32, 896], strides = [1, 1]} : vector<64x896xf32> to vector<32x896xf32>
    %41 = arith.truncf %40 : vector<32x896xf32> to vector<32x896xbf16>
    %c96_18 = arith.constant 96 : index
    %c896_19 = arith.constant 896 : index
    %42 = vector.load %arg6[%c96_18, %c896_19] : memref<224x1792xbf16, #tpu.memory_space<vmem>>, vector<32x896xbf16>
    tpu.vector_store %arg6[%c96_18, %c896_19], %41 {strides = array<i32>} : memref<224x1792xbf16, #tpu.memory_space<vmem>>, vector<32x896xbf16>,
    %c27_i32 = arith.constant 27 : i32
    %43 = tpu.dynamic_rotate %4 by %c27_i32 dim 1 : vector<64x896xf32>, i32 -> vector<64x896xf32>
    %44 = vector.extract_strided_slice %5 {offsets = [4, 0], sizes = [1, 896], strides = [1, 1]} : vector<7x896xf32> to vector<1x896xf32>
    %45 = vector.broadcast %44 : vector<1x896xf32> to vector<64x896xf32>
    %46 = arith.mulf %43, %45 : vector<64x896xf32>
    %47 = vector.extract_strided_slice %46 {offsets = [0, 0], sizes = [32, 896], strides = [1, 1]} : vector<64x896xf32> to vector<32x896xf32>
    %48 = arith.truncf %47 : vector<32x896xf32> to vector<32x896xbf16>
    %c128 = arith.constant 128 : index
    %c0_20 = arith.constant 0 : index
    %49 = vector.load %arg6[%c128, %c0_20] : memref<224x1792xbf16, #tpu.memory_space<vmem>>, vector<32x896xbf16>
    tpu.vector_store %arg6[%c128, %c0_20], %48 {strides = array<i32>} : memref<224x1792xbf16, #tpu.memory_space<vmem>>, vector<32x896xbf16>,
    %50 = vector.extract_strided_slice %46 {offsets = [32, 0], sizes = [32, 896], strides = [1, 1]} : vector<64x896xf32> to vector<32x896xf32>
    %51 = arith.truncf %50 : vector<32x896xf32> to vector<32x896xbf16>
    %c128_21 = arith.constant 128 : index
    %c896_22 = arith.constant 896 : index
    %52 = vector.load %arg6[%c128_21, %c896_22] : memref<224x1792xbf16, #tpu.memory_space<vmem>>, vector<32x896xbf16>
    tpu.vector_store %arg6[%c128_21, %c896_22], %51 {strides = array<i32>} : memref<224x1792xbf16, #tpu.memory_space<vmem>>, vector<32x896xbf16>,
    %c26_i32 = arith.constant 26 : i32
    %53 = tpu.dynamic_rotate %4 by %c26_i32 dim 1 : vector<64x896xf32>, i32 -> vector<64x896xf32>
    %54 = vector.extract_strided_slice %5 {offsets = [5, 0], sizes = [1, 896], strides = [1, 1]} : vector<7x896xf32> to vector<1x896xf32>
    %55 = vector.broadcast %54 : vector<1x896xf32> to vector<64x896xf32>
    %56 = arith.mulf %53, %55 : vector<64x896xf32>
    %57 = vector.extract_strided_slice %56 {offsets = [0, 0], sizes = [32, 896], strides = [1, 1]} : vector<64x896xf32> to vector<32x896xf32>
    %58 = arith.truncf %57 : vector<32x896xf32> to vector<32x896xbf16>
    %c160 = arith.constant 160 : index
    %c0_23 = arith.constant 0 : index
    %59 = vector.load %arg6[%c160, %c0_23] : memref<224x1792xbf16, #tpu.memory_space<vmem>>, vector<32x896xbf16>
    tpu.vector_store %arg6[%c160, %c0_23], %58 {strides = array<i32>} : memref<224x1792xbf16, #tpu.memory_space<vmem>>, vector<32x896xbf16>,
    %60 = vector.extract_strided_slice %56 {offsets = [32, 0], sizes = [32, 896], strides = [1, 1]} : vector<64x896xf32> to vector<32x896xf32>
    %61 = arith.truncf %60 : vector<32x896xf32> to vector<32x896xbf16>
    %c160_24 = arith.constant 160 : index
    %c896_25 = arith.constant 896 : index
    %62 = vector.load %arg6[%c160_24, %c896_25] : memref<224x1792xbf16, #tpu.memory_space<vmem>>, vector<32x896xbf16>
    tpu.vector_store %arg6[%c160_24, %c896_25], %61 {strides = array<i32>} : memref<224x1792xbf16, #tpu.memory_space<vmem>>, vector<32x896xbf16>,
    %c25_i32 = arith.constant 25 : i32
    %63 = tpu.dynamic_rotate %4 by %c25_i32 dim 1 : vector<64x896xf32>, i32 -> vector<64x896xf32>
    %64 = vector.extract_strided_slice %5 {offsets = [6, 0], sizes = [1, 896], strides = [1, 1]} : vector<7x896xf32> to vector<1x896xf32>
    %65 = vector.broadcast %64 : vector<1x896xf32> to vector<64x896xf32>
    %66 = arith.mulf %63, %65 : vector<64x896xf32>
    %67 = vector.extract_strided_slice %66 {offsets = [0, 0], sizes = [32, 896], strides = [1, 1]} : vector<64x896xf32> to vector<32x896xf32>
    %68 = arith.truncf %67 : vector<32x896xf32> to vector<32x896xbf16>
    %c192 = arith.constant 192 : index
    %c0_26 = arith.constant 0 : index
    %69 = vector.load %arg6[%c192, %c0_26] : memref<224x1792xbf16, #tpu.memory_space<vmem>>, vector<32x896xbf16>
    tpu.vector_store %arg6[%c192, %c0_26], %68 {strides = array<i32>} : memref<224x1792xbf16, #tpu.memory_space<vmem>>, vector<32x896xbf16>,
    %70 = vector.extract_strided_slice %66 {offsets = [32, 0], sizes = [32, 896], strides = [1, 1]} : vector<64x896xf32> to vector<32x896xf32>
    %71 = arith.truncf %70 : vector<32x896xf32> to vector<32x896xbf16>
    %c192_27 = arith.constant 192 : index
    %c896_28 = arith.constant 896 : index
    %72 = vector.load %arg6[%c192_27, %c896_28] : memref<224x1792xbf16, #tpu.memory_space<vmem>>, vector<32x896xbf16>
    tpu.vector_store %arg6[%c192_27, %c896_28], %71 {strides = array<i32>} : memref<224x1792xbf16, #tpu.memory_space<vmem>>, vector<32x896xbf16>,
    %c0_29 = arith.constant 0 : index
    %c0_30 = arith.constant 0 : index
    %73 = vector.load %arg2[%c0_29, %c0_30] : memref<128x224xbf16, #tpu.memory_space<vmem>>, vector<128x224xbf16>
    %c0_31 = arith.constant 0 : index
    %c0_32 = arith.constant 0 : index
    %74 = vector.load %arg6[%c0_31, %c0_32] : memref<224x1792xbf16, #tpu.memory_space<vmem>>, vector<224x1792xbf16>
    %cst = arith.constant dense<0.000000e+00> : vector<128x1792xf32>
    %75 = tpu.matmul %73, %74, %cst {dimension_numbers = #tpu.dot_dimension_numbers<[1], [0], [0], [1], [0, 0, 1, 1], [], []>} : vector<128x224xbf16>, vector<224x1792xbf16>, vector<128x1792xf32> -> vector<128x1792xf32>
    %76 = vector.extract_strided_slice %75 {offsets = [0, 0], sizes = [128, 784], strides = [1, 1]} : vector<128x1792xf32> to vector<128x784xf32>
    %c0_33 = arith.constant 0 : index
    %c0_34 = arith.constant 0 : index
    %c0_35 = arith.constant 0 : index
    %77 = vector.load %arg4[%c0_33, %c0_34, %c0_35] : memref<2x128x784xf32, #tpu.memory_space<vmem>>, vector<1x128x784xf32>
    %78 = vector.shape_cast %77 : vector<1x128x784xf32> to vector<128x784xf32>
    %79 = vector.shape_cast %76 : vector<128x784xf32> to vector<1x128x784xf32>
    tpu.vector_store %arg4[%c0_33, %c0_34, %c0_35], %79 {strides = array<i32>} : memref<2x128x784xf32, #tpu.memory_space<vmem>>, vector<1x128x784xf32>,
    %80 = vector.extract_strided_slice %75 {offsets = [0, 896], sizes = [128, 784], strides = [1, 1]} : vector<128x1792xf32> to vector<128x784xf32>
    %c1 = arith.constant 1 : index
    %c0_36 = arith.constant 0 : index
    %c0_37 = arith.constant 0 : index
    %81 = vector.load %arg4[%c1, %c0_36, %c0_37] : memref<2x128x784xf32, #tpu.memory_space<vmem>>, vector<1x128x784xf32>
    %82 = vector.shape_cast %81 : vector<1x128x784xf32> to vector<128x784xf32>
    %83 = vector.shape_cast %80 : vector<128x784xf32> to vector<1x128x784xf32>
    tpu.vector_store %arg4[%c1, %c0_36, %c0_37], %83 {strides = array<i32>} : memref<2x128x784xf32, #tpu.memory_space<vmem>>, vector<1x128x784xf32>,
    return
  }
  func.func @transform_0(%arg0: i32) -> (i32, i32) {
    %c0_i32 = arith.constant 0 : i32
    %c0_i32_0 = arith.constant 0 : i32
    return %arg0, %c0_i32 : i32, i32
  }
  func.func @transform_1(%arg0: i32) -> (i32, i32) {
    %c0_i32 = arith.constant 0 : i32
    %c0_i32_0 = arith.constant 0 : i32
    %c0_i32_1 = arith.constant 0 : i32
    return %c0_i32, %c0_i32_0 : i32, i32
  }
  func.func @transform_2(%arg0: i32) -> (i32, i32) {
    %c0_i32 = arith.constant 0 : i32
    %c0_i32_0 = arith.constant 0 : i32
    %c0_i32_1 = arith.constant 0 : i32
    return %c0_i32, %c0_i32_0 : i32, i32
  }
  func.func @transform_3(%arg0: i32) -> (i32, i32, i32) {
    %c0_i32 = arith.constant 0 : i32
    %c0_i32_0 = arith.constant 0 : i32
    %c0_i32_1 = arith.constant 0 : i32
    return %arg0, %c0_i32, %c0_i32_0 : i32, i32, i32
  }
}

module attributes {stable_mosaic.version = 11 : i64} {
  func.func @kernel(%arg0: i32, %arg1: memref<64x784xf32, #tpu.memory_space<vmem>>, %arg2: memref<128x224xbf16, #tpu.memory_space<vmem>>, %arg3: memref<7x896xf32, #tpu.memory_space<vmem>>, %arg4: memref<2x128x784xf32, #tpu.memory_space<vmem>>, %arg5: memref<64x896xf32, #tpu.memory_space<vmem>>, %arg6: memref<224x1792xbf16, #tpu.memory_space<vmem>>) attributes {dimension_semantics = [#tpu.dimension_semantics<parallel>], iteration_bounds = array<i64: 1>, scalar_prefetch = 0 : i64, scratch_operands = 2 : i64, tpu.core_type = #tpu.core_type<tc>, window_params = [{transform_indices = @transform_0, window_bounds = array<i64: 64, 784>}, {pipeline_mode = #tpu.pipeline_mode<synchronous>, transform_indices = @transform_1, window_bounds = array<i64: 128, 224>}, {pipeline_mode = #tpu.pipeline_mode<synchronous>, transform_indices = @transform_2, window_bounds = array<i64: 7, 896>}, {transform_indices = @transform_3, window_bounds = array<i64: 2, 128, 784>}]} {
    %c0 = arith.constant 0 : index
    %c0_0 = arith.constant 0 : index
    %0 = vector.load %arg1[%c0, %c0_0] : memref<64x784xf32, #tpu.memory_space<vmem>>, vector<64x784xf32>
    %c0_1 = arith.constant 0 : index
    %c0_2 = arith.constant 0 : index
    %1 = vector.load %arg5[%c0_1, %c0_2] : memref<64x896xf32, #tpu.memory_space<vmem>>, vector<64x784xf32>
    tpu.vector_store %arg5[%c0_1, %c0_2], %0 {strides = array<i32>} : memref<64x896xf32, #tpu.memory_space<vmem>>, vector<64x784xf32>,
    %2 = vector.extract_strided_slice %0 {offsets = [0, 672], sizes = [64, 112], strides = [1, 1]} : vector<64x784xf32> to vector<64x112xf32>
    %c0_3 = arith.constant 0 : index
    %c784 = arith.constant 784 : index
    %3 = vector.load %arg5[%c0_3, %c784] : memref<64x896xf32, #tpu.memory_space<vmem>>, vector<64x112xf32>
    tpu.vector_store %arg5[%c0_3, %c784], %2 {strides = array<i32>} : memref<64x896xf32, #tpu.memory_space<vmem>>, vector<64x112xf32>,
    %c0_4 = arith.constant 0 : index
    %c0_5 = arith.constant 0 : index
    %4 = vector.load %arg5[%c0_4, %c0_5] : memref<64x896xf32, #tpu.memory_space<vmem>>, vector<64x896xf32>
    %c0_6 = arith.constant 0 : index
    %c0_7 = arith.constant 0 : index
    %5 = vector.load %arg3[%c0_6, %c0_7] : memref<7x896xf32, #tpu.memory_space<vmem>>, vector<7x896xf32>
    %6 = vector.extract_strided_slice %4 {offsets = [0, 865], sizes = [64, 31], strides = [1, 1]} : vector<64x896xf32> to vector<64x31xf32>
    %7 = vector.extract_strided_slice %4 {offsets = [0, 0], sizes = [64, 865], strides = [1, 1]} : vector<64x896xf32> to vector<64x865xf32>
    %8 = tpu.concatenate %6, %7 in 1 : vector<64x31xf32>, vector<64x865xf32> -> vector<64x896xf32>
    %9 = vector.extract_strided_slice %5 {offsets = [0, 0], sizes = [1, 896], strides = [1, 1]} : vector<7x896xf32> to vector<1x896xf32>
    %10 = vector.broadcast %9 : vector<1x896xf32> to vector<64x896xf32>
    %11 = arith.mulf %8, %10 : vector<64x896xf32>
    %12 = vector.extract_strided_slice %11 {offsets = [0, 0], sizes = [32, 896], strides = [1, 1]} : vector<64x896xf32> to vector<32x896xf32>
    %13 = arith.truncf %12 : vector<32x896xf32> to vector<32x896xbf16>
    %c0_8 = arith.constant 0 : index
    %c0_9 = arith.constant 0 : index
    %14 = vector.load %arg6[%c0_8, %c0_9] : memref<224x1792xbf16, #tpu.memory_space<vmem>>, vector<32x896xbf16>
    tpu.vector_store %arg6[%c0_8, %c0_9], %13 {strides = array<i32>} : memref<224x1792xbf16, #tpu.memory_space<vmem>>, vector<32x896xbf16>,
    %15 = vector.extract_strided_slice %11 {offsets = [32, 0], sizes = [32, 896], strides = [1, 1]} : vector<64x896xf32> to vector<32x896xf32>
    %16 = arith.truncf %15 : vector<32x896xf32> to vector<32x896xbf16>
    %c0_10 = arith.constant 0 : index
    %c896 = arith.constant 896 : index
    %17 = vector.load %arg6[%c0_10, %c896] : memref<224x1792xbf16, #tpu.memory_space<vmem>>, vector<32x896xbf16>
    tpu.vector_store %arg6[%c0_10, %c896], %16 {strides = array<i32>} : memref<224x1792xbf16, #tpu.memory_space<vmem>>, vector<32x896xbf16>,
    %18 = vector.extract_strided_slice %4 {offsets = [0, 866], sizes = [64, 30], strides = [1, 1]} : vector<64x896xf32> to vector<64x30xf32>
    %19 = vector.extract_strided_slice %4 {offsets = [0, 0], sizes = [64, 866], strides = [1, 1]} : vector<64x896xf32> to vector<64x866xf32>
    %20 = tpu.concatenate %18, %19 in 1 : vector<64x30xf32>, vector<64x866xf32> -> vector<64x896xf32>
    %21 = vector.extract_strided_slice %5 {offsets = [1, 0], sizes = [1, 896], strides = [1, 1]} : vector<7x896xf32> to vector<1x896xf32>
    %22 = vector.broadcast %21 : vector<1x896xf32> to vector<64x896xf32>
    %23 = arith.mulf %20, %22 : vector<64x896xf32>
    %24 = vector.extract_strided_slice %23 {offsets = [0, 0], sizes = [32, 896], strides = [1, 1]} : vector<64x896xf32> to vector<32x896xf32>
    %25 = arith.truncf %24 : vector<32x896xf32> to vector<32x896xbf16>
    %c32 = arith.constant 32 : index
    %c0_11 = arith.constant 0 : index
    %26 = vector.load %arg6[%c32, %c0_11] : memref<224x1792xbf16, #tpu.memory_space<vmem>>, vector<32x896xbf16>
    tpu.vector_store %arg6[%c32, %c0_11], %25 {strides = array<i32>} : memref<224x1792xbf16, #tpu.memory_space<vmem>>, vector<32x896xbf16>,
    %27 = vector.extract_strided_slice %23 {offsets = [32, 0], sizes = [32, 896], strides = [1, 1]} : vector<64x896xf32> to vector<32x896xf32>
    %28 = arith.truncf %27 : vector<32x896xf32> to vector<32x896xbf16>
    %c32_12 = arith.constant 32 : index
    %c896_13 = arith.constant 896 : index
    %29 = vector.load %arg6[%c32_12, %c896_13] : memref<224x1792xbf16, #tpu.memory_space<vmem>>, vector<32x896xbf16>
    tpu.vector_store %arg6[%c32_12, %c896_13], %28 {strides = array<i32>} : memref<224x1792xbf16, #tpu.memory_space<vmem>>, vector<32x896xbf16>,
    %30 = vector.extract_strided_slice %4 {offsets = [0, 867], sizes = [64, 29], strides = [1, 1]} : vector<64x896xf32> to vector<64x29xf32>
    %31 = vector.extract_strided_slice %4 {offsets = [0, 0], sizes = [64, 867], strides = [1, 1]} : vector<64x896xf32> to vector<64x867xf32>
    %32 = tpu.concatenate %30, %31 in 1 : vector<64x29xf32>, vector<64x867xf32> -> vector<64x896xf32>
    %33 = vector.extract_strided_slice %5 {offsets = [2, 0], sizes = [1, 896], strides = [1, 1]} : vector<7x896xf32> to vector<1x896xf32>
    %34 = vector.broadcast %33 : vector<1x896xf32> to vector<64x896xf32>
    %35 = arith.mulf %32, %34 : vector<64x896xf32>
    %36 = vector.extract_strided_slice %35 {offsets = [0, 0], sizes = [32, 896], strides = [1, 1]} : vector<64x896xf32> to vector<32x896xf32>
    %37 = arith.truncf %36 : vector<32x896xf32> to vector<32x896xbf16>
    %c64 = arith.constant 64 : index
    %c0_14 = arith.constant 0 : index
    %38 = vector.load %arg6[%c64, %c0_14] : memref<224x1792xbf16, #tpu.memory_space<vmem>>, vector<32x896xbf16>
    tpu.vector_store %arg6[%c64, %c0_14], %37 {strides = array<i32>} : memref<224x1792xbf16, #tpu.memory_space<vmem>>, vector<32x896xbf16>,
    %39 = vector.extract_strided_slice %35 {offsets = [32, 0], sizes = [32, 896], strides = [1, 1]} : vector<64x896xf32> to vector<32x896xf32>
    %40 = arith.truncf %39 : vector<32x896xf32> to vector<32x896xbf16>
    %c64_15 = arith.constant 64 : index
    %c896_16 = arith.constant 896 : index
    %41 = vector.load %arg6[%c64_15, %c896_16] : memref<224x1792xbf16, #tpu.memory_space<vmem>>, vector<32x896xbf16>
    tpu.vector_store %arg6[%c64_15, %c896_16], %40 {strides = array<i32>} : memref<224x1792xbf16, #tpu.memory_space<vmem>>, vector<32x896xbf16>,
    %42 = vector.extract_strided_slice %4 {offsets = [0, 868], sizes = [64, 28], strides = [1, 1]} : vector<64x896xf32> to vector<64x28xf32>
    %43 = vector.extract_strided_slice %4 {offsets = [0, 0], sizes = [64, 868], strides = [1, 1]} : vector<64x896xf32> to vector<64x868xf32>
    %44 = tpu.concatenate %42, %43 in 1 : vector<64x28xf32>, vector<64x868xf32> -> vector<64x896xf32>
    %45 = vector.extract_strided_slice %44 {offsets = [0, 0], sizes = [32, 896], strides = [1, 1]} : vector<64x896xf32> to vector<32x896xf32>
    %46 = arith.truncf %45 : vector<32x896xf32> to vector<32x896xbf16>
    %c96 = arith.constant 96 : index
    %c0_17 = arith.constant 0 : index
    %47 = vector.load %arg6[%c96, %c0_17] : memref<224x1792xbf16, #tpu.memory_space<vmem>>, vector<32x896xbf16>
    tpu.vector_store %arg6[%c96, %c0_17], %46 {strides = array<i32>} : memref<224x1792xbf16, #tpu.memory_space<vmem>>, vector<32x896xbf16>,
    %48 = vector.extract_strided_slice %44 {offsets = [32, 0], sizes = [32, 896], strides = [1, 1]} : vector<64x896xf32> to vector<32x896xf32>
    %49 = arith.truncf %48 : vector<32x896xf32> to vector<32x896xbf16>
    %c96_18 = arith.constant 96 : index
    %c896_19 = arith.constant 896 : index
    %50 = vector.load %arg6[%c96_18, %c896_19] : memref<224x1792xbf16, #tpu.memory_space<vmem>>, vector<32x896xbf16>
    tpu.vector_store %arg6[%c96_18, %c896_19], %49 {strides = array<i32>} : memref<224x1792xbf16, #tpu.memory_space<vmem>>, vector<32x896xbf16>,
    %51 = vector.extract_strided_slice %4 {offsets = [0, 869], sizes = [64, 27], strides = [1, 1]} : vector<64x896xf32> to vector<64x27xf32>
    %52 = vector.extract_strided_slice %4 {offsets = [0, 0], sizes = [64, 869], strides = [1, 1]} : vector<64x896xf32> to vector<64x869xf32>
    %53 = tpu.concatenate %51, %52 in 1 : vector<64x27xf32>, vector<64x869xf32> -> vector<64x896xf32>
    %54 = vector.extract_strided_slice %5 {offsets = [4, 0], sizes = [1, 896], strides = [1, 1]} : vector<7x896xf32> to vector<1x896xf32>
    %55 = vector.broadcast %54 : vector<1x896xf32> to vector<64x896xf32>
    %56 = arith.mulf %53, %55 : vector<64x896xf32>
    %57 = vector.extract_strided_slice %56 {offsets = [0, 0], sizes = [32, 896], strides = [1, 1]} : vector<64x896xf32> to vector<32x896xf32>
    %58 = arith.truncf %57 : vector<32x896xf32> to vector<32x896xbf16>
    %c128 = arith.constant 128 : index
    %c0_20 = arith.constant 0 : index
    %59 = vector.load %arg6[%c128, %c0_20] : memref<224x1792xbf16, #tpu.memory_space<vmem>>, vector<32x896xbf16>
    tpu.vector_store %arg6[%c128, %c0_20], %58 {strides = array<i32>} : memref<224x1792xbf16, #tpu.memory_space<vmem>>, vector<32x896xbf16>,
    %60 = vector.extract_strided_slice %56 {offsets = [32, 0], sizes = [32, 896], strides = [1, 1]} : vector<64x896xf32> to vector<32x896xf32>
    %61 = arith.truncf %60 : vector<32x896xf32> to vector<32x896xbf16>
    %c128_21 = arith.constant 128 : index
    %c896_22 = arith.constant 896 : index
    %62 = vector.load %arg6[%c128_21, %c896_22] : memref<224x1792xbf16, #tpu.memory_space<vmem>>, vector<32x896xbf16>
    tpu.vector_store %arg6[%c128_21, %c896_22], %61 {strides = array<i32>} : memref<224x1792xbf16, #tpu.memory_space<vmem>>, vector<32x896xbf16>,
    %63 = vector.extract_strided_slice %4 {offsets = [0, 870], sizes = [64, 26], strides = [1, 1]} : vector<64x896xf32> to vector<64x26xf32>
    %64 = vector.extract_strided_slice %4 {offsets = [0, 0], sizes = [64, 870], strides = [1, 1]} : vector<64x896xf32> to vector<64x870xf32>
    %65 = tpu.concatenate %63, %64 in 1 : vector<64x26xf32>, vector<64x870xf32> -> vector<64x896xf32>
    %66 = vector.extract_strided_slice %5 {offsets = [5, 0], sizes = [1, 896], strides = [1, 1]} : vector<7x896xf32> to vector<1x896xf32>
    %67 = vector.broadcast %66 : vector<1x896xf32> to vector<64x896xf32>
    %68 = arith.mulf %65, %67 : vector<64x896xf32>
    %69 = vector.extract_strided_slice %68 {offsets = [0, 0], sizes = [32, 896], strides = [1, 1]} : vector<64x896xf32> to vector<32x896xf32>
    %70 = arith.truncf %69 : vector<32x896xf32> to vector<32x896xbf16>
    %c160 = arith.constant 160 : index
    %c0_23 = arith.constant 0 : index
    %71 = vector.load %arg6[%c160, %c0_23] : memref<224x1792xbf16, #tpu.memory_space<vmem>>, vector<32x896xbf16>
    tpu.vector_store %arg6[%c160, %c0_23], %70 {strides = array<i32>} : memref<224x1792xbf16, #tpu.memory_space<vmem>>, vector<32x896xbf16>,
    %72 = vector.extract_strided_slice %68 {offsets = [32, 0], sizes = [32, 896], strides = [1, 1]} : vector<64x896xf32> to vector<32x896xf32>
    %73 = arith.truncf %72 : vector<32x896xf32> to vector<32x896xbf16>
    %c160_24 = arith.constant 160 : index
    %c896_25 = arith.constant 896 : index
    %74 = vector.load %arg6[%c160_24, %c896_25] : memref<224x1792xbf16, #tpu.memory_space<vmem>>, vector<32x896xbf16>
    tpu.vector_store %arg6[%c160_24, %c896_25], %73 {strides = array<i32>} : memref<224x1792xbf16, #tpu.memory_space<vmem>>, vector<32x896xbf16>,
    %75 = vector.extract_strided_slice %4 {offsets = [0, 871], sizes = [64, 25], strides = [1, 1]} : vector<64x896xf32> to vector<64x25xf32>
    %76 = vector.extract_strided_slice %4 {offsets = [0, 0], sizes = [64, 871], strides = [1, 1]} : vector<64x896xf32> to vector<64x871xf32>
    %77 = tpu.concatenate %75, %76 in 1 : vector<64x25xf32>, vector<64x871xf32> -> vector<64x896xf32>
    %78 = vector.extract_strided_slice %5 {offsets = [6, 0], sizes = [1, 896], strides = [1, 1]} : vector<7x896xf32> to vector<1x896xf32>
    %79 = vector.broadcast %78 : vector<1x896xf32> to vector<64x896xf32>
    %80 = arith.mulf %77, %79 : vector<64x896xf32>
    %81 = vector.extract_strided_slice %80 {offsets = [0, 0], sizes = [32, 896], strides = [1, 1]} : vector<64x896xf32> to vector<32x896xf32>
    %82 = arith.truncf %81 : vector<32x896xf32> to vector<32x896xbf16>
    %c192 = arith.constant 192 : index
    %c0_26 = arith.constant 0 : index
    %83 = vector.load %arg6[%c192, %c0_26] : memref<224x1792xbf16, #tpu.memory_space<vmem>>, vector<32x896xbf16>
    tpu.vector_store %arg6[%c192, %c0_26], %82 {strides = array<i32>} : memref<224x1792xbf16, #tpu.memory_space<vmem>>, vector<32x896xbf16>,
    %84 = vector.extract_strided_slice %80 {offsets = [32, 0], sizes = [32, 896], strides = [1, 1]} : vector<64x896xf32> to vector<32x896xf32>
    %85 = arith.truncf %84 : vector<32x896xf32> to vector<32x896xbf16>
    %c192_27 = arith.constant 192 : index
    %c896_28 = arith.constant 896 : index
    %86 = vector.load %arg6[%c192_27, %c896_28] : memref<224x1792xbf16, #tpu.memory_space<vmem>>, vector<32x896xbf16>
    tpu.vector_store %arg6[%c192_27, %c896_28], %85 {strides = array<i32>} : memref<224x1792xbf16, #tpu.memory_space<vmem>>, vector<32x896xbf16>,
    %c0_29 = arith.constant 0 : index
    %c0_30 = arith.constant 0 : index
    %87 = vector.load %arg2[%c0_29, %c0_30] : memref<128x224xbf16, #tpu.memory_space<vmem>>, vector<128x224xbf16>
    %c0_31 = arith.constant 0 : index
    %c0_32 = arith.constant 0 : index
    %88 = vector.load %arg6[%c0_31, %c0_32] : memref<224x1792xbf16, #tpu.memory_space<vmem>>, vector<224x1792xbf16>
    %cst = arith.constant dense<0.000000e+00> : vector<128x1792xf32>
    %89 = tpu.matmul %87, %88, %cst {dimension_numbers = #tpu.dot_dimension_numbers<[1], [0], [0], [1], [0, 0, 1, 1], [], []>} : vector<128x224xbf16>, vector<224x1792xbf16>, vector<128x1792xf32> -> vector<128x1792xf32>
    %90 = vector.extract_strided_slice %89 {offsets = [0, 0], sizes = [128, 784], strides = [1, 1]} : vector<128x1792xf32> to vector<128x784xf32>
    %c0_33 = arith.constant 0 : index
    %c0_34 = arith.constant 0 : index
    %c0_35 = arith.constant 0 : index
    %91 = vector.load %arg4[%c0_33, %c0_34, %c0_35] : memref<2x128x784xf32, #tpu.memory_space<vmem>>, vector<1x128x784xf32>
    %92 = vector.shape_cast %91 : vector<1x128x784xf32> to vector<128x784xf32>
    %93 = vector.shape_cast %90 : vector<128x784xf32> to vector<1x128x784xf32>
    tpu.vector_store %arg4[%c0_33, %c0_34, %c0_35], %93 {strides = array<i32>} : memref<2x128x784xf32, #tpu.memory_space<vmem>>, vector<1x128x784xf32>,
    %94 = vector.extract_strided_slice %89 {offsets = [0, 896], sizes = [128, 784], strides = [1, 1]} : vector<128x1792xf32> to vector<128x784xf32>
    %c1 = arith.constant 1 : index
    %c0_36 = arith.constant 0 : index
    %c0_37 = arith.constant 0 : index
    %95 = vector.load %arg4[%c1, %c0_36, %c0_37] : memref<2x128x784xf32, #tpu.memory_space<vmem>>, vector<1x128x784xf32>
    %96 = vector.shape_cast %95 : vector<1x128x784xf32> to vector<128x784xf32>
    %97 = vector.shape_cast %94 : vector<128x784xf32> to vector<1x128x784xf32>
    tpu.vector_store %arg4[%c1, %c0_36, %c0_37], %97 {strides = array<i32>} : memref<2x128x784xf32, #tpu.memory_space<vmem>>, vector<1x128x784xf32>,
    return
  }
  func.func @transform_0(%arg0: i32) -> (i32, i32) {
    %c0_i32 = arith.constant 0 : i32
    %c0_i32_0 = arith.constant 0 : i32
    return %arg0, %c0_i32 : i32, i32
  }
  func.func @transform_1(%arg0: i32) -> (i32, i32) {
    %c0_i32 = arith.constant 0 : i32
    %c0_i32_0 = arith.constant 0 : i32
    %c0_i32_1 = arith.constant 0 : i32
    return %c0_i32, %c0_i32_0 : i32, i32
  }
  func.func @transform_2(%arg0: i32) -> (i32, i32) {
    %c0_i32 = arith.constant 0 : i32
    %c0_i32_0 = arith.constant 0 : i32
    %c0_i32_1 = arith.constant 0 : i32
    return %c0_i32, %c0_i32_0 : i32, i32
  }
  func.func @transform_3(%arg0: i32) -> (i32, i32, i32) {
    %c0_i32 = arith.constant 0 : i32
    %c0_i32_0 = arith.constant 0 : i32
    %c0_i32_1 = arith.constant 0 : i32
    return %arg0, %c0_i32, %c0_i32_0 : i32, i32, i32
  }
}

</mosaic_0001>

<bundles_post_ra>
// kernel: _lambda_.1
= control target key start
LH: loop header
LB: loop body
LE: loop exit
PB: predicated region body
PF: predicated region fallthrough
CT: control target
= control target key end

     0   :  { %vm77_vm0 = vcmask 130048   ;;  %s7119_s18 = smov 112   ;;  %vm176_vm1 = vcmask 916480   ;;  %vm193_vm2 = vcmask 1047680   ;;  %s7122_s8 = smov 29   ;;  %vm4674_vm7 = vcmask 785408   ;;  %s11497_s0 = inlined_call_operand.vmem [shape: f32[64,784], index: 0, kind: input, shape index: {}]   ;;  %s11498_s2 = inlined_call_operand.vmem [shape: f32[7,896], index: 2, kind: input, shape index: {}]   ;;  %s11499_s1 = inlined_call_operand.vmem [shape: bf16[128,224], index: 1, kind: input, shape index: {}]   ;;  %s11500_s3 = inlined_call_operand.vmem [shape: f32[2,128,784], index: 3, kind: output, shape index: {}]  }
   0x1   :  { %v7150_v0 = vld [vmem:[%s11497_s0 + $0x60] sm:$0xff]  ;;  %v7155_v1 = vld [vmem:[%s11497_s0 + $0x28] sm:$0xff]  ;;  %v21_v3 = vld [vmem:[%s11497_s0 + $0x30] sm:$0xff]  ;;  %s7123_s9 = smov 28   ;;  %s7124_s10 = smov 25  }
   0x2   :  { %v28_v2 = vld [vmem:[%s11497_s0 + $0x68] sm:$0xff]  ;;  %148 = vrot.lane.b32.xlu1 %v7150_v0, %s7119_s18  ;;  %84 = vst [vmem:[#allocation2 + $0x60] sm:$0xff] %v7150_v0  ;;  %144 = vrot.lane.b32.xlu0 %v7155_v1, %s7119_s18  ;;  %76 = vst [vmem:[#allocation2 + $0x28] sm:$0xff] %v7155_v1  ;;  %v35_v4 = vld [vmem:[%s11497_s0 + $0xa0] sm:$0xff]  ;;  %s7125_s11 = smov 26   ;;  %s7126_s12 = smov 27  }
   0x3   :  { %85 = vst.msk [vmem:[#allocation2 + $0x68] sm:$0xff] %vm77_vm0, %v28_v2  ;;  %78 = vst.msk [vmem:[#allocation2 + $0x30] sm:$0xff] %vm77_vm0, %v21_v3  ;;  %v7178_v5 = vld [vmem:[%s11497_s0 + $0x98] sm:$0xff]  ;;  %v7186_v7 = vld [vmem:[%s11497_s0 + $0xd0] sm:$0xff] }
   0x4   :  { %92 = vst.msk [vmem:[#allocation2 + $0xa0] sm:$0xff] %vm77_vm0, %v35_v4  ;;  %v42_v6 = vld [vmem:[%s11497_s0 + $0xd8] sm:$0xff]  ;;  %91 = vst [vmem:[#allocation2 + $0x98] sm:$0xff] %v7178_v5  ;;  %v7194_v8 = vld [vmem:[%s11497_s0 + $0x110] sm:$0xff] }
   0x5   :  { %99 = vst.msk [vmem:[#allocation2 + $0xd8] sm:$0xff] %vm77_vm0, %v42_v6  ;;  %98 = vst [vmem:[#allocation2 + $0xd0] sm:$0xff] %v7186_v7  ;;  %v7199_v9 = vld [vmem:[%s11497_s0 + $0x108] sm:$0xff]  ;;  %v7214_v11 = vld [vmem:[%s11497_s0 + $0x140] sm:$0xff] }
   0x6   :  { %v7204_v10 = vld [vmem:[%s11497_s0 + $0x148] sm:$0xff]  ;;  %106 = vst.msk [vmem:[#allocation2 + $0x110] sm:$0xff] %vm77_vm0, %v7194_v8  ;;  %105 = vst [vmem:[#allocation2 + $0x108] sm:$0xff] %v7199_v9  ;;  %v7219_v12 = vld [vmem:[%s11497_s0 + $0x180] sm:$0xff]  ;;  %150 = vrot.lane.b32.xlu1 %v28_v2, %s7119_s18  ;;  %146 = vrot.lane.b32.xlu0 %v21_v3, %s7119_s18 }
   0x7   :  { %113 = vst.msk [vmem:[#allocation2 + $0x148] sm:$0xff] %vm77_vm0, %v7204_v10  ;;  %v7224_v13 = vld [vmem:[%s11497_s0 + $0x178] sm:$0xff]  ;;  %112 = vst [vmem:[#allocation2 + $0x140] sm:$0xff] %v7214_v11  ;;  %v7240_v15 = vld [vmem:[%s11497_s0 + $0x1b0] sm:$0xff] }
   0x8   :  { %120 = vst.msk [vmem:[#allocation2 + $0x180] sm:$0xff] %vm77_vm0, %v7219_v12  ;;  %119 = vst [vmem:[#allocation2 + $0x178] sm:$0xff] %v7224_v13  ;;  %v7235_v14 = vld [vmem:[%s11497_s0 + $0x1b8] sm:$0xff]  ;;  %v7253_v17 = vld [vmem:[%s11497_s0] sm:$0xff] }
   0x9   :  { %127 = vst.msk [vmem:[#allocation2 + $0x1b8] sm:$0xff] %vm77_vm0, %v7235_v14  ;;  %126 = vst [vmem:[#allocation2 + $0x1b0] sm:$0xff] %v7240_v15  ;;  %v7248_v16 = vld [vmem:[%s11497_s0 + $0x38] sm:$0xff]  ;;  %v7258_v18 = vld [vmem:[%s11497_s0 + $0xa8] sm:$0xff] }
   0xa   :  { %11620 = vst [vmem:[#allocation4_spill] sm:$0xff] %v7253_v17  ;;  %79 = vst [vmem:[#allocation2 + $0x38] sm:$0xff] %v7248_v16  ;;  %v7266_v19 = vld [vmem:[%s11497_s0 + $0x70] sm:$0xff]  ;;  %v7271_v20 = vld [vmem:[%s11497_s0 + $0x118] sm:$0xff]  ;;  %154 = vrot.lane.b32.xlu1 %v35_v4, %s7119_s18  ;;  %152 = vrot.lane.b32.xlu0 %v7178_v5, %s7119_s18 }
   0xb   :  { %71 = vst [vmem:[#allocation2] sm:$0xff] %v7253_v17  ;;  %93 = vst [vmem:[#allocation2 + $0xa8] sm:$0xff] %v7258_v18  ;;  %v7276_v21 = vld [vmem:[%s11497_s0 + $0xe0] sm:$0xff]  ;;  %v7284_v22 = vld [vmem:[%s11497_s0 + $0x188] sm:$0xff] }
   0xc   :  { %11621 = vst [vmem:[#allocation5_spill] sm:$0xff] %v7266_v19  ;;  %86 = vst [vmem:[#allocation2 + $0x70] sm:$0xff] %v7266_v19  ;;  %v7289_v23 = vld [vmem:[%s11497_s0 + $0x150] sm:$0xff]  ;;  %v7294_v24 = vld [vmem:[%s11497_s0 + $0x40] sm:$0xff] }
   0xd   :  { %107 = vst [vmem:[#allocation2 + $0x118] sm:$0xff] %v7271_v20  ;;  %100 = vst [vmem:[#allocation2 + $0xe0] sm:$0xff] %v7276_v21  ;;  %v7305_v25 = vld [vmem:[%s11497_s0 + $0x8] sm:$0xff]  ;;  %v7310_v26 = vld [vmem:[%s11497_s0 + $0xb0] sm:$0xff] }
   0xe   :  { %121 = vst [vmem:[#allocation2 + $0x188] sm:$0xff] %v7284_v22  ;;  %114 = vst [vmem:[#allocation2 + $0x150] sm:$0xff] %v7289_v23  ;;  %v7317_v27 = vld [vmem:[%s11497_s0 + $0x78] sm:$0xff]  ;;  %v7322_v28 = vld [vmem:[%s11497_s0 + $0x120] sm:$0xff]  ;;  %158 = vrot.lane.b32.xlu1 %v42_v6, %s7119_s18  ;;  %156 = vrot.lane.b32.xlu0 %v7186_v7, %s7119_s18 }
   0xf   :  { %80 = vst [vmem:[#allocation2 + $0x40] sm:$0xff] %v7294_v24  ;;  %72 = vst [vmem:[#allocation2 + $0x8] sm:$0xff] %v7305_v25  ;;  %v7327_v29 = vld [vmem:[%s11497_s0 + $0xe8] sm:$0xff]  ;;  %v7335_v30 = vld [vmem:[%s11497_s0 + $0x190] sm:$0xff] }
  0x10   :  { %94 = vst [vmem:[#allocation2 + $0xb0] sm:$0xff] %v7310_v26  ;;  %87 = vst [vmem:[#allocation2 + $0x78] sm:$0xff] %v7317_v27  ;;  %v7340_v31 = vld [vmem:[%s11497_s0 + $0x158] sm:$0xff]  ;;  %v7345_v32 = vld [vmem:[%s11497_s0 + $0x48] sm:$0xff] }
  0x11   :  { %108 = vst [vmem:[#allocation2 + $0x120] sm:$0xff] %v7322_v28  ;;  %101 = vst [vmem:[#allocation2 + $0xe8] sm:$0xff] %v7327_v29  ;;  %v7353_v33 = vld [vmem:[%s11497_s0 + $0x10] sm:$0xff]  ;;  %v7358_v34 = vld [vmem:[%s11497_s0 + $0xb8] sm:$0xff] }
  0x12   :  { %122 = vst [vmem:[#allocation2 + $0x190] sm:$0xff] %v7335_v30  ;;  %115 = vst [vmem:[#allocation2 + $0x158] sm:$0xff] %v7340_v31  ;;  %v7363_v35 = vld [vmem:[%s11497_s0 + $0x80] sm:$0xff]  ;;  %v7374_v36 = vld [vmem:[%s11497_s0 + $0x128] sm:$0xff]  ;;  %162 = vrot.lane.b32.xlu1 %v7194_v8, %s7119_s18  ;;  %160 = vrot.lane.b32.xlu0 %v7199_v9, %s7119_s18 }
  0x13   :  { %81 = vst [vmem:[#allocation2 + $0x48] sm:$0xff] %v7345_v32  ;;  %11622 = vst [vmem:[#allocation6_spill] sm:$0xff] %v7358_v34  ;;  %v7379_v37 = vld [vmem:[%s11497_s0 + $0xf0] sm:$0xff]  ;;  %v7386_v38 = vld [vmem:[%s11497_s0 + $0x198] sm:$0xff] }
  0x14   :  { %11623 = vst [vmem:[#allocation7_spill] sm:$0xff] %v7363_v35  ;;  %73 = vst [vmem:[#allocation2 + $0x10] sm:$0xff] %v7353_v33  ;;  %v7391_v39 = vld [vmem:[%s11497_s0 + $0x160] sm:$0xff]  ;;  %v7396_v40 = vld [vmem:[%s11497_s0 + $0x50] sm:$0xff] }
  0x15   :  { %95 = vst [vmem:[#allocation2 + $0xb8] sm:$0xff] %v7358_v34  ;;  %88 = vst [vmem:[#allocation2 + $0x80] sm:$0xff] %v7363_v35  ;;  %v7404_v41 = vld [vmem:[%s11497_s0 + $0x18] sm:$0xff]  ;;  %v7409_v42 = vld [vmem:[%s11497_s0 + $0xc0] sm:$0xff] }
  0x16   :  { %109 = vst [vmem:[#allocation2 + $0x128] sm:$0xff] %v7374_v36  ;;  %102 = vst [vmem:[#allocation2 + $0xf0] sm:$0xff] %v7379_v37  ;;  %v7414_v43 = vld [vmem:[%s11497_s0 + $0x88] sm:$0xff]  ;;  %v7422_v44 = vld [vmem:[%s11497_s0 + $0x130] sm:$0xff]  ;;  %166 = vrot.lane.b32.xlu1 %v7204_v10, %s7119_s18  ;;  %164 = vrot.lane.b32.xlu0 %v7214_v11, %s7119_s18 }
  0x17   :  { %123 = vst [vmem:[#allocation2 + $0x198] sm:$0xff] %v7386_v38  ;;  %116 = vst [vmem:[#allocation2 + $0x160] sm:$0xff] %v7391_v39  ;;  %v7427_v45 = vld [vmem:[%s11497_s0 + $0xf8] sm:$0xff]  ;;  %v7432_v46 = vld [vmem:[%s11497_s0 + $0x1a0] sm:$0xff] }
  0x18   :  { %82 = vst [vmem:[#allocation2 + $0x50] sm:$0xff] %v7396_v40  ;;  %74 = vst [vmem:[#allocation2 + $0x18] sm:$0xff] %v7404_v41  ;;  %v7444_v47 = vld [vmem:[%s11497_s0 + $0x168] sm:$0xff]  ;;  %v7449_v48 = vld [vmem:[%s11497_s0 + $0x58] sm:$0xff] }
  0x19   :  { %96 = vst [vmem:[#allocation2 + $0xc0] sm:$0xff] %v7409_v42  ;;  %89 = vst [vmem:[#allocation2 + $0x88] sm:$0xff] %v7414_v43  ;;  %v7456_v49 = vld [vmem:[%s11497_s0 + $0x20] sm:$0xff]  ;;  %v7461_v50 = vld [vmem:[%s11497_s0 + $0xc8] sm:$0xff] }
  0x1a   :  { %110 = vst [vmem:[#allocation2 + $0x130] sm:$0xff] %v7422_v44  ;;  %103 = vst [vmem:[#allocation2 + $0xf8] sm:$0xff] %v7427_v45  ;;  %v7466_v51 = vld [vmem:[%s11497_s0 + $0x90] sm:$0xff]  ;;  %v7474_v52 = vld [vmem:[%s11497_s0 + $0x138] sm:$0xff]  ;;  %170 = vrot.lane.b32.xlu1 %v7219_v12, %s7119_s18  ;;  %168 = vrot.lane.b32.xlu0 %v7224_v13, %s7119_s18 }
  0x1b   :  { %124 = vst [vmem:[#allocation2 + $0x1a0] sm:$0xff] %v7432_v46  ;;  %117 = vst [vmem:[#allocation2 + $0x168] sm:$0xff] %v7444_v47  ;;  %v7479_v53 = vld [vmem:[%s11497_s0 + $0x100] sm:$0xff]  ;;  %v7484_v54 = vld [vmem:[%s11497_s0 + $0x1a8] sm:$0xff] }
  0x1c   :  { %83 = vst [vmem:[#allocation2 + $0x58] sm:$0xff] %v7449_v48  ;;  %75 = vst [vmem:[#allocation2 + $0x20] sm:$0xff] %v7456_v49  ;;  %v7492_v55 = vld [vmem:[%s11497_s0 + $0x170] sm:$0xff]  ;;  %s7120_s0 = smov 31  }
  0x1d   :  { %97 = vst [vmem:[#allocation2 + $0xc8] sm:$0xff] %v7461_v50  ;;  %90 = vst [vmem:[#allocation2 + $0x90] sm:$0xff] %v7466_v51 }
  0x1e   :  { %111 = vst [vmem:[#allocation2 + $0x138] sm:$0xff] %v7474_v52  ;;  %104 = vst [vmem:[#allocation2 + $0x100] sm:$0xff] %v7479_v53  ;;  %174 = vrot.lane.b32.xlu1 %v7235_v14, %s7119_s18  ;;  %172 = vrot.lane.b32.xlu0 %v7240_v15, %s7119_s18  ;;  %s7121_s18 = smov 30  }
  0x1f   :  { %125 = vst [vmem:[#allocation2 + $0x1a8] sm:$0xff] %v7484_v54  ;;  %118 = vst [vmem:[#allocation2 + $0x170] sm:$0xff] %v7492_v55 }
  0x22   :  { %267 = vrot.lane.b32.xlu1 %v7248_v16, %s7120_s0  ;;  %265 = vrot.lane.b32.xlu0 %v7253_v17, %s7120_s0 }
  0x26   :  { %271 = vrot.lane.b32.xlu1 %v7258_v18, %s7120_s0  ;;  %269 = vrot.lane.b32.xlu0 %v7266_v19, %s7120_s0 }
  0x2a   :  { %275 = vrot.lane.b32.xlu1 %v7271_v20, %s7120_s0  ;;  %273 = vrot.lane.b32.xlu0 %v7276_v21, %s7120_s0 }
  0x2e   :  { %279 = vrot.lane.b32.xlu1 %v7284_v22, %s7120_s0  ;;  %277 = vrot.lane.b32.xlu0 %v7289_v23, %s7120_s0 }
  0x32   :  { %283 = vrot.lane.b32.xlu1 %v7294_v24, %s7120_s0  ;;  %281 = vrot.lane.b32.xlu0 %v7305_v25, %s7120_s0 }
  0x36   :  { %287 = vrot.lane.b32.xlu1 %v7310_v26, %s7120_s0  ;;  %285 = vrot.lane.b32.xlu0 %v7317_v27, %s7120_s0 }
  0x3a   :  { %291 = vrot.lane.b32.xlu1 %v7322_v28, %s7120_s0  ;;  %289 = vrot.lane.b32.xlu0 %v7327_v29, %s7120_s0 }
  0x3e   :  { %295 = vrot.lane.b32.xlu1 %v7335_v30, %s7120_s0  ;;  %293 = vrot.lane.b32.xlu0 %v7340_v31, %s7120_s0 }
  0x42   :  { %299 = vrot.lane.b32.xlu1 %v7345_v32, %s7120_s0  ;;  %297 = vrot.lane.b32.xlu0 %v7353_v33, %s7120_s0 }
  0x46   :  { %303 = vrot.lane.b32.xlu1 %v7358_v34, %s7120_s0  ;;  %301 = vrot.lane.b32.xlu0 %v7363_v35, %s7120_s0 }
  0x4a   :  { %307 = vrot.lane.b32.xlu1 %v7374_v36, %s7120_s0  ;;  %305 = vrot.lane.b32.xlu0 %v7379_v37, %s7120_s0 }
  0x4e   :  { %311 = vrot.lane.b32.xlu1 %v7386_v38, %s7120_s0  ;;  %309 = vrot.lane.b32.xlu0 %v7391_v39, %s7120_s0 }
  0x52   :  { %315 = vrot.lane.b32.xlu1 %v7396_v40, %s7120_s0  ;;  %313 = vrot.lane.b32.xlu0 %v7404_v41, %s7120_s0 }
  0x56   :  { %319 = vrot.lane.b32.xlu1 %v7409_v42, %s7120_s0  ;;  %317 = vrot.lane.b32.xlu0 %v7414_v43, %s7120_s0 }
  0x5a   :  { %323 = vrot.lane.b32.xlu1 %v7422_v44, %s7120_s0  ;;  %321 = vrot.lane.b32.xlu0 %v7427_v45, %s7120_s0 }
  0x5e   :  { %327 = vrot.lane.b32.xlu1 %v7432_v46, %s7120_s0  ;;  %325 = vrot.lane.b32.xlu0 %v7444_v47, %s7120_s0 }
  0x62   :  { %331 = vrot.lane.b32.xlu1 %v7449_v48, %s7120_s0  ;;  %329 = vrot.lane.b32.xlu0 %v7456_v49, %s7120_s0 }
  0x66   :  { %335 = vrot.lane.b32.xlu1 %v7461_v50, %s7120_s0  ;;  %333 = vrot.lane.b32.xlu0 %v7466_v51, %s7120_s0 }
  0x6a   :  { %339 = vrot.lane.b32.xlu1 %v7474_v52, %s7120_s0  ;;  %337 = vrot.lane.b32.xlu0 %v7479_v53, %s7120_s0 }
  0x6e   :  { %343 = vrot.lane.b32.xlu1 %v7484_v54, %s7120_s0  ;;  %341 = vrot.lane.b32.xlu0 %v7492_v55, %s7120_s0 }
  0x72   :  { %347 = vrot.lane.b32.xlu1 %v7150_v0, %s7120_s0  ;;  %345 = vrot.lane.b32.xlu0 %v7155_v1, %s7120_s0 }
  0x74   :  { %v149_v56 = vpop.permute.xlu1 %148  ;;  %v145_v57 = vpop.permute.xlu0 %144 }
  0x76   :  { %351 = vrot.lane.b32.xlu1 %v7186_v7, %s7120_s0  ;;  %349 = vrot.lane.b32.xlu0 %v7178_v5, %s7120_s0 }
  0x78   :  { %v151_v58 = vpop.permute.xlu1 %150  ;;  %v147_v59 = vpop.permute.xlu0 %146 }
  0x79   :  { %v178_v60 = vsel %vm176_vm1, %v149_v56, %v151_v58  ;;  %v177_v61 = vsel %vm176_vm1, %v145_v57, %v147_v59 }
  0x7a   :  { %195 = vst.msk [vmem:[#allocation2 + $0x68] sm:$0xff] %vm193_vm2, %v178_v60  ;;  %194 = vst.msk [vmem:[#allocation2 + $0x30] sm:$0xff] %vm193_vm2, %v177_v61  ;;  %355 = vrot.lane.b32.xlu1 %v7214_v11, %s7120_s0  ;;  %353 = vrot.lane.b32.xlu0 %v7199_v9, %s7120_s0 }
  0x7c   :  { %v155_v62 = vpop.permute.xlu1 %154  ;;  %v153_v63 = vpop.permute.xlu0 %152 }
  0x7d   :  { %v179_v2 = vsel %vm176_vm1, %v153_v63, %v155_v62 }
  0x7e   :  { %196 = vst.msk [vmem:[#allocation2 + $0xa0] sm:$0xff] %vm193_vm2, %v179_v2  ;;  %359 = vrot.lane.b32.xlu1 %v7240_v15, %s7120_s0  ;;  %357 = vrot.lane.b32.xlu0 %v7224_v13, %s7120_s0 }
  0x80   :  { %v159_v3 = vpop.permute.xlu1 %158  ;;  %v157_v4 = vpop.permute.xlu0 %156 }
  0x81   :  { %v180_v6 = vsel %vm176_vm1, %v157_v4, %v159_v3  ;;  %v7610_v8 = vld [vmem:[#allocation2 + $0x68] sm:$0xff]  ;;  %v7612_v10 = vld [vmem:[#allocation2 + $0x30] sm:$0xff] }
  0x82   :  { %11624 = vst [vmem:[#allocation8_spill] sm:$0xff] %v7610_v8  ;;  %11625 = vst [vmem:[#allocation9_spill] sm:$0xff] %v7612_v10  ;;  %363 = vrot.lane.b32.xlu1 %v7610_v8, %s7120_s0  ;;  %361 = vrot.lane.b32.xlu0 %v7612_v10, %s7120_s0 }
  0x83   :  { %197 = vst.msk [vmem:[#allocation2 + $0xd8] sm:$0xff] %vm193_vm2, %v180_v6 }
  0x84   :  { %v163_v12 = vpop.permute.xlu1 %162  ;;  %v161_v14 = vpop.permute.xlu0 %160 }
  0x85   :  { %v181_v56 = vsel %vm176_vm1, %v161_v14, %v163_v12  ;;  %v7620_v57 = vld [vmem:[#allocation2 + $0xa0] sm:$0xff] }
  0x86   :  { %11626 = vst [vmem:[#allocation10_spill] sm:$0xff] %v7620_v57  ;;  %198 = vst.msk [vmem:[#allocation2 + $0x110] sm:$0xff] %vm193_vm2, %v181_v56  ;;  %365 = vrot.lane.b32.xlu0 %v7620_v57, %s7120_s0 }
  0x88   :  { %v167_v58 = vpop.permute.xlu1 %166  ;;  %v165_v59 = vpop.permute.xlu0 %164 }
  0x89   :  { %v182_v60 = vsel %vm176_vm1, %v165_v59, %v167_v58 }
  0x8a   :  { %v7626_v61 = vld [vmem:[#allocation2 + $0xd8] sm:$0xff]  ;;  %199 = vst.msk [vmem:[#allocation2 + $0x148] sm:$0xff] %vm193_vm2, %v182_v60 }
  0x8b   :  { %11627 = vst [vmem:[#allocation11_spill] sm:$0xff] %v7626_v61  ;;  %367 = vrot.lane.b32.xlu1 %v7626_v61, %s7120_s0 }
  0x8c   :  { %v171_v62 = vpop.permute.xlu1 %170  ;;  %v169_v63 = vpop.permute.xlu0 %168 }
  0x8d   :  { %v183_v2 = vsel %vm176_vm1, %v169_v63, %v171_v62  ;;  %v7632_v3 = vld [vmem:[#allocation2 + $0x110] sm:$0xff] }
  0x8e   :  { %11628 = vst [vmem:[#allocation12_spill] sm:$0xff] %v7632_v3  ;;  %200 = vst.msk [vmem:[#allocation2 + $0x180] sm:$0xff] %vm193_vm2, %v183_v2  ;;  %369 = vrot.lane.b32.xlu0 %v7632_v3, %s7120_s0 }
  0x90   :  { %v175_v4 = vpop.permute.xlu1 %174  ;;  %v173_v6 = vpop.permute.xlu0 %172 }
  0x91   :  { %v184_v12 = vsel %vm176_vm1, %v173_v6, %v175_v4  ;;  %v7638_v14 = vld [vmem:[#allocation2 + $0x148] sm:$0xff] }
  0x92   :  { %11629 = vst [vmem:[#allocation13_spill] sm:$0xff] %v7638_v14  ;;  %201 = vst.msk [vmem:[#allocation2 + $0x1b8] sm:$0xff] %vm193_vm2, %v184_v12  ;;  %371 = vrot.lane.b32.xlu1 %v7638_v14, %s7120_s0 }
  0x94   :  { %v7643_v56 = vpop.permute.xlu1 %267  ;;  %v7645_v58 = vpop.permute.xlu0 %265 }
  0x95   :  { %v7647_v59 = vld [vmem:[#allocation2 + $0x180] sm:$0xff] }
  0x96   :  { %11630 = vst [vmem:[#allocation14_spill] sm:$0xff] %v7647_v59  ;;  %373 = vrot.lane.b32.xlu0 %v7647_v59, %s7120_s0 }
  0x98   :  { %v7651_v60 = vpop.permute.xlu1 %271  ;;  %v7653_v62 = vpop.permute.xlu0 %269 }
  0x99   :  { %11631 = vst [vmem:[#allocation15_spill] sm:$0xff] %v7651_v60  ;;  %v7655_v63 = vld [vmem:[#allocation2 + $0x1b8] sm:$0xff] }
  0x9a   :  { %11632 = vst [vmem:[#allocation16_spill] sm:$0xff] %v7655_v63  ;;  %375 = vrot.lane.b32.xlu1 %v7655_v63, %s7120_s0  ;;  %728 = vrot.lane.b32.xlu0 %v7253_v17, %s7121_s18 }
  0x9c   :  { %v7661_v2 = vpop.permute.xlu1 %275  ;;  %v7663_v4 = vpop.permute.xlu0 %273 }
  0x9d   :  { %11633 = vst [vmem:[#allocation17_spill] sm:$0xff] %v7661_v2  ;;  %11634 = vst [vmem:[#allocation18_spill] sm:$0xff] %v7663_v4 }
  0x9e   :  { %730 = vrot.lane.b32.xlu1 %v7248_v16, %s7121_s18  ;;  %732 = vrot.lane.b32.xlu0 %v7266_v19, %s7121_s18 }
  0xa0   :  { %v7669_v6 = vpop.permute.xlu1 %279  ;;  %v7671_v12 = vpop.permute.xlu0 %277 }
  0xa1   :  { %11635 = vst [vmem:[#allocation19_spill] sm:$0xff] %v7669_v6  ;;  %11636 = vst [vmem:[#allocation20_spill] sm:$0xff] %v7671_v12  ;;  %v377_v6 = vlaneseq }
  0xa2   :  { %734 = vrot.lane.b32.xlu1 %v7258_v18, %s7121_s18  ;;  %736 = vrot.lane.b32.xlu0 %v7276_v21, %s7121_s18 }
  0xa3   :  { %v7713_v59 = vshrl.u32 %v377_v6, 7 }
  0xa4   :  { %v7677_v17 = vpop.permute.xlu1 %283  ;;  %v7679_v63 = vpop.permute.xlu0 %281 }
  0xa5   :  { %11638 = vst [vmem:[#allocation22_spill] sm:$0xff] %v7713_v59 }
  0xa6   :  { %738 = vrot.lane.b32.xlu1 %v7271_v20, %s7121_s18  ;;  %740 = vrot.lane.b32.xlu0 %v7289_v23, %s7121_s18 }
  0xa8   :  { %v7685_v16 = vpop.permute.xlu1 %287  ;;  %v7687_v19 = vpop.permute.xlu0 %285 }
  0xa9   :  { %11637 = vst [vmem:[#allocation21_spill] sm:$0xff] %v7685_v16 }
  0xaa   :  { %742 = vrot.lane.b32.xlu1 %v7284_v22, %s7121_s18  ;;  %744 = vrot.lane.b32.xlu0 %v7305_v25, %s7121_s18 }
  0xac   :  { %v7693_v18 = vpop.permute.xlu1 %291  ;;  %v7695_v21 = vpop.permute.xlu0 %289 }
  0xae   :  { %746 = vrot.lane.b32.xlu1 %v7294_v24, %s7121_s18  ;;  %748 = vrot.lane.b32.xlu0 %v7317_v27, %s7121_s18 }
  0xb0   :  { %v7701_v20 = vpop.permute.xlu1 %295  ;;  %v7703_v23 = vpop.permute.xlu0 %293 }
  0xb2   :  { %750 = vrot.lane.b32.xlu1 %v7310_v26, %s7121_s18  ;;  %752 = vrot.lane.b32.xlu0 %v7327_v29, %s7121_s18  ;;  %v7719_v26 = vand.u32 127, %v377_v6 }
  0xb4   :  { %v300_v22 = vpop.permute.xlu1 %299  ;;  %v298_v25 = vpop.permute.xlu0 %297  ;;  %vm379_vm3 = vcmp.lt.s32.totalorder %v7719_v26, 31  ;;  %vm840_vm4 = vcmp.lt.s32.totalorder %v7719_v26, 30  ;;  %vm1762_vm5 = vcmp.lt.s32.totalorder %v7719_v26, 28  ;;  %vm1301_vm6 = vcmp.lt.s32.totalorder %v7719_v26, 29 }
  0xb5   :  { %vm3061_vm8 = vcmp.lt.s32.totalorder %v7719_v26, 25  ;;  %vm2600_vm9 = vcmp.lt.s32.totalorder %v7719_v26, 26  ;;  %vm2139_vm10 = vcmp.lt.s32.totalorder %v7719_v26, 27 }
  0xb6   :  { %754 = vrot.lane.b32.xlu1 %v7322_v28, %s7121_s18  ;;  %756 = vrot.lane.b32.xlu0 %v7340_v31, %s7121_s18  ;;  %v7724_v28 = vld [vmem:[%s11498_s2 + $0x10] sm:$0x7f]  ;;  %v7727_v31 = vsub.s32 0, %v7713_v59  ;;  %v413_v59 = vsel %vm379_vm3, %v7677_v17, %v300_v22 }
  0xb7   :  { %11639 = vst [vmem:[#allocation23_spill] sm:$0xff] %v7724_v28 }
  0xb8   :  { %v304_v24 = vpop.permute.xlu1 %303  ;;  %v302_v27 = vpop.permute.xlu0 %301 }
  0xb9   :  { %v415_v57 = vsel %vm379_vm3, %v7685_v16, %v304_v24 }
  0xba   :  { %758 = vrot.lane.b32.xlu1 %v7335_v30, %s7121_s18  ;;  %760 = vrot.lane.b32.xlu0 %v7353_v33, %s7121_s18  ;;  %v7736_v30 = vld [vmem:[%s11498_s2 + $0x18] sm:$0x7f]  ;;  %v447_v33 = vrot.slane %v7724_v28, %v7727_v31 }
  0xbb   :  { %11640 = vst [vmem:[#allocation24_spill] sm:$0xff] %v7736_v30 }
  0xbc   :  { %v308_v29 = vpop.permute.xlu1 %307  ;;  %v306_v12 = vpop.permute.xlu0 %305  ;;  %v473_v28 = vmul.f32 %v447_v33, %v413_v59  ;;  %v414_v59 = vsel %vm379_vm3, %v7687_v19, %v302_v27 }
  0xbd   :  { %v417_v16 = vsel %vm379_vm3, %v7693_v18, %v308_v29 }
  0xbe   :  { %762 = vrot.lane.b32.xlu1 %v7345_v32, %s7121_s18  ;;  %764 = vrot.lane.b32.xlu0 %v7363_v35, %s7121_s18  ;;  %v412_v32 = vsel %vm379_vm3, %v7679_v63, %v298_v25  ;;  %v451_v35 = vrot.slane %v7736_v30, %v7727_v31 }
  0xbf   :  { %v466_v61 = vmul.f32 %v447_v33, %v412_v32  ;;  %v487_v32 = vmul.f32 %v447_v33, %v415_v57 }
  0xc0   :  { %v312_v6 = vpop.permute.xlu1 %311  ;;  %v310_v14 = vpop.permute.xlu0 %309 }
  0xc2   :  { %766 = vrot.lane.b32.xlu1 %v7358_v34, %s7121_s18  ;;  %768 = vrot.lane.b32.xlu0 %v7379_v37, %s7121_s18 }
  0xc4   :  { %v7753_v3 = vpop.permute.xlu1 %315  ;;  %v7755_v2 = vpop.permute.xlu0 %313 }
  0xc5   :  { %v405_v34 = vsel %vm379_vm3, %v300_v22, %v7753_v3  ;;  %v404_v37 = vsel %vm379_vm3, %v298_v25, %v7755_v2  ;;  %v480_v25 = vmul.f32 %v447_v33, %v414_v59 }
  0xc6   :  { %v474_v30 = vmul.f32 %v451_v35, %v405_v34  ;;  %v467_v4 = vmul.f32 %v451_v35, %v404_v37  ;;  %770 = vrot.lane.b32.xlu1 %v7374_v36, %s7121_s18  ;;  %772 = vrot.lane.b32.xlu0 %v7391_v39, %s7121_s18  ;;  %v416_v39 = vsel %vm379_vm3, %v7695_v21, %v306_v12 }
  0xc7   :  { %v494_v37 = vmul.f32 %v447_v33, %v416_v39 }
  0xc8   :  { %v6328_v8 = vpack.c.bf16 %v474_v30, %v473_v28  ;;  %v6324_v10 = vpack.c.bf16 %v467_v4, %v466_v61  ;;  %v7773_v22 = vpop.permute.xlu1 %319  ;;  %v7775_v60 = vpop.permute.xlu0 %317 }
  0xc9   :  { %v407_v34 = vsel %vm379_vm3, %v304_v24, %v7773_v22  ;;  %v406_v36 = vsel %vm379_vm3, %v302_v27, %v7775_v60  ;;  %v501_v27 = vmul.f32 %v447_v33, %v417_v16  ;;  %v418_v16 = vsel %vm379_vm3, %v7703_v23, %v310_v14 }
  0xca   :  { %613 = vst [vmem:[#allocation3 + $0x40] sm:$0xff] %v6328_v8  ;;  %609 = vst [vmem:[#allocation3 + $0x8] sm:$0xff] %v6324_v10  ;;  %v488_v57 = vmul.f32 %v451_v35, %v407_v34  ;;  %v481_v61 = vmul.f32 %v451_v35, %v406_v36  ;;  %774 = vrot.lane.b32.xlu1 %v7386_v38, %s7121_s18  ;;  %776 = vrot.lane.b32.xlu0 %v7404_v41, %s7121_s18 }
  0xcb   :  { %v419_v38 = vsel %vm379_vm3, %v7701_v20, %v312_v6  ;;  %v508_v39 = vmul.f32 %v447_v33, %v418_v16 }
  0xcc   :  { %v6336_v4 = vpack.c.bf16 %v488_v57, %v487_v32  ;;  %v6332_v24 = vpack.c.bf16 %v481_v61, %v480_v25  ;;  %v7793_v28 = vpop.permute.xlu1 %323  ;;  %v7795_v30 = vpop.permute.xlu0 %321  ;;  %v515_v34 = vmul.f32 %v447_v33, %v419_v38 }
  0xcd   :  { %v409_v8 = vsel %vm379_vm3, %v308_v29, %v7793_v28  ;;  %v408_v10 = vsel %vm379_vm3, %v306_v12, %v7795_v30 }
  0xce   :  { %621 = vst [vmem:[#allocation3 + $0xb0] sm:$0xff] %v6336_v4  ;;  %617 = vst [vmem:[#allocation3 + $0x78] sm:$0xff] %v6332_v24  ;;  %v502_v41 = vmul.f32 %v451_v35, %v409_v8  ;;  %v495_v59 = vmul.f32 %v451_v35, %v408_v10  ;;  %778 = vrot.lane.b32.xlu1 %v7396_v40, %s7121_s18  ;;  %780 = vrot.lane.b32.xlu0 %v7414_v43, %s7121_s18 }
  0xd0   :  { %v6344_v29 = vpack.c.bf16 %v502_v41, %v501_v27  ;;  %v6340_v12 = vpack.c.bf16 %v495_v59, %v494_v37  ;;  %v7813_v32 = vpop.permute.xlu1 %327  ;;  %v7815_v25 = vpop.permute.xlu0 %325 }
  0xd1   :  { %v411_v36 = vsel %vm379_vm3, %v312_v6, %v7813_v32  ;;  %v410_v40 = vsel %vm379_vm3, %v310_v14, %v7815_v25  ;;  %v7838_v6 = vld [vmem:[%s11498_s2 + $0x20] sm:$0x7f] }
  0xd2   :  { %717 = vst [vmem:[#allocation3 + $0x5c] sm:$0xff] %v6344_v29  ;;  %713 = vst [vmem:[#allocation3 + $0x24] sm:$0xff] %v6340_v12  ;;  %v516_v57 = vmul.f32 %v451_v35, %v411_v36  ;;  %v509_v61 = vmul.f32 %v451_v35, %v410_v40  ;;  %782 = vrot.lane.b32.xlu1 %v7409_v42, %s7121_s18  ;;  %784 = vrot.lane.b32.xlu0 %v7427_v45, %s7121_s18 }
  0xd4   :  { %v6352_v4 = vpack.c.bf16 %v516_v57, %v515_v34  ;;  %v6348_v24 = vpack.c.bf16 %v509_v61, %v508_v39  ;;  %v332_v27 = vpop.permute.xlu1 %331  ;;  %v330_v37 = vpop.permute.xlu0 %329 }
  0xd6   :  { %725 = vst [vmem:[#allocation3 + $0xcc] sm:$0xff] %v6352_v4  ;;  %721 = vst [vmem:[#allocation3 + $0x94] sm:$0xff] %v6348_v24  ;;  %786 = vrot.lane.b32.xlu1 %v7422_v44, %s7121_s18  ;;  %788 = vrot.lane.b32.xlu0 %v7444_v47, %s7121_s18  ;;  %v7847_v44 = vld [vmem:[%s11498_s2 + $0x28] sm:$0x7f] }
  0xd7   :  { %v7869_v8 = vrot.slane %v7847_v44, %v7727_v31 }
  0xd8   :  { %v336_v14 = vpop.permute.xlu1 %335  ;;  %v334_v35 = vpop.permute.xlu0 %333 }
  0xd9   :  { %v398_v59 = vsel %vm379_vm3, %v7775_v60, %v334_v35 }
  0xda   :  { %790 = vrot.lane.b32.xlu1 %v7432_v46, %s7121_s18  ;;  %792 = vrot.lane.b32.xlu0 %v7456_v49, %s7121_s18  ;;  %v7851_v46 = vrot.slane %v7838_v6, %v7727_v31 }
  0xdc   :  { %v340_v45 = vpop.permute.xlu1 %339  ;;  %v338_v33 = vpop.permute.xlu0 %337  ;;  %v482_v60 = vmul.f32 %v7851_v46, %v398_v59 }
  0xdd   :  { %v401_v39 = vsel %vm379_vm3, %v7793_v28, %v340_v45  ;;  %v400_v57 = vsel %vm379_vm3, %v7795_v30, %v338_v33  ;;  %v7922_v28 = vld [vmem:[%s11498_s2 + $0x8] sm:$0x7f] }
  0xde   :  { %794 = vrot.lane.b32.xlu1 %v7449_v48, %s7121_s18  ;;  %796 = vrot.lane.b32.xlu0 %v7466_v51, %s7121_s18  ;;  %v397_v48 = vsel %vm379_vm3, %v7753_v3, %v332_v27  ;;  %v396_v51 = vsel %vm379_vm3, %v7755_v2, %v330_v37  ;;  %v399_v2 = vsel %vm379_vm3, %v7773_v22, %v336_v14 }
  0xdf   :  { %v475_v10 = vmul.f32 %v7851_v46, %v397_v48  ;;  %v468_v3 = vmul.f32 %v7851_v46, %v396_v51  ;;  %v489_v22 = vmul.f32 %v7851_v46, %v399_v2  ;;  %v7944_v51 = vld [vmem:[%s11498_s2 + $0x30] sm:$0x7f] }
  0xe0   :  { %v7853_v47 = vpop.permute.xlu1 %343  ;;  %v7855_v49 = vpop.permute.xlu0 %341 }
  0xe2   :  { %798 = vrot.lane.b32.xlu1 %v7461_v50, %s7121_s18  ;;  %800 = vrot.lane.b32.xlu0 %v7479_v53, %s7121_s18 }
  0xe4   :  { %v7872_v38 = vpop.permute.xlu1 %347  ;;  %v7874_v41 = vpop.permute.xlu0 %345 }
  0xe5   :  { %v389_v50 = vsel %vm379_vm3, %v332_v27, %v7872_v38  ;;  %v388_v53 = vsel %vm379_vm3, %v330_v37, %v7874_v41 }
  0xe6   :  { %v476_v16 = vmul.f32 %v7869_v8, %v389_v50  ;;  %v469_v29 = vmul.f32 %v7869_v8, %v388_v53  ;;  %802 = vrot.lane.b32.xlu1 %v7474_v52, %s7121_s18  ;;  %804 = vrot.lane.b32.xlu0 %v7492_v55, %s7121_s18 }
  0xe8   :  { %v6329_v12 = vpack.c.bf16 %v476_v16, %v475_v10  ;;  %v6325_v34 = vpack.c.bf16 %v469_v29, %v468_v3  ;;  %v7896_v36 = vpop.permute.xlu1 %351  ;;  %v7898_v40 = vpop.permute.xlu0 %349  ;;  %v403_v10 = vsel %vm379_vm3, %v7813_v32, %v7853_v47  ;;  %v402_v32 = vsel %vm379_vm3, %v7815_v25, %v7855_v49 }
  0xe9   :  { %v391_v52 = vsel %vm379_vm3, %v336_v14, %v7896_v36  ;;  %v390_v55 = vsel %vm379_vm3, %v334_v35, %v7898_v40  ;;  %v7931_v14 = vld [vmem:[%s11498_s2] sm:$0x7f]  ;;  %v7978_v16 = vrot.slane %v7944_v51, %v7727_v31  ;;  %v420_v25 = vsel %vm379_vm3, %v7645_v58, %v7679_v63 }
  0xea   :  { %614 = vst [vmem:[#allocation3 + $0x48] sm:$0xff] %v6329_v12  ;;  %610 = vst [vmem:[#allocation3 + $0x10] sm:$0xff] %v6325_v34  ;;  %v490_v61 = vmul.f32 %v7869_v8, %v391_v52  ;;  %v483_v4 = vmul.f32 %v7869_v8, %v390_v55  ;;  %806 = vrot.lane.b32.xlu1 %v7484_v54, %s7121_s18  ;;  %808 = vrot.lane.b32.xlu0 %v7155_v1, %s7121_s18 }
  0xeb   :  { %v503_v54 = vmul.f32 %v7851_v46, %v401_v39  ;;  %v496_v1 = vmul.f32 %v7851_v46, %v400_v57  ;;  %v7966_v2 = vrot.slane %v7931_v14, %v7727_v31  ;;  %v517_v29 = vmul.f32 %v7851_v46, %v403_v10 }
  0xec   :  { %v6337_v24 = vpack.c.bf16 %v490_v61, %v489_v22  ;;  %v6333_v27 = vpack.c.bf16 %v483_v4, %v482_v60  ;;  %v7924_v30 = vpop.permute.xlu1 %355  ;;  %v7926_v37 = vpop.permute.xlu0 %353 }
  0xed   :  { %v393_v35 = vsel %vm379_vm3, %v340_v45, %v7924_v30  ;;  %v392_v48 = vsel %vm379_vm3, %v338_v33, %v7926_v37  ;;  %v7958_v33 = vrot.slane %v7922_v28, %v7727_v31  ;;  %v510_v31 = vmul.f32 %v7851_v46, %v402_v32 }
  0xee   :  { %622 = vst [vmem:[#allocation3 + $0xb8] sm:$0xff] %v6337_v24  ;;  %618 = vst [vmem:[#allocation3 + $0x80] sm:$0xff] %v6333_v27  ;;  %v504_v3 = vmul.f32 %v7869_v8, %v393_v35  ;;  %v497_v45 = vmul.f32 %v7869_v8, %v392_v48  ;;  %810 = vrot.lane.b32.xlu1 %v7150_v0, %s7121_s18  ;;  %812 = vrot.lane.b32.xlu0 %v7178_v5, %s7121_s18  ;;  %v11641_v35 = vld [vmem:[#allocation21_spill] sm:$0xff]  ;;  %v11642_v48 = vld [vmem:[#allocation15_spill] sm:$0xff] }
  0xef   :  { %v421_v0 = vsel %vm379_vm3, %v7643_v56, %v7677_v17  ;;  %v465_v34 = vmul.f32 %v7958_v33, %v420_v25  ;;  %v11644_v25 = vld [vmem:[#allocation8_spill] sm:$0xff] }
  0xf0   :  { %v6345_v50 = vpack.c.bf16 %v504_v3, %v503_v54  ;;  %v6341_v5 = vpack.c.bf16 %v497_v45, %v496_v1  ;;  %v7972_v53 = vpop.permute.xlu1 %359  ;;  %v7974_v59 = vpop.permute.xlu0 %357 }
  0xf1   :  { %v395_v17 = vsel %vm379_vm3, %v7853_v47, %v7972_v53  ;;  %v394_v22 = vsel %vm379_vm3, %v7855_v49, %v7974_v59  ;;  %v472_v47 = vmul.f32 %v7958_v33, %v421_v0 }
  0xf2   :  { %718 = vst [vmem:[#allocation3 + $0x64] sm:$0xff] %v6345_v50  ;;  %714 = vst [vmem:[#allocation3 + $0x2c] sm:$0xff] %v6341_v5  ;;  %v518_v12 = vmul.f32 %v7869_v8, %v395_v17  ;;  %v511_v63 = vmul.f32 %v7869_v8, %v394_v22  ;;  %814 = vrot.lane.b32.xlu1 %v7186_v7, %s7121_s18  ;;  %816 = vrot.lane.b32.xlu0 %v7199_v9, %s7121_s18  ;;  %v11646_v17 = vld [vmem:[#allocation10_spill] sm:$0xff] }
  0xf4   :  { %v6353_v60 = vpack.c.bf16 %v518_v12, %v517_v29  ;;  %v6349_v49 = vpack.c.bf16 %v511_v63, %v510_v31  ;;  %v364_v39 = vpop.permute.xlu1 %363  ;;  %v362_v46 = vpop.permute.xlu0 %361  ;;  %v11645_v29 = vld [vmem:[#allocation18_spill] sm:$0xff] }
  0xf5   :  { %v381_v52 = vsel %vm379_vm3, %v7872_v38, %v364_v39  ;;  %v429_v8 = vsel %vm379_vm3, %v364_v39, %v7643_v56  ;;  %v380_v7 = vsel %vm379_vm3, %v7874_v41, %v362_v46  ;;  %v428_v9 = vsel %vm379_vm3, %v362_v46, %v7645_v58  ;;  %v11648_v39 = vld [vmem:[#allocation17_spill] sm:$0xff]  ;;  %v11649_v46 = vld [vmem:[#allocation12_spill] sm:$0xff] }
  0xf6   :  { %726 = vst [vmem:[#allocation3 + $0xd4] sm:$0xff] %v6353_v60  ;;  %722 = vst [vmem:[#allocation3 + $0x9c] sm:$0xff] %v6349_v49  ;;  %v471_v55 = vmul.f32 %v7966_v2, %v429_v8  ;;  %v477_v57 = vmul.f32 %v7978_v16, %v381_v52  ;;  %v464_v38 = vmul.f32 %v7966_v2, %v428_v9  ;;  %818 = vrot.lane.b32.xlu1 %v7214_v11, %s7121_s18  ;;  %v11647_v49 = vld [vmem:[#allocation11_spill] sm:$0xff] }
  0xf7   :  { %v470_v61 = vmul.f32 %v7978_v16, %v380_v7  ;;  %v422_v56 = vsel %vm379_vm3, %v7653_v62, %v7687_v19  ;;  %820 = vrot.lane.b32.xlu0 %v7224_v13, %s7121_s18 }
  0xf8   :  { %v6327_v58 = vpack.c.bf16 %v472_v47, %v471_v55  ;;  %v6330_v41 = vpack.c.bf16 %v477_v57, %v477_v57  ;;  %v6323_v4 = vpack.c.bf16 %v465_v34, %v464_v38  ;;  %v366_v27 = vpop.permute.xlu0 %365  ;;  %v479_v1 = vmul.f32 %v7958_v33, %v422_v56  ;;  %v11651_v56 = vld [vmem:[#allocation20_spill] sm:$0xff] }
  0xf9   :  { %v6326_v24 = vpack.c.bf16 %v470_v61, %v470_v61  ;;  %v382_v54 = vsel %vm379_vm3, %v7898_v40, %v366_v27  ;;  %v430_v11 = vsel %vm379_vm3, %v366_v27, %v7653_v62  ;;  %v423_v40 = vsel %vm379_vm3, %v11642_v48, %v11641_v35  ;;  %v11643_v62 = vld [vmem:[#allocation9_spill] sm:$0xff]  ;;  %v11655_v35 = vld [vmem:[#allocation4_spill] sm:$0xff] }
  0xfa   :  { %612 = vst [vmem:[#allocation3 + $0x38] sm:$0xff] %v6327_v58  ;;  %615 = vst [vmem:[#allocation3 + $0x50] sm:$0xf] %v6330_v41  ;;  %v478_v13 = vmul.f32 %v7966_v2, %v430_v11  ;;  %v484_v19 = vmul.f32 %v7978_v16, %v382_v54  ;;  %822 = vrot.lane.b32.xlu1 %v7240_v15, %s7121_s18  ;;  %v486_v15 = vmul.f32 %v7958_v33, %v423_v40  ;;  %v11650_v61 = vld [vmem:[#allocation13_spill] sm:$0xff]  ;;  %v11652_v58 = vld [vmem:[#allocation14_spill] sm:$0xff] }
  0xfb   :  { %608 = vst [vmem:[#allocation3] sm:$0xff] %v6323_v4  ;;  %611 = vst [vmem:[#allocation3 + $0x18] sm:$0xf] %v6326_v24  ;;  %824 = vrot.lane.b32.xlu0 %v11643_v62, %s7121_s18 }
  0xfc   :  { %v6331_v10 = vpack.c.bf16 %v479_v1, %v478_v13  ;;  %v6334_v3 = vpack.c.bf16 %v484_v19, %v484_v19  ;;  %v11653_v13 = vld [vmem:[#allocation16_spill] sm:$0xff]  ;;  %v11654_v19 = vld [vmem:[#allocation19_spill] sm:$0xff] }
  0xfd   :  { %v368_v45 = vpop.permute.xlu1 %367 }
  0xfe   :  { %v383_v32 = vsel %vm379_vm3, %v7896_v36, %v368_v45  ;;  %v431_v0 = vsel %vm379_vm3, %v368_v45, %v11642_v48  ;;  %616 = vst [vmem:[#allocation3 + $0x70] sm:$0xff] %v6331_v10  ;;  %619 = vst [vmem:[#allocation3 + $0x88] sm:$0xf] %v6334_v3  ;;  %826 = vrot.lane.b32.xlu1 %v11644_v25, %s7121_s18  ;;  %v424_v36 = vsel %vm379_vm3, %v11645_v29, %v7695_v21 }
  0xff   :  { %v485_v50 = vmul.f32 %v7966_v2, %v431_v0  ;;  %v491_v5 = vmul.f32 %v7978_v16, %v383_v32  ;;  %828 = vrot.lane.b32.xlu0 %v11646_v17, %s7121_s18  ;;  %v493_v34 = vmul.f32 %v7958_v33, %v424_v36 }
 0x100   :  { %v370_v12 = vpop.permute.xlu0 %369 }
 0x101   :  { %v6335_v22 = vpack.c.bf16 %v486_v15, %v485_v50  ;;  %v6338_v31 = vpack.c.bf16 %v491_v5, %v491_v5  ;;  %v384_v63 = vsel %vm379_vm3, %v7926_v37, %v370_v12  ;;  %v432_v47 = vsel %vm379_vm3, %v370_v12, %v11645_v29  ;;  %v8122_v50 = vld [vmem:[#allocation2 + $0x38] sm:$0xff]  ;;  %v11656_v5 = vld [vmem:[#allocation5_spill] sm:$0xff] }
 0x102   :  { %v492_v21 = vmul.f32 %v7966_v2, %v432_v47  ;;  %v498_v60 = vmul.f32 %v7978_v16, %v384_v63  ;;  %830 = vrot.lane.b32.xlu1 %v11647_v49, %s7121_s18  ;;  %v425_v37 = vsel %vm379_vm3, %v11648_v39, %v7693_v18  ;;  %v6942_v12 = vld [vmem:[#allocation2 + $0x118] sm:$0xff]  ;;  %v6943_v63 = vld [vmem:[#allocation2 + $0x150] sm:$0xff] }
 0x103   :  { %620 = vst [vmem:[#allocation3 + $0xa8] sm:$0xff] %v6335_v22  ;;  %623 = vst [vmem:[#allocation3 + $0xc0] sm:$0xf] %v6338_v31  ;;  %832 = vrot.lane.b32.xlu0 %v11649_v46, %s7121_s18  ;;  %v500_v57 = vmul.f32 %v7958_v33, %v425_v37  ;;  %v8152_v37 = vld [vmem:[#allocation2 + $0x8] sm:$0xff]  ;;  %v8156_v46 = vld [vmem:[#allocation2 + $0xb0] sm:$0xff] }
 0x104   :  { %v6339_v52 = vpack.c.bf16 %v493_v34, %v492_v21  ;;  %v6342_v8 = vpack.c.bf16 %v498_v60, %v498_v60  ;;  %v372_v7 = vpop.permute.xlu1 %371  ;;  %v6944_v21 = vld [vmem:[#allocation2 + $0x188] sm:$0xff]  ;;  %v8148_v60 = vld [vmem:[#allocation2 + $0x70] sm:$0xff] }
 0x105   :  { %v385_v9 = vsel %vm379_vm3, %v7924_v30, %v372_v7  ;;  %v433_v55 = vsel %vm379_vm3, %v372_v7, %v11648_v39  ;;  %v426_v30 = vsel %vm379_vm3, %v11651_v56, %v7703_v23 }
 0x106   :  { %712 = vst [vmem:[#allocation3 + $0x1c] sm:$0xff] %v6339_v52  ;;  %715 = vst [vmem:[#allocation3 + $0x34] sm:$0xf] %v6342_v8  ;;  %v499_v18 = vmul.f32 %v7966_v2, %v433_v55  ;;  %v505_v38 = vmul.f32 %v7978_v16, %v385_v9  ;;  %834 = vrot.lane.b32.xlu1 %v11650_v61, %s7121_s18  ;;  %v507_v11 = vmul.f32 %v7958_v33, %v426_v30  ;;  %v8158_v52 = vld [vmem:[#allocation2 + $0x78] sm:$0xff]  ;;  %v8178_v30 = vld [vmem:[#allocation2] sm:$0xff] }
 0x107   :  { %836 = vrot.lane.b32.xlu0 %v11652_v58, %s7121_s18  ;;  %v6588_v8 = vpack.i.bf16 %v8156_v46, %v8158_v52  ;;  %v11661_v55 = vld [vmem:[#allocation7_spill] sm:$0xff]  ;;  %v6608_v58 = vpack.i.bf16 %v8122_v50, %v8178_v30 }
 0x108   :  { %v6343_v41 = vpack.c.bf16 %v500_v57, %v499_v18  ;;  %v6346_v4 = vpack.c.bf16 %v505_v38, %v505_v38  ;;  %v374_v24 = vpop.permute.xlu0 %373  ;;  %v11662_v57 = vld [vmem:[#allocation6_spill] sm:$0xff]  ;;  %v6598_v38 = vpack.i.bf16 %v7409_v42, %v7414_v43  ;;  %v6603_v42 = vpack.i.bf16 %v11647_v49, %v11646_v17  ;;  %v8189_v43 = vld [vmem:[#allocation2 + $0x40] sm:$0xff] }
 0x109   :  { %v386_v27 = vsel %vm379_vm3, %v7974_v59, %v374_v24  ;;  %v434_v54 = vsel %vm379_vm3, %v374_v24, %v11651_v56  ;;  %v427_v59 = vsel %vm379_vm3, %v11654_v19, %v7701_v20  ;;  %v6593_v18 = vpack.i.bf16 %v11662_v57, %v11661_v55  ;;  %v8247_v57 = vld [vmem:[#allocation2 + $0xc0] sm:$0xff] }
 0x10a   :  { %716 = vst [vmem:[#allocation3 + $0x54] sm:$0xff] %v6343_v41  ;;  %719 = vst [vmem:[#allocation3 + $0x6c] sm:$0xf] %v6346_v4  ;;  %v506_v23 = vmul.f32 %v7966_v2, %v434_v54  ;;  %v512_v1 = vmul.f32 %v7978_v16, %v386_v27  ;;  %838 = vrot.lane.b32.xlu1 %v11653_v13, %s7121_s18  ;;  %v514_v0 = vmul.f32 %v7958_v33, %v427_v59  ;;  %v8132_v33 = vld [vmem:[#allocation2 + $0xa8] sm:$0xff]  ;;  %v8196_v54 = vld [vmem:[#allocation2 + $0x10] sm:$0xff] }
 0x10b   :  { %1189 = vrot.lane.b32.xlu0 %v11655_v35, %s7122_s8  ;;  %v6583_v39 = vpack.i.bf16 %v8132_v33, %v8148_v60  ;;  %v6613_v24 = vpack.i.bf16 %v8189_v43, %v8152_v37  ;;  %v8194_v27 = vld [vmem:[#allocation2 + $0x48] sm:$0xff]  ;;  %v8205_v13 = vld [vmem:[#allocation2 + $0x50] sm:$0xff] }
 0x10c   :  { %v6347_v48 = vpack.c.bf16 %v507_v11, %v506_v23  ;;  %v6350_v40 = vpack.c.bf16 %v512_v1, %v512_v1  ;;  %v376_v10 = vpop.permute.xlu1 %375  ;;  %v8111_v3 = vpop.permute.xlu0 %728  ;;  %v6618_v11 = vpack.i.bf16 %v8194_v27, %v8196_v54 }
 0x10d   :  { %v387_v45 = vsel %vm379_vm3, %v7972_v53, %v376_v10  ;;  %v435_v32 = vsel %vm379_vm3, %v376_v10, %v11654_v19  ;;  %v8207_v19 = vld [vmem:[#allocation2 + $0x18] sm:$0xff] }
 0x10e   :  { %720 = vst [vmem:[#allocation3 + $0x8c] sm:$0xff] %v6347_v48  ;;  %723 = vst [vmem:[#allocation3 + $0xa4] sm:$0xf] %v6350_v40  ;;  %v513_v20 = vmul.f32 %v7966_v2, %v435_v32  ;;  %v519_v15 = vmul.f32 %v7978_v16, %v387_v45  ;;  %1191 = vrot.lane.b32.xlu1 %v8122_v50, %s7122_s8  ;;  %v6941_v2 = vld [vmem:[#allocation2 + $0xe0] sm:$0xff]  ;;  %v6623_v59 = vpack.i.bf16 %v8205_v13, %v8207_v19 }
 0x10f   :  { %1193 = vrot.lane.b32.xlu0 %v11656_v5, %s7122_s8  ;;  %v6628_v40 = vpack.i.bf16 %v11644_v25, %v11643_v62  ;;  %v11664_v5 = vld [vmem:[#allocation22_spill] sm:$0xff] }
 0x110   :  { %v6351_v53 = vpack.c.bf16 %v514_v0, %v513_v20  ;;  %v6354_v29 = vpack.c.bf16 %v519_v15, %v519_v15  ;;  %v8128_v36 = vpop.permute.xlu1 %730  ;;  %v8130_v22 = vpop.permute.xlu0 %732  ;;  %v8222_v20 = vld [vmem:[#allocation2 + $0x80] sm:$0xff]  ;;  %v8226_v15 = vld [vmem:[#allocation2 + $0xb8] sm:$0xff] }
 0x112   :  { %724 = vst [vmem:[#allocation3 + $0xc4] sm:$0xff] %v6351_v53  ;;  %727 = vst [vmem:[#allocation3 + $0xdc] sm:$0xf] %v6354_v29  ;;  %1195 = vrot.lane.b32.xlu1 %v8132_v33, %s7122_s8  ;;  %v8231_v53 = vsub.s32 1, %v11664_v5 }
 0x113   :  { %1197 = vrot.lane.b32.xlu0 %v6941_v2, %s7122_s8 }
 0x114   :  { %v8137_v16 = vpop.permute.xlu1 %734  ;;  %v8139_v31 = vpop.permute.xlu0 %736 }
 0x115   :  { %11657 = vst [vmem:[#allocation21_spill] sm:$0xff] %v8139_v31 }
 0x116   :  { %1199 = vrot.lane.b32.xlu1 %v6942_v12, %s7122_s8  ;;  %v11665_v12 = vld [vmem:[#allocation23_spill] sm:$0xff] }
 0x117   :  { %1201 = vrot.lane.b32.xlu0 %v6943_v63, %s7122_s8  ;;  %v8236_v63 = vrot.slane %v11665_v12, %v8231_v53 }
 0x118   :  { %v8143_v47 = vpop.permute.xlu1 %738  ;;  %v8145_v34 = vpop.permute.xlu0 %740 }
 0x119   :  { %11658 = vst [vmem:[#allocation15_spill] sm:$0xff] %v8143_v47  ;;  %11659 = vst [vmem:[#allocation9_spill] sm:$0xff] %v8145_v34 }
 0x11a   :  { %1203 = vrot.lane.b32.xlu1 %v6944_v21, %s7122_s8  ;;  %v8238_v21 = vld [vmem:[#allocation2 + $0x88] sm:$0xff] }
 0x11b   :  { %1205 = vrot.lane.b32.xlu0 %v8152_v37, %s7122_s8 }
 0x11c   :  { %v8162_v7 = vpop.permute.xlu1 %742  ;;  %v8164_v9 = vpop.permute.xlu0 %744 }
 0x11d   :  { %11660 = vst [vmem:[#allocation8_spill] sm:$0xff] %v8162_v7 }
 0x11e   :  { %6584 = vrot.lane.b32.xlu1 %v6583_v39, %s7123_s9  ;;  %v11666_v39 = vld [vmem:[#allocation24_spill] sm:$0xff] }
 0x11f   :  { %6589 = vrot.lane.b32.xlu0 %v6588_v8, %s7123_s9  ;;  %v912_v8 = vrot.slane %v11666_v39, %v8231_v53 }
 0x120   :  { %v8172_v61 = vpop.permute.xlu1 %746  ;;  %v8174_v56 = vpop.permute.xlu0 %748 }
 0x122   :  { %6594 = vrot.lane.b32.xlu1 %v6593_v18, %s7123_s9 }
 0x123   :  { %6599 = vrot.lane.b32.xlu0 %v6598_v38, %s7123_s9 }
 0x124   :  { %v8182_v41 = vpop.permute.xlu1 %750  ;;  %v8184_v4 = vpop.permute.xlu0 %752 }
 0x126   :  { %6604 = vrot.lane.b32.xlu1 %v6603_v42, %s7123_s9 }
 0x127   :  { %6609 = vrot.lane.b32.xlu0 %v6608_v58, %s7123_s9 }
 0x128   :  { %v8200_v23 = vpop.permute.xlu1 %754  ;;  %v8202_v1 = vpop.permute.xlu0 %756 }
 0x129   :  { %11663 = vst [vmem:[#allocation18_spill] sm:$0xff] %v8200_v23 }
 0x12a   :  { %6614 = vrot.lane.b32.xlu1 %v6613_v24, %s7123_s9 }
 0x12b   :  { %6619 = vrot.lane.b32.xlu0 %v6618_v11, %s7123_s9 }
 0x12c   :  { %v8212_v35 = vpop.permute.xlu1 %758  ;;  %v761_v48 = vpop.permute.xlu0 %760 }
 0x12d   :  { %v873_v55 = vsel %vm840_vm4, %v8164_v9, %v761_v48 }
 0x12e   :  { %6624 = vrot.lane.b32.xlu1 %v6623_v59, %s7123_s9  ;;  %v8257_v42 = vmul.f32 %v8236_v63, %v873_v55 }
 0x12f   :  { %6629 = vrot.lane.b32.xlu0 %v6628_v40, %s7123_s9 }
 0x130   :  { %v763_v10 = vpop.permute.xlu1 %762  ;;  %v765_v45 = vpop.permute.xlu0 %764  ;;  %11667 = vst [vmem:[#allocation10_spill] sm:$0xff] %v8257_v42 }
 0x131   :  { %v874_v24 = vsel %vm840_vm4, %v8172_v61, %v763_v10  ;;  %v875_v59 = vsel %vm840_vm4, %v8174_v56, %v765_v45 }
 0x132   :  { %1209 = vrot.lane.b32.xlu1 %v8158_v52, %s7122_s8  ;;  %v8276_v12 = vmul.f32 %v8236_v63, %v874_v24 }
 0x133   :  { %1211 = vrot.lane.b32.xlu0 %v8156_v46, %s7122_s8 }
 0x134   :  { %v767_v32 = vpop.permute.xlu1 %766  ;;  %v769_v0 = vpop.permute.xlu0 %768  ;;  %11669 = vst [vmem:[#allocation17_spill] sm:$0xff] %v8276_v12 }
 0x135   :  { %v876_v39 = vsel %vm840_vm4, %v8182_v41, %v767_v32 }
 0x136   :  { %1225 = vrot.lane.b32.xlu1 %v8222_v20, %s7122_s8 }
 0x137   :  { %1227 = vrot.lane.b32.xlu0 %v8226_v15, %s7122_s8 }
 0x138   :  { %v771_v29 = vpop.permute.xlu1 %770  ;;  %v773_v2 = vpop.permute.xlu0 %772 }
 0x13a   :  { %1241 = vrot.lane.b32.xlu1 %v8238_v21, %s7122_s8 }
 0x13b   :  { %1243 = vrot.lane.b32.xlu0 %v8247_v57, %s7122_s8 }
 0x13c   :  { %v775_v18 = vpop.permute.xlu1 %774  ;;  %v8251_v38 = vpop.permute.xlu0 %776 }
 0x13d   :  { %v865_v58 = vsel %vm840_vm4, %v761_v48, %v8251_v38 }
 0x13e   :  { %v8262_v11 = vmul.f32 %v912_v8, %v865_v58  ;;  %1289 = vrot.lane.b32.xlu1 %v11646_v17, %s7122_s8  ;;  %v877_v58 = vsel %vm840_vm4, %v8184_v4, %v769_v0 }
 0x13f   :  { %1291 = vrot.lane.b32.xlu0 %v11647_v49, %s7122_s8  ;;  %v8288_v49 = vmul.f32 %v8236_v63, %v875_v59  ;;  %v955_v7 = vmul.f32 %v8236_v63, %v877_v58 }
 0x140   :  { %11668 = vst [vmem:[#allocation11_spill] sm:$0xff] %v8262_v11  ;;  %v8271_v48 = vpop.permute.xlu1 %778  ;;  %v8273_v40 = vpop.permute.xlu0 %780 }
 0x141   :  { %v866_v17 = vsel %vm840_vm4, %v763_v10, %v8271_v48  ;;  %v867_v55 = vsel %vm840_vm4, %v765_v45, %v8273_v40  ;;  %11670 = vst [vmem:[#allocation12_spill] sm:$0xff] %v8288_v49  ;;  %v8302_v10 = vmul.f32 %v8236_v63, %v876_v39 }
 0x142   :  { %v8293_v24 = vmul.f32 %v912_v8, %v866_v17  ;;  %v8295_v5 = vmul.f32 %v912_v8, %v867_v55  ;;  %1207 = vrot.lane.b32.xlu1 %v8189_v43, %s7122_s8  ;;  %v878_v17 = vsel %vm840_vm4, %v8200_v23, %v771_v29 }
 0x143   :  { %1221 = vrot.lane.b32.xlu0 %v8196_v54, %s7122_s8  ;;  %v962_v31 = vmul.f32 %v8236_v63, %v878_v17 }
 0x144   :  { %11671 = vst [vmem:[#allocation13_spill] sm:$0xff] %v8293_v24  ;;  %v8304_v45 = vpop.permute.xlu1 %782  ;;  %v8306_v59 = vpop.permute.xlu0 %784 }
 0x145   :  { %v868_v55 = vsel %vm840_vm4, %v767_v32, %v8304_v45  ;;  %v869_v34 = vsel %vm840_vm4, %v769_v0, %v8306_v59  ;;  %v879_v32 = vsel %vm840_vm4, %v8202_v1, %v773_v2 }
 0x146   :  { %v8318_v39 = vmul.f32 %v912_v8, %v868_v55  ;;  %v956_v47 = vmul.f32 %v912_v8, %v869_v34  ;;  %1223 = vrot.lane.b32.xlu1 %v8194_v27, %s7122_s8  ;;  %v969_v42 = vmul.f32 %v8236_v63, %v879_v32 }
 0x147   :  { %1237 = vrot.lane.b32.xlu0 %v8207_v19, %s7122_s8 }
 0x148   :  { %v6372_v0 = vpack.c.bf16 %v956_v47, %v955_v7  ;;  %v8331_v55 = vpop.permute.xlu1 %786  ;;  %v8333_v34 = vpop.permute.xlu0 %788  ;;  %v880_v7 = vsel %vm840_vm4, %v8212_v35, %v775_v18 }
 0x149   :  { %v870_v58 = vsel %vm840_vm4, %v771_v29, %v8331_v55  ;;  %v871_v23 = vsel %vm840_vm4, %v773_v2, %v8333_v34 }
 0x14a   :  { %1174 = vst [vmem:[#allocation3 + $0x104] sm:$0xff] %v6372_v0  ;;  %v963_v12 = vmul.f32 %v912_v8, %v870_v58  ;;  %v970_v11 = vmul.f32 %v912_v8, %v871_v23  ;;  %1239 = vrot.lane.b32.xlu1 %v8205_v13, %s7122_s8  ;;  %v976_v0 = vmul.f32 %v8236_v63, %v880_v7 }
 0x14b   :  { %1285 = vrot.lane.b32.xlu0 %v11643_v62, %s7122_s8 }
 0x14c   :  { %v6376_v2 = vpack.c.bf16 %v963_v12, %v962_v31  ;;  %v6380_v17 = vpack.c.bf16 %v970_v11, %v969_v42  ;;  %v8354_v58 = vpop.permute.xlu1 %790  ;;  %v793_v23 = vpop.permute.xlu0 %792  ;;  %v8374_v11 = vrot.slane %v7838_v6, %v8231_v53  ;;  %v8380_v12 = vrot.slane %v7847_v44, %v8231_v53 }
 0x14d   :  { %v872_v32 = vsel %vm840_vm4, %v775_v18, %v8354_v58 }
 0x14e   :  { %1178 = vst [vmem:[#allocation3 + $0x13c] sm:$0xff] %v6376_v2  ;;  %1182 = vst [vmem:[#allocation3 + $0x174] sm:$0xff] %v6380_v17  ;;  %v977_v47 = vmul.f32 %v912_v8, %v872_v32  ;;  %1287 = vrot.lane.b32.xlu1 %v11644_v25, %s7122_s8 }
 0x14f   :  { %2953 = vrot.lane.b32.xlu0 %v8148_v60, %s7124_s10 }
 0x150   :  { %v6384_v62 = vpack.c.bf16 %v977_v47, %v976_v0  ;;  %v795_v31 = vpop.permute.xlu1 %794  ;;  %v797_v42 = vpop.permute.xlu0 %796  ;;  %v857_v47 = vsel %vm840_vm4, %v8251_v38, %v793_v23  ;;  %v8404_v0 = vld [vmem:[#allocation2 + $0xa0] sm:$0xff] }
 0x151   :  { %v929_v17 = vmul.f32 %v8374_v11, %v857_v47  ;;  %v858_v38 = vsel %vm840_vm4, %v8271_v48, %v795_v31  ;;  %v859_v32 = vsel %vm840_vm4, %v8273_v40, %v797_v42 }
 0x152   :  { %1186 = vst [vmem:[#allocation3 + $0x1ac] sm:$0xff] %v6384_v62  ;;  %2955 = vrot.lane.b32.xlu1 %v8132_v33, %s7124_s10  ;;  %v936_v40 = vmul.f32 %v8374_v11, %v858_v38  ;;  %v943_v29 = vmul.f32 %v8374_v11, %v859_v32 }
 0x153   :  { %2969 = vrot.lane.b32.xlu0 %v8158_v52, %s7124_s10 }
 0x154   :  { %v799_v63 = vpop.permute.xlu1 %798  ;;  %v801_v18 = vpop.permute.xlu0 %800 }
 0x156   :  { %2971 = vrot.lane.b32.xlu1 %v8156_v46, %s7124_s10 }
 0x157   :  { %2985 = vrot.lane.b32.xlu0 %v8222_v20, %s7124_s10 }
 0x158   :  { %v803_v25 = vpop.permute.xlu1 %802  ;;  %v805_v8 = vpop.permute.xlu0 %804 }
 0x15a   :  { %2987 = vrot.lane.b32.xlu1 %v8226_v15, %s7124_s10 }
 0x15b   :  { %3001 = vrot.lane.b32.xlu0 %v8238_v21, %s7124_s10 }
 0x15c   :  { %v8387_v7 = vpop.permute.xlu1 %806  ;;  %v8389_v2 = vpop.permute.xlu0 %808 }
 0x15d   :  { %v849_v6 = vsel %vm840_vm4, %v793_v23, %v8389_v2 }
 0x15e   :  { %v930_v44 = vmul.f32 %v8380_v12, %v849_v6  ;;  %3003 = vrot.lane.b32.xlu1 %v8247_v57, %s7124_s10 }
 0x15f   :  { %3049 = vrot.lane.b32.xlu0 %v8404_v0, %s7124_s10 }
 0x160   :  { %v6357_v23 = vpack.c.bf16 %v930_v44, %v929_v17  ;;  %v8408_v62 = vpop.permute.xlu1 %810  ;;  %v8410_v47 = vpop.permute.xlu0 %812  ;;  %v8422_v44 = vld [vmem:[#allocation2 + $0xd8] sm:$0xff] }
 0x161   :  { %v850_v6 = vsel %vm840_vm4, %v795_v31, %v8408_v62  ;;  %v851_v48 = vsel %vm840_vm4, %v797_v42, %v8410_v47  ;;  %v860_v31 = vsel %vm840_vm4, %v8304_v45, %v799_v63  ;;  %v861_v42 = vsel %vm840_vm4, %v8306_v59, %v801_v18 }
 0x162   :  { %1071 = vst [vmem:[#allocation3 + $0xf0] sm:$0xff] %v6357_v23  ;;  %v937_v24 = vmul.f32 %v8380_v12, %v850_v6  ;;  %v944_v17 = vmul.f32 %v8380_v12, %v851_v48  ;;  %3051 = vrot.lane.b32.xlu1 %v8422_v44, %s7124_s10  ;;  %v950_v49 = vmul.f32 %v8374_v11, %v860_v31 }
 0x163   :  { %2949 = vrot.lane.b32.xlu0 %v8178_v30, %s7124_s10  ;;  %v957_v59 = vmul.f32 %v8374_v11, %v861_v42  ;;  %v8462_v42 = vrot.slane %v7922_v28, %v8231_v53 }
 0x164   :  { %v6361_v38 = vpack.c.bf16 %v937_v24, %v936_v40  ;;  %v6365_v32 = vpack.c.bf16 %v944_v17, %v943_v29  ;;  %v8434_v23 = vpop.permute.xlu1 %814  ;;  %v8436_v6 = vpop.permute.xlu0 %816 }
 0x165   :  { %v852_v48 = vsel %vm840_vm4, %v799_v63, %v8434_v23  ;;  %v853_v45 = vsel %vm840_vm4, %v801_v18, %v8436_v6  ;;  %v862_v63 = vsel %vm840_vm4, %v8331_v55, %v803_v25  ;;  %v863_v18 = vsel %vm840_vm4, %v8333_v34, %v805_v8 }
 0x166   :  { %1075 = vst [vmem:[#allocation3 + $0x128] sm:$0xff] %v6361_v38  ;;  %1079 = vst [vmem:[#allocation3 + $0x160] sm:$0xff] %v6365_v32  ;;  %v951_v24 = vmul.f32 %v8380_v12, %v852_v48  ;;  %v958_v29 = vmul.f32 %v8380_v12, %v853_v45  ;;  %2951 = vrot.lane.b32.xlu1 %v8122_v50, %s7124_s10  ;;  %v8471_v32 = vrot.slane %v7931_v14, %v8231_v53 }
 0x167   :  { %2965 = vrot.lane.b32.xlu0 %v8152_v37, %s7124_s10  ;;  %v964_v34 = vmul.f32 %v8374_v11, %v862_v63  ;;  %v971_v14 = vmul.f32 %v8374_v11, %v863_v18  ;;  %v8494_v45 = vrot.slane %v7944_v51, %v8231_v53 }
 0x168   :  { %v6369_v40 = vpack.c.bf16 %v951_v24, %v950_v49  ;;  %v6373_v17 = vpack.c.bf16 %v958_v29, %v957_v59  ;;  %v8458_v31 = vpop.permute.xlu1 %818  ;;  %v881_v49 = vsel %vm840_vm4, %v8111_v3, %v8164_v9  ;;  %v864_v9 = vsel %vm840_vm4, %v8354_v58, %v8387_v7 }
 0x169   :  { %v854_v38 = vsel %vm840_vm4, %v803_v25, %v8458_v31  ;;  %v8467_v55 = vpop.permute.xlu0 %820  ;;  %v883_v59 = vsel %vm840_vm4, %v8130_v22, %v8174_v56  ;;  %v8507_v29 = vmul.f32 %v8462_v42, %v881_v49  ;;  %v11673_v49 = vld [vmem:[#allocation18_spill] sm:$0xff] }
 0x16a   :  { %1083 = vst [vmem:[#allocation3 + $0x198] sm:$0xff] %v6369_v40  ;;  %1175 = vst [vmem:[#allocation3 + $0x10c] sm:$0xff] %v6373_v17  ;;  %v965_v28 = vmul.f32 %v8380_v12, %v854_v38  ;;  %v855_v25 = vsel %vm840_vm4, %v805_v8, %v8467_v55  ;;  %2967 = vrot.lane.b32.xlu1 %v8189_v43, %s7124_s10  ;;  %v882_v8 = vsel %vm840_vm4, %v8128_v36, %v8172_v61 }
 0x16b   :  { %v972_v48 = vmul.f32 %v8380_v12, %v855_v25  ;;  %2981 = vrot.lane.b32.xlu0 %v8196_v54, %s7124_s10  ;;  %v978_v61 = vmul.f32 %v8374_v11, %v864_v9  ;;  %v8524_v17 = vmul.f32 %v8462_v42, %v882_v8 }
 0x16c   :  { %v6377_v58 = vpack.c.bf16 %v965_v28, %v964_v34  ;;  %v8504_v24 = vpop.permute.xlu1 %822  ;;  %v11674_v34 = vld [vmem:[#allocation15_spill] sm:$0xff] }
 0x16d   :  { %v6381_v63 = vpack.c.bf16 %v972_v48, %v971_v14  ;;  %v856_v51 = vsel %vm840_vm4, %v8387_v7, %v8504_v24  ;;  %v825_v53 = vpop.permute.xlu0 %824  ;;  %v8527_v7 = vmul.f32 %v8462_v42, %v883_v59  ;;  %v886_v28 = vsel %vm840_vm4, %v11674_v34, %v11673_v49 }
 0x16e   :  { %1179 = vst [vmem:[#allocation3 + $0x144] sm:$0xff] %v6377_v58  ;;  %v979_v18 = vmul.f32 %v8380_v12, %v856_v51  ;;  %v841_v56 = vsel %vm840_vm4, %v8389_v2, %v825_v53  ;;  %v889_v40 = vsel %vm840_vm4, %v825_v53, %v8111_v3  ;;  %2983 = vrot.lane.b32.xlu1 %v8194_v27, %s7124_s10  ;;  %v11672_v2 = vld [vmem:[#allocation21_spill] sm:$0xff] }
 0x16f   :  { %1183 = vst [vmem:[#allocation3 + $0x17c] sm:$0xff] %v6381_v63  ;;  %v8530_v11 = vmul.f32 %v8471_v32, %v889_v40  ;;  %v931_v12 = vmul.f32 %v8494_v45, %v841_v56  ;;  %2997 = vrot.lane.b32.xlu0 %v8207_v19, %s7124_s10  ;;  %v884_v3 = vsel %vm840_vm4, %v8137_v16, %v8182_v41 }
 0x170   :  { %v885_v38 = vsel %vm840_vm4, %v11672_v2, %v8184_v4  ;;  %v6385_v25 = vpack.c.bf16 %v979_v18, %v978_v61  ;;  %v827_v14 = vpop.permute.xlu1 %826  ;;  %v8573_v61 = vld [vmem:[#allocation2 + $0x30] sm:$0xff] }
 0x171   :  { %v6358_v9 = vpack.c.bf16 %v931_v12, %v931_v12  ;;  %v842_v48 = vsel %vm840_vm4, %v8408_v62, %v827_v14  ;;  %v890_v41 = vsel %vm840_vm4, %v827_v14, %v8128_v36  ;;  %v829_v8 = vpop.permute.xlu0 %828  ;;  %v8566_v36 = vmul.f32 %v8462_v42, %v884_v3 }
 0x172   :  { %1187 = vst [vmem:[#allocation3 + $0x1b4] sm:$0xff] %v6385_v25  ;;  %v8554_v4 = vmul.f32 %v8471_v32, %v890_v41  ;;  %v938_v59 = vmul.f32 %v8494_v45, %v842_v48  ;;  %v843_v58 = vsel %vm840_vm4, %v8410_v47, %v829_v8  ;;  %v891_v63 = vsel %vm840_vm4, %v829_v8, %v8130_v22  ;;  %v11675_v47 = vld [vmem:[#allocation9_spill] sm:$0xff]  ;;  %v11676_v41 = vld [vmem:[#allocation8_spill] sm:$0xff] }
 0x173   :  { %2999 = vrot.lane.b32.xlu1 %v8205_v13, %s7124_s10  ;;  %v954_v62 = vmul.f32 %v8462_v42, %v885_v38  ;;  %1072 = vst [vmem:[#allocation3 + $0xf8] sm:$0xf] %v6358_v9  ;;  %v8570_v51 = vmul.f32 %v8471_v32, %v891_v63  ;;  %v945_v53 = vmul.f32 %v8494_v45, %v843_v58 }
 0x174   :  { %3045 = vrot.lane.b32.xlu0 %v8573_v61, %s7124_s10  ;;  %v961_v22 = vmul.f32 %v8462_v42, %v886_v28  ;;  %v887_v18 = vsel %vm840_vm4, %v11675_v47, %v8202_v1  ;;  %v6362_v56 = vpack.c.bf16 %v938_v59, %v938_v59  ;;  %v831_v40 = vpop.permute.xlu1 %830  ;;  %v888_v8 = vsel %vm840_vm4, %v11676_v41, %v8212_v35 }
 0x175   :  { %v6366_v12 = vpack.c.bf16 %v945_v53, %v945_v53  ;;  %v844_v3 = vsel %vm840_vm4, %v8434_v23, %v831_v40  ;;  %v892_v38 = vsel %vm840_vm4, %v831_v40, %v8137_v16  ;;  %v833_v49 = vpop.permute.xlu0 %832  ;;  %v8598_v23 = vld [vmem:[#allocation2 + $0x68] sm:$0xff]  ;;  %v968_v48 = vmul.f32 %v8462_v42, %v887_v18 }
 0x176   :  { %1076 = vst [vmem:[#allocation3 + $0x130] sm:$0xf] %v6362_v56  ;;  %v8589_v28 = vmul.f32 %v8471_v32, %v892_v38  ;;  %v952_v25 = vmul.f32 %v8494_v45, %v844_v3  ;;  %v845_v1 = vsel %vm840_vm4, %v8436_v6, %v833_v49  ;;  %v893_v14 = vsel %vm840_vm4, %v833_v49, %v11672_v2 }
 0x177   :  { %3047 = vrot.lane.b32.xlu1 %v8598_v23, %s7124_s10  ;;  %1080 = vst [vmem:[#allocation3 + $0x168] sm:$0xf] %v6366_v12  ;;  %v953_v16 = vmul.f32 %v8471_v32, %v893_v14  ;;  %v959_v9 = vmul.f32 %v8494_v45, %v845_v1 }
 0x178   :  { %2492 = vrot.lane.b32.xlu0 %v8148_v60, %s7125_s11  ;;  %v6370_v59 = vpack.c.bf16 %v952_v25, %v952_v25  ;;  %v835_v58 = vpop.permute.xlu1 %834 }
 0x179   :  { %v6371_v63 = vpack.c.bf16 %v954_v62, %v953_v16  ;;  %v6374_v53 = vpack.c.bf16 %v959_v9, %v959_v9  ;;  %v846_v56 = vsel %vm840_vm4, %v8458_v31, %v835_v58  ;;  %v894_v40 = vsel %vm840_vm4, %v835_v58, %v11674_v34  ;;  %v837_v12 = vpop.permute.xlu0 %836 }
 0x17a   :  { %1084 = vst [vmem:[#allocation3 + $0x1a0] sm:$0xf] %v6370_v59  ;;  %v960_v18 = vmul.f32 %v8471_v32, %v894_v40  ;;  %v966_v3 = vmul.f32 %v8494_v45, %v846_v56  ;;  %v847_v35 = vsel %vm840_vm4, %v8467_v55, %v837_v12  ;;  %v895_v62 = vsel %vm840_vm4, %v837_v12, %v11675_v47 }
 0x17b   :  { %2494 = vrot.lane.b32.xlu1 %v8132_v33, %s7125_s11  ;;  %1173 = vst [vmem:[#allocation3 + $0xfc] sm:$0xff] %v6371_v63  ;;  %1176 = vst [vmem:[#allocation3 + $0x114] sm:$0xf] %v6374_v53  ;;  %v967_v31 = vmul.f32 %v8471_v32, %v895_v62  ;;  %v973_v34 = vmul.f32 %v8494_v45, %v847_v35  ;;  %v975_v58 = vmul.f32 %v8462_v42, %v888_v8 }
 0x17c   :  { %2508 = vrot.lane.b32.xlu0 %v8158_v52, %s7125_s11  ;;  %v6375_v49 = vpack.c.bf16 %v961_v22, %v960_v18  ;;  %v6378_v47 = vpack.c.bf16 %v966_v3, %v966_v3  ;;  %v839_v25 = vpop.permute.xlu1 %838 }
 0x17d   :  { %v6379_v1 = vpack.c.bf16 %v968_v48, %v967_v31  ;;  %v6382_v14 = vpack.c.bf16 %v973_v34, %v973_v34  ;;  %v848_v16 = vsel %vm840_vm4, %v8504_v24, %v839_v25  ;;  %v896_v9 = vsel %vm840_vm4, %v839_v25, %v11676_v41  ;;  %v8645_v59 = vpop.permute.xlu0 %1189 }
 0x17e   :  { %1177 = vst [vmem:[#allocation3 + $0x134] sm:$0xff] %v6375_v49  ;;  %1180 = vst [vmem:[#allocation3 + $0x14c] sm:$0xf] %v6378_v47  ;;  %v974_v22 = vmul.f32 %v8471_v32, %v896_v9  ;;  %v980_v63 = vmul.f32 %v8494_v45, %v848_v16 }
 0x17f   :  { %2510 = vrot.lane.b32.xlu1 %v8156_v46, %s7125_s11  ;;  %1181 = vst [vmem:[#allocation3 + $0x16c] sm:$0xff] %v6379_v1  ;;  %1184 = vst [vmem:[#allocation3 + $0x184] sm:$0xf] %v6382_v14 }
 0x180   :  { %2524 = vrot.lane.b32.xlu0 %v8222_v20, %s7125_s11  ;;  %v6383_v24 = vpack.c.bf16 %v975_v58, %v974_v22  ;;  %v6386_v48 = vpack.c.bf16 %v980_v63, %v980_v63  ;;  %v8654_v41 = vpop.permute.xlu1 %1191 }
 0x181   :  { %v8656_v53 = vpop.permute.xlu0 %1193 }
 0x182   :  { %1185 = vst [vmem:[#allocation3 + $0x1a4] sm:$0xff] %v6383_v24  ;;  %1188 = vst [vmem:[#allocation3 + $0x1bc] sm:$0xf] %v6386_v48 }
 0x183   :  { %2526 = vrot.lane.b32.xlu1 %v8226_v15, %s7125_s11 }
 0x184   :  { %2540 = vrot.lane.b32.xlu0 %v8238_v21, %s7125_s11  ;;  %v8662_v42 = vpop.permute.xlu1 %1195 }
 0x185   :  { %v8664_v32 = vpop.permute.xlu0 %1197 }
 0x186   :  { %11677 = vst [vmem:[#allocation20_spill] sm:$0xff] %v8664_v32 }
 0x187   :  { %2542 = vrot.lane.b32.xlu1 %v8247_v57, %s7125_s11 }
 0x188   :  { %2588 = vrot.lane.b32.xlu0 %v8404_v0, %s7125_s11  ;;  %v8670_v45 = vpop.permute.xlu1 %1199 }
 0x189   :  { %11678 = vst [vmem:[#allocation14_spill] sm:$0xff] %v8670_v45  ;;  %v8672_v8 = vpop.permute.xlu0 %1201 }
 0x18b   :  { %2590 = vrot.lane.b32.xlu1 %v8422_v44, %s7125_s11 }
 0x18c   :  { %2488 = vrot.lane.b32.xlu0 %v8178_v30, %s7125_s11  ;;  %v8678_v56 = vpop.permute.xlu1 %1203 }
 0x18d   :  { %v8680_v40 = vpop.permute.xlu0 %1205 }
 0x18f   :  { %2490 = vrot.lane.b32.xlu1 %v8122_v50, %s7125_s11 }
 0x190   :  { %2504 = vrot.lane.b32.xlu0 %v8152_v37, %s7125_s11  ;;  %v6585_v12 = vpop.permute.xlu1 %6584 }
 0x191   :  { %v6590_v18 = vpop.permute.xlu0 %6589  ;;  %v6587_v47 = vunpack.i.h.bf16 %v6585_v12  ;;  %v6586_v25 = vunpack.i.l.bf16 %v6585_v12 }
 0x192   :  { %v6592_v35 = vunpack.i.h.bf16 %v6590_v18  ;;  %v6591_v62 = vunpack.i.l.bf16 %v6590_v18 }
 0x193   :  { %2506 = vrot.lane.b32.xlu1 %v8189_v43, %s7125_s11 }
 0x194   :  { %2520 = vrot.lane.b32.xlu0 %v8196_v54, %s7125_s11  ;;  %v6595_v3 = vpop.permute.xlu1 %6594  ;;  %v1806_v18 = vsel %vm1762_vm5, %v6587_v47, %v6592_v35 }
 0x195   :  { %v6597_v31 = vunpack.i.h.bf16 %v6595_v3  ;;  %v6596_v34 = vunpack.i.l.bf16 %v6595_v3  ;;  %v8691_v49 = vpop.permute.xlu0 %6599  ;;  %v1805_v3 = vsel %vm1762_vm5, %v6586_v25, %v6591_v62 }
 0x196   :  { %v11537_v1 = vunpack.i.h.bf16 %v8691_v49  ;;  %v11538_v14 = vunpack.i.l.bf16 %v8691_v49 }
 0x197   :  { %2522 = vrot.lane.b32.xlu1 %v8194_v27, %s7125_s11  ;;  %v1797_v16 = vsel %vm1762_vm5, %v6591_v62, %v6596_v34  ;;  %v1798_v9 = vsel %vm1762_vm5, %v6592_v35, %v6597_v31 }
 0x198   :  { %2536 = vrot.lane.b32.xlu0 %v8207_v19, %s7125_s11  ;;  %v1790_v58 = vsel %vm1762_vm5, %v6597_v31, %v11537_v1  ;;  %v1789_v22 = vsel %vm1762_vm5, %v6596_v34, %v11538_v14  ;;  %v8711_v63 = vpop.permute.xlu1 %6604  ;;  %v7060_v1 = vpack.c.bf16 %v1798_v9, %v1797_v16 }
 0x199   :  { %v11545_v24 = vunpack.i.h.bf16 %v8711_v63  ;;  %v11539_v48 = vunpack.i.l.bf16 %v8711_v63  ;;  %v6610_v12 = vpop.permute.xlu0 %6609  ;;  %v7059_v35 = vpack.c.bf16 %v1790_v58, %v1789_v22 }
 0x19a   :  { %v6612_v62 = vunpack.i.h.bf16 %v6610_v12  ;;  %v6611_v2 = vunpack.i.l.bf16 %v6610_v12 }
 0x19b   :  { %2538 = vrot.lane.b32.xlu1 %v8205_v13, %s7125_s11  ;;  %v1813_v31 = vsel %vm1762_vm5, %v11539_v48, %v6586_v25  ;;  %v1814_v34 = vsel %vm1762_vm5, %v11545_v24, %v6587_v47  ;;  %4812 = vmatprep.subr.bf16.mxu1 %v7059_v35  ;;  %v7061_v25 = vpack.c.bf16 %v1806_v18, %v1805_v3  ;;  %v9015_v24 = vld [vmem:[#allocation2 + $0x118] sm:$0xff] }
 0x19c   :  { %2584 = vrot.lane.b32.xlu0 %v8573_v61, %s7125_s11  ;;  %v6615_v14 = vpop.permute.xlu1 %6614  ;;  %4813 = vmatpush1.bf16.msra.mxu1 %v7060_v1  ;;  %v7062_v48 = vpack.c.bf16 %v1814_v34, %v1813_v31 }
 0x19d   :  { %v6620_v6 = vpop.permute.xlu0 %6619  ;;  %v6617_v55 = vunpack.i.h.bf16 %v6615_v14  ;;  %v6616_v38 = vunpack.i.l.bf16 %v6615_v14  ;;  %4699 = vmatprep.subr.bf16.mxu0 %v7061_v25  ;;  %v11679_v25 = vld [vmem:[#allocation22_spill] sm:$0xff] }
 0x19e   :  { %v6622_v45 = vunpack.i.h.bf16 %v6620_v6  ;;  %v6621_v47 = vunpack.i.l.bf16 %v6620_v6  ;;  %4700 = vmatpush1.bf16.msra.mxu0 %v7062_v48 }
 0x19f   :  { %2586 = vrot.lane.b32.xlu1 %v8598_v23, %s7125_s11  ;;  %v1803_v1 = vsel %vm1762_vm5, %v6611_v2, %v6616_v38  ;;  %v1804_v6 = vsel %vm1762_vm5, %v6612_v62, %v6617_v55 }
 0x1a0   :  { %2031 = vrot.lane.b32.xlu0 %v8148_v60, %s7126_s12  ;;  %v8735_v16 = vpop.permute.xlu1 %6624  ;;  %v1796_v12 = vsel %vm1762_vm5, %v6617_v55, %v6622_v45  ;;  %v1795_v18 = vsel %vm1762_vm5, %v6616_v38, %v6621_v47 }
 0x1a1   :  { %v11543_v9 = vunpack.i.h.bf16 %v8735_v16  ;;  %v11544_v58 = vunpack.i.l.bf16 %v8735_v16  ;;  %v8739_v14 = vpop.permute.xlu0 %6629 }
 0x1a2   :  { %v11542_v22 = vunpack.i.h.bf16 %v8739_v14  ;;  %v11541_v60 = vunpack.i.l.bf16 %v8739_v14 }
 0x1a3   :  { %2033 = vrot.lane.b32.xlu1 %v8132_v33, %s7126_s12  ;;  %v1787_v48 = vsel %vm1762_vm5, %v6621_v47, %v11544_v58  ;;  %v1788_v3 = vsel %vm1762_vm5, %v6622_v45, %v11543_v9  ;;  %v7064_v45 = vpack.c.bf16 %v1796_v12, %v1795_v18  ;;  %v8776_v47 = vsub.s32 2, %v11679_v25 }
 0x1a4   :  { %2047 = vrot.lane.b32.xlu0 %v8158_v52, %s7126_s12  ;;  %v1811_v33 = vsel %vm1762_vm5, %v11541_v60, %v6611_v2  ;;  %v1812_v38 = vsel %vm1762_vm5, %v11542_v22, %v6612_v62  ;;  %v1210_v55 = vpop.permute.xlu1 %1209  ;;  %v7063_v34 = vpack.c.bf16 %v1788_v3, %v1787_v48  ;;  %v7065_v52 = vpack.c.bf16 %v1804_v6, %v1803_v1  ;;  %v8793_v62 = vld [vmem:[%s11498_s2 + $0x18] sm:$0x7f] }
 0x1a5   :  { %v1212_v31 = vpop.permute.xlu0 %1211  ;;  %v7066_v35 = vpack.c.bf16 %v1812_v38, %v1811_v33  ;;  %v8797_v1 = vrot.slane %v8793_v62, %v8776_v47 }
 0x1a6   :  { %4814 = vmatprep.subr.bf16.mxu1 %v7063_v34  ;;  %4701 = vmatprep.subr.bf16.mxu0 %v7065_v52 }
 0x1a7   :  { %2049 = vrot.lane.b32.xlu1 %v8156_v46, %s7126_s12  ;;  %4815 = vmatpush1.bf16.msra.mxu1 %v7064_v45  ;;  %v8782_v46 = vld [vmem:[%s11498_s2 + $0x10] sm:$0x7f]  ;;  %11681 = vst [vmem:[#allocation19_spill] sm:$0xff] %v8797_v1  ;;  %v1344_v45 = vsel %vm1301_vm6, %v8656_v53, %v1210_v55 }
 0x1a8   :  { %2063 = vrot.lane.b32.xlu0 %v8222_v20, %s7126_s12  ;;  %v1226_v2 = vpop.permute.xlu1 %1225  ;;  %v8786_v20 = vrot.slane %v8782_v46, %v8776_v47  ;;  %4702 = vmatpush1.bf16.msra.mxu0 %v7066_v35 }
 0x1a9   :  { %v1228_v60 = vpop.permute.xlu0 %1227  ;;  %v1336_v6 = vsel %vm1301_vm6, %v1210_v55, %v1226_v2  ;;  %v1345_v55 = vsel %vm1301_vm6, %v8662_v42, %v1212_v31 }
 0x1aa   :  { %11680 = vst [vmem:[#allocation16_spill] sm:$0xff] %v8786_v20  ;;  %v1337_v12 = vsel %vm1301_vm6, %v1212_v31, %v1228_v60  ;;  %v1402_v3 = vmul.f32 %v8786_v20, %v1336_v6 }
 0x1ab   :  { %2065 = vrot.lane.b32.xlu1 %v8226_v15, %s7126_s12  ;;  %v1409_v52 = vmul.f32 %v8786_v20, %v1337_v12 }
 0x1ac   :  { %2079 = vrot.lane.b32.xlu0 %v8238_v21, %s7126_s12  ;;  %v8805_v15 = vpop.permute.xlu1 %1241  ;;  %v8822_v21 = vld [vmem:[%s11498_s2] sm:$0x7f] }
 0x1ad   :  { %v1328_v18 = vsel %vm1301_vm6, %v1226_v2, %v8805_v15  ;;  %v8810_v48 = vpop.permute.xlu0 %1243  ;;  %v8826_v34 = vrot.slane %v8822_v21, %v8776_v47  ;;  %v7068_v9 = vpack.c.bf16 %v1409_v52, %v1402_v3 }
 0x1ae   :  { %v1403_v33 = vmul.f32 %v8797_v1, %v1328_v18  ;;  %v1329_v38 = vsel %vm1301_vm6, %v1228_v60, %v8810_v48 }
 0x1af   :  { %2081 = vrot.lane.b32.xlu1 %v8247_v57, %s7126_s12  ;;  %v1410_v60 = vmul.f32 %v8797_v1, %v1329_v38  ;;  %v8838_v57 = vld [vmem:[%s11498_s2 + $0x8] sm:$0x7f] }
 0x1b0   :  { %2127 = vrot.lane.b32.xlu0 %v8404_v0, %s7126_s12  ;;  %v8842_v35 = vrot.slane %v8838_v57, %v8776_v47  ;;  %v8847_v2 = vpop.permute.xlu1 %1289 }
 0x1b1   :  { %v1352_v0 = vsel %vm1301_vm6, %v8847_v2, %v8656_v53  ;;  %v8853_v6 = vpop.permute.xlu0 %1291  ;;  %v7067_v53 = vpack.c.bf16 %v1410_v60, %v1403_v33 }
 0x1b2   :  { %v1401_v12 = vmul.f32 %v8842_v35, %v1344_v45  ;;  %v1400_v18 = vmul.f32 %v8826_v34, %v1352_v0  ;;  %v1353_v38 = vsel %vm1301_vm6, %v8853_v6, %v8662_v42  ;;  %v1408_v31 = vmul.f32 %v8842_v35, %v1345_v55 }
 0x1b3   :  { %2129 = vrot.lane.b32.xlu1 %v8422_v44, %s7126_s12  ;;  %v1407_v22 = vmul.f32 %v8826_v34, %v1353_v38  ;;  %4816 = vmatprep.subr.bf16.mxu1 %v7067_v53 }
 0x1b4   :  { %2027 = vrot.lane.b32.xlu0 %v8178_v30, %s7126_s12  ;;  %v1208_v45 = vpop.permute.xlu1 %1207  ;;  %4817 = vmatpush1.bf16.msra.mxu1 %v7068_v9  ;;  %v7069_v44 = vpack.c.bf16 %v1408_v31, %v1401_v12 }
 0x1b5   :  { %v1222_v58 = vpop.permute.xlu0 %1221  ;;  %v7070_v42 = vpack.c.bf16 %v1407_v22, %v1400_v18  ;;  %v1342_v22 = vsel %vm1301_vm6, %v8645_v59, %v8680_v40  ;;  %v1343_v12 = vsel %vm1301_vm6, %v8654_v41, %v1208_v45 }
 0x1b6   :  { %v1334_v55 = vsel %vm1301_vm6, %v8680_v40, %v1222_v58  ;;  %4703 = vmatprep.subr.bf16.mxu0 %v7069_v44  ;;  %v1387_v40 = vmul.f32 %v8842_v35, %v1342_v22  ;;  %v8947_v22 = vld [vmem:[#allocation2 + $0xc8] sm:$0xff] }
 0x1b7   :  { %2029 = vrot.lane.b32.xlu1 %v8122_v50, %s7126_s12  ;;  %4704 = vmatpush1.bf16.msra.mxu0 %v7070_v42  ;;  %v1388_v50 = vmul.f32 %v8786_v20, %v1334_v55  ;;  %v8929_v42 = vld [vmem:[#allocation2 + $0x150] sm:$0xff] }
 0x1b8   :  { %2043 = vrot.lane.b32.xlu0 %v8152_v37, %s7126_s12  ;;  %v1224_v0 = vpop.permute.xlu1 %1223 }
 0x1b9   :  { %v8874_v30 = vpop.permute.xlu0 %1237  ;;  %v1335_v37 = vsel %vm1301_vm6, %v1208_v45, %v1224_v0 }
 0x1ba   :  { %11682 = vst [vmem:[#allocation4_spill] sm:$0xff] %v8874_v30  ;;  %v1326_v3 = vsel %vm1301_vm6, %v1222_v58, %v8874_v30  ;;  %v1395_v52 = vmul.f32 %v8786_v20, %v1335_v37  ;;  %v9085_v30 = vld [vmem:[#allocation2 + $0x148] sm:$0xff] }
 0x1bb   :  { %2045 = vrot.lane.b32.xlu1 %v8189_v43, %s7126_s12  ;;  %v1389_v9 = vmul.f32 %v8797_v1, %v1326_v3  ;;  %v8939_v3 = vld [vmem:[#allocation2 + $0x158] sm:$0xff] }
 0x1bc   :  { %2059 = vrot.lane.b32.xlu0 %v8196_v54, %s7126_s12  ;;  %v8891_v58 = vpop.permute.xlu1 %1239  ;;  %v7072_v44 = vpack.c.bf16 %v1395_v52, %v1388_v50  ;;  %v11686_v50 = vpack.c.bf16 %v8318_v39, %v8295_v5  ;;  %v8957_v5 = vsub.s32 6, %v11679_v25 }
 0x1bd   :  { %11683 = vst [vmem:[#allocation5_spill] sm:$0xff] %v8891_v58  ;;  %v1327_v43 = vsel %vm1301_vm6, %v1224_v0, %v8891_v58  ;;  %v8896_v33 = vpop.permute.xlu0 %1285 }
 0x1be   :  { %11684 = vst [vmem:[#allocation7_spill] sm:$0xff] %v8896_v33  ;;  %v1396_v60 = vmul.f32 %v8797_v1, %v1327_v43  ;;  %v1350_v54 = vsel %vm1301_vm6, %v8896_v33, %v8645_v59  ;;  %v8949_v43 = vld [vmem:[#allocation2 + $0x90] sm:$0xff]  ;;  %11687 = vst [vmem:[#allocation23_spill] sm:$0xff] %v8957_v5  ;;  %v9017_v1 = vld [vmem:[#allocation2 + $0xe0] sm:$0xff] }
 0x1bf   :  { %2061 = vrot.lane.b32.xlu1 %v8194_v27, %s7126_s12  ;;  %v1386_v18 = vmul.f32 %v8826_v34, %v1350_v54  ;;  %v1394_v27 = vmul.f32 %v8842_v35, %v1343_v12  ;;  %v11688_v54 = vld [vmem:[#allocation12_spill] sm:$0xff]  ;;  %v8963_v12 = vld [vmem:[#allocation2 + $0x98] sm:$0xff]  ;;  %v6658_v20 = vpack.i.bf16 %v9015_v24, %v9017_v1 }
 0x1c0   :  { %2075 = vrot.lane.b32.xlu0 %v8207_v19, %s7126_s12  ;;  %v8913_v38 = vpop.permute.xlu1 %1287  ;;  %v7071_v45 = vpack.c.bf16 %v1396_v60, %v1389_v9  ;;  %v8927_v19 = vld [vmem:[#allocation2 + $0x188] sm:$0xff] }
 0x1c1   :  { %11685 = vst [vmem:[#allocation6_spill] sm:$0xff] %v8913_v38  ;;  %v1351_v59 = vsel %vm1301_vm6, %v8913_v38, %v8654_v41  ;;  %v8919_v31 = vpop.permute.xlu0 %2953  ;;  %v6633_v41 = vpack.i.bf16 %v8927_v19, %v8929_v42  ;;  %v7073_v37 = vpack.c.bf16 %v1394_v27, %v1387_v40  ;;  %v6735_v60 = vld [vmem:[%s11499_s1 + $0x4] ss:$8 sps:$4 sm:$0xff]   ;;  %v11689_v40 = vpack.c.bf16 %v8302_v10, %v11688_v54  ;;  %v9040_v38 = vld [vmem:[#allocation2 + $0x58] sm:$0xff] }
 0x1c2   :  { %v1393_v53 = vmul.f32 %v8826_v34, %v1351_v59  ;;  %4818 = vmatprep.subr.bf16.mxu1 %v7071_v45  ;;  %v11690_v27 = vpack.c.bf16 %v8566_v36, %v8527_v7  ;;  %v8975_v10 = vrot.slane %v8782_v46, %v8957_v5  ;;  %v11693_v45 = vld [vmem:[#allocation13_spill] sm:$0xff]  ;;  %6155 = vmatprep.mubr.msk.bf16.mxu0 %vm4674_vm7, %v6735_v60 }
 0x1c3   :  { %2077 = vrot.lane.b32.xlu1 %v8205_v13, %s7126_s12  ;;  %4819 = vmatpush1.bf16.msra.mxu1 %v7072_v44  ;;  %v8937_v13 = vld [vmem:[#allocation2 + $0x190] sm:$0xff]  ;;  %v11694_v44 = vld [vmem:[#allocation11_spill] sm:$0xff] }
 0x1c4   :  { %2123 = vrot.lane.b32.xlu0 %v8573_v61, %s7126_s12  ;;  %v8933_v55 = vpop.permute.xlu1 %2955  ;;  %v6638_v61 = vpack.i.bf16 %v8937_v13, %v8939_v3  ;;  %4820 = vmatprep.subr.bf16.mxu1 %v11686_v50  ;;  %v7074_v9 = vpack.c.bf16 %v1393_v53, %v1386_v18  ;;  %v8965_v18 = vld [vmem:[#allocation2 + $0xd0] sm:$0xff]  ;;  %11691 = vst [vmem:[#allocation24_spill] sm:$0xff] %v8975_v10 }
 0x1c5   :  { %v2970_v0 = vpop.permute.xlu0 %2969  ;;  %4705 = vmatprep.subr.bf16.mxu0 %v7073_v37  ;;  %v6648_v59 = vpack.i.bf16 %v8965_v18, %v8963_v12  ;;  %v8980_v53 = vrot.slane %v8793_v62, %v8957_v5  ;;  %6163 = vmatprep.mubr.msk.bf16.mxu1 %vm4674_vm7, %v6735_v60  ;;  %v8991_v50 = vrot.slane %v8838_v57, %v8957_v5 }
 0x1c6   :  { %4706 = vmatpush1.bf16.msra.mxu0 %v7074_v9  ;;  %v8995_v9 = vld [vmem:[#allocation2 + $0x180] sm:$0xff]  ;;  %v11697_v60 = vpack.c.bf16 %v8589_v28, %v8570_v51  ;;  %v9023_v51 = vld [vmem:[#allocation2 + $0xe8] sm:$0xff] }
 0x1c7   :  { %2125 = vrot.lane.b32.xlu1 %v8598_v23, %s7126_s12  ;;  %v6643_v23 = vpack.i.bf16 %v8947_v22, %v8949_v43  ;;  %4821 = vmatpush1.bf16.msra.mxu1 %v11689_v40  ;;  %11692 = vst [vmem:[#allocation21_spill] sm:$0xff] %v8980_v53  ;;  %v9003_v40 = vrot.slane %v8822_v21, %v8957_v5  ;;  %v9021_v5 = vld [vmem:[#allocation2 + $0x120] sm:$0xff] }
 0x1c8   :  { %6634 = vrot.lane.b32.xlu0 %v6633_v41, %s7123_s9  ;;  %v2972_v52 = vpop.permute.xlu1 %2971  ;;  %4707 = vmatprep.subr.bf16.mxu0 %v11690_v27  ;;  %v11695_v41 = vpack.c.bf16 %v11693_v45, %v11694_v44  ;;  %v11698_v27 = vld [vmem:[#allocation17_spill] sm:$0xff]  ;;  %v11699_v45 = vld [vmem:[#allocation10_spill] sm:$0xff]  ;;  %v6663_v28 = vpack.i.bf16 %v9021_v5, %v9023_v51 }
 0x1c9   :  { %v2986_v39 = vpop.permute.xlu0 %2985  ;;  %v11700_v44 = vpack.c.bf16 %v11698_v27, %v11699_v45  ;;  %v6725_v45 = vld [vmem:[#allocation3 + $0x78] ss:$56 sps:$4 sm:$0xff]  }
 0x1ca   :  { %4822 = vmatprep.subr.bf16.mxu1 %v11695_v41  ;;  %v3096_v7 = vsel %vm3061_vm8, %v2970_v0, %v2986_v39  ;;  %4708 = vmatpush1.bf16.msra.mxu0 %v11697_v60  ;;  %v11701_v60 = vpack.c.bf16 %v8524_v17, %v8507_v29  ;;  %v9042_v29 = vld [vmem:[#allocation2 + $0x20] sm:$0xff] }
 0x1cb   :  { %6639 = vrot.lane.b32.xlu1 %v6638_v61, %s7123_s9  ;;  %v6723_v61 = vld [vmem:[#allocation3 + $0x7c] ss:$56 sps:$4 sm:$0xff]   ;;  %4823 = vmatpush1.bf16.msra.mxu1 %v11700_v44  ;;  %v3104_v44 = vsel %vm3061_vm8, %v8919_v31, %v2970_v0  ;;  %v6668_v17 = vpack.i.bf16 %v9040_v38, %v9042_v29  ;;  %v11704_v0 = vpack.c.bf16 %v8554_v4, %v8530_v11  ;;  %v9067_v11 = vld [vmem:[#allocation2 + $0x60] sm:$0xff]  ;;  %v9069_v4 = vld [vmem:[#allocation2 + $0x28] sm:$0xff] }
 0x1cc   :  { %6644 = vrot.lane.b32.xlu0 %v6643_v23, %s7123_s9  ;;  %v2988_v36 = vpop.permute.xlu1 %2987  ;;  %v8997_v23 = vld [vmem:[#allocation2 + $0x1b8] sm:$0xff]  ;;  %4709 = vmatprep.subr.bf16.mxu0 %v11701_v60  ;;  %v6728_v60 = vld [vmem:[#allocation3 + $0xc] ss:$56 sps:$4 sm:$0xff]  }
 0x1cd   :  { %v8993_v37 = vpop.permute.xlu0 %3001  ;;  %v6653_v54 = vpack.i.bf16 %v8997_v23, %v8995_v9  ;;  %4824 = vmatprep.subr.bf16.mxu1 %v6723_v61 }
 0x1ce   :  { %11696 = vst [vmem:[#allocation18_spill] sm:$0xff] %v8993_v37  ;;  %v3088_v41 = vsel %vm3061_vm8, %v2986_v39, %v8993_v37  ;;  %v3162_v39 = vmul.f32 %v8975_v10, %v3096_v7  ;;  %v6726_v7 = vld [vmem:[#allocation3 + $0x74] ss:$56 sps:$4 sm:$0xff]   ;;  %4710 = vmatpush1.bf16.msra.mxu0 %v11704_v0 }
 0x1cf   :  { %6649 = vrot.lane.b32.xlu1 %v6648_v59, %s7123_s9  ;;  %v3097_v59 = vsel %vm3061_vm8, %v2972_v52, %v2988_v36  ;;  %v3163_v27 = vmul.f32 %v8980_v53, %v3088_v41  ;;  %4825 = vmatpush1.bf16.msra.mxu1 %v6725_v45  ;;  %v6730_v45 = vld [vmem:[#allocation3 + $0x70] ss:$56 sps:$4 sm:$0xff]  }
 0x1d0   :  { %6654 = vrot.lane.b32.xlu0 %v6653_v54, %s7123_s9  ;;  %v9038_v37 = vpop.permute.xlu1 %3003  ;;  %v3105_v54 = vsel %vm3061_vm8, %v8933_v55, %v2972_v52  ;;  %v3169_v32 = vmul.f32 %v8975_v10, %v3097_v59  ;;  %4711 = vmatprep.subr.bf16.mxu0 %v6726_v7  ;;  %v6673_v59 = vpack.i.bf16 %v9067_v11, %v9069_v4 }
 0x1d1   :  { %11702 = vst [vmem:[#allocation15_spill] sm:$0xff] %v9038_v37  ;;  %v3089_v61 = vsel %vm3061_vm8, %v2988_v36, %v9038_v37  ;;  %v9052_v41 = vpop.permute.xlu0 %3049  ;;  %v3161_v36 = vmul.f32 %v8991_v50, %v3104_v44  ;;  %4826 = vmatprep.subr.bf16.mxu1 %v6728_v60  ;;  %v3168_v7 = vmul.f32 %v8991_v50, %v3105_v54  ;;  %v9083_v54 = vld [vmem:[#allocation2 + $0x110] sm:$0xff] }
 0x1d2   :  { %11703 = vst [vmem:[#allocation9_spill] sm:$0xff] %v9052_v41  ;;  %v3170_v33 = vmul.f32 %v8980_v53, %v3089_v61  ;;  %v3112_v52 = vsel %vm3061_vm8, %v9052_v41, %v8919_v31  ;;  %v6731_v61 = vld [vmem:[#allocation3 + $0x8] ss:$56 sps:$4 sm:$0xff]   ;;  %4712 = vmatpush1.bf16.msra.mxu0 %v6730_v45 }
 0x1d3   :  { %6659 = vrot.lane.b32.xlu1 %v6658_v20, %s7123_s9  ;;  %v3160_v37 = vmul.f32 %v9003_v40, %v3112_v52  ;;  %v6732_v20 = vld [vmem:[#allocation3 + $0x4] ss:$56 sps:$4 sm:$0xff]   ;;  %4827 = vmatpush1.bf16.msra.mxu1 %v6731_v61  ;;  %v7076_v52 = vpack.c.bf16 %v3169_v32, %v3162_v39  ;;  %v6734_v41 = vld [vmem:[#allocation3] ss:$56 sps:$4 sm:$0xff]  }
 0x1d4   :  { %6664 = vrot.lane.b32.xlu0 %v6663_v28, %s7123_s9  ;;  %v9073_v31 = vpop.permute.xlu1 %3051  ;;  %4713 = vmatprep.subr.bf16.mxu0 %v6732_v20  ;;  %v7075_v60 = vpack.c.bf16 %v3170_v33, %v3163_v27 }
 0x1d5   :  { %v3113_v28 = vsel %vm3061_vm8, %v9073_v31, %v8933_v55  ;;  %v2950_v44 = vpop.permute.xlu0 %2949  ;;  %v6678_v55 = vpack.i.bf16 %v9085_v30, %v9083_v54 }
 0x1d6   :  { %v3167_v0 = vmul.f32 %v9003_v40, %v3113_v28  ;;  %4832 = vmatprep.subr.bf16.mxu1 %v7075_v60  ;;  %4714 = vmatpush1.bf16.msra.mxu0 %v6734_v41 }
 0x1d7   :  { %6669 = vrot.lane.b32.xlu1 %v6668_v17, %s7123_s9  ;;  %4833 = vmatpush2.bf16.msra.mxu1 %v7076_v52  ;;  %v7077_v17 = vpack.c.bf16 %v3168_v7, %v3161_v36 }
 0x1d8   :  { %6674 = vrot.lane.b32.xlu0 %v6673_v59, %s7123_s9  ;;  %v2952_v58 = vpop.permute.xlu1 %2951  ;;  %v7078_v33 = vpack.c.bf16 %v3167_v0, %v3160_v37 }
 0x1d9   :  { %v2966_v45 = vpop.permute.xlu0 %2965  ;;  %4719 = vmatprep.subr.bf16.mxu0 %v7077_v17 }
 0x1da   :  { %4720 = vmatpush2.bf16.msra.mxu0 %v7078_v33  ;;  %v3102_v7 = vsel %vm3061_vm8, %v2950_v44, %v2966_v45 }
 0x1db   :  { %6679 = vrot.lane.b32.xlu1 %v6678_v55, %s7123_s9 }
 0x1dc   :  { %1217 = vrot.lane.b32.xlu0 %v8939_v3, %s7122_s8  ;;  %v2968_v32 = vpop.permute.xlu1 %2967 }
 0x1dd   :  { %v2982_v39 = vpop.permute.xlu0 %2981  ;;  %v3103_v33 = vsel %vm3061_vm8, %v2952_v58, %v2968_v32 }
 0x1de   :  { %v3094_v27 = vsel %vm3061_vm8, %v2966_v45, %v2982_v39  ;;  %v3147_v45 = vmul.f32 %v8991_v50, %v3102_v7 }
 0x1df   :  { %1219 = vrot.lane.b32.xlu1 %v8937_v13, %s7122_s8  ;;  %v3148_v36 = vmul.f32 %v8975_v10, %v3094_v27 }
 0x1e0   :  { %1257 = vrot.lane.b32.xlu0 %v8949_v43, %s7122_s8  ;;  %v2984_v41 = vpop.permute.xlu1 %2983 }
 0x1e1   :  { %v9098_v59 = vpop.permute.xlu0 %2997  ;;  %v3095_v61 = vsel %vm3061_vm8, %v2968_v32, %v2984_v41 }
 0x1e2   :  { %v3086_v37 = vsel %vm3061_vm8, %v2982_v39, %v9098_v59  ;;  %v3155_v52 = vmul.f32 %v8975_v10, %v3095_v61 }
 0x1e3   :  { %1259 = vrot.lane.b32.xlu1 %v8947_v22, %s7122_s8  ;;  %v3149_v20 = vmul.f32 %v8980_v53, %v3086_v37  ;;  %v3154_v37 = vmul.f32 %v8991_v50, %v3103_v33 }
 0x1e4   :  { %1273 = vrot.lane.b32.xlu0 %v8963_v12, %s7122_s8  ;;  %v7080_v7 = vpack.c.bf16 %v3155_v52, %v3148_v36 }
 0x1e5   :  { %v9113_v28 = vpop.permute.xlu1 %2999 }
 0x1e6   :  { %11705 = vst [vmem:[#allocation8_spill] sm:$0xff] %v9113_v28  ;;  %v3087_v0 = vsel %vm3061_vm8, %v2984_v41, %v9113_v28  ;;  %v9118_v60 = vpop.permute.xlu0 %3045 }
 0x1e7   :  { %11706 = vst [vmem:[#allocation22_spill] sm:$0xff] %v9118_v60  ;;  %v3156_v55 = vmul.f32 %v8980_v53, %v3087_v0  ;;  %v3110_v17 = vsel %vm3061_vm8, %v9118_v60, %v2950_v44  ;;  %1275 = vrot.lane.b32.xlu1 %v8965_v18, %s7122_s8 }
 0x1e8   :  { %v3146_v39 = vmul.f32 %v9003_v40, %v3110_v17  ;;  %1297 = vrot.lane.b32.xlu0 %v8995_v9, %s7122_s8 }
 0x1e9   :  { %v9133_v27 = vpop.permute.xlu1 %3047  ;;  %v7079_v32 = vpack.c.bf16 %v3156_v55, %v3149_v20  ;;  %v9149_v20 = vsub.s32 5, %v11679_v25 }
 0x1ea   :  { %11707 = vst [vmem:[#allocation12_spill] sm:$0xff] %v9133_v27  ;;  %v3111_v41 = vsel %vm3061_vm8, %v9133_v27, %v2952_v58  ;;  %v2493_v44 = vpop.permute.xlu0 %2492  ;;  %v7081_v58 = vpack.c.bf16 %v3154_v37, %v3147_v45 }
 0x1eb   :  { %v3153_v61 = vmul.f32 %v9003_v40, %v3111_v41  ;;  %1299 = vrot.lane.b32.xlu1 %v8997_v23, %s7122_s8  ;;  %4834 = vmatprep.subr.bf16.mxu1 %v7079_v32  ;;  %11708 = vst [vmem:[#allocation13_spill] sm:$0xff] %v9149_v20  ;;  %v9156_v52 = vrot.slane %v8782_v46, %v9149_v20 }
 0x1ec   :  { %1213 = vrot.lane.b32.xlu0 %v9023_v51, %s7122_s8  ;;  %4835 = vmatpush2.bf16.msra.mxu1 %v7080_v7  ;;  %v9162_v55 = vrot.slane %v8793_v62, %v9149_v20  ;;  %v9170_v41 = vrot.slane %v8838_v57, %v9149_v20 }
 0x1ed   :  { %v2495_v0 = vpop.permute.xlu1 %2494  ;;  %v7082_v53 = vpack.c.bf16 %v3153_v61, %v3146_v39  ;;  %4721 = vmatprep.subr.bf16.mxu0 %v7081_v58  ;;  %11709 = vst [vmem:[#allocation11_spill] sm:$0xff] %v9156_v52  ;;  %v9185_v58 = vrot.slane %v8822_v21, %v9149_v20 }
 0x1ee   :  { %v2509_v17 = vpop.permute.xlu0 %2508  ;;  %11710 = vst [vmem:[#allocation17_spill] sm:$0xff] %v9162_v55 }
 0x1ef   :  { %1215 = vrot.lane.b32.xlu1 %v9021_v5, %s7122_s8  ;;  %4722 = vmatpush2.bf16.msra.mxu0 %v7082_v53 }
 0x1f0   :  { %1253 = vrot.lane.b32.xlu0 %v9042_v29, %s7122_s8 }
 0x1f1   :  { %v2511_v33 = vpop.permute.xlu1 %2510 }
 0x1f2   :  { %v2525_v36 = vpop.permute.xlu0 %2524  ;;  %v2644_v28 = vsel %vm2600_vm9, %v2495_v0, %v2511_v33 }
 0x1f3   :  { %1255 = vrot.lane.b32.xlu1 %v9040_v38, %s7122_s8  ;;  %v2635_v45 = vsel %vm2600_vm9, %v2509_v17, %v2525_v36 }
 0x1f4   :  { %1269 = vrot.lane.b32.xlu0 %v9069_v4, %s7122_s8  ;;  %v2701_v61 = vmul.f32 %v9156_v52, %v2635_v45 }
 0x1f5   :  { %v2527_v53 = vpop.permute.xlu1 %2526 }
 0x1f6   :  { %v9166_v39 = vpop.permute.xlu0 %2540  ;;  %v2636_v32 = vsel %vm2600_vm9, %v2511_v33, %v2527_v53 }
 0x1f7   :  { %11711 = vst [vmem:[#allocation10_spill] sm:$0xff] %v9166_v39  ;;  %v2627_v37 = vsel %vm2600_vm9, %v2525_v36, %v9166_v39  ;;  %1271 = vrot.lane.b32.xlu1 %v9067_v11, %s7122_s8  ;;  %v2643_v36 = vsel %vm2600_vm9, %v2493_v44, %v2509_v17 }
 0x1f8   :  { %v2702_v7 = vmul.f32 %v9162_v55, %v2627_v37  ;;  %1293 = vrot.lane.b32.xlu0 %v9083_v54, %s7122_s8  ;;  %v2708_v37 = vmul.f32 %v9156_v52, %v2636_v32  ;;  %v2700_v17 = vmul.f32 %v9170_v41, %v2643_v36 }
 0x1f9   :  { %v9189_v10 = vpop.permute.xlu1 %2542 }
 0x1fa   :  { %11712 = vst [vmem:[#allocation25_spill] sm:$0xff] %v9189_v10  ;;  %v2628_v45 = vsel %vm2600_vm9, %v2527_v53, %v9189_v10  ;;  %v9194_v39 = vpop.permute.xlu0 %2588  ;;  %v2707_v10 = vmul.f32 %v9170_v41, %v2644_v28  ;;  %v7084_v36 = vpack.c.bf16 %v2708_v37, %v2701_v61 }
 0x1fb   :  { %11713 = vst [vmem:[#allocation26_spill] sm:$0xff] %v9194_v39  ;;  %v2709_v27 = vmul.f32 %v9162_v55, %v2628_v45  ;;  %v2651_v20 = vsel %vm2600_vm9, %v9194_v39, %v2493_v44  ;;  %1295 = vrot.lane.b32.xlu1 %v9085_v30, %s7122_s8 }
 0x1fc   :  { %v2699_v53 = vmul.f32 %v9185_v58, %v2651_v20  ;;  %2961 = vrot.lane.b32.xlu0 %v8929_v42, %s7124_s10 }
 0x1fd   :  { %v9209_v32 = vpop.permute.xlu1 %2590  ;;  %v7083_v33 = vpack.c.bf16 %v2709_v27, %v2702_v7 }
 0x1fe   :  { %11714 = vst [vmem:[#allocation27_spill] sm:$0xff] %v9209_v32  ;;  %v2652_v45 = vsel %vm2600_vm9, %v9209_v32, %v2495_v0  ;;  %v2489_v44 = vpop.permute.xlu0 %2488  ;;  %v7085_v0 = vpack.c.bf16 %v2707_v10, %v2700_v17 }
 0x1ff   :  { %v2706_v39 = vmul.f32 %v9185_v58, %v2652_v45  ;;  %2963 = vrot.lane.b32.xlu1 %v8927_v19, %s7124_s10  ;;  %4836 = vmatprep.subr.bf16.mxu1 %v7083_v33 }
 0x200   :  { %2977 = vrot.lane.b32.xlu0 %v8939_v3, %s7124_s10  ;;  %4837 = vmatpush2.bf16.msra.mxu1 %v7084_v36 }
 0x201   :  { %v2491_v20 = vpop.permute.xlu1 %2490  ;;  %v7086_v32 = vpack.c.bf16 %v2706_v39, %v2699_v53  ;;  %4723 = vmatprep.subr.bf16.mxu0 %v7085_v0 }
 0x202   :  { %v2505_v60 = vpop.permute.xlu0 %2504 }
 0x203   :  { %2979 = vrot.lane.b32.xlu1 %v8937_v13, %s7124_s10  ;;  %4724 = vmatpush2.bf16.msra.mxu0 %v7086_v32  ;;  %v2641_v53 = vsel %vm2600_vm9, %v2489_v44, %v2505_v60 }
 0x204   :  { %3017 = vrot.lane.b32.xlu0 %v8949_v43, %s7124_s10 }
 0x205   :  { %v2507_v28 = vpop.permute.xlu1 %2506 }
 0x206   :  { %v2521_v45 = vpop.permute.xlu0 %2520 }
 0x207   :  { %3019 = vrot.lane.b32.xlu1 %v8947_v22, %s7124_s10  ;;  %v2633_v27 = vsel %vm2600_vm9, %v2505_v60, %v2521_v45  ;;  %v2686_v60 = vmul.f32 %v9170_v41, %v2641_v53 }
 0x208   :  { %3033 = vrot.lane.b32.xlu0 %v8963_v12, %s7124_s10  ;;  %v2687_v39 = vmul.f32 %v9156_v52, %v2633_v27 }
 0x209   :  { %v2523_v61 = vpop.permute.xlu1 %2522 }
 0x20a   :  { %v9230_v7 = vpop.permute.xlu0 %2536  ;;  %v2634_v37 = vsel %vm2600_vm9, %v2507_v28, %v2523_v61 }
 0x20b   :  { %v2625_v10 = vsel %vm2600_vm9, %v2521_v45, %v9230_v7  ;;  %3035 = vrot.lane.b32.xlu1 %v8965_v18, %s7124_s10  ;;  %v2694_v0 = vmul.f32 %v9156_v52, %v2634_v37 }
 0x20c   :  { %v2688_v17 = vmul.f32 %v9162_v55, %v2625_v10  ;;  %3057 = vrot.lane.b32.xlu0 %v8995_v9, %s7124_s10  ;;  %v2642_v10 = vsel %vm2600_vm9, %v2491_v20, %v2507_v28 }
 0x20d   :  { %v9245_v32 = vpop.permute.xlu1 %2538  ;;  %v7088_v53 = vpack.c.bf16 %v2694_v0, %v2687_v39 }
 0x20e   :  { %11715 = vst [vmem:[#allocation28_spill] sm:$0xff] %v9245_v32  ;;  %v2626_v33 = vsel %vm2600_vm9, %v2523_v61, %v9245_v32  ;;  %v9250_v36 = vpop.permute.xlu0 %2584 }
 0x20f   :  { %v2695_v45 = vmul.f32 %v9162_v55, %v2626_v33  ;;  %v2649_v27 = vsel %vm2600_vm9, %v9250_v36, %v2489_v44  ;;  %3059 = vrot.lane.b32.xlu1 %v8997_v23, %s7124_s10  ;;  %v2693_v55 = vmul.f32 %v9170_v41, %v2642_v10 }
 0x210   :  { %v2685_v61 = vmul.f32 %v9185_v58, %v2649_v27  ;;  %2957 = vrot.lane.b32.xlu0 %v9017_v1, %s7124_s10 }
 0x211   :  { %v9265_v37 = vpop.permute.xlu1 %2586  ;;  %v7087_v28 = vpack.c.bf16 %v2695_v45, %v2688_v17  ;;  %v9281_v17 = vsub.s32 4, %v11679_v25 }
 0x212   :  { %11716 = vst [vmem:[#allocation29_spill] sm:$0xff] %v9265_v37  ;;  %v2650_v33 = vsel %vm2600_vm9, %v9265_v37, %v2491_v20  ;;  %v2032_v44 = vpop.permute.xlu0 %2031  ;;  %v7089_v20 = vpack.c.bf16 %v2693_v55, %v2686_v60 }
 0x213   :  { %v2692_v52 = vmul.f32 %v9185_v58, %v2650_v33  ;;  %2959 = vrot.lane.b32.xlu1 %v9015_v24, %s7124_s10  ;;  %4838 = vmatprep.subr.bf16.mxu1 %v7087_v28  ;;  %v9288_v0 = vrot.slane %v8782_v46, %v9281_v17  ;;  %v9302_v60 = vrot.slane %v8838_v57, %v9281_v17 }
 0x214   :  { %2973 = vrot.lane.b32.xlu0 %v9023_v51, %s7124_s10  ;;  %4839 = vmatpush2.bf16.msra.mxu1 %v7088_v53  ;;  %v9317_v57 = vrot.slane %v8822_v21, %v9281_v17 }
 0x215   :  { %v2034_v27 = vpop.permute.xlu1 %2033  ;;  %v7090_v37 = vpack.c.bf16 %v2692_v52, %v2685_v61  ;;  %4725 = vmatprep.subr.bf16.mxu0 %v7089_v20  ;;  %11717 = vst [vmem:[#allocation30_spill] sm:$0xff] %v9288_v0  ;;  %v9294_v52 = vrot.slane %v8793_v62, %v9281_v17 }
 0x216   :  { %v2048_v32 = vpop.permute.xlu0 %2047 }
 0x217   :  { %2975 = vrot.lane.b32.xlu1 %v9021_v5, %s7124_s10  ;;  %4726 = vmatpush2.bf16.msra.mxu0 %v7090_v37  ;;  %11718 = vst [vmem:[#allocation31_spill] sm:$0xff] %v9294_v52  ;;  %v2182_v33 = vsel %vm2139_vm10, %v2032_v44, %v2048_v32 }
 0x218   :  { %3013 = vrot.lane.b32.xlu0 %v9042_v29, %s7124_s10 }
 0x219   :  { %v2050_v10 = vpop.permute.xlu1 %2049 }
 0x21a   :  { %v2064_v39 = vpop.permute.xlu0 %2063 }
 0x21b   :  { %3015 = vrot.lane.b32.xlu1 %v9040_v38, %s7124_s10  ;;  %v2174_v25 = vsel %vm2139_vm10, %v2048_v32, %v2064_v39  ;;  %v2239_v32 = vmul.f32 %v9302_v60, %v2182_v33 }
 0x21c   :  { %3029 = vrot.lane.b32.xlu0 %v9069_v4, %s7124_s10  ;;  %v2240_v62 = vmul.f32 %v9288_v0, %v2174_v25 }
 0x21d   :  { %v2066_v55 = vpop.permute.xlu1 %2065 }
 0x21e   :  { %v9298_v45 = vpop.permute.xlu0 %2079  ;;  %v2175_v61 = vsel %vm2139_vm10, %v2050_v10, %v2066_v55 }
 0x21f   :  { %11719 = vst [vmem:[#allocation32_spill] sm:$0xff] %v9298_v45  ;;  %v2166_v46 = vsel %vm2139_vm10, %v2064_v39, %v9298_v45  ;;  %3031 = vrot.lane.b32.xlu1 %v9067_v11, %s7124_s10  ;;  %v2247_v39 = vmul.f32 %v9288_v0, %v2175_v61 }
 0x220   :  { %v2241_v37 = vmul.f32 %v9294_v52, %v2166_v46  ;;  %3053 = vrot.lane.b32.xlu0 %v9083_v54, %s7124_s10  ;;  %v2183_v46 = vsel %vm2139_vm10, %v2034_v27, %v2050_v10 }
 0x221   :  { %v9321_v28 = vpop.permute.xlu1 %2081  ;;  %v7092_v33 = vpack.c.bf16 %v2247_v39, %v2240_v62 }
 0x222   :  { %11720 = vst [vmem:[#allocation33_spill] sm:$0xff] %v9321_v28  ;;  %v2167_v53 = vsel %vm2139_vm10, %v2066_v55, %v9321_v28  ;;  %v9326_v20 = vpop.permute.xlu0 %2127  ;;  %v2246_v28 = vmul.f32 %v9302_v60, %v2183_v46 }
 0x223   :  { %11721 = vst [vmem:[#allocation34_spill] sm:$0xff] %v9326_v20  ;;  %v2248_v25 = vmul.f32 %v9294_v52, %v2167_v53  ;;  %v2190_v21 = vsel %vm2139_vm10, %v9326_v20, %v2032_v44  ;;  %3055 = vrot.lane.b32.xlu1 %v9085_v30, %s7124_s10 }
 0x224   :  { %v2238_v55 = vmul.f32 %v9317_v57, %v2190_v21  ;;  %2500 = vrot.lane.b32.xlu0 %v8929_v42, %s7125_s11 }
 0x225   :  { %v9341_v61 = vpop.permute.xlu1 %2129  ;;  %v7091_v10 = vpack.c.bf16 %v2248_v25, %v2241_v37 }
 0x226   :  { %11722 = vst [vmem:[#allocation35_spill] sm:$0xff] %v9341_v61  ;;  %v2191_v53 = vsel %vm2139_vm10, %v9341_v61, %v2034_v27  ;;  %v2028_v44 = vpop.permute.xlu0 %2027  ;;  %v7093_v27 = vpack.c.bf16 %v2246_v28, %v2239_v32 }
 0x227   :  { %v2245_v20 = vmul.f32 %v9317_v57, %v2191_v53  ;;  %2502 = vrot.lane.b32.xlu1 %v8927_v19, %s7125_s11  ;;  %4840 = vmatprep.subr.bf16.mxu1 %v7091_v10 }
 0x228   :  { %2516 = vrot.lane.b32.xlu0 %v8939_v3, %s7125_s11  ;;  %4841 = vmatpush2.bf16.msra.mxu1 %v7092_v33 }
 0x229   :  { %v2030_v21 = vpop.permute.xlu1 %2029  ;;  %v7094_v61 = vpack.c.bf16 %v2245_v20, %v2238_v55  ;;  %4727 = vmatprep.subr.bf16.mxu0 %v7093_v27 }
 0x22a   :  { %v2044_v45 = vpop.permute.xlu0 %2043 }
 0x22b   :  { %2518 = vrot.lane.b32.xlu1 %v8937_v13, %s7125_s11  ;;  %4728 = vmatpush2.bf16.msra.mxu0 %v7094_v61  ;;  %v2180_v55 = vsel %vm2139_vm10, %v2028_v44, %v2044_v45 }
 0x22c   :  { %2556 = vrot.lane.b32.xlu0 %v8949_v43, %s7125_s11 }
 0x22d   :  { %v2046_v46 = vpop.permute.xlu1 %2045 }
 0x22e   :  { %v2060_v53 = vpop.permute.xlu0 %2059 }
 0x22f   :  { %2558 = vrot.lane.b32.xlu1 %v8947_v22, %s7125_s11  ;;  %v2172_v62 = vsel %vm2139_vm10, %v2044_v45, %v2060_v53  ;;  %v2225_v45 = vmul.f32 %v9302_v60, %v2180_v55 }
 0x230   :  { %2572 = vrot.lane.b32.xlu0 %v8963_v12, %s7125_s11  ;;  %v2226_v20 = vmul.f32 %v9288_v0, %v2172_v62  ;;  %v2181_v62 = vsel %vm2139_vm10, %v2030_v21, %v2046_v46 }
 0x231   :  { %v2062_v37 = vpop.permute.xlu1 %2061 }
 0x232   :  { %v9362_v39 = vpop.permute.xlu0 %2075  ;;  %v2173_v25 = vsel %vm2139_vm10, %v2046_v46, %v2062_v37 }
 0x233   :  { %v2164_v28 = vsel %vm2139_vm10, %v2060_v53, %v9362_v39  ;;  %2574 = vrot.lane.b32.xlu1 %v8965_v18, %s7125_s11  ;;  %v2233_v33 = vmul.f32 %v9288_v0, %v2173_v25 }
 0x234   :  { %v2227_v32 = vmul.f32 %v9294_v52, %v2164_v28  ;;  %2596 = vrot.lane.b32.xlu0 %v8995_v9, %s7125_s11 }
 0x235   :  { %v9377_v61 = vpop.permute.xlu1 %2077  ;;  %v7096_v55 = vpack.c.bf16 %v2233_v33, %v2226_v20 }
 0x236   :  { %v2165_v10 = vsel %vm2139_vm10, %v2062_v37, %v9377_v61  ;;  %v9382_v18 = vpop.permute.xlu0 %2123 }
 0x237   :  { %v2234_v27 = vmul.f32 %v9294_v52, %v2165_v10  ;;  %v2188_v53 = vsel %vm2139_vm10, %v9382_v18, %v2028_v44  ;;  %2598 = vrot.lane.b32.xlu1 %v8997_v23, %s7125_s11  ;;  %v2232_v10 = vmul.f32 %v9302_v60, %v2181_v62 }
 0x238   :  { %v2224_v37 = vmul.f32 %v9317_v57, %v2188_v53  ;;  %2496 = vrot.lane.b32.xlu0 %v9017_v1, %s7125_s11 }
 0x239   :  { %v9397_v28 = vpop.permute.xlu1 %2125  ;;  %v7095_v46 = vpack.c.bf16 %v2234_v27, %v2227_v32  ;;  %v7097_v62 = vpack.c.bf16 %v2232_v10, %v2225_v45  ;;  %v11725_v10 = vunpack.i.h.bf16 %v8691_v49 }
 0x23a   :  { %v2189_v25 = vsel %vm2139_vm10, %v9397_v28, %v2030_v21  ;;  %v6635_v44 = vpop.permute.xlu0 %6634 }
 0x23b   :  { %v2231_v23 = vmul.f32 %v9317_v57, %v2189_v25  ;;  %2498 = vrot.lane.b32.xlu1 %v9015_v24, %s7125_s11  ;;  %4842 = vmatprep.subr.bf16.mxu1 %v7095_v46  ;;  %v6740_v24 = vld [vmem:[%s11499_s1] ss:$8 sps:$4 sm:$0xff]   ;;  %v6636_v20 = vunpack.i.l.bf16 %v6635_v44 }
 0x23c   :  { %2512 = vrot.lane.b32.xlu0 %v9023_v51, %s7125_s11  ;;  %4843 = vmatpush2.bf16.msra.mxu1 %v7096_v55  ;;  %v6637_v51 = vunpack.i.h.bf16 %v6635_v44 }
 0x23d   :  { %v9408_v53 = vpop.permute.xlu1 %6639  ;;  %v7098_v25 = vpack.c.bf16 %v2231_v23, %v2224_v37  ;;  %4729 = vmatprep.subr.bf16.mxu0 %v7097_v62  ;;  %v11726_v62 = vunpack.i.h.bf16 %v8711_v63 }
 0x23e   :  { %v6645_v52 = vpop.permute.xlu0 %6644  ;;  %v11591_v33 = vunpack.i.l.bf16 %v9408_v53 }
 0x23f   :  { %v6647_v0 = vunpack.i.h.bf16 %v6645_v52  ;;  %v6646_v21 = vunpack.i.l.bf16 %v6645_v52  ;;  %2514 = vrot.lane.b32.xlu1 %v9021_v5, %s7125_s11  ;;  %4845 = vmatmul.mubr.bf16.vlgmr.msra.gmra.mxu1 %v6740_v24  ;;  %v6783_v52 = vld [vmem:[%s11499_s1 + $0x14] ss:$8 sps:$4 sm:$0xff]   ;;  %v11592_v5 = vunpack.i.h.bf16 %v9408_v53 }
 0x240   :  { %2552 = vrot.lane.b32.xlu0 %v9042_v29, %s7125_s11  ;;  %4730 = vmatpush2.bf16.msra.mxu0 %v7098_v25  ;;  %v11724_v29 = vunpack.i.l.bf16 %v8691_v49 }
 0x241   :  { %v6650_v32 = vpop.permute.xlu1 %6649  ;;  %v1782_v23 = vsel %vm1762_vm5, %v11725_v10, %v6647_v0  ;;  %6164 = vmatprep.mubr.msk.bf16.mxu1 %vm4674_vm7, %v6783_v52 }
 0x242   :  { %v6652_v27 = vunpack.i.h.bf16 %v6650_v32  ;;  %v6651_v45 = vunpack.i.l.bf16 %v6650_v32  ;;  %v9422_v37 = vpop.permute.xlu0 %6654  ;;  %v1781_v44 = vsel %vm1762_vm5, %v11724_v29, %v6646_v21  ;;  %v11727_v32 = vunpack.i.l.bf16 %v8711_v63 }
 0x243   :  { %11723 = vst [vmem:[#allocation36_spill] sm:$0xff] %v9422_v37  ;;  %2554 = vrot.lane.b32.xlu1 %v9040_v38, %s7125_s11  ;;  %4732 = vmatmul.mubr.bf16.vlgmr.msra.gmra.mxu0 %v6740_v24  ;;  %v1809_v63 = vsel %vm1762_vm5, %v6636_v20, %v11591_v33  ;;  %v6761_v33 = vld [vmem:[#allocation3 + $0x84] ss:$56 sps:$4 sm:$0xff]  }
 0x244   :  { %v1766_v25 = vsel %vm1762_vm5, %v6652_v27, %v11726_v62  ;;  %v1765_v49 = vsel %vm1762_vm5, %v6651_v45, %v11727_v32  ;;  %v1773_v29 = vsel %vm1762_vm5, %v6646_v21, %v6651_v45  ;;  %v1774_v10 = vsel %vm1762_vm5, %v6647_v0, %v6652_v27  ;;  %2568 = vrot.lane.b32.xlu0 %v9069_v4, %s7125_s11 }
 0x245   :  { %v6434_v38 = vpack.c.bf16 %v1766_v25, %v1766_v25  ;;  %v6430_v46 = vpack.c.bf16 %v1765_v49, %v1765_v49  ;;  %v6660_v55 = vpop.permute.xlu1 %6659  ;;  %v1810_v21 = vsel %vm1762_vm5, %v6637_v51, %v11592_v5  ;;  %v11728_v45 = vunpack.i.l.bf16 %v9422_v37  ;;  %6156 = vmatprep.mubr.msk.bf16.mxu0 %vm4674_vm7, %v6783_v52 }
 0x246   :  { %v11729_v4 = vunpack.i.h.bf16 %v9422_v37  ;;  %v9467_v27 = vpop.permute.xlu0 %6664  ;;  %v7099_v32 = vpack.c.bf16 %v1782_v23, %v1781_v44  ;;  %v11731_v23 = vunpack.i.l.bf16 %v8735_v16  ;;  %v6756_v37 = vld [vmem:[#allocation3 + $0x168] ss:$56 sps:$4 sm:$0xff]  }
 0x247   :  { %v1817_v0 = vsel %vm1762_vm5, %v11728_v45, %v6636_v20  ;;  %11730 = vst [vmem:[#allocation37_spill] sm:$0xff] %v9467_v27  ;;  %1922 = vst [vmem:[#allocation3 + $0x360] sm:$0xf] %v6434_v38  ;;  %2570 = vrot.lane.b32.xlu1 %v9067_v11, %s7125_s11  ;;  %v6785_v20 = vld [vmem:[%s11499_s1 + $0x10] ss:$8 sps:$4 sm:$0xff]   ;;  %v11590_v44 = vunpack.i.l.bf16 %v9467_v27 }
 0x248   :  { %v1818_v24 = vsel %vm1762_vm5, %v11729_v4, %v6637_v51  ;;  %1918 = vst [vmem:[#allocation3 + $0x328] sm:$0xf] %v6430_v46  ;;  %v6443_v62 = vpack.c.bf16 %v1809_v63, %v1817_v0  ;;  %2592 = vrot.lane.b32.xlu0 %v9083_v54, %s7125_s11  ;;  %v7100_v51 = vpack.c.bf16 %v1774_v10, %v1773_v29  ;;  %v6786_v11 = vld [vmem:[%s11499_s1 + $0x24] ss:$8 sps:$4 sm:$0xff]   ;;  %v6662_v63 = vunpack.i.h.bf16 %v6660_v55 }
 0x249   :  { %v6447_v25 = vpack.c.bf16 %v1810_v21, %v1818_v24  ;;  %v6670_v49 = vpop.permute.xlu1 %6669  ;;  %4855 = vmatmul.mubr.bf16.gmra.mxu1 %v6785_v20  ;;  %v6661_v21 = vunpack.i.l.bf16 %v6660_v55  ;;  %v11589_v54 = vunpack.i.h.bf16 %v9467_v27  ;;  %v11732_v10 = vunpack.i.h.bf16 %v8735_v16 }
 0x24a   :  { %2019 = vst [vmem:[#allocation3 + $0x32c] sm:$0xff] %v6443_v62  ;;  %v6672_v52 = vunpack.i.h.bf16 %v6670_v49  ;;  %v6671_v46 = vunpack.i.l.bf16 %v6670_v49  ;;  %v6675_v38 = vpop.permute.xlu0 %6674  ;;  %4925 = vmatprep.subr.bf16.mxu0 %v7100_v51  ;;  %6165 = vmatprep.mubr.msk.bf16.mxu1 %vm4674_vm7, %v6786_v11  ;;  %v11733_v4 = vunpack.i.l.bf16 %v8739_v14  ;;  %v11734_v62 = vunpack.i.h.bf16 %v8739_v14  ;;  %v6788_v14 = vld [vmem:[%s11499_s1 + $0x20] ss:$8 sps:$4 sm:$0xff]  }
 0x24b   :  { %2023 = vst [vmem:[#allocation3 + $0x364] sm:$0xff] %v6447_v25  ;;  %v6677_v45 = vunpack.i.h.bf16 %v6675_v38  ;;  %v6676_v0 = vunpack.i.l.bf16 %v6675_v38  ;;  %2594 = vrot.lane.b32.xlu1 %v9085_v30, %s7125_s11  ;;  %4926 = vmatpush1.bf16.msra.mxu0 %v7099_v32 }
 0x24c   :  { %v1779_v29 = vsel %vm1762_vm5, %v11731_v23, %v6671_v46  ;;  %v1780_v55 = vsel %vm1762_vm5, %v11732_v10, %v6672_v52  ;;  %2039 = vrot.lane.b32.xlu0 %v8929_v42, %s7126_s12  ;;  %4742 = vmatmul.mubr.bf16.gmra.mxu0 %v6785_v20  ;;  %v1808_v20 = vsel %vm1762_vm5, %v6662_v63, %v11589_v54  ;;  %v11756_v54 = vld [vmem:[#allocation18_spill] sm:$0xff] }
 0x24d   :  { %v1772_v30 = vsel %vm1762_vm5, %v6672_v52, %v6677_v45  ;;  %v1763_v24 = vsel %vm1762_vm5, %v6676_v0, %v11733_v4  ;;  %v1764_v16 = vsel %vm1762_vm5, %v6677_v45, %v11734_v62  ;;  %v1771_v25 = vsel %vm1762_vm5, %v6671_v46, %v6676_v0  ;;  %v9507_v32 = vpop.permute.xlu1 %6679  ;;  %6157 = vmatprep.mubr.msk.bf16.mxu0 %vm4674_vm7, %v6786_v11  ;;  %v9567_v62 = vld [vmem:[%s11498_s2 + $0x30] sm:$0x7f] }
 0x24e   :  { %11735 = vst [vmem:[#allocation38_spill] sm:$0xff] %v9507_v32  ;;  %v6422_v42 = vpack.c.bf16 %v1763_v24, %v1763_v24  ;;  %v6426_v51 = vpack.c.bf16 %v1764_v16, %v1764_v16  ;;  %v9509_v49 = vpop.permute.xlu0 %1217  ;;  %v11587_v52 = vunpack.i.h.bf16 %v9507_v32  ;;  %v11588_v38 = vunpack.i.l.bf16 %v9507_v32 }
 0x24f   :  { %11736 = vst [vmem:[#allocation39_spill] sm:$0xff] %v9509_v49  ;;  %2041 = vrot.lane.b32.xlu1 %v8927_v19, %s7126_s12  ;;  %v6737_v46 = vld [vmem:[#allocation3 + $0x328] ss:$56 sps:$4 sm:$0xff]   ;;  %v7101_v11 = vpack.c.bf16 %v1772_v30, %v1771_v25  ;;  %v1807_v19 = vsel %vm1762_vm5, %v6661_v21, %v11590_v44  ;;  %v7102_v10 = vpack.c.bf16 %v1780_v55, %v1779_v29 }
 0x250   :  { %1910 = vst [vmem:[#allocation3 + $0x2b8] sm:$0xf] %v6422_v42  ;;  %1914 = vst [vmem:[#allocation3 + $0x2f0] sm:$0xf] %v6426_v51  ;;  %2055 = vrot.lane.b32.xlu0 %v8939_v3, %s7126_s12  ;;  %v1815_v45 = vsel %vm1762_vm5, %v11588_v38, %v6661_v21  ;;  %v1816_v0 = vsel %vm1762_vm5, %v11587_v52, %v6662_v63  ;;  %v6792_v21 = vld [vmem:[%s11499_s1 + $0x34] ss:$8 sps:$4 sm:$0xff]   ;;  %v9571_v16 = vrot.slane %v9567_v62, %v8776_v47 }
 0x251   :  { %v9537_v23 = vpop.permute.xlu1 %1219  ;;  %4865 = vmatmul.mubr.bf16.gmra.mxu1 %v6788_v14  ;;  %v6435_v30 = vpack.c.bf16 %v1807_v19, %v1815_v45  ;;  %v6439_v4 = vpack.c.bf16 %v1808_v20, %v1816_v0  ;;  %4927 = vmatprep.subr.bf16.mxu0 %v7101_v11  ;;  %v9547_v63 = vld [vmem:[%s11498_s2 + $0x20] sm:$0x7f]  ;;  %v9775_v52 = vld [vmem:[#allocation2 + $0xf0] sm:$0xff] }
 0x252   :  { %11737 = vst [vmem:[#allocation40_spill] sm:$0xff] %v9537_v23  ;;  %v6739_v3 = vld [vmem:[#allocation3 + $0x32c] ss:$56 sps:$4 sm:$0xff]   ;;  %v1258_v24 = vpop.permute.xlu0 %1257  ;;  %v9551_v29 = vrot.slane %v9547_v63, %v8776_v47  ;;  %11740 = vst [vmem:[#allocation43_spill] sm:$0xff] %v9571_v16  ;;  %4928 = vmatpush1.bf16.msra.mxu0 %v7102_v10  ;;  %6166 = vmatprep.mubr.msk.bf16.mxu1 %vm4674_vm7, %v6792_v21  ;;  %v6753_v38 = vld [vmem:[#allocation3 + $0xf0] ss:$56 sps:$4 sm:$0xff]  }
 0x253   :  { %5038 = vmatprep.subr.bf16.mxu1 %v6739_v3  ;;  %2057 = vrot.lane.b32.xlu1 %v8937_v13, %s7126_s12  ;;  %2011 = vst [vmem:[#allocation3 + $0x2bc] sm:$0xff] %v6435_v30  ;;  %2015 = vst [vmem:[#allocation3 + $0x2f4] sm:$0xff] %v6439_v4  ;;  %v9558_v13 = vld [vmem:[%s11498_s2 + $0x28] sm:$0x7f] }
 0x254   :  { %11738 = vst [vmem:[#allocation41_spill] sm:$0xff] %v9551_v29  ;;  %5039 = vmatpush1.bf16.msra.mxu1 %v6737_v46  ;;  %2095 = vrot.lane.b32.xlu0 %v8949_v43, %s7126_s12  ;;  %v9562_v55 = vrot.slane %v9558_v13, %v8776_v47  ;;  %v1320_v43 = vsel %vm1301_vm6, %v8805_v15, %v1258_v24  ;;  %v6794_v15 = vld [vmem:[%s11499_s1 + $0x30] ss:$8 sps:$4 sm:$0xff]   ;;  %v6795_v19 = vld [vmem:[%s11499_s1 + $0x44] ss:$8 sps:$4 sm:$0xff]  }
 0x255   :  { %v1260_v25 = vpop.permute.xlu1 %1259  ;;  %4752 = vmatmul.mubr.bf16.gmra.mxu0 %v6788_v14 }
 0x256   :  { %11739 = vst [vmem:[#allocation42_spill] sm:$0xff] %v9562_v55  ;;  %v1321_v42 = vsel %vm1301_vm6, %v8810_v48, %v1260_v25  ;;  %v1274_v51 = vpop.permute.xlu0 %1273  ;;  %6158 = vmatprep.mubr.msk.bf16.mxu0 %vm4674_vm7, %v6792_v21  ;;  %v1404_v48 = vmul.f32 %v9551_v29, %v1320_v43  ;;  %v1349_v43 = vsel %vm1301_vm6, %v8678_v56, %v9537_v23 }
 0x257   :  { %v1304_v20 = vsel %vm1301_vm6, %v1274_v51, %v8847_v2  ;;  %v1312_v47 = vsel %vm1301_vm6, %v1258_v24, %v1274_v51  ;;  %2097 = vrot.lane.b32.xlu1 %v8947_v22, %s7126_s12  ;;  %v1348_v2 = vsel %vm1301_vm6, %v8672_v8, %v9509_v49  ;;  %v1411_v22 = vmul.f32 %v9551_v29, %v1321_v42  ;;  %v6990_v24 = vld [vmem:[#allocation2 + $0xd0] sm:$0xff] }
 0x258   :  { %v1405_v14 = vmul.f32 %v9562_v55, %v1312_v47  ;;  %v1406_v46 = vmul.f32 %v9571_v16, %v1304_v20  ;;  %2111 = vrot.lane.b32.xlu0 %v8963_v12, %s7126_s12  ;;  %v6741_v21 = vld [vmem:[#allocation3 + $0x2b8] ss:$56 sps:$4 sm:$0xff]  }
 0x259   :  { %v1276_v11 = vpop.permute.xlu1 %1275  ;;  %4875 = vmatmul.mubr.bf16.gmra.mxu1 %v6794_v15 }
 0x25a   :  { %v6398_v45 = vpack.c.bf16 %v1406_v46, %v1406_v46  ;;  %v1305_v0 = vsel %vm1301_vm6, %v1276_v11, %v8853_v6  ;;  %v1313_v12 = vsel %vm1301_vm6, %v1260_v25, %v1276_v11  ;;  %v9609_v3 = vpop.permute.xlu0 %1297  ;;  %6167 = vmatprep.mubr.msk.bf16.mxu1 %vm4674_vm7, %v6795_v19  ;;  %v1429_v6 = vmul.f32 %v8842_v35, %v1348_v2 }
 0x25b   :  { %11741 = vst [vmem:[#allocation44_spill] sm:$0xff] %v9609_v3  ;;  %v1412_v10 = vmul.f32 %v9562_v55, %v1313_v12  ;;  %v1413_v30 = vmul.f32 %v9571_v16, %v1305_v0  ;;  %v1356_v4 = vsel %vm1301_vm6, %v9609_v3, %v8672_v8  ;;  %2113 = vrot.lane.b32.xlu1 %v6990_v24, %s7126_s12  ;;  %v6743_v8 = vld [vmem:[#allocation3 + $0x2bc] ss:$56 sps:$4 sm:$0xff]   ;;  %v6797_v0 = vld [vmem:[%s11499_s1 + $0x40] ss:$8 sps:$4 sm:$0xff]  }
 0x25c   :  { %1541 = vst [vmem:[#allocation3 + $0x248] sm:$0xf] %v6398_v45  ;;  %v1428_v25 = vmul.f32 %v8826_v34, %v1356_v4  ;;  %2135 = vrot.lane.b32.xlu0 %v8995_v9, %s7126_s12  ;;  %5040 = vmatprep.subr.bf16.mxu1 %v6743_v8  ;;  %v1436_v2 = vmul.f32 %v8842_v35, %v1349_v43  ;;  %v6991_v9 = vld [vmem:[#allocation2 + $0x1b8] sm:$0xff]  ;;  %v6993_v4 = vld [vmem:[#allocation2 + $0xe8] sm:$0xff]  ;;  %v6994_v8 = vld [vmem:[#allocation2 + $0x120] sm:$0xff] }
 0x25d   :  { %v6402_v42 = vpack.c.bf16 %v1413_v30, %v1413_v30  ;;  %v9627_v51 = vpop.permute.xlu1 %1299  ;;  %4762 = vmatmul.mubr.bf16.gmra.mxu0 %v6794_v15  ;;  %5041 = vmatpush1.bf16.msra.mxu1 %v6741_v21  ;;  %v7103_v45 = vpack.c.bf16 %v1411_v22, %v1404_v48  ;;  %v6798_v48 = vld [vmem:[%s11499_s1 + $0x54] ss:$8 sps:$4 sm:$0xff]  }
 0x25e   :  { %11742 = vst [vmem:[#allocation45_spill] sm:$0xff] %v9627_v51  ;;  %v6411_v20 = vpack.c.bf16 %v1429_v6, %v1428_v25  ;;  %v1357_v47 = vsel %vm1301_vm6, %v9627_v51, %v8678_v56  ;;  %v9633_v46 = vpop.permute.xlu0 %1213  ;;  %v7104_v56 = vpack.c.bf16 %v1412_v10, %v1405_v14  ;;  %6159 = vmatprep.mubr.msk.bf16.mxu0 %vm4674_vm7, %v6795_v19  ;;  %v6992_v22 = vld [vmem:[#allocation2 + $0x118] sm:$0xff]  ;;  %v11746_v10 = vld [vmem:[#allocation5_spill] sm:$0xff] }
 0x25f   :  { %11743 = vst [vmem:[#allocation46_spill] sm:$0xff] %v9633_v46  ;;  %1545 = vst [vmem:[#allocation3 + $0x280] sm:$0xf] %v6402_v42  ;;  %v1435_v11 = vmul.f32 %v8826_v34, %v1357_v47  ;;  %2137 = vrot.lane.b32.xlu1 %v6991_v9, %s7126_s12  ;;  %v11747_v6 = vld [vmem:[#allocation7_spill] sm:$0xff]  ;;  %v11748_v9 = vld [vmem:[#allocation20_spill] sm:$0xff] }
 0x260   :  { %1642 = vst [vmem:[#allocation3 + $0x24c] sm:$0xff] %v6411_v20  ;;  %2035 = vrot.lane.b32.xlu0 %v9017_v1, %s7126_s12  ;;  %4929 = vmatprep.subr.bf16.mxu0 %v7104_v56  ;;  %v11745_v1 = vld [vmem:[#allocation4_spill] sm:$0xff]  ;;  %v6803_v42 = vld [vmem:[%s11499_s1 + $0x50] ss:$8 sps:$4 sm:$0xff]   ;;  %v11758_v51 = vld [vmem:[#allocation9_spill] sm:$0xff] }
 0x261   :  { %v6415_v15 = vpack.c.bf16 %v1436_v2, %v1435_v11  ;;  %v9644_v12 = vpop.permute.xlu1 %1215  ;;  %4885 = vmatmul.mubr.bf16.gmra.mxu1 %v6797_v0  ;;  %4930 = vmatpush1.bf16.msra.mxu0 %v7103_v45  ;;  %v6995_v11 = vld [vmem:[#allocation2 + $0x20] sm:$0xff]  ;;  %v1346_v45 = vsel %vm1301_vm6, %v11748_v9, %v9633_v46  ;;  %v9787_v46 = vld [vmem:[#allocation2 + $0x130] sm:$0xff] }
 0x262   :  { %11744 = vst [vmem:[#allocation47_spill] sm:$0xff] %v9644_v12  ;;  %v1254_v30 = vpop.permute.xlu0 %1253  ;;  %6168 = vmatprep.mubr.msk.bf16.mxu1 %vm4674_vm7, %v6798_v48 }
 0x263   :  { %1646 = vst [vmem:[#allocation3 + $0x284] sm:$0xff] %v6415_v15  ;;  %2037 = vrot.lane.b32.xlu1 %v6992_v22, %s7126_s12  ;;  %v1318_v14 = vsel %vm1301_vm6, %v11745_v1, %v1254_v30 }
 0x264   :  { %2051 = vrot.lane.b32.xlu0 %v6993_v4, %s7126_s12  ;;  %v1390_v20 = vmul.f32 %v9551_v29, %v1318_v14  ;;  %v11750_v4 = vld [vmem:[#allocation6_spill] sm:$0xff] }
 0x265   :  { %v1256_v19 = vpop.permute.xlu1 %1255  ;;  %4772 = vmatmul.mubr.bf16.gmra.mxu0 %v6797_v0  ;;  %v11749_v0 = vld [vmem:[#allocation14_spill] sm:$0xff] }
 0x266   :  { %v1319_v24 = vsel %vm1301_vm6, %v11746_v10, %v1256_v19  ;;  %v1270_v21 = vpop.permute.xlu0 %1269  ;;  %6160 = vmatprep.mubr.msk.bf16.mxu0 %vm4674_vm7, %v6798_v48  ;;  %v1347_v56 = vsel %vm1301_vm6, %v11749_v0, %v9644_v12  ;;  %v6804_v48 = vld [vmem:[%s11499_s1 + $0x64] ss:$8 sps:$4 sm:$0xff]  }
 0x267   :  { %v1302_v43 = vsel %vm1301_vm6, %v1270_v21, %v11747_v6  ;;  %v1310_v25 = vsel %vm1301_vm6, %v1254_v30, %v1270_v21  ;;  %2053 = vrot.lane.b32.xlu1 %v6994_v8, %s7126_s12  ;;  %v1397_v15 = vmul.f32 %v9551_v29, %v1319_v24  ;;  %v6744_v21 = vld [vmem:[#allocation3 + $0x248] ss:$56 sps:$4 sm:$0xff]   ;;  %v6996_v8 = vld [vmem:[#allocation2 + $0x58] sm:$0xff] }
 0x268   :  { %v1391_v47 = vmul.f32 %v9562_v55, %v1310_v25  ;;  %v1392_v2 = vmul.f32 %v9571_v16, %v1302_v43  ;;  %2091 = vrot.lane.b32.xlu0 %v6995_v11, %s7126_s12  ;;  %v6997_v11 = vld [vmem:[#allocation2 + $0x28] sm:$0xff]  ;;  %v9805_v29 = vld [vmem:[#allocation2 + $0x100] sm:$0xff] }
 0x269   :  { %v1272_v30 = vpop.permute.xlu1 %1271  ;;  %4895 = vmatmul.mubr.bf16.gmra.mxu1 %v6803_v42 }
 0x26a   :  { %v6390_v22 = vpack.c.bf16 %v1392_v2, %v1392_v2  ;;  %v1303_v1 = vsel %vm1301_vm6, %v1272_v30, %v11750_v4  ;;  %v1311_v14 = vsel %vm1301_vm6, %v1256_v19, %v1272_v30  ;;  %v9689_v10 = vpop.permute.xlu0 %1293  ;;  %v6746_v6 = vld [vmem:[#allocation3 + $0x24c] ss:$56 sps:$4 sm:$0xff]   ;;  %6169 = vmatprep.mubr.msk.bf16.mxu1 %vm4674_vm7, %v6804_v48  ;;  %v1415_v19 = vmul.f32 %v8842_v35, %v1346_v45 }
 0x26b   :  { %11751 = vst [vmem:[#allocation4_spill] sm:$0xff] %v9689_v10  ;;  %v1398_v24 = vmul.f32 %v9562_v55, %v1311_v14  ;;  %v1399_v43 = vmul.f32 %v9571_v16, %v1303_v1  ;;  %v1354_v25 = vsel %vm1301_vm6, %v9689_v10, %v11748_v9  ;;  %2093 = vrot.lane.b32.xlu1 %v6996_v8, %s7126_s12  ;;  %v9732_v8 = vld [vmem:[#allocation2 + $0x1a0] sm:$0xff]  ;;  %v9803_v55 = vld [vmem:[#allocation2 + $0x138] sm:$0xff] }
 0x26c   :  { %1533 = vst [vmem:[#allocation3 + $0x1d8] sm:$0xf] %v6390_v22  ;;  %v1414_v2 = vmul.f32 %v8826_v34, %v1354_v25  ;;  %2107 = vrot.lane.b32.xlu0 %v6997_v11, %s7126_s12  ;;  %5042 = vmatprep.subr.bf16.mxu1 %v6746_v6  ;;  %v1422_v9 = vmul.f32 %v8842_v35, %v1347_v56  ;;  %v6998_v25 = vld [vmem:[#allocation2 + $0x60] sm:$0xff]  ;;  %v6999_v56 = vld [vmem:[#allocation2 + $0x110] sm:$0xff]  ;;  %v9739_v11 = vld [vmem:[#allocation2 + $0x1a8] sm:$0xff] }
 0x26d   :  { %v6394_v30 = vpack.c.bf16 %v1399_v43, %v1399_v43  ;;  %v9702_v4 = vpop.permute.xlu1 %1295  ;;  %5043 = vmatpush1.bf16.msra.mxu1 %v6744_v21  ;;  %4782 = vmatmul.mubr.bf16.gmra.mxu0 %v6803_v42  ;;  %v7105_v6 = vpack.c.bf16 %v1397_v15, %v1390_v20  ;;  %v7106_v43 = vpack.c.bf16 %v1398_v24, %v1391_v47  ;;  %v6806_v35 = vld [vmem:[%s11499_s1 + $0x60] ss:$8 sps:$4 sm:$0xff]   ;;  %v6749_v47 = vld [vmem:[#allocation3 + $0x164] ss:$56 sps:$4 sm:$0xff]  }
 0x26e   :  { %11752 = vst [vmem:[#allocation5_spill] sm:$0xff] %v9702_v4  ;;  %v6403_v1 = vpack.c.bf16 %v1415_v19, %v1414_v2  ;;  %v1355_v14 = vsel %vm1301_vm6, %v9702_v4, %v11749_v0  ;;  %v9709_v45 = vpop.permute.xlu0 %2961  ;;  %6161 = vmatprep.mubr.msk.bf16.mxu0 %vm4674_vm7, %v6804_v48  ;;  %v9718_v0 = vld [vmem:[#allocation2 + $0x198] sm:$0xff]  ;;  %v9720_v42 = vld [vmem:[#allocation2 + $0x160] sm:$0xff]  ;;  %v7002_v24 = vld [vmem:[#allocation2 + $0x148] sm:$0xff] }
 0x26f   :  { %1537 = vst [vmem:[#allocation3 + $0x210] sm:$0xf] %v6394_v30  ;;  %v1421_v22 = vmul.f32 %v8826_v34, %v1355_v14  ;;  %2109 = vrot.lane.b32.xlu1 %v6998_v25, %s7126_s12  ;;  %v6683_v34 = vpack.i.bf16 %v9718_v0, %v9720_v42  ;;  %4931 = vmatprep.subr.bf16.mxu0 %v7106_v43  ;;  %v6807_v48 = vld [vmem:[%s11499_s1 + $0x74] ss:$8 sps:$4 sm:$0xff]   ;;  %v9734_v19 = vld [vmem:[#allocation2 + $0x168] sm:$0xff] }
 0x270   :  { %1634 = vst [vmem:[#allocation3 + $0x1dc] sm:$0xff] %v6403_v1  ;;  %2131 = vrot.lane.b32.xlu0 %v6999_v56, %s7126_s12  ;;  %4932 = vmatpush1.bf16.msra.mxu0 %v7105_v6  ;;  %v6688_v2 = vpack.i.bf16 %v9732_v8, %v9734_v19  ;;  %v9741_v30 = vld [vmem:[#allocation2 + $0x170] sm:$0xff]  ;;  %v6747_v1 = vld [vmem:[#allocation3 + $0x160] ss:$56 sps:$4 sm:$0xff]  }
 0x271   :  { %v6407_v21 = vpack.c.bf16 %v1422_v9, %v1421_v22  ;;  %v9724_v20 = vpop.permute.xlu1 %2963  ;;  %4905 = vmatmul.mubr.bf16.gmra.mxu1 %v6806_v35  ;;  %4933 = vmatprep.subr.bf16.mxu0 %v6749_v47  ;;  %v6693_v9 = vpack.i.bf16 %v9739_v11, %v9741_v30  ;;  %v6755_v22 = vld [vmem:[#allocation3 + $0xf4] ss:$56 sps:$4 sm:$0xff]   ;;  %v11755_v6 = vld [vmem:[#allocation23_spill] sm:$0xff] }
 0x272   :  { %v9726_v15 = vpop.permute.xlu0 %2977  ;;  %6170 = vmatprep.mubr.msk.bf16.mxu1 %vm4674_vm7, %v6807_v48  ;;  %v9750_v43 = vrot.slane %v9547_v63, %v11755_v6  ;;  %v9753_v56 = vld [vmem:[#allocation2 + $0x178] sm:$0xff] }
 0x273   :  { %11753 = vst [vmem:[#allocation7_spill] sm:$0xff] %v9726_v15  ;;  %1638 = vst [vmem:[#allocation3 + $0x214] sm:$0xff] %v6407_v21  ;;  %2133 = vrot.lane.b32.xlu1 %v7002_v24, %s7126_s12  ;;  %v9762_v47 = vld [vmem:[%s11499_s1 + $0x70] ss:$8 sps:$4 sm:$0xff]   ;;  %v9767_v24 = vrot.slane %v9558_v13, %v11755_v6 }
 0x274   :  { %6684 = vrot.lane.b32.xlu0 %v6683_v34, %s7123_s9  ;;  %4934 = vmatpush1.bf16.msra.mxu0 %v6747_v1  ;;  %v9755_v34 = vld [vmem:[#allocation2 + $0x1b0] sm:$0xff]  ;;  %v9773_v1 = vld [vmem:[#allocation2 + $0x128] sm:$0xff] }
 0x275   :  { %v9746_v14 = vpop.permute.xlu1 %2979  ;;  %v6698_v21 = vpack.i.bf16 %v9755_v34, %v9753_v56  ;;  %4935 = vmatprep.subr.bf16.mxu0 %v6755_v22  ;;  %v6703_v22 = vpack.i.bf16 %v9773_v1, %v9775_v52  ;;  %4792 = vmatmul.mubr.bf16.gmra.mxu0 %v6806_v35  ;;  %v9789_v35 = vld [vmem:[#allocation2 + $0xf8] sm:$0xff] }
 0x276   :  { %11754 = vst [vmem:[#allocation20_spill] sm:$0xff] %v9746_v14  ;;  %v3018_v25 = vpop.permute.xlu0 %3017  ;;  %6162 = vmatprep.mubr.msk.bf16.mxu0 %vm4674_vm7, %v6807_v48  ;;  %v6750_v10 = vld [vmem:[#allocation3 + $0x1d8] ss:$56 sps:$4 sm:$0xff]   ;;  %v7013_v48 = vld [vmem:[%s11499_s1 + $0x4] ss:$8 sps:$4 sm:$0xff]  }
 0x277   :  { %6689 = vrot.lane.b32.xlu1 %v6688_v2, %s7123_s9  ;;  %v9771_v2 = vrot.slane %v9567_v62, %v11755_v6  ;;  %v11757_v6 = vld [vmem:[#allocation15_spill] sm:$0xff] }
 0x278   :  { %6694 = vrot.lane.b32.xlu0 %v6693_v9, %s7123_s9  ;;  %v3080_v9 = vsel %vm3061_vm8, %v11756_v54, %v3018_v25  ;;  %v6708_v54 = vpack.i.bf16 %v9787_v46, %v9789_v35  ;;  %4936 = vmatpush1.bf16.msra.mxu0 %v6753_v38  ;;  %v6713_v38 = vpack.i.bf16 %v9803_v55, %v9805_v29 }
 0x279   :  { %v3020_v44 = vpop.permute.xlu1 %3019  ;;  %4915 = vmatmul.mubr.bf16.gmra.mxu1 %v9762_v47  ;;  %4937 = vmatprep.subr.bf16.mxu0 %v6761_v33  ;;  %v9810_v3 = vmul.f32 %v9750_v43, %v3080_v9  ;;  %v3109_v33 = vsel %vm3061_vm8, %v9724_v20, %v9746_v14 }
 0x27a   :  { %v3081_v5 = vsel %vm3061_vm8, %v11757_v6, %v3020_v44  ;;  %v3034_v4 = vpop.permute.xlu0 %3033  ;;  %v6752_v12 = vld [vmem:[#allocation3 + $0x1dc] ss:$56 sps:$4 sm:$0xff]   ;;  %6179 = vmatprep.mubr.msk.bf16.mxu1 %vm4674_vm7, %v7013_v48 }
 0x27b   :  { %v3064_v6 = vsel %vm3061_vm8, %v3034_v4, %v11758_v51  ;;  %v3072_v16 = vsel %vm3061_vm8, %v3018_v25, %v3034_v4  ;;  %6699 = vrot.lane.b32.xlu1 %v6698_v21, %s7123_s9  ;;  %5044 = vmatprep.subr.bf16.mxu1 %v6752_v12  ;;  %v6758_v4 = vld [vmem:[#allocation3 + $0x16c] ss:$56 sps:$4 sm:$0xff]   ;;  %v3108_v25 = vsel %vm3061_vm8, %v9709_v45, %v9726_v15 }
 0x27c   :  { %v3165_v23 = vmul.f32 %v9767_v24, %v3072_v16  ;;  %v3166_v51 = vmul.f32 %v9771_v2, %v3064_v6  ;;  %6704 = vrot.lane.b32.xlu0 %v6703_v22, %s7123_s9  ;;  %v3171_v21 = vmul.f32 %v9750_v43, %v3081_v5  ;;  %5045 = vmatpush1.bf16.msra.mxu1 %v6750_v10  ;;  %v9824_v16 = vld [vmem:[#allocation2 + $0x108] sm:$0xff]  ;;  %v9826_v6 = vld [vmem:[#allocation2 + $0x140] sm:$0xff] }
 0x27d   :  { %v3036_v9 = vpop.permute.xlu1 %3035  ;;  %v6718_v12 = vpack.i.bf16 %v9826_v6, %v9824_v16  ;;  %v6759_v22 = vld [vmem:[#allocation3 + $0x80] ss:$56 sps:$4 sm:$0xff]   ;;  %5046 = vmatprep.subr.bf16.mxu1 %v6758_v4  ;;  %v6767_v5 = vld [vmem:[#allocation3 + $0x14] ss:$56 sps:$4 sm:$0xff]   ;;  %4802 = vmatmul.mubr.bf16.gmra.mxu0 %v9762_v47 }
 0x27e   :  { %v6526_v32 = vpack.c.bf16 %v3166_v51, %v3166_v51  ;;  %v3065_v15 = vsel %vm3061_vm8, %v3036_v9, %v9073_v31  ;;  %v3073_v14 = vsel %vm3061_vm8, %v3020_v44, %v3036_v9  ;;  %v9835_v49 = vpop.permute.xlu0 %3057  ;;  %4938 = vmatpush1.bf16.msra.mxu0 %v6759_v22  ;;  %v3189_v31 = vmul.f32 %v8991_v50, %v3108_v25  ;;  %v6764_v4 = vld [vmem:[#allocation3 + $0xfc] ss:$56 sps:$4 sm:$0xff]   ;;  %v6765_v9 = vld [vmem:[#allocation3 + $0x10] ss:$56 sps:$4 sm:$0xff]  }
 0x27f   :  { %v3172_v10 = vmul.f32 %v9767_v24, %v3073_v14  ;;  %v3173_v27 = vmul.f32 %v9771_v2, %v3065_v15  ;;  %v3116_v51 = vsel %vm3061_vm8, %v9835_v49, %v9709_v45  ;;  %6709 = vrot.lane.b32.xlu1 %v6708_v54, %s7123_s9  ;;  %4939 = vmatprep.subr.bf16.mxu0 %v6767_v5  ;;  %v6771_v5 = vld [vmem:[#allocation3 + $0x18] ss:$56 sps:$4 sm:$0xff]  }
 0x280   :  { %3301 = vst [vmem:[#allocation3 + $0x5c8] sm:$0xf] %v6526_v32  ;;  %v3188_v44 = vmul.f32 %v9003_v40, %v3116_v51  ;;  %6714 = vrot.lane.b32.xlu0 %v6713_v38, %s7123_s9  ;;  %5047 = vmatpush1.bf16.msra.mxu1 %v6756_v37  ;;  %v3196_v45 = vmul.f32 %v8991_v50, %v3109_v33  ;;  %v6762_v37 = vld [vmem:[#allocation3 + $0xf8] ss:$56 sps:$4 sm:$0xff]   ;;  %v6770_v33 = vld [vmem:[#allocation3 + $0x8c] ss:$56 sps:$4 sm:$0xff]  }
 0x281   :  { %v6530_v14 = vpack.c.bf16 %v3173_v27, %v3173_v27  ;;  %v9847_v15 = vpop.permute.xlu1 %3059  ;;  %5048 = vmatprep.subr.bf16.mxu1 %v6764_v4  ;;  %6171 = vmatprep.mubr.msk.bf16.mxu0 %vm4674_vm7, %v7013_v48  ;;  %v7107_v47 = vpack.c.bf16 %v3171_v21, %v9810_v3  ;;  %v7108_v38 = vpack.c.bf16 %v3172_v10, %v3165_v23  ;;  %v6773_v23 = vld [vmem:[#allocation3 + $0x1c] ss:$56 sps:$4 sm:$0xff]  }
 0x282   :  { %v6539_v54 = vpack.c.bf16 %v3189_v31, %v3188_v44  ;;  %v3117_v32 = vsel %vm3061_vm8, %v9847_v15, %v9724_v20  ;;  %v2958_v25 = vpop.permute.xlu0 %2957  ;;  %4940 = vmatpush1.bf16.msra.mxu0 %v6765_v9  ;;  %v11759_v9 = vld [vmem:[#allocation22_spill] sm:$0xff] }
 0x283   :  { %3305 = vst [vmem:[#allocation3 + $0x600] sm:$0xf] %v6530_v14  ;;  %v3195_v27 = vmul.f32 %v9003_v40, %v3117_v32  ;;  %6719 = vrot.lane.b32.xlu1 %v6718_v12, %s7123_s9  ;;  %4945 = vmatprep.subr.bf16.mxu0 %v7108_v38  ;;  %v6768_v12 = vld [vmem:[#allocation3 + $0x88] ss:$56 sps:$4 sm:$0xff]  }
 0x284   :  { %3402 = vst [vmem:[#allocation3 + $0x5cc] sm:$0xff] %v6539_v54  ;;  %1233 = vrot.lane.b32.xlu0 %v9720_v42, %s7122_s8  ;;  %5049 = vmatpush1.bf16.msra.mxu1 %v6762_v37 }
 0x285   :  { %v6543_v20 = vpack.c.bf16 %v3196_v45, %v3195_v27  ;;  %v2960_v22 = vpop.permute.xlu1 %2959  ;;  %5050 = vmatprep.subr.bf16.mxu1 %v6770_v33 }
 0x286   :  { %v9861_v48 = vpop.permute.xlu0 %2973  ;;  %4946 = vmatpush2.bf16.msra.mxu0 %v7107_v47 }
 0x287   :  { %3406 = vst [vmem:[#allocation3 + $0x604] sm:$0xff] %v6543_v20  ;;  %1235 = vrot.lane.b32.xlu1 %v9718_v0, %s7122_s8  ;;  %v3106_v47 = vsel %vm3061_vm8, %v2958_v25, %v9861_v48  ;;  %v11761_v20 = vld [vmem:[#allocation12_spill] sm:$0xff] }
 0x288   :  { %1249 = vrot.lane.b32.xlu0 %v9734_v19, %s7122_s8  ;;  %5051 = vmatpush1.bf16.msra.mxu1 %v6768_v12 }
 0x289   :  { %v9867_v3 = vpop.permute.xlu1 %2975  ;;  %5052 = vmatprep.subr.bf16.mxu1 %v6773_v23 }
 0x28a   :  { %v3014_v21 = vpop.permute.xlu0 %3013  ;;  %v6774_v44 = vld [vmem:[#allocation3 + $0x5c8] ss:$56 sps:$4 sm:$0xff]  }
 0x28b   :  { %1251 = vrot.lane.b32.xlu1 %v9732_v8, %s7122_s8  ;;  %v3078_v10 = vsel %vm3061_vm8, %v9098_v59, %v3014_v21  ;;  %v11760_v59 = vld [vmem:[#allocation8_spill] sm:$0xff] }
 0x28c   :  { %1265 = vrot.lane.b32.xlu0 %v9741_v30, %s7122_s8  ;;  %5053 = vmatpush1.bf16.msra.mxu1 %v6771_v5  ;;  %v3150_v14 = vmul.f32 %v9750_v43, %v3078_v10 }
 0x28d   :  { %v3016_v51 = vpop.permute.xlu1 %3015 }
 0x28e   :  { %v3030_v31 = vpop.permute.xlu0 %3029  ;;  %v6776_v4 = vld [vmem:[#allocation3 + $0x5cc] ss:$56 sps:$4 sm:$0xff]   ;;  %v3079_v32 = vsel %vm3061_vm8, %v11760_v59, %v3016_v51 }
 0x28f   :  { %v3062_v45 = vsel %vm3061_vm8, %v3030_v31, %v11759_v9  ;;  %v3070_v54 = vsel %vm3061_vm8, %v3014_v21, %v3030_v31  ;;  %1267 = vrot.lane.b32.xlu1 %v9739_v11, %s7122_s8  ;;  %5058 = vmatprep.subr.bf16.mxu1 %v6776_v4  ;;  %v3157_v5 = vmul.f32 %v9750_v43, %v3079_v32 }
 0x290   :  { %v3151_v27 = vmul.f32 %v9767_v24, %v3070_v54  ;;  %v3152_v37 = vmul.f32 %v9771_v2, %v3062_v45  ;;  %1281 = vrot.lane.b32.xlu0 %v9753_v56, %s7122_s8  ;;  %5059 = vmatpush2.bf16.msra.mxu1 %v6774_v44  ;;  %v3175_v4 = vmul.f32 %v8991_v50, %v3106_v47 }
 0x291   :  { %v3032_v38 = vpop.permute.xlu1 %3031 }
 0x292   :  { %v6518_v33 = vpack.c.bf16 %v3152_v37, %v3152_v37  ;;  %v3063_v12 = vsel %vm3061_vm8, %v3032_v38, %v11761_v20  ;;  %v3071_v23 = vsel %vm3061_vm8, %v3016_v51, %v3032_v38  ;;  %v9899_v21 = vpop.permute.xlu0 %3053  ;;  %v3107_v51 = vsel %vm3061_vm8, %v2960_v22, %v9867_v3 }
 0x293   :  { %v3158_v10 = vmul.f32 %v9767_v24, %v3071_v23  ;;  %v3159_v31 = vmul.f32 %v9771_v2, %v3063_v12  ;;  %v3114_v44 = vsel %vm3061_vm8, %v9899_v21, %v2958_v25  ;;  %1283 = vrot.lane.b32.xlu1 %v9755_v34, %s7122_s8  ;;  %v3182_v37 = vmul.f32 %v8991_v50, %v3107_v51 }
 0x294   :  { %3293 = vst [vmem:[#allocation3 + $0x558] sm:$0xf] %v6518_v33  ;;  %v3174_v9 = vmul.f32 %v9003_v40, %v3114_v44  ;;  %1229 = vrot.lane.b32.xlu0 %v9775_v52, %s7122_s8  ;;  %v7109_v38 = vpack.c.bf16 %v3157_v5, %v3150_v14 }
 0x295   :  { %v6522_v45 = vpack.c.bf16 %v3159_v31, %v3159_v31  ;;  %v9916_v54 = vpop.permute.xlu1 %3055  ;;  %v7110_v33 = vpack.c.bf16 %v3158_v10, %v3151_v27  ;;  %v11763_v27 = vld [vmem:[#allocation10_spill] sm:$0xff] }
 0x296   :  { %v6531_v59 = vpack.c.bf16 %v3175_v4, %v3174_v9  ;;  %v3115_v25 = vsel %vm3061_vm8, %v9916_v54, %v2960_v22  ;;  %v2501_v32 = vpop.permute.xlu0 %2500  ;;  %v11762_v22 = vld [vmem:[#allocation13_spill] sm:$0xff] }
 0x297   :  { %3297 = vst [vmem:[#allocation3 + $0x590] sm:$0xf] %v6522_v45  ;;  %v3181_v47 = vmul.f32 %v9003_v40, %v3115_v25  ;;  %1231 = vrot.lane.b32.xlu1 %v9773_v1, %s7122_s8  ;;  %4947 = vmatprep.subr.bf16.mxu0 %v7110_v33  ;;  %v9937_v14 = vrot.slane %v9547_v63, %v11762_v22 }
 0x298   :  { %3394 = vst [vmem:[#allocation3 + $0x55c] sm:$0xff] %v6531_v59  ;;  %1245 = vrot.lane.b32.xlu0 %v9789_v35, %s7122_s8  ;;  %4948 = vmatpush2.bf16.msra.mxu0 %v7109_v38  ;;  %v9948_v10 = vrot.slane %v9558_v13, %v11762_v22  ;;  %v9952_v31 = vrot.slane %v9567_v62, %v11762_v22  ;;  %v11764_v59 = vld [vmem:[#allocation26_spill] sm:$0xff] }
 0x299   :  { %v6535_v20 = vpack.c.bf16 %v3182_v37, %v3181_v47  ;;  %v2503_v12 = vpop.permute.xlu1 %2502  ;;  %v11765_v47 = vld [vmem:[#allocation25_spill] sm:$0xff] }
 0x29a   :  { %v9927_v23 = vpop.permute.xlu0 %2516 }
 0x29b   :  { %3398 = vst [vmem:[#allocation3 + $0x594] sm:$0xff] %v6535_v20  ;;  %1247 = vrot.lane.b32.xlu1 %v9787_v46, %s7122_s8  ;;  %v2647_v22 = vsel %vm2600_vm9, %v2501_v32, %v9927_v23 }
 0x29c   :  { %1261 = vrot.lane.b32.xlu0 %v9805_v29, %s7122_s8 }
 0x29d   :  { %v9933_v50 = vpop.permute.xlu1 %2518 }
 0x29e   :  { %v2557_v40 = vpop.permute.xlu0 %2556  ;;  %v6777_v51 = vld [vmem:[#allocation3 + $0x558] ss:$56 sps:$4 sm:$0xff]  }
 0x29f   :  { %1263 = vrot.lane.b32.xlu1 %v9803_v55, %s7122_s8  ;;  %v2619_v5 = vsel %vm2600_vm9, %v11763_v27, %v2557_v40 }
 0x2a0   :  { %1277 = vrot.lane.b32.xlu0 %v9824_v16, %s7122_s8  ;;  %v2703_v45 = vmul.f32 %v9937_v14, %v2619_v5  ;;  %v11766_v5 = vld [vmem:[#allocation27_spill] sm:$0xff] }
 0x2a1   :  { %v2559_v44 = vpop.permute.xlu1 %2558 }
 0x2a2   :  { %v2573_v4 = vpop.permute.xlu0 %2572  ;;  %v6779_v9 = vld [vmem:[#allocation3 + $0x55c] ss:$56 sps:$4 sm:$0xff]   ;;  %v2620_v38 = vsel %vm2600_vm9, %v11765_v47, %v2559_v44 }
 0x2a3   :  { %v2603_v25 = vsel %vm2600_vm9, %v2573_v4, %v11764_v59  ;;  %v2611_v37 = vsel %vm2600_vm9, %v2557_v40, %v2573_v4  ;;  %1279 = vrot.lane.b32.xlu1 %v9826_v6, %s7122_s8  ;;  %5060 = vmatprep.subr.bf16.mxu1 %v6779_v9 }
 0x2a4   :  { %v2704_v33 = vmul.f32 %v9948_v10, %v2611_v37  ;;  %v2705_v20 = vmul.f32 %v9952_v31, %v2603_v25  ;;  %2993 = vrot.lane.b32.xlu0 %v9720_v42, %s7124_s10  ;;  %5061 = vmatpush2.bf16.msra.mxu1 %v6777_v51  ;;  %v2710_v25 = vmul.f32 %v9937_v14, %v2620_v38 }
 0x2a5   :  { %v2575_v40 = vpop.permute.xlu1 %2574 }
 0x2a6   :  { %v6494_v27 = vpack.c.bf16 %v2705_v20, %v2705_v20  ;;  %v2604_v4 = vsel %vm2600_vm9, %v2575_v40, %v11766_v5  ;;  %v2612_v59 = vsel %vm2600_vm9, %v2559_v44, %v2575_v40  ;;  %v9977_v37 = vpop.permute.xlu0 %2596  ;;  %v2728_v20 = vmul.f32 %v9170_v41, %v2647_v22 }
 0x2a7   :  { %11767 = vst [vmem:[#allocation14_spill] sm:$0xff] %v9977_v37  ;;  %v2711_v9 = vmul.f32 %v9948_v10, %v2612_v59  ;;  %v2712_v47 = vmul.f32 %v9952_v31, %v2604_v4  ;;  %v2655_v51 = vsel %vm2600_vm9, %v9977_v37, %v2501_v32  ;;  %2995 = vrot.lane.b32.xlu1 %v9718_v0, %s7124_s10 }
 0x2a8   :  { %v2648_v44 = vsel %vm2600_vm9, %v2503_v12, %v9933_v50  ;;  %2840 = vst [vmem:[#allocation3 + $0x4e8] sm:$0xf] %v6494_v27  ;;  %v2727_v38 = vmul.f32 %v9185_v58, %v2655_v51  ;;  %3009 = vrot.lane.b32.xlu0 %v9734_v19, %s7124_s10  ;;  %v7111_v27 = vpack.c.bf16 %v2710_v25, %v2703_v45 }
 0x2a9   :  { %v6498_v40 = vpack.c.bf16 %v2712_v47, %v2712_v47  ;;  %v9994_v5 = vpop.permute.xlu1 %2598  ;;  %v2735_v22 = vmul.f32 %v9170_v41, %v2648_v44  ;;  %v7112_v51 = vpack.c.bf16 %v2711_v9, %v2704_v33 }
 0x2aa   :  { %11768 = vst [vmem:[#allocation6_spill] sm:$0xff] %v9994_v5  ;;  %v6507_v4 = vpack.c.bf16 %v2728_v20, %v2727_v38  ;;  %v2656_v32 = vsel %vm2600_vm9, %v9994_v5, %v2503_v12  ;;  %v2497_v59 = vpop.permute.xlu0 %2496 }
 0x2ab   :  { %2844 = vst [vmem:[#allocation3 + $0x520] sm:$0xf] %v6498_v40  ;;  %v2734_v37 = vmul.f32 %v9185_v58, %v2656_v32  ;;  %3011 = vrot.lane.b32.xlu1 %v9732_v8, %s7124_s10  ;;  %4949 = vmatprep.subr.bf16.mxu0 %v7112_v51 }
 0x2ac   :  { %2941 = vst [vmem:[#allocation3 + $0x4ec] sm:$0xff] %v6507_v4  ;;  %3025 = vrot.lane.b32.xlu0 %v9741_v30, %s7124_s10  ;;  %4950 = vmatpush2.bf16.msra.mxu0 %v7111_v27 }
 0x2ad   :  { %v6511_v47 = vpack.c.bf16 %v2735_v22, %v2734_v37  ;;  %v2499_v20 = vpop.permute.xlu1 %2498 }
 0x2ae   :  { %v10005_v38 = vpop.permute.xlu0 %2512 }
 0x2af   :  { %2945 = vst [vmem:[#allocation3 + $0x524] sm:$0xff] %v6511_v47  ;;  %3027 = vrot.lane.b32.xlu1 %v9739_v11, %s7124_s10 }
 0x2b0   :  { %3041 = vrot.lane.b32.xlu0 %v9753_v56, %s7124_s10 }
 0x2b1   :  { %v10011_v12 = vpop.permute.xlu1 %2514 }
 0x2b2   :  { %v2553_v45 = vpop.permute.xlu0 %2552  ;;  %v6780_v9 = vld [vmem:[#allocation3 + $0x4e8] ss:$56 sps:$4 sm:$0xff]  }
 0x2b3   :  { %3043 = vrot.lane.b32.xlu1 %v9755_v34, %s7124_s10  ;;  %v2617_v33 = vsel %vm2600_vm9, %v9230_v7, %v2553_v45  ;;  %v11769_v7 = vld [vmem:[#allocation28_spill] sm:$0xff] }
 0x2b4   :  { %2989 = vrot.lane.b32.xlu0 %v9775_v52, %s7124_s10  ;;  %v2689_v40 = vmul.f32 %v9937_v14, %v2617_v33  ;;  %v11770_v33 = vld [vmem:[#allocation29_spill] sm:$0xff] }
 0x2b5   :  { %v2555_v37 = vpop.permute.xlu1 %2554 }
 0x2b6   :  { %v2569_v25 = vpop.permute.xlu0 %2568  ;;  %v6782_v44 = vld [vmem:[#allocation3 + $0x4ec] ss:$56 sps:$4 sm:$0xff]   ;;  %v2618_v22 = vsel %vm2600_vm9, %v11769_v7, %v2555_v37 }
 0x2b7   :  { %v2601_v4 = vsel %vm2600_vm9, %v2569_v25, %v9250_v36  ;;  %v2609_v32 = vsel %vm2600_vm9, %v2553_v45, %v2569_v25  ;;  %2991 = vrot.lane.b32.xlu1 %v9773_v1, %s7124_s10  ;;  %5062 = vmatprep.subr.bf16.mxu1 %v6782_v44  ;;  %v2645_v36 = vsel %vm2600_vm9, %v2497_v59, %v10005_v38 }
 0x2b8   :  { %v2690_v27 = vmul.f32 %v9948_v10, %v2609_v32  ;;  %v2691_v51 = vmul.f32 %v9952_v31, %v2601_v4  ;;  %3005 = vrot.lane.b32.xlu0 %v9789_v35, %s7124_s10  ;;  %5063 = vmatpush2.bf16.msra.mxu1 %v6780_v9  ;;  %v2696_v4 = vmul.f32 %v9937_v14, %v2618_v22 }
 0x2b9   :  { %v2571_v47 = vpop.permute.xlu1 %2570 }
 0x2ba   :  { %v6486_v45 = vpack.c.bf16 %v2691_v51, %v2691_v51  ;;  %v2602_v25 = vsel %vm2600_vm9, %v2571_v47, %v11770_v33  ;;  %v2610_v32 = vsel %vm2600_vm9, %v2555_v37, %v2571_v47  ;;  %v10043_v7 = vpop.permute.xlu0 %2592  ;;  %v2714_v51 = vmul.f32 %v9170_v41, %v2645_v36 }
 0x2bb   :  { %11771 = vst [vmem:[#allocation23_spill] sm:$0xff] %v10043_v7  ;;  %v2697_v44 = vmul.f32 %v9948_v10, %v2610_v32  ;;  %v2698_v5 = vmul.f32 %v9952_v31, %v2602_v25  ;;  %v2653_v9 = vsel %vm2600_vm9, %v10043_v7, %v2497_v59  ;;  %3007 = vrot.lane.b32.xlu1 %v9787_v46, %s7124_s10 }
 0x2bc   :  { %v2646_v37 = vsel %vm2600_vm9, %v2499_v20, %v10011_v12  ;;  %2832 = vst [vmem:[#allocation3 + $0x478] sm:$0xf] %v6486_v45  ;;  %v2713_v22 = vmul.f32 %v9185_v58, %v2653_v9  ;;  %3021 = vrot.lane.b32.xlu0 %v9805_v29, %s7124_s10  ;;  %v7113_v45 = vpack.c.bf16 %v2696_v4, %v2689_v40  ;;  %v11772_v40 = vld [vmem:[#allocation32_spill] sm:$0xff] }
 0x2bd   :  { %v6490_v47 = vpack.c.bf16 %v2698_v5, %v2698_v5  ;;  %v10060_v33 = vpop.permute.xlu1 %2594  ;;  %v2721_v36 = vmul.f32 %v9170_v41, %v2646_v37  ;;  %v7114_v9 = vpack.c.bf16 %v2697_v44, %v2690_v27  ;;  %v10096_v4 = vrot.slane %v9567_v62, %v9281_v17 }
 0x2be   :  { %v6499_v25 = vpack.c.bf16 %v2714_v51, %v2713_v22  ;;  %v2654_v59 = vsel %vm2600_vm9, %v10060_v33, %v2499_v20  ;;  %v2040_v32 = vpop.permute.xlu0 %2039  ;;  %v10081_v20 = vrot.slane %v9547_v63, %v9281_v17 }
 0x2bf   :  { %2836 = vst [vmem:[#allocation3 + $0x4b0] sm:$0xf] %v6490_v47  ;;  %v2720_v7 = vmul.f32 %v9185_v58, %v2654_v59  ;;  %3023 = vrot.lane.b32.xlu1 %v9803_v55, %s7124_s10  ;;  %4951 = vmatprep.subr.bf16.mxu0 %v7114_v9  ;;  %v11773_v59 = vld [vmem:[#allocation34_spill] sm:$0xff] }
 0x2c0   :  { %2933 = vst [vmem:[#allocation3 + $0x47c] sm:$0xff] %v6499_v25  ;;  %3037 = vrot.lane.b32.xlu0 %v9824_v16, %s7124_s10  ;;  %4952 = vmatpush2.bf16.msra.mxu0 %v7113_v45 }
 0x2c1   :  { %v6503_v5 = vpack.c.bf16 %v2721_v36, %v2720_v7  ;;  %v2042_v51 = vpop.permute.xlu1 %2041  ;;  %v10092_v7 = vrot.slane %v9558_v13, %v9281_v17  ;;  %v11774_v13 = vld [vmem:[#allocation33_spill] sm:$0xff] }
 0x2c2   :  { %v10071_v22 = vpop.permute.xlu0 %2055 }
 0x2c3   :  { %2937 = vst [vmem:[#allocation3 + $0x4b4] sm:$0xff] %v6503_v5  ;;  %3039 = vrot.lane.b32.xlu1 %v9826_v6, %s7124_s10  ;;  %v2186_v5 = vsel %vm2139_vm10, %v2040_v32, %v10071_v22 }
 0x2c4   :  { %2532 = vrot.lane.b32.xlu0 %v9720_v42, %s7125_s11 }
 0x2c5   :  { %v10077_v41 = vpop.permute.xlu1 %2057 }
 0x2c6   :  { %v2096_v58 = vpop.permute.xlu0 %2095  ;;  %v6789_v37 = vld [vmem:[#allocation3 + $0x478] ss:$56 sps:$4 sm:$0xff]  }
 0x2c7   :  { %2534 = vrot.lane.b32.xlu1 %v9718_v0, %s7125_s11  ;;  %v2158_v27 = vsel %vm2139_vm10, %v11772_v40, %v2096_v58 }
 0x2c8   :  { %2548 = vrot.lane.b32.xlu0 %v9734_v19, %s7125_s11  ;;  %v2242_v25 = vmul.f32 %v10081_v20, %v2158_v27  ;;  %v11775_v27 = vld [vmem:[#allocation35_spill] sm:$0xff] }
 0x2c9   :  { %v2098_v63 = vpop.permute.xlu1 %2097 }
 0x2ca   :  { %v2112_v44 = vpop.permute.xlu0 %2111  ;;  %v6791_v47 = vld [vmem:[#allocation3 + $0x47c] ss:$56 sps:$4 sm:$0xff]   ;;  %v2159_v17 = vsel %vm2139_vm10, %v11774_v13, %v2098_v63 }
 0x2cb   :  { %v2142_v36 = vsel %vm2139_vm10, %v2112_v44, %v11773_v59  ;;  %v2150_v45 = vsel %vm2139_vm10, %v2096_v58, %v2112_v44  ;;  %2550 = vrot.lane.b32.xlu1 %v9732_v8, %s7125_s11  ;;  %5064 = vmatprep.subr.bf16.mxu1 %v6791_v47 }
 0x2cc   :  { %v2243_v62 = vmul.f32 %v10092_v7, %v2150_v45  ;;  %v2244_v9 = vmul.f32 %v10096_v4, %v2142_v36  ;;  %2564 = vrot.lane.b32.xlu0 %v9741_v30, %s7125_s11  ;;  %5065 = vmatpush2.bf16.msra.mxu1 %v6789_v37  ;;  %v2249_v36 = vmul.f32 %v10081_v20, %v2159_v17 }
 0x2cd   :  { %v2114_v58 = vpop.permute.xlu1 %2113 }
 0x2ce   :  { %v6462_v40 = vpack.c.bf16 %v2244_v9, %v2244_v9  ;;  %v2143_v44 = vsel %vm2139_vm10, %v2114_v58, %v11775_v27  ;;  %v2151_v59 = vsel %vm2139_vm10, %v2098_v63, %v2114_v58  ;;  %v10121_v45 = vpop.permute.xlu0 %2135  ;;  %v2267_v9 = vmul.f32 %v9302_v60, %v2186_v5 }
 0x2cf   :  { %11776 = vst [vmem:[#allocation18_spill] sm:$0xff] %v10121_v45  ;;  %v2250_v47 = vmul.f32 %v10092_v7, %v2151_v59  ;;  %v2251_v13 = vmul.f32 %v10096_v4, %v2143_v44  ;;  %v2194_v37 = vsel %vm2139_vm10, %v10121_v45, %v2040_v32  ;;  %2566 = vrot.lane.b32.xlu1 %v9739_v11, %s7125_s11 }
 0x2d0   :  { %v2187_v63 = vsel %vm2139_vm10, %v2042_v51, %v10077_v41  ;;  %2379 = vst [vmem:[#allocation3 + $0x408] sm:$0xf] %v6462_v40  ;;  %v2266_v17 = vmul.f32 %v9317_v57, %v2194_v37  ;;  %2580 = vrot.lane.b32.xlu0 %v9753_v56, %s7125_s11  ;;  %v7115_v40 = vpack.c.bf16 %v2249_v36, %v2242_v25 }
 0x2d1   :  { %v6466_v58 = vpack.c.bf16 %v2251_v13, %v2251_v13  ;;  %v10138_v27 = vpop.permute.xlu1 %2137  ;;  %v2274_v5 = vmul.f32 %v9302_v60, %v2187_v63  ;;  %v7116_v37 = vpack.c.bf16 %v2250_v47, %v2243_v62 }
 0x2d2   :  { %v6475_v44 = vpack.c.bf16 %v2267_v9, %v2266_v17  ;;  %v2195_v32 = vsel %vm2139_vm10, %v10138_v27, %v2042_v51  ;;  %v2036_v59 = vpop.permute.xlu0 %2035 }
 0x2d3   :  { %2383 = vst [vmem:[#allocation3 + $0x440] sm:$0xf] %v6466_v58  ;;  %v2273_v45 = vmul.f32 %v9317_v57, %v2195_v32  ;;  %2582 = vrot.lane.b32.xlu1 %v9755_v34, %s7125_s11  ;;  %4953 = vmatprep.subr.bf16.mxu0 %v7116_v37 }
 0x2d4   :  { %2480 = vst [vmem:[#allocation3 + $0x40c] sm:$0xff] %v6475_v44  ;;  %2528 = vrot.lane.b32.xlu0 %v9775_v52, %s7125_s11  ;;  %4954 = vmatpush2.bf16.msra.mxu0 %v7115_v40 }
 0x2d5   :  { %v6479_v13 = vpack.c.bf16 %v2274_v5, %v2273_v45  ;;  %v2038_v9 = vpop.permute.xlu1 %2037 }
 0x2d6   :  { %v10149_v17 = vpop.permute.xlu0 %2051 }
 0x2d7   :  { %2484 = vst [vmem:[#allocation3 + $0x444] sm:$0xff] %v6479_v13  ;;  %2530 = vrot.lane.b32.xlu1 %v9773_v1, %s7125_s11 }
 0x2d8   :  { %2544 = vrot.lane.b32.xlu0 %v9789_v35, %s7125_s11 }
 0x2d9   :  { %v10155_v51 = vpop.permute.xlu1 %2053 }
 0x2da   :  { %v2092_v25 = vpop.permute.xlu0 %2091  ;;  %v6800_v47 = vld [vmem:[#allocation3 + $0x408] ss:$56 sps:$4 sm:$0xff]  }
 0x2db   :  { %2546 = vrot.lane.b32.xlu1 %v9787_v46, %s7125_s11  ;;  %v2156_v62 = vsel %vm2139_vm10, %v9362_v39, %v2092_v25 }
 0x2dc   :  { %2560 = vrot.lane.b32.xlu0 %v9805_v29, %s7125_s11  ;;  %v2228_v58 = vmul.f32 %v10081_v20, %v2156_v62 }
 0x2dd   :  { %v2094_v45 = vpop.permute.xlu1 %2093 }
 0x2de   :  { %v2108_v36 = vpop.permute.xlu0 %2107  ;;  %v6802_v63 = vld [vmem:[#allocation3 + $0x40c] ss:$56 sps:$4 sm:$0xff]   ;;  %v2157_v39 = vsel %vm2139_vm10, %v9377_v61, %v2094_v45 }
 0x2df   :  { %v2140_v44 = vsel %vm2139_vm10, %v2108_v36, %v9382_v18  ;;  %v2148_v32 = vsel %vm2139_vm10, %v2092_v25, %v2108_v36  ;;  %2562 = vrot.lane.b32.xlu1 %v9803_v55, %s7125_s11  ;;  %5066 = vmatprep.subr.bf16.mxu1 %v6802_v63  ;;  %v2184_v18 = vsel %vm2139_vm10, %v2036_v59, %v10149_v17 }
 0x2e0   :  { %v2229_v5 = vmul.f32 %v10092_v7, %v2148_v32  ;;  %v2230_v40 = vmul.f32 %v10096_v4, %v2140_v44  ;;  %2576 = vrot.lane.b32.xlu0 %v9824_v16, %s7125_s11  ;;  %5067 = vmatpush2.bf16.msra.mxu1 %v6800_v47  ;;  %v2235_v36 = vmul.f32 %v10081_v20, %v2157_v39 }
 0x2e1   :  { %v2110_v37 = vpop.permute.xlu1 %2109 }
 0x2e2   :  { %v6454_v13 = vpack.c.bf16 %v2230_v40, %v2230_v40  ;;  %v2141_v25 = vsel %vm2139_vm10, %v2110_v37, %v9397_v28  ;;  %v2149_v61 = vsel %vm2139_vm10, %v2094_v45, %v2110_v37  ;;  %v10187_v62 = vpop.permute.xlu0 %2131  ;;  %v2253_v28 = vmul.f32 %v9302_v60, %v2184_v18 }
 0x2e3   :  { %v2236_v63 = vmul.f32 %v10092_v7, %v2149_v61  ;;  %v2237_v44 = vmul.f32 %v10096_v4, %v2141_v25  ;;  %v2192_v47 = vsel %vm2139_vm10, %v10187_v62, %v2036_v59  ;;  %2578 = vrot.lane.b32.xlu1 %v9826_v6, %s7125_s11  ;;  %v2185_v45 = vsel %vm2139_vm10, %v2038_v9, %v10155_v51 }
 0x2e4   :  { %2371 = vst [vmem:[#allocation3 + $0x398] sm:$0xf] %v6454_v13  ;;  %v2252_v32 = vmul.f32 %v9317_v57, %v2192_v47  ;;  %2071 = vrot.lane.b32.xlu0 %v9720_v42, %s7126_s12  ;;  %v2260_v18 = vmul.f32 %v9302_v60, %v2185_v45  ;;  %v7117_v13 = vpack.c.bf16 %v2235_v36, %v2228_v58 }
 0x2e5   :  { %v6458_v39 = vpack.c.bf16 %v2237_v44, %v2237_v44  ;;  %v10204_v40 = vpop.permute.xlu1 %2133  ;;  %v7118_v44 = vpack.c.bf16 %v2236_v63, %v2229_v5 }
 0x2e6   :  { %11777 = vst [vmem:[#allocation15_spill] sm:$0xff] %v10204_v40  ;;  %v6467_v37 = vpack.c.bf16 %v2253_v28, %v2252_v32  ;;  %v2193_v6 = vsel %vm2139_vm10, %v10204_v40, %v2038_v9  ;;  %v6685_v59 = vpop.permute.xlu0 %6684 }
 0x2e7   :  { %2375 = vst [vmem:[#allocation3 + $0x3d0] sm:$0xf] %v6458_v39  ;;  %v2259_v25 = vmul.f32 %v9317_v57, %v2193_v6  ;;  %2073 = vrot.lane.b32.xlu1 %v9718_v0, %s7126_s12  ;;  %v6687_v42 = vunpack.i.h.bf16 %v6685_v59  ;;  %v6686_v61 = vunpack.i.l.bf16 %v6685_v59  ;;  %4955 = vmatprep.subr.bf16.mxu0 %v7118_v44  ;;  %v11778_v0 = vunpack.i.h.bf16 %v9408_v53 }
 0x2e8   :  { %2472 = vst [vmem:[#allocation3 + $0x39c] sm:$0xff] %v6467_v37  ;;  %2087 = vrot.lane.b32.xlu0 %v9734_v19, %s7126_s12  ;;  %4956 = vmatpush2.bf16.msra.mxu0 %v7117_v13  ;;  %v11779_v19 = vunpack.i.l.bf16 %v9408_v53  ;;  %v10234_v53 = vld [vmem:[%s11499_s1] ss:$8 sps:$4 sm:$0xff]   ;;  %v10246_v13 = vld [vmem:[%s11499_s1 + $0x14] ss:$8 sps:$4 sm:$0xff]  }
 0x2e9   :  { %v6471_v47 = vpack.c.bf16 %v2260_v18, %v2259_v25  ;;  %v6690_v28 = vpop.permute.xlu1 %6689  ;;  %v1802_v58 = vsel %vm1762_vm5, %v11778_v0, %v6687_v42 }
 0x2ea   :  { %v6692_v9 = vunpack.i.h.bf16 %v6690_v28  ;;  %v6691_v32 = vunpack.i.l.bf16 %v6690_v28  ;;  %v6695_v40 = vpop.permute.xlu0 %6694  ;;  %v1801_v5 = vsel %vm1762_vm5, %v11779_v19, %v6686_v61 }
 0x2eb   :  { %2476 = vst [vmem:[#allocation3 + $0x3d4] sm:$0xff] %v6471_v47  ;;  %v6697_v60 = vunpack.i.h.bf16 %v6695_v40  ;;  %v6696_v57 = vunpack.i.l.bf16 %v6695_v40  ;;  %2089 = vrot.lane.b32.xlu1 %v9732_v8, %s7126_s12  ;;  %4958 = vmatmul.mubr.bf16.vlgmr.msra.gmra.mxu0 %v10234_v53 }
 0x2ec   :  { %v1793_v36 = vsel %vm1762_vm5, %v6686_v61, %v6691_v32  ;;  %v1794_v63 = vsel %vm1762_vm5, %v6687_v42, %v6692_v9  ;;  %2103 = vrot.lane.b32.xlu0 %v9741_v30, %s7126_s12  ;;  %6172 = vmatprep.mubr.msk.bf16.mxu0 %vm4674_vm7, %v10246_v13  ;;  %v11780_v42 = vld [vmem:[#allocation36_spill] sm:$0xff] }
 0x2ed   :  { %v6444_v8 = vpack.c.bf16 %v1793_v36, %v1801_v5  ;;  %v6448_v45 = vpack.c.bf16 %v1794_v63, %v1802_v58  ;;  %v6700_v39 = vpop.permute.xlu1 %6699  ;;  %v1786_v59 = vsel %vm1762_vm5, %v6692_v9, %v6697_v60  ;;  %v1785_v30 = vsel %vm1762_vm5, %v6691_v32, %v6696_v57 }
 0x2ee   :  { %v6702_v40 = vunpack.i.h.bf16 %v6700_v39  ;;  %v6701_v37 = vunpack.i.l.bf16 %v6700_v39  ;;  %v6705_v6 = vpop.permute.xlu0 %6704  ;;  %v11781_v61 = vunpack.i.l.bf16 %v11780_v42  ;;  %v11782_v47 = vunpack.i.h.bf16 %v11780_v42 }
 0x2ef   :  { %2020 = vst [vmem:[#allocation3 + $0x334] sm:$0xff] %v6444_v8  ;;  %2024 = vst [vmem:[#allocation3 + $0x36c] sm:$0xff] %v6448_v45  ;;  %v6707_v18 = vunpack.i.h.bf16 %v6705_v6  ;;  %v6706_v25 = vunpack.i.l.bf16 %v6705_v6  ;;  %2105 = vrot.lane.b32.xlu1 %v9739_v11, %s7126_s12  ;;  %v6810_v45 = vld [vmem:[#allocation3 + $0x398] ss:$56 sps:$4 sm:$0xff]  }
 0x2f0   :  { %v1769_v44 = vsel %vm1762_vm5, %v6701_v37, %v11781_v61  ;;  %v1770_v28 = vsel %vm1762_vm5, %v6702_v40, %v11782_v47  ;;  %v1777_v11 = vsel %vm1762_vm5, %v6696_v57, %v6701_v37  ;;  %v1778_v9 = vsel %vm1762_vm5, %v6697_v60, %v6702_v40  ;;  %2119 = vrot.lane.b32.xlu0 %v9753_v56, %s7126_s12  ;;  %v11783_v57 = vld [vmem:[#allocation37_spill] sm:$0xff] }
 0x2f1   :  { %v6445_v32 = vpack.c.bf16 %v1777_v11, %v1785_v30  ;;  %v6446_v0 = vpack.c.bf16 %v1769_v44, %v1769_v44  ;;  %v6449_v58 = vpack.c.bf16 %v1778_v9, %v1786_v59  ;;  %v6450_v19 = vpack.c.bf16 %v1770_v28, %v1770_v28  ;;  %v6710_v5 = vpop.permute.xlu1 %6709  ;;  %v6813_v9 = vld [vmem:[#allocation3 + $0x330] ss:$56 sps:$4 sm:$0xff]  }
 0x2f2   :  { %v6712_v36 = vunpack.i.h.bf16 %v6710_v5  ;;  %v6711_v63 = vunpack.i.l.bf16 %v6710_v5  ;;  %v6715_v8 = vpop.permute.xlu0 %6714  ;;  %v6812_v39 = vld [vmem:[#allocation3 + $0x39c] ss:$56 sps:$4 sm:$0xff]   ;;  %v11784_v37 = vunpack.i.l.bf16 %v11783_v57  ;;  %v11785_v6 = vunpack.i.h.bf16 %v11783_v57 }
 0x2f3   :  { %2021 = vst [vmem:[#allocation3 + $0x33c] sm:$0xff] %v6445_v32  ;;  %2022 = vst [vmem:[#allocation3 + $0x344] sm:$0xf] %v6446_v0  ;;  %v6717_v56 = vunpack.i.h.bf16 %v6715_v8  ;;  %v6716_v40 = vunpack.i.l.bf16 %v6715_v8  ;;  %2121 = vrot.lane.b32.xlu1 %v9755_v34, %s7126_s12  ;;  %5068 = vmatprep.subr.bf16.mxu1 %v6812_v39  ;;  %v7020_v32 = vld [vmem:[%s11499_s1 + $0x10] ss:$8 sps:$4 sm:$0xff]  }
 0x2f4   :  { %2025 = vst [vmem:[#allocation3 + $0x374] sm:$0xff] %v6449_v58  ;;  %2026 = vst [vmem:[#allocation3 + $0x37c] sm:$0xf] %v6450_v19  ;;  %v1799_v60 = vsel %vm1762_vm5, %v11784_v37, %v6706_v25  ;;  %v1800_v59 = vsel %vm1762_vm5, %v11785_v6, %v6707_v18  ;;  %v1791_v30 = vsel %vm1762_vm5, %v6706_v25, %v6711_v63  ;;  %2067 = vrot.lane.b32.xlu0 %v9775_v52, %s7126_s12  ;;  %v11786_v25 = vld [vmem:[#allocation39_spill] sm:$0xff]  ;;  %v7021_v19 = vld [vmem:[%s11499_s1 + $0x24] ss:$8 sps:$4 sm:$0xff]  }
 0x2f5   :  { %v1792_v42 = vsel %vm1762_vm5, %v6707_v18, %v6712_v36  ;;  %v6436_v61 = vpack.c.bf16 %v1791_v30, %v1799_v60  ;;  %v6720_v47 = vpop.permute.xlu1 %6719  ;;  %5069 = vmatpush2.bf16.msra.mxu1 %v6810_v45  ;;  %4968 = vmatmul.mubr.bf16.gmra.mxu0 %v7020_v32  ;;  %v1784_v18 = vsel %vm1762_vm5, %v6712_v36, %v6717_v56  ;;  %v11787_v5 = vld [vmem:[#allocation38_spill] sm:$0xff] }
 0x2f6   :  { %v6440_v44 = vpack.c.bf16 %v1792_v42, %v1800_v59  ;;  %v6722_v34 = vunpack.i.h.bf16 %v6720_v47  ;;  %v6721_v28 = vunpack.i.l.bf16 %v6720_v47  ;;  %v1234_v11 = vpop.permute.xlu0 %1233  ;;  %v1783_v52 = vsel %vm1762_vm5, %v6711_v63, %v6716_v40  ;;  %v6815_v58 = vld [vmem:[#allocation3 + $0x334] ss:$56 sps:$4 sm:$0xff]   ;;  %6173 = vmatprep.mubr.msk.bf16.mxu0 %vm4674_vm7, %v7021_v19  ;;  %v6816_v42 = vld [vmem:[#allocation3 + $0x338] ss:$56 sps:$4 sm:$0xff]  }
 0x2f7   :  { %2012 = vst [vmem:[#allocation3 + $0x2c4] sm:$0xff] %v6436_v61  ;;  %v1340_v0 = vsel %vm1301_vm6, %v11786_v25, %v1234_v11  ;;  %2069 = vrot.lane.b32.xlu1 %v9773_v1, %s7126_s12  ;;  %v11788_v8 = vunpack.i.l.bf16 %v11787_v5  ;;  %v11789_v63 = vunpack.i.h.bf16 %v11787_v5  ;;  %5151 = vmatprep.subr.bf16.mxu0 %v6815_v58  ;;  %v11792_v47 = vld [vmem:[#allocation19_spill] sm:$0xff] }
 0x2f8   :  { %2016 = vst [vmem:[#allocation3 + $0x2fc] sm:$0xff] %v6440_v44  ;;  %v1775_v1 = vsel %vm1762_vm5, %v6716_v40, %v6721_v28  ;;  %v1776_v39 = vsel %vm1762_vm5, %v6717_v56, %v6722_v34  ;;  %2083 = vrot.lane.b32.xlu0 %v9789_v35, %s7126_s12  ;;  %5152 = vmatpush1.bf16.msra.mxu0 %v6813_v9  ;;  %v11790_v40 = vld [vmem:[#allocation16_spill] sm:$0xff] }
 0x2f9   :  { %v1767_v36 = vsel %vm1762_vm5, %v6721_v28, %v11788_v8  ;;  %v1768_v45 = vsel %vm1762_vm5, %v6722_v34, %v11789_v63  ;;  %v6437_v57 = vpack.c.bf16 %v1775_v1, %v1783_v52  ;;  %v6441_v60 = vpack.c.bf16 %v1776_v39, %v1784_v18  ;;  %v1236_v59 = vpop.permute.xlu1 %1235  ;;  %5071 = vmatmul.mubr.bf16.vlgmr.msra.gmra.mxu1 %v10234_v53  ;;  %v11791_v44 = vld [vmem:[#allocation40_spill] sm:$0xff] }
 0x2fa   :  { %v6438_v37 = vpack.c.bf16 %v1767_v36, %v1767_v36  ;;  %v6442_v6 = vpack.c.bf16 %v1768_v45, %v1768_v45  ;;  %v1250_v30 = vpop.permute.xlu0 %1249  ;;  %6180 = vmatprep.mubr.msk.bf16.mxu1 %vm4674_vm7, %v10246_v13  ;;  %v1430_v61 = vmul.f32 %v11790_v40, %v1340_v0  ;;  %v1341_v53 = vsel %vm1301_vm6, %v11791_v44, %v1236_v59  ;;  %v6819_v13 = vld [vmem:[#allocation3 + $0x2c0] ss:$56 sps:$4 sm:$0xff]   ;;  %v7023_v0 = vld [vmem:[%s11499_s1 + $0x34] ss:$8 sps:$4 sm:$0xff]  }
 0x2fb   :  { %2013 = vst [vmem:[#allocation3 + $0x2cc] sm:$0xff] %v6437_v57  ;;  %2017 = vst [vmem:[#allocation3 + $0x304] sm:$0xff] %v6441_v60  ;;  %v1332_v56 = vsel %vm1301_vm6, %v1234_v11, %v1250_v30  ;;  %2085 = vrot.lane.b32.xlu1 %v9787_v46, %s7126_s12  ;;  %v6818_v35 = vld [vmem:[#allocation3 + $0x33c] ss:$56 sps:$4 sm:$0xff]   ;;  %v7022_v18 = vld [vmem:[%s11499_s1 + $0x20] ss:$8 sps:$4 sm:$0xff]   ;;  %v1437_v52 = vmul.f32 %v11790_v40, %v1341_v53 }
 0x2fc   :  { %2014 = vst [vmem:[#allocation3 + $0x2d4] sm:$0xf] %v6438_v37  ;;  %2018 = vst [vmem:[#allocation3 + $0x30c] sm:$0xf] %v6442_v6  ;;  %v1431_v34 = vmul.f32 %v11792_v47, %v1332_v56  ;;  %2099 = vrot.lane.b32.xlu0 %v9805_v29, %s7126_s12  ;;  %5264 = vmatprep.subr.bf16.mxu1 %v6818_v35  ;;  %v11793_v63 = vld [vmem:[#allocation44_spill] sm:$0xff]  ;;  %v11794_v57 = vld [vmem:[#allocation41_spill] sm:$0xff] }
 0x2fd   :  { %v1252_v28 = vpop.permute.xlu1 %1251  ;;  %5265 = vmatpush1.bf16.msra.mxu1 %v6816_v42  ;;  %4978 = vmatmul.mubr.bf16.gmra.mxu0 %v7022_v18  ;;  %v7024_v39 = vld [vmem:[#allocation2 + $0x140] sm:$0xff] }
 0x2fe   :  { %v6412_v11 = vpack.c.bf16 %v1431_v34, %v1430_v61  ;;  %v1333_v46 = vsel %vm1301_vm6, %v1236_v59, %v1252_v28  ;;  %v1266_v9 = vpop.permute.xlu0 %1265  ;;  %6174 = vmatprep.mubr.msk.bf16.mxu0 %vm4674_vm7, %v7023_v0  ;;  %v11796_v59 = vld [vmem:[#allocation43_spill] sm:$0xff]  ;;  %v11797_v61 = vld [vmem:[#allocation45_spill] sm:$0xff] }
 0x2ff   :  { %v1438_v25 = vmul.f32 %v11792_v47, %v1333_v46  ;;  %2101 = vrot.lane.b32.xlu1 %v9803_v55, %s7126_s12  ;;  %v6821_v29 = vld [vmem:[#allocation3 + $0x2c4] ss:$56 sps:$4 sm:$0xff]   ;;  %v1324_v5 = vsel %vm1301_vm6, %v1250_v30, %v1266_v9  ;;  %v6822_v55 = vld [vmem:[#allocation3 + $0x2c8] ss:$56 sps:$4 sm:$0xff]   ;;  %v7025_v46 = vld [vmem:[%s11499_s1 + $0x30] ss:$8 sps:$4 sm:$0xff]  }
 0x300   :  { %1643 = vst [vmem:[#allocation3 + $0x254] sm:$0xff] %v6412_v11  ;;  %2115 = vrot.lane.b32.xlu0 %v9824_v16, %s7126_s12  ;;  %5153 = vmatprep.subr.bf16.mxu0 %v6821_v29  ;;  %v1432_v37 = vmul.f32 %v11794_v57, %v1324_v5 }
 0x301   :  { %v6416_v58 = vpack.c.bf16 %v1438_v25, %v1437_v52  ;;  %v1268_v8 = vpop.permute.xlu1 %1267  ;;  %5154 = vmatpush1.bf16.msra.mxu0 %v6819_v13  ;;  %5081 = vmatmul.mubr.bf16.gmra.mxu1 %v7020_v32  ;;  %v11795_v32 = vld [vmem:[#allocation42_spill] sm:$0xff] }
 0x302   :  { %v1282_v36 = vpop.permute.xlu0 %1281  ;;  %v6824_v16 = vld [vmem:[#allocation3 + $0x2cc] ss:$56 sps:$4 sm:$0xff]   ;;  %6181 = vmatprep.mubr.msk.bf16.mxu1 %vm4674_vm7, %v7021_v19  ;;  %v1325_v60 = vsel %vm1301_vm6, %v1252_v28, %v1268_v8  ;;  %v11798_v25 = vld [vmem:[#allocation46_spill] sm:$0xff] }
 0x303   :  { %1647 = vst [vmem:[#allocation3 + $0x28c] sm:$0xff] %v6416_v58  ;;  %v1308_v45 = vsel %vm1301_vm6, %v1282_v36, %v11793_v63  ;;  %v1316_v1 = vsel %vm1301_vm6, %v1266_v9, %v1282_v36  ;;  %2117 = vrot.lane.b32.xlu1 %v7024_v39, %s7126_s12  ;;  %5266 = vmatprep.subr.bf16.mxu1 %v6824_v16  ;;  %v7026_v9 = vld [vmem:[%s11499_s1 + $0x44] ss:$8 sps:$4 sm:$0xff]  }
 0x304   :  { %v1433_v6 = vmul.f32 %v11795_v32, %v1316_v1  ;;  %v1434_v30 = vmul.f32 %v11796_v59, %v1308_v45  ;;  %5267 = vmatpush1.bf16.msra.mxu1 %v6822_v55  ;;  %v1439_v34 = vmul.f32 %v11794_v57, %v1325_v60  ;;  %v11799_v45 = vld [vmem:[#allocation47_spill] sm:$0xff] }
 0x305   :  { %v1284_v42 = vpop.permute.xlu1 %1283  ;;  %4988 = vmatmul.mubr.bf16.gmra.mxu0 %v7025_v46 }
 0x306   :  { %v6413_v56 = vpack.c.bf16 %v1433_v6, %v1432_v37  ;;  %v6414_v35 = vpack.c.bf16 %v1434_v30, %v1434_v30  ;;  %v1309_v44 = vsel %vm1301_vm6, %v1284_v42, %v11797_v61  ;;  %v1317_v19 = vsel %vm1301_vm6, %v1268_v8, %v1284_v42  ;;  %v1230_v53 = vpop.permute.xlu0 %1229  ;;  %6175 = vmatprep.mubr.msk.bf16.mxu0 %vm4674_vm7, %v7026_v9  ;;  %v6825_v8 = vld [vmem:[#allocation3 + $0x250] ss:$56 sps:$4 sm:$0xff]   ;;  %v7028_v42 = vld [vmem:[%s11499_s1 + $0x54] ss:$8 sps:$4 sm:$0xff]  }
 0x307   :  { %v1440_v28 = vmul.f32 %v11795_v32, %v1317_v19  ;;  %v1441_v11 = vmul.f32 %v11796_v59, %v1309_v44  ;;  %v1338_v29 = vsel %vm1301_vm6, %v11798_v25, %v1230_v53  ;;  %v7027_v30 = vld [vmem:[%s11499_s1 + $0x40] ss:$8 sps:$4 sm:$0xff]  }
 0x308   :  { %1644 = vst [vmem:[#allocation3 + $0x25c] sm:$0xff] %v6413_v56  ;;  %1645 = vst [vmem:[#allocation3 + $0x264] sm:$0xf] %v6414_v35  ;;  %v1416_v63 = vmul.f32 %v11790_v40, %v1338_v29  ;;  %v11800_v19 = vld [vmem:[#allocation4_spill] sm:$0xff] }
 0x309   :  { %v6417_v13 = vpack.c.bf16 %v1440_v28, %v1439_v34  ;;  %v6418_v52 = vpack.c.bf16 %v1441_v11, %v1441_v11  ;;  %v1232_v58 = vpop.permute.xlu1 %1231  ;;  %5091 = vmatmul.mubr.bf16.gmra.mxu1 %v7022_v18 }
 0x30a   :  { %v1246_v5 = vpop.permute.xlu0 %1245  ;;  %v6827_v36 = vld [vmem:[#allocation3 + $0x254] ss:$56 sps:$4 sm:$0xff]   ;;  %6182 = vmatprep.mubr.msk.bf16.mxu1 %vm4674_vm7, %v7023_v0  ;;  %v1339_v1 = vsel %vm1301_vm6, %v11799_v45, %v1232_v58  ;;  %v6828_v44 = vld [vmem:[#allocation3 + $0x258] ss:$56 sps:$4 sm:$0xff]  }
 0x30b   :  { %1648 = vst [vmem:[#allocation3 + $0x294] sm:$0xff] %v6417_v13  ;;  %1649 = vst [vmem:[#allocation3 + $0x29c] sm:$0xf] %v6418_v52  ;;  %v1330_v55 = vsel %vm1301_vm6, %v1230_v53, %v1246_v5  ;;  %5155 = vmatprep.subr.bf16.mxu0 %v6827_v36  ;;  %v1423_v6 = vmul.f32 %v11790_v40, %v1339_v1  ;;  %v7029_v45 = vld [vmem:[%s11499_s1 + $0x50] ss:$8 sps:$4 sm:$0xff]  }
 0x30c   :  { %v1417_v39 = vmul.f32 %v11792_v47, %v1330_v55  ;;  %5156 = vmatpush1.bf16.msra.mxu0 %v6825_v8  ;;  %v7030_v1 = vld [vmem:[%s11499_s1 + $0x64] ss:$8 sps:$4 sm:$0xff]  }
 0x30d   :  { %v1248_v16 = vpop.permute.xlu1 %1247  ;;  %4998 = vmatmul.mubr.bf16.gmra.mxu0 %v7027_v30 }
 0x30e   :  { %v6404_v37 = vpack.c.bf16 %v1417_v39, %v1416_v63  ;;  %v1331_v18 = vsel %vm1301_vm6, %v1232_v58, %v1248_v16  ;;  %v1262_v60 = vpop.permute.xlu0 %1261  ;;  %6176 = vmatprep.mubr.msk.bf16.mxu0 %vm4674_vm7, %v7028_v42  ;;  %v11801_v58 = vld [vmem:[#allocation5_spill] sm:$0xff] }
 0x30f   :  { %v1424_v0 = vmul.f32 %v11792_v47, %v1331_v18  ;;  %v1322_v35 = vsel %vm1301_vm6, %v1246_v5, %v1262_v60  ;;  %v6831_v18 = vld [vmem:[#allocation3 + $0x1e0] ss:$56 sps:$4 sm:$0xff]  }
 0x310   :  { %1635 = vst [vmem:[#allocation3 + $0x1e4] sm:$0xff] %v6404_v37  ;;  %v1418_v28 = vmul.f32 %v11794_v57, %v1322_v35  ;;  %v11804_v35 = vld [vmem:[#allocation20_spill] sm:$0xff] }
 0x311   :  { %v6408_v56 = vpack.c.bf16 %v1424_v0, %v1423_v6  ;;  %v1264_v61 = vpop.permute.xlu1 %1263  ;;  %5101 = vmatmul.mubr.bf16.gmra.mxu1 %v7025_v46  ;;  %v11803_v0 = vld [vmem:[#allocation24_spill] sm:$0xff] }
 0x312   :  { %v1278_v40 = vpop.permute.xlu0 %1277  ;;  %v6830_v47 = vld [vmem:[#allocation3 + $0x25c] ss:$56 sps:$4 sm:$0xff]   ;;  %6183 = vmatprep.mubr.msk.bf16.mxu1 %vm4674_vm7, %v7026_v9  ;;  %v1323_v11 = vsel %vm1301_vm6, %v1248_v16, %v1264_v61 }
 0x313   :  { %1639 = vst [vmem:[#allocation3 + $0x21c] sm:$0xff] %v6408_v56  ;;  %v1306_v53 = vsel %vm1301_vm6, %v1278_v40, %v11800_v19  ;;  %v1314_v34 = vsel %vm1301_vm6, %v1262_v60, %v1278_v40  ;;  %5268 = vmatprep.subr.bf16.mxu1 %v6830_v47  ;;  %v1425_v36 = vmul.f32 %v11794_v57, %v1323_v11  ;;  %v11802_v57 = vld [vmem:[#allocation7_spill] sm:$0xff]  ;;  %v11805_v40 = vld [vmem:[#allocation21_spill] sm:$0xff] }
 0x314   :  { %v1419_v13 = vmul.f32 %v11795_v32, %v1314_v34  ;;  %v1420_v52 = vmul.f32 %v11796_v59, %v1306_v53  ;;  %5269 = vmatpush1.bf16.msra.mxu1 %v6828_v44  ;;  %v6836_v47 = vld [vmem:[#allocation3 + $0x174] ss:$56 sps:$4 sm:$0xff]   ;;  %v6834_v11 = vld [vmem:[#allocation3 + $0x170] ss:$56 sps:$4 sm:$0xff]  }
 0x315   :  { %v1280_v46 = vpop.permute.xlu1 %1279  ;;  %5008 = vmatmul.mubr.bf16.gmra.mxu0 %v7029_v45 }
 0x316   :  { %v6405_v25 = vpack.c.bf16 %v1419_v13, %v1418_v28  ;;  %v6406_v29 = vpack.c.bf16 %v1420_v52, %v1420_v52  ;;  %v1307_v5 = vsel %vm1301_vm6, %v1280_v46, %v11801_v58  ;;  %v1315_v9 = vsel %vm1301_vm6, %v1264_v61, %v1280_v46  ;;  %v2994_v8 = vpop.permute.xlu0 %2993  ;;  %6177 = vmatprep.mubr.msk.bf16.mxu0 %vm4674_vm7, %v7030_v1  ;;  %v10436_v13 = vld [vmem:[%s11499_s1 + $0x60] ss:$8 sps:$4 sm:$0xff]   ;;  %v6839_v52 = vld [vmem:[#allocation3 + $0x104] ss:$56 sps:$4 sm:$0xff]  }
 0x317   :  { %v1426_v55 = vmul.f32 %v11795_v32, %v1315_v9  ;;  %v1427_v63 = vmul.f32 %v11796_v59, %v1307_v5  ;;  %v3100_v32 = vsel %vm3061_vm8, %v11802_v57, %v2994_v8  ;;  %v10442_v46 = vld [vmem:[%s11499_s1 + $0x74] ss:$8 sps:$4 sm:$0xff]  }
 0x318   :  { %1636 = vst [vmem:[#allocation3 + $0x1ec] sm:$0xff] %v6405_v25  ;;  %1637 = vst [vmem:[#allocation3 + $0x1f4] sm:$0xf] %v6406_v29  ;;  %v3190_v56 = vmul.f32 %v11803_v0, %v3100_v32  ;;  %v6845_v32 = vld [vmem:[#allocation3 + $0x94] ss:$56 sps:$4 sm:$0xff]  }
 0x319   :  { %v6409_v39 = vpack.c.bf16 %v1426_v55, %v1425_v36  ;;  %v6410_v16 = vpack.c.bf16 %v1427_v63, %v1427_v63  ;;  %v2996_v59 = vpop.permute.xlu1 %2995  ;;  %5111 = vmatmul.mubr.bf16.gmra.mxu1 %v7027_v30  ;;  %v6837_v63 = vld [vmem:[#allocation3 + $0x100] ss:$56 sps:$4 sm:$0xff]  }
 0x31a   :  { %v3010_v37 = vpop.permute.xlu0 %3009  ;;  %v6833_v60 = vld [vmem:[#allocation3 + $0x1e4] ss:$56 sps:$4 sm:$0xff]   ;;  %6184 = vmatprep.mubr.msk.bf16.mxu1 %vm4674_vm7, %v7028_v42  ;;  %v3101_v61 = vsel %vm3061_vm8, %v11804_v35, %v2996_v59  ;;  %v6840_v9 = vld [vmem:[#allocation3 + $0x1e8] ss:$56 sps:$4 sm:$0xff]  }
 0x31b   :  { %1640 = vst [vmem:[#allocation3 + $0x224] sm:$0xff] %v6409_v39  ;;  %1641 = vst [vmem:[#allocation3 + $0x22c] sm:$0xf] %v6410_v16  ;;  %v3092_v6 = vsel %vm3061_vm8, %v2994_v8, %v3010_v37  ;;  %5157 = vmatprep.subr.bf16.mxu0 %v6833_v60  ;;  %v3197_v42 = vmul.f32 %v11803_v0, %v3101_v61 }
 0x31c   :  { %v3191_v44 = vmul.f32 %v11805_v40, %v3092_v6  ;;  %5158 = vmatpush1.bf16.msra.mxu0 %v6831_v18 }
 0x31d   :  { %v3012_v19 = vpop.permute.xlu1 %3011  ;;  %5159 = vmatprep.subr.bf16.mxu0 %v6836_v47  ;;  %5018 = vmatmul.mubr.bf16.gmra.mxu0 %v10436_v13  ;;  %v6846_v47 = vld [vmem:[#allocation3 + $0x178] ss:$56 sps:$4 sm:$0xff]  }
 0x31e   :  { %v6540_v30 = vpack.c.bf16 %v3191_v44, %v3190_v56  ;;  %v3093_v53 = vsel %vm3061_vm8, %v2996_v59, %v3012_v19  ;;  %v3026_v34 = vpop.permute.xlu0 %3025  ;;  %6178 = vmatprep.mubr.msk.bf16.mxu0 %vm4674_vm7, %v10442_v46  ;;  %v6843_v44 = vld [vmem:[#allocation3 + $0x90] ss:$56 sps:$4 sm:$0xff]  }
 0x31f   :  { %v3198_v28 = vmul.f32 %v11805_v40, %v3093_v53  ;;  %v3084_v29 = vsel %vm3061_vm8, %v3010_v37, %v3026_v34  ;;  %v7034_v53 = vld [vmem:[%s11499_s1 + $0x4] ss:$8 sps:$4 sm:$0xff]  }
 0x320   :  { %3403 = vst [vmem:[#allocation3 + $0x5d4] sm:$0xff] %v6540_v30  ;;  %5160 = vmatpush1.bf16.msra.mxu0 %v6834_v11  ;;  %v3192_v39 = vmul.f32 %v9750_v43, %v3084_v29  ;;  %v6854_v30 = vld [vmem:[#allocation3 + $0x10c] ss:$56 sps:$4 sm:$0xff]   ;;  %v6849_v29 = vld [vmem:[#allocation3 + $0x20] ss:$56 sps:$4 sm:$0xff]  }
 0x321   :  { %v6544_v25 = vpack.c.bf16 %v3198_v28, %v3197_v42  ;;  %v3028_v58 = vpop.permute.xlu1 %3027  ;;  %5161 = vmatprep.subr.bf16.mxu0 %v6839_v52  ;;  %5121 = vmatmul.mubr.bf16.gmra.mxu1 %v7029_v45 }
 0x322   :  { %v3042_v5 = vpop.permute.xlu0 %3041  ;;  %v6842_v8 = vld [vmem:[#allocation3 + $0x1ec] ss:$56 sps:$4 sm:$0xff]   ;;  %6185 = vmatprep.mubr.msk.bf16.mxu1 %vm4674_vm7, %v7030_v1  ;;  %v3085_v16 = vsel %vm3061_vm8, %v3012_v19, %v3028_v58  ;;  %v7033_v19 = vld [vmem:[%s11499_s1 + $0x70] ss:$8 sps:$4 sm:$0xff]  }
 0x323   :  { %3407 = vst [vmem:[#allocation3 + $0x60c] sm:$0xff] %v6544_v25  ;;  %v3068_v36 = vsel %vm3061_vm8, %v3042_v5, %v9835_v49  ;;  %v3076_v55 = vsel %vm3061_vm8, %v3026_v34, %v3042_v5  ;;  %5270 = vmatprep.subr.bf16.mxu1 %v6842_v8  ;;  %v6848_v49 = vld [vmem:[#allocation3 + $0x17c] ss:$56 sps:$4 sm:$0xff]   ;;  %v3199_v56 = vmul.f32 %v9750_v43, %v3085_v16  ;;  %v6858_v16 = vld [vmem:[#allocation3 + $0x98] ss:$56 sps:$4 sm:$0xff]  }
 0x324   :  { %v3193_v57 = vmul.f32 %v9767_v24, %v3076_v55  ;;  %v3194_v45 = vmul.f32 %v9771_v2, %v3068_v36  ;;  %5162 = vmatpush1.bf16.msra.mxu0 %v6837_v63  ;;  %5271 = vmatpush1.bf16.msra.mxu1 %v6840_v9  ;;  %v6860_v36 = vld [vmem:[#allocation3 + $0x9c] ss:$56 sps:$4 sm:$0xff]  }
 0x325   :  { %v3044_v59 = vpop.permute.xlu1 %3043  ;;  %5163 = vmatprep.subr.bf16.mxu0 %v6845_v32  ;;  %5272 = vmatprep.subr.bf16.mxu1 %v6848_v49  ;;  %v6863_v32 = vld [vmem:[#allocation3 + $0x2c] ss:$56 sps:$4 sm:$0xff]  }
 0x326   :  { %v6541_v37 = vpack.c.bf16 %v3193_v57, %v3192_v39  ;;  %v6542_v18 = vpack.c.bf16 %v3194_v45, %v3194_v45  ;;  %v3069_v1 = vsel %vm3061_vm8, %v3044_v59, %v9847_v15  ;;  %v3077_v60 = vsel %vm3061_vm8, %v3028_v58, %v3044_v59  ;;  %v2990_v6 = vpop.permute.xlu0 %2989  ;;  %5028 = vmatmul.mubr.bf16.gmra.mxu0 %v7033_v19  ;;  %v6851_v15 = vld [vmem:[#allocation3 + $0x24] ss:$56 sps:$4 sm:$0xff]   ;;  %v6852_v58 = vld [vmem:[#allocation3 + $0x108] ss:$56 sps:$4 sm:$0xff]  }
 0x327   :  { %v3200_v35 = vmul.f32 %v9767_v24, %v3077_v60  ;;  %v3201_v61 = vmul.f32 %v9771_v2, %v3069_v1  ;;  %6187 = vmatprep.mubr.msk.bf16.mxu0 %vm4674_vm7, %v7034_v53  ;;  %v3098_v28 = vsel %vm3061_vm8, %v9861_v48, %v2990_v6  ;;  %v6855_v45 = vld [vmem:[#allocation3 + $0x5d0] ss:$56 sps:$4 sm:$0xff]  }
 0x328   :  { %3404 = vst [vmem:[#allocation3 + $0x5dc] sm:$0xff] %v6541_v37  ;;  %3405 = vst [vmem:[#allocation3 + $0x5e4] sm:$0xf] %v6542_v18  ;;  %5164 = vmatpush1.bf16.msra.mxu0 %v6843_v44  ;;  %5273 = vmatpush1.bf16.msra.mxu1 %v6846_v47  ;;  %v3176_v5 = vmul.f32 %v11803_v0, %v3098_v28 }
 0x329   :  { %v6545_v34 = vpack.c.bf16 %v3200_v35, %v3199_v56  ;;  %v6546_v42 = vpack.c.bf16 %v3201_v61, %v3201_v61  ;;  %v2992_v11 = vpop.permute.xlu1 %2991  ;;  %5165 = vmatprep.subr.bf16.mxu0 %v6851_v15  ;;  %5274 = vmatprep.subr.bf16.mxu1 %v6854_v30 }
 0x32a   :  { %v3006_v52 = vpop.permute.xlu0 %3005  ;;  %5131 = vmatmul.mubr.bf16.gmra.mxu1 %v10436_v13  ;;  %v3099_v48 = vsel %vm3061_vm8, %v9867_v3, %v2992_v11  ;;  %v6857_v8 = vld [vmem:[#allocation3 + $0x5d4] ss:$56 sps:$4 sm:$0xff]  }
 0x32b   :  { %3408 = vst [vmem:[#allocation3 + $0x614] sm:$0xff] %v6545_v34  ;;  %3409 = vst [vmem:[#allocation3 + $0x61c] sm:$0xf] %v6546_v42  ;;  %v3090_v25 = vsel %vm3061_vm8, %v2990_v6, %v3006_v52  ;;  %6186 = vmatprep.mubr.msk.bf16.mxu1 %vm4674_vm7, %v10442_v46  ;;  %v3183_v3 = vmul.f32 %v11803_v0, %v3099_v48  ;;  %v11807_v48 = vld [vmem:[#allocation17_spill] sm:$0xff] }
 0x32c   :  { %v3177_v9 = vmul.f32 %v11805_v40, %v3090_v25  ;;  %5166 = vmatpush1.bf16.msra.mxu0 %v6849_v29  ;;  %5275 = vmatpush1.bf16.msra.mxu1 %v6852_v58  ;;  %v6867_v29 = vld [vmem:[#allocation3 + $0x560] ss:$56 sps:$4 sm:$0xff]  }
 0x32d   :  { %v3008_v55 = vpop.permute.xlu1 %3007  ;;  %5171 = vmatprep.subr.bf16.mxu0 %v6857_v8  ;;  %5276 = vmatprep.subr.bf16.mxu1 %v6860_v36 }
 0x32e   :  { %v6532_v63 = vpack.c.bf16 %v3177_v9, %v3176_v5  ;;  %v3091_v13 = vsel %vm3061_vm8, %v2992_v11, %v3008_v55  ;;  %v3022_v39 = vpop.permute.xlu0 %3021 }
 0x32f   :  { %v3184_v57 = vmul.f32 %v11805_v40, %v3091_v13  ;;  %v3082_v46 = vsel %vm3061_vm8, %v3006_v52, %v3022_v39  ;;  %v6861_v40 = vld [vmem:[#allocation3 + $0x28] ss:$56 sps:$4 sm:$0xff]  }
 0x330   :  { %3395 = vst [vmem:[#allocation3 + $0x564] sm:$0xff] %v6532_v63  ;;  %5172 = vmatpush2.bf16.msra.mxu0 %v6855_v45  ;;  %5277 = vmatpush1.bf16.msra.mxu1 %v6858_v16  ;;  %v3178_v1 = vmul.f32 %v9750_v43, %v3082_v46  ;;  %v4846_v16 = vpop.f32.mrf.mxu1 }
 0x331   :  { %v6536_v59 = vpack.c.bf16 %v3184_v57, %v3183_v3  ;;  %v3024_v49 = vpop.permute.xlu1 %3023  ;;  %5278 = vmatprep.subr.bf16.mxu1 %v6863_v32  ;;  %5492 = vst [vmem:[%s11500_s3 + $0x10] sm:$0xff] %v4846_v16 }
 0x332   :  { %v3038_v37 = vpop.permute.xlu0 %3037  ;;  %5141 = vmatmul.mubr.bf16.gmra.mxu1 %v7033_v19  ;;  %v3083_v60 = vsel %vm3061_vm8, %v3008_v55, %v3024_v49  ;;  %v6866_v35 = vld [vmem:[#allocation3 + $0x5dc] ss:$56 sps:$4 sm:$0xff]  }
 0x333   :  { %3399 = vst [vmem:[#allocation3 + $0x59c] sm:$0xff] %v6536_v59  ;;  %v3066_v18 = vsel %vm3061_vm8, %v3038_v37, %v9899_v21  ;;  %v3074_v0 = vsel %vm3061_vm8, %v3022_v39, %v3038_v37  ;;  %6195 = vmatprep.mubr.msk.bf16.mxu1 %vm4674_vm7, %v7034_v53  ;;  %v3185_v30 = vmul.f32 %v9750_v43, %v3083_v60  ;;  %v6864_v53 = vld [vmem:[#allocation3 + $0x5d8] ss:$56 sps:$4 sm:$0xff]   ;;  %v4733_v39 = vpop.f32.mrf.mxu0 }
 0x334   :  { %v3179_v6 = vmul.f32 %v9767_v24, %v3074_v0  ;;  %v3180_v56 = vmul.f32 %v9771_v2, %v3066_v18  ;;  %5279 = vmatpush1.bf16.msra.mxu1 %v6861_v40  ;;  %5490 = vst [vmem:[%s11500_s3] sm:$0xff] %v4733_v39  ;;  %v4848_v0 = vpop.f32.mrf.mxu1 }
 0x335   :  { %v3040_v61 = vpop.permute.xlu1 %3039  ;;  %5284 = vmatprep.subr.bf16.mxu1 %v6866_v35  ;;  %v4735_v46 = vpop.f32.mrf.mxu0  ;;  %5493 = vst [vmem:[%s11500_s3 + $0x18] sm:$0xff] %v4848_v0 }
 0x336   :  { %v6533_v21 = vpack.c.bf16 %v3179_v6, %v3178_v1  ;;  %v6534_v44 = vpack.c.bf16 %v3180_v56, %v3180_v56  ;;  %v3067_v47 = vsel %vm3061_vm8, %v3040_v61, %v9916_v54  ;;  %v3075_v19 = vsel %vm3061_vm8, %v3024_v49, %v3040_v61  ;;  %v2533_v15 = vpop.permute.xlu0 %2532  ;;  %v11808_v49 = vld [vmem:[#allocation14_spill] sm:$0xff]  ;;  %5491 = vst [vmem:[%s11500_s3 + $0x8] sm:$0xff] %v4735_v46  ;;  %v4850_v61 = vpop.f32.mrf.mxu1 }
 0x337   :  { %v3186_v34 = vmul.f32 %v9767_v24, %v3075_v19  ;;  %v3187_v42 = vmul.f32 %v9771_v2, %v3067_v47  ;;  %v2639_v54 = vsel %vm2600_vm9, %v9927_v23, %v2533_v15  ;;  %v11806_v24 = vld [vmem:[#allocation11_spill] sm:$0xff]  ;;  %v4737_v56 = vpop.f32.mrf.mxu0  ;;  %v11809_v47 = vld [vmem:[#allocation6_spill] sm:$0xff]  ;;  %5499 = vst [vmem:[%s11500_s3 + $0x48] sm:$0xff] %v4850_v61 }
 0x338   :  { %3396 = vst [vmem:[#allocation3 + $0x56c] sm:$0xff] %v6533_v21  ;;  %3397 = vst [vmem:[#allocation3 + $0x574] sm:$0xf] %v6534_v44  ;;  %5285 = vmatpush2.bf16.msra.mxu1 %v6864_v53  ;;  %v2729_v2 = vmul.f32 %v11806_v24, %v2639_v54 }
 0x339   :  { %v6537_v28 = vpack.c.bf16 %v3186_v34, %v3185_v30  ;;  %v6538_v11 = vpack.c.bf16 %v3187_v42, %v3187_v42  ;;  %v2535_v52 = vpop.permute.xlu1 %2534  ;;  %5497 = vst [vmem:[%s11500_s3 + $0x38] sm:$0xff] %v4737_v56 }
 0x33a   :  { %v2549_v25 = vpop.permute.xlu0 %2548  ;;  %v6869_v58 = vld [vmem:[#allocation3 + $0x564] ss:$56 sps:$4 sm:$0xff]   ;;  %v2640_v5 = vsel %vm2600_vm9, %v9933_v50, %v2535_v52  ;;  %v6870_v32 = vld [vmem:[#allocation3 + $0x568] ss:$56 sps:$4 sm:$0xff]  }
 0x33b   :  { %3400 = vst [vmem:[#allocation3 + $0x5a4] sm:$0xff] %v6537_v28  ;;  %3401 = vst [vmem:[#allocation3 + $0x5ac] sm:$0xf] %v6538_v11  ;;  %v2631_v43 = vsel %vm2600_vm9, %v2533_v15, %v2549_v25  ;;  %5173 = vmatprep.subr.bf16.mxu0 %v6869_v58  ;;  %v2736_v63 = vmul.f32 %v11806_v24, %v2640_v5  ;;  %v4739_v28 = vpop.f32.mrf.mxu0  ;;  %v4852_v11 = vpop.f32.mrf.mxu1 }
 0x33c   :  { %v2730_v9 = vmul.f32 %v11807_v48, %v2631_v43  ;;  %5174 = vmatpush2.bf16.msra.mxu0 %v6867_v29  ;;  %5498 = vst [vmem:[%s11500_s3 + $0x40] sm:$0xff] %v4739_v28  ;;  %5500 = vst [vmem:[%s11500_s3 + $0x50] sm:$0xff] %v4852_v11  ;;  %v6873_v43 = vld [vmem:[#allocation3 + $0x4f0] ss:$56 sps:$4 sm:$0xff]  }
 0x33d   :  { %v2551_v23 = vpop.permute.xlu1 %2550  ;;  %v4743_v5 = vpop.f32.mrf.mxu0 }
 0x33e   :  { %v6508_v8 = vpack.c.bf16 %v2730_v9, %v2729_v2  ;;  %v2632_v36 = vsel %vm2600_vm9, %v2535_v52, %v2551_v23  ;;  %v2565_v55 = vpop.permute.xlu0 %2564  ;;  %5504 = vst [vmem:[%s11500_s3 + $0x70] sm:$0xff] %v4743_v5 }
 0x33f   :  { %v2737_v13 = vmul.f32 %v11807_v48, %v2632_v36  ;;  %v2623_v50 = vsel %vm2600_vm9, %v2549_v25, %v2565_v55 }
 0x340   :  { %2942 = vst [vmem:[#allocation3 + $0x4f4] sm:$0xff] %v6508_v8  ;;  %v2731_v40 = vmul.f32 %v9937_v14, %v2623_v50 }
 0x341   :  { %v6512_v3 = vpack.c.bf16 %v2737_v13, %v2736_v63  ;;  %v2567_v57 = vpop.permute.xlu1 %2566 }
 0x342   :  { %v2581_v45 = vpop.permute.xlu0 %2580  ;;  %v6872_v59 = vld [vmem:[#allocation3 + $0x56c] ss:$56 sps:$4 sm:$0xff]   ;;  %v2624_v1 = vsel %vm2600_vm9, %v2551_v23, %v2567_v57 }
 0x343   :  { %2946 = vst [vmem:[#allocation3 + $0x52c] sm:$0xff] %v6512_v3  ;;  %v2607_v37 = vsel %vm2600_vm9, %v2581_v45, %v11808_v49  ;;  %v2615_v18 = vsel %vm2600_vm9, %v2565_v55, %v2581_v45  ;;  %5286 = vmatprep.subr.bf16.mxu1 %v6872_v59  ;;  %v2738_v34 = vmul.f32 %v9937_v14, %v2624_v1  ;;  %v4745_v55 = vpop.f32.mrf.mxu0 }
 0x344   :  { %v2732_v60 = vmul.f32 %v9948_v10, %v2615_v18  ;;  %v2733_v6 = vmul.f32 %v9952_v31, %v2607_v37  ;;  %5287 = vmatpush2.bf16.msra.mxu1 %v6870_v32  ;;  %5505 = vst [vmem:[%s11500_s3 + $0x78] sm:$0xff] %v4745_v55  ;;  %v11812_v55 = vld [vmem:[#allocation31_spill] sm:$0xff] }
 0x345   :  { %v2583_v35 = vpop.permute.xlu1 %2582  ;;  %v4747_v3 = vpop.f32.mrf.mxu0 }
 0x346   :  { %v6509_v21 = vpack.c.bf16 %v2732_v60, %v2731_v40  ;;  %v6510_v44 = vpack.c.bf16 %v2733_v6, %v2733_v6  ;;  %v2608_v19 = vsel %vm2600_vm9, %v2583_v35, %v11809_v47  ;;  %v2616_v15 = vsel %vm2600_vm9, %v2567_v57, %v2583_v35  ;;  %v2529_v30 = vpop.permute.xlu0 %2528  ;;  %5511 = vst [vmem:[%s11500_s3 + $0xa8] sm:$0xff] %v4747_v3  ;;  %v11810_v40 = vld [vmem:[#allocation23_spill] sm:$0xff] }
 0x347   :  { %v2739_v42 = vmul.f32 %v9948_v10, %v2616_v15  ;;  %v2740_v53 = vmul.f32 %v9952_v31, %v2608_v19  ;;  %v2637_v25 = vsel %vm2600_vm9, %v10005_v38, %v2529_v30  ;;  %v4856_v38 = vpop.f32.mrf.mxu1  ;;  %v4749_v32 = vpop.f32.mrf.mxu0 }
 0x348   :  { %2943 = vst [vmem:[#allocation3 + $0x4fc] sm:$0xff] %v6509_v21  ;;  %2944 = vst [vmem:[#allocation3 + $0x504] sm:$0xf] %v6510_v44  ;;  %v2715_v23 = vmul.f32 %v11806_v24, %v2637_v25 }
 0x349   :  { %v6513_v54 = vpack.c.bf16 %v2739_v42, %v2738_v34  ;;  %v6514_v52 = vpack.c.bf16 %v2740_v53, %v2740_v53  ;;  %v2531_v29 = vpop.permute.xlu1 %2530  ;;  %5506 = vst [vmem:[%s11500_s3 + $0x80] sm:$0xff] %v4856_v38  ;;  %v4858_v13 = vpop.f32.mrf.mxu1  ;;  %5512 = vst [vmem:[%s11500_s3 + $0xb0] sm:$0xff] %v4749_v32 }
 0x34a   :  { %v2545_v58 = vpop.permute.xlu0 %2544  ;;  %v6875_v2 = vld [vmem:[#allocation3 + $0x4f4] ss:$56 sps:$4 sm:$0xff]   ;;  %v2638_v8 = vsel %vm2600_vm9, %v10011_v12, %v2531_v29  ;;  %5507 = vst [vmem:[%s11500_s3 + $0x88] sm:$0xff] %v4858_v13  ;;  %v6876_v37 = vld [vmem:[#allocation3 + $0x4f8] ss:$56 sps:$4 sm:$0xff]   ;;  %v4753_v0 = vpop.f32.mrf.mxu0 }
 0x34b   :  { %2947 = vst [vmem:[#allocation3 + $0x534] sm:$0xff] %v6513_v54  ;;  %2948 = vst [vmem:[#allocation3 + $0x53c] sm:$0xf] %v6514_v52  ;;  %v2629_v9 = vsel %vm2600_vm9, %v2529_v30, %v2545_v58  ;;  %5175 = vmatprep.subr.bf16.mxu0 %v6875_v2  ;;  %v2722_v50 = vmul.f32 %v11806_v24, %v2638_v8  ;;  %v4860_v45 = vpop.f32.mrf.mxu1  ;;  %v6879_v2 = vld [vmem:[#allocation3 + $0x480] ss:$56 sps:$4 sm:$0xff]  }
 0x34c   :  { %v2716_v36 = vmul.f32 %v11807_v48, %v2629_v9  ;;  %5176 = vmatpush2.bf16.msra.mxu0 %v6873_v43  ;;  %5513 = vst [vmem:[%s11500_s3 + $0xb8] sm:$0xff] %v4860_v45  ;;  %5518 = vst [vmem:[%s11500_s3 + $0xe0] sm:$0xff] %v4753_v0  ;;  %v4755_v44 = vpop.f32.mrf.mxu0 }
 0x34d   :  { %v2547_v63 = vpop.permute.xlu1 %2546  ;;  %v4862_v24 = vpop.f32.mrf.mxu1  ;;  %5519 = vst [vmem:[%s11500_s3 + $0xe8] sm:$0xff] %v4755_v44 }
 0x34e   :  { %v6500_v39 = vpack.c.bf16 %v2716_v36, %v2715_v23  ;;  %v2630_v16 = vsel %vm2600_vm9, %v2531_v29, %v2547_v63  ;;  %v2561_v12 = vpop.permute.xlu0 %2560  ;;  %5514 = vst [vmem:[%s11500_s3 + $0xc0] sm:$0xff] %v4862_v24  ;;  %v4757_v28 = vpop.f32.mrf.mxu0  ;;  %v11811_v23 = vld [vmem:[#allocation30_spill] sm:$0xff] }
 0x34f   :  { %v2723_v57 = vmul.f32 %v11807_v48, %v2630_v16  ;;  %v2621_v46 = vsel %vm2600_vm9, %v2545_v58, %v2561_v12  ;;  %v4866_v6 = vpop.f32.mrf.mxu1  ;;  %5525 = vst [vmem:[%s11500_s3 + $0x118] sm:$0xff] %v4757_v28 }
 0x350   :  { %2934 = vst [vmem:[#allocation3 + $0x484] sm:$0xff] %v6500_v39  ;;  %v2717_v56 = vmul.f32 %v9937_v14, %v2621_v46  ;;  %5520 = vst [vmem:[%s11500_s3 + $0xf0] sm:$0xff] %v4866_v6  ;;  %v4759_v25 = vpop.f32.mrf.mxu0 }
 0x351   :  { %v6504_v59 = vpack.c.bf16 %v2723_v57, %v2722_v50  ;;  %v2563_v49 = vpop.permute.xlu1 %2562  ;;  %v4868_v19 = vpop.f32.mrf.mxu1  ;;  %5526 = vst [vmem:[%s11500_s3 + $0x120] sm:$0xff] %v4759_v25 }
 0x352   :  { %v2577_v48 = vpop.permute.xlu0 %2576  ;;  %v6878_v18 = vld [vmem:[#allocation3 + $0x4fc] ss:$56 sps:$4 sm:$0xff]   ;;  %v2622_v35 = vsel %vm2600_vm9, %v2547_v63, %v2563_v49  ;;  %5521 = vst [vmem:[%s11500_s3 + $0xf8] sm:$0xff] %v4868_v19  ;;  %v4763_v9 = vpop.f32.mrf.mxu0 }
 0x353   :  { %2938 = vst [vmem:[#allocation3 + $0x4bc] sm:$0xff] %v6504_v59  ;;  %v2605_v1 = vsel %vm2600_vm9, %v2577_v48, %v11810_v40  ;;  %v2613_v60 = vsel %vm2600_vm9, %v2561_v12, %v2577_v48  ;;  %5288 = vmatprep.subr.bf16.mxu1 %v6878_v18  ;;  %v2724_v11 = vmul.f32 %v9937_v14, %v2622_v35  ;;  %5532 = vst [vmem:[%s11500_s3 + $0x150] sm:$0xff] %v4763_v9 }
 0x354   :  { %v2718_v61 = vmul.f32 %v9948_v10, %v2613_v60  ;;  %v2719_v21 = vmul.f32 %v9952_v31, %v2605_v1  ;;  %5289 = vmatpush2.bf16.msra.mxu1 %v6876_v37  ;;  %v4765_v13 = vpop.f32.mrf.mxu0  ;;  %v11813_v1 = vld [vmem:[#allocation18_spill] sm:$0xff] }
 0x355   :  { %v2579_v47 = vpop.permute.xlu1 %2578  ;;  %5533 = vst [vmem:[%s11500_s3 + $0x158] sm:$0xff] %v4765_v13 }
 0x356   :  { %v6501_v15 = vpack.c.bf16 %v2718_v61, %v2717_v56  ;;  %v6502_v30 = vpack.c.bf16 %v2719_v21, %v2719_v21  ;;  %v2606_v34 = vsel %vm2600_vm9, %v2579_v47, %v10060_v33  ;;  %v2614_v42 = vsel %vm2600_vm9, %v2563_v49, %v2579_v47  ;;  %v2072_v53 = vpop.permute.xlu0 %2071  ;;  %v4870_v33 = vpop.f32.mrf.mxu1 }
 0x357   :  { %v2725_v54 = vmul.f32 %v9948_v10, %v2614_v42  ;;  %v2726_v52 = vmul.f32 %v9952_v31, %v2606_v34  ;;  %5527 = vst [vmem:[%s11500_s3 + $0x128] sm:$0xff] %v4870_v33  ;;  %v2178_v14 = vsel %vm2139_vm10, %v10071_v22, %v2072_v53  ;;  %v4767_v50 = vpop.f32.mrf.mxu0 }
 0x358   :  { %2935 = vst [vmem:[#allocation3 + $0x48c] sm:$0xff] %v6501_v15  ;;  %2936 = vst [vmem:[#allocation3 + $0x494] sm:$0xf] %v6502_v30  ;;  %v4872_v31 = vpop.f32.mrf.mxu1  ;;  %v2268_v8 = vmul.f32 %v11811_v23, %v2178_v14 }
 0x359   :  { %v6505_v29 = vpack.c.bf16 %v2725_v54, %v2724_v11  ;;  %v6506_v58 = vpack.c.bf16 %v2726_v52, %v2726_v52  ;;  %v2074_v10 = vpop.permute.xlu1 %2073  ;;  %5528 = vst [vmem:[%s11500_s3 + $0x130] sm:$0xff] %v4872_v31  ;;  %5539 = vst [vmem:[%s11500_s3 + $0x188] sm:$0xff] %v4767_v50  ;;  %v4769_v59 = vpop.f32.mrf.mxu0 }
 0x35a   :  { %v2088_v43 = vpop.permute.xlu0 %2087  ;;  %v6881_v5 = vld [vmem:[#allocation3 + $0x484] ss:$56 sps:$4 sm:$0xff]   ;;  %v4876_v22 = vpop.f32.mrf.mxu1  ;;  %v2179_v36 = vsel %vm2139_vm10, %v10077_v41, %v2074_v10  ;;  %5540 = vst [vmem:[%s11500_s3 + $0x190] sm:$0xff] %v4769_v59  ;;  %v6882_v18 = vld [vmem:[#allocation3 + $0x488] ss:$56 sps:$4 sm:$0xff]  }
 0x35b   :  { %2939 = vst [vmem:[#allocation3 + $0x4c4] sm:$0xff] %v6505_v29  ;;  %2940 = vst [vmem:[#allocation3 + $0x4cc] sm:$0xf] %v6506_v58  ;;  %v2170_v38 = vsel %vm2139_vm10, %v2072_v53, %v2088_v43  ;;  %5177 = vmatprep.subr.bf16.mxu0 %v6881_v5  ;;  %v2275_v57 = vmul.f32 %v11811_v23, %v2179_v36  ;;  %v4773_v40 = vpop.f32.mrf.mxu0 }
 0x35c   :  { %v2269_v63 = vmul.f32 %v11812_v55, %v2170_v38  ;;  %5534 = vst [vmem:[%s11500_s3 + $0x160] sm:$0xff] %v4876_v22  ;;  %5178 = vmatpush2.bf16.msra.mxu0 %v6879_v2  ;;  %v4878_v16 = vpop.f32.mrf.mxu1  ;;  %5546 = vst [vmem:[%s11500_s3 + $0x1c0] sm:$0xff] %v4773_v40  ;;  %v6885_v2 = vld [vmem:[#allocation3 + $0x410] ss:$56 sps:$4 sm:$0xff]  }
 0x35d   :  { %v2090_v39 = vpop.permute.xlu1 %2089  ;;  %5535 = vst [vmem:[%s11500_s3 + $0x168] sm:$0xff] %v4878_v16  ;;  %v4775_v47 = vpop.f32.mrf.mxu0 }
 0x35e   :  { %v6476_v12 = vpack.c.bf16 %v2269_v63, %v2268_v8  ;;  %v2171_v3 = vsel %vm2139_vm10, %v2074_v10, %v2090_v39  ;;  %v2104_v41 = vpop.permute.xlu0 %2103  ;;  %v4880_v32 = vpop.f32.mrf.mxu1  ;;  %5547 = vst [vmem:[%s11500_s3 + $0x1c8] sm:$0xff] %v4775_v47 }
 0x35f   :  { %v2276_v45 = vmul.f32 %v11812_v55, %v2171_v3  ;;  %5541 = vst [vmem:[%s11500_s3 + $0x198] sm:$0xff] %v4880_v32  ;;  %v2162_v49 = vsel %vm2139_vm10, %v2088_v43, %v2104_v41  ;;  %v4777_v11 = vpop.f32.mrf.mxu0 }
 0x360   :  { %2481 = vst [vmem:[#allocation3 + $0x414] sm:$0xff] %v6476_v12  ;;  %v4882_v48 = vpop.f32.mrf.mxu1  ;;  %v2270_v35 = vmul.f32 %v10081_v20, %v2162_v49  ;;  %5553 = vst [vmem:[%s11500_s3 + $0x1f8] sm:$0xff] %v4777_v11 }
 0x361   :  { %v6480_v46 = vpack.c.bf16 %v2276_v45, %v2275_v57  ;;  %v2106_v24 = vpop.permute.xlu1 %2105  ;;  %5542 = vst [vmem:[%s11500_s3 + $0x1a0] sm:$0xff] %v4882_v48  ;;  %v4779_v25 = vpop.f32.mrf.mxu0 }
 0x362   :  { %v2120_v37 = vpop.permute.xlu0 %2119  ;;  %v6884_v0 = vld [vmem:[#allocation3 + $0x48c] ss:$56 sps:$4 sm:$0xff]   ;;  %v4886_v56 = vpop.f32.mrf.mxu1  ;;  %v2163_v61 = vsel %vm2139_vm10, %v2090_v39, %v2106_v24  ;;  %5554 = vst [vmem:[%s11500_s3 + $0x200] sm:$0xff] %v4779_v25 }
 0x363   :  { %2485 = vst [vmem:[#allocation3 + $0x44c] sm:$0xff] %v6480_v46  ;;  %v2146_v60 = vsel %vm2139_vm10, %v2120_v37, %v11813_v1  ;;  %v2154_v6 = vsel %vm2139_vm10, %v2104_v41, %v2120_v37  ;;  %5290 = vmatprep.subr.bf16.mxu1 %v6884_v0  ;;  %5548 = vst [vmem:[%s11500_s3 + $0x1d0] sm:$0xff] %v4886_v56  ;;  %v2277_v54 = vmul.f32 %v10081_v20, %v2163_v61  ;;  %v4783_v9 = vpop.f32.mrf.mxu0 }
 0x364   :  { %v2271_v21 = vmul.f32 %v10092_v7, %v2154_v6  ;;  %v2272_v44 = vmul.f32 %v10096_v4, %v2146_v60  ;;  %5291 = vmatpush2.bf16.msra.mxu1 %v6882_v18  ;;  %v4888_v15 = vpop.f32.mrf.mxu1  ;;  %5560 = vst [vmem:[%s11500_s3 + $0x230] sm:$0xff] %v4783_v9 }
 0x365   :  { %v2122_v19 = vpop.permute.xlu1 %2121  ;;  %5549 = vst [vmem:[%s11500_s3 + $0x1d8] sm:$0xff] %v4888_v15  ;;  %v4785_v63 = vpop.f32.mrf.mxu0 }
 0x366   :  { %v6477_v30 = vpack.c.bf16 %v2271_v21, %v2270_v35  ;;  %v6478_v34 = vpack.c.bf16 %v2272_v44, %v2272_v44  ;;  %v2147_v42 = vsel %vm2139_vm10, %v2122_v19, %v10138_v27  ;;  %v2155_v53 = vsel %vm2139_vm10, %v2106_v24, %v2122_v19  ;;  %v2068_v28 = vpop.permute.xlu0 %2067  ;;  %v4890_v27 = vpop.f32.mrf.mxu1  ;;  %5561 = vst [vmem:[%s11500_s3 + $0x238] sm:$0xff] %v4785_v63  ;;  %v11814_v44 = vld [vmem:[#allocation15_spill] sm:$0xff] }
 0x367   :  { %v2278_v52 = vmul.f32 %v10092_v7, %v2155_v53  ;;  %v2279_v33 = vmul.f32 %v10096_v4, %v2147_v42  ;;  %5555 = vst [vmem:[%s11500_s3 + $0x208] sm:$0xff] %v4890_v27  ;;  %v2176_v14 = vsel %vm2139_vm10, %v10149_v17, %v2068_v28  ;;  %v4787_v3 = vpop.f32.mrf.mxu0  ;;  %v10857_v63 = vld [vmem:[%s11499_s1 + $0x10] ss:$8 sps:$4 sm:$0xff]  }
 0x368   :  { %2482 = vst [vmem:[#allocation3 + $0x41c] sm:$0xff] %v6477_v30  ;;  %2483 = vst [vmem:[#allocation3 + $0x424] sm:$0xf] %v6478_v34  ;;  %v4892_v31 = vpop.f32.mrf.mxu1  ;;  %v2254_v22 = vmul.f32 %v11811_v23, %v2176_v14 }
 0x369   :  { %v6481_v29 = vpack.c.bf16 %v2278_v52, %v2277_v54  ;;  %v6482_v58 = vpack.c.bf16 %v2279_v33, %v2279_v33  ;;  %v2070_v10 = vpop.permute.xlu1 %2069  ;;  %5556 = vst [vmem:[%s11500_s3 + $0x210] sm:$0xff] %v4892_v31  ;;  %5567 = vst [vmem:[%s11500_s3 + $0x268] sm:$0xff] %v4787_v3  ;;  %v4789_v45 = vpop.f32.mrf.mxu0  ;;  %v6896_v33 = vld [vmem:[#allocation3 + $0x344] ss:$56 sps:$4 sm:$0xff]   ;;  %v6899_v31 = vld [vmem:[#allocation3 + $0x2d4] ss:$56 sps:$4 sm:$0xff]  }
 0x36a   :  { %v2084_v43 = vpop.permute.xlu0 %2083  ;;  %v6887_v5 = vld [vmem:[#allocation3 + $0x414] ss:$56 sps:$4 sm:$0xff]   ;;  %v4896_v17 = vpop.f32.mrf.mxu1  ;;  %v2177_v8 = vsel %vm2139_vm10, %v10155_v51, %v2070_v10  ;;  %5568 = vst [vmem:[%s11500_s3 + $0x270] sm:$0xff] %v4789_v45  ;;  %v6888_v49 = vld [vmem:[#allocation3 + $0x418] ss:$56 sps:$4 sm:$0xff]  }
 0x36b   :  { %2486 = vst [vmem:[#allocation3 + $0x454] sm:$0xff] %v6481_v29  ;;  %2487 = vst [vmem:[#allocation3 + $0x45c] sm:$0xf] %v6482_v58  ;;  %v2168_v38 = vsel %vm2139_vm10, %v2068_v28, %v2084_v43  ;;  %5179 = vmatprep.subr.bf16.mxu0 %v6887_v5  ;;  %v2261_v41 = vmul.f32 %v11811_v23, %v2177_v8  ;;  %v4793_v48 = vpop.f32.mrf.mxu0  ;;  %v6894_v58 = vld [vmem:[#allocation3 + $0x340] ss:$56 sps:$4 sm:$0xff]  }
 0x36c   :  { %v2255_v36 = vmul.f32 %v11812_v55, %v2168_v38  ;;  %5562 = vst [vmem:[%s11500_s3 + $0x240] sm:$0xff] %v4896_v17  ;;  %5180 = vmatpush2.bf16.msra.mxu0 %v6885_v2  ;;  %v4898_v39 = vpop.f32.mrf.mxu1  ;;  %5574 = vst [vmem:[%s11500_s3 + $0x2a0] sm:$0xff] %v4793_v48  ;;  %v10843_v2 = vld [vmem:[%s11499_s1 + $0x14] ss:$8 sps:$4 sm:$0xff]   ;;  %v6897_v17 = vld [vmem:[#allocation3 + $0x2d0] ss:$56 sps:$4 sm:$0xff]  }
 0x36d   :  { %v2086_v13 = vpop.permute.xlu1 %2085  ;;  %5563 = vst [vmem:[%s11500_s3 + $0x248] sm:$0xff] %v4898_v39  ;;  %v6903_v8 = vld [vmem:[#allocation3 + $0x260] ss:$56 sps:$4 sm:$0xff]   ;;  %v10865_v39 = vld [vmem:[%s11499_s1 + $0x24] ss:$8 sps:$4 sm:$0xff]  }
 0x36e   :  { %v6468_v16 = vpack.c.bf16 %v2255_v36, %v2254_v22  ;;  %v2169_v12 = vsel %vm2139_vm10, %v2070_v10, %v2086_v13  ;;  %v2100_v51 = vpop.permute.xlu0 %2099  ;;  %v4900_v57 = vpop.f32.mrf.mxu1  ;;  %v10834_v10 = vld [vmem:[%s11499_s1] ss:$8 sps:$4 sm:$0xff]   ;;  %v6905_v22 = vld [vmem:[#allocation3 + $0x264] ss:$56 sps:$4 sm:$0xff]   ;;  %v6908_v36 = vld [vmem:[#allocation3 + $0x1f4] ss:$56 sps:$4 sm:$0xff]  }
 0x36f   :  { %v2262_v50 = vmul.f32 %v11812_v55, %v2169_v12  ;;  %5569 = vst [vmem:[%s11500_s3 + $0x278] sm:$0xff] %v4900_v57  ;;  %v2160_v59 = vsel %vm2139_vm10, %v2084_v43, %v2100_v51  ;;  %v6909_v12 = vld [vmem:[#allocation3 + $0x180] ss:$56 sps:$4 sm:$0xff]   ;;  %v6917_v57 = vld [vmem:[#allocation3 + $0xa4] ss:$56 sps:$4 sm:$0xff]  }
 0x370   :  { %2473 = vst [vmem:[#allocation3 + $0x3a4] sm:$0xff] %v6468_v16  ;;  %v4902_v23 = vpop.f32.mrf.mxu1  ;;  %v2256_v40 = vmul.f32 %v10081_v20, %v2160_v59  ;;  %v6911_v16 = vld [vmem:[#allocation3 + $0x184] ss:$56 sps:$4 sm:$0xff]   ;;  %v10873_v3 = vld [vmem:[%s11499_s1 + $0x20] ss:$8 sps:$4 sm:$0xff]  }
 0x371   :  { %v6472_v32 = vpack.c.bf16 %v2262_v50, %v2261_v41  ;;  %v2102_v46 = vpop.permute.xlu1 %2101  ;;  %5570 = vst [vmem:[%s11500_s3 + $0x280] sm:$0xff] %v4902_v23  ;;  %v6912_v41 = vld [vmem:[#allocation3 + $0x110] ss:$56 sps:$4 sm:$0xff]   ;;  %v10881_v50 = vld [vmem:[%s11499_s1 + $0x34] ss:$8 sps:$4 sm:$0xff]  }
 0x372   :  { %v2116_v55 = vpop.permute.xlu0 %2115  ;;  %v6890_v24 = vld [vmem:[#allocation3 + $0x41c] ss:$56 sps:$4 sm:$0xff]   ;;  %v4906_v0 = vpop.f32.mrf.mxu1  ;;  %v2161_v1 = vsel %vm2139_vm10, %v2086_v13, %v2102_v46  ;;  %v6906_v13 = vld [vmem:[#allocation3 + $0x1f0] ss:$56 sps:$4 sm:$0xff]   ;;  %v6915_v45 = vld [vmem:[#allocation3 + $0xa0] ss:$56 sps:$4 sm:$0xff]  }
 0x373   :  { %2477 = vst [vmem:[#allocation3 + $0x3dc] sm:$0xff] %v6472_v32  ;;  %v2144_v37 = vsel %vm2139_vm10, %v2116_v55, %v10187_v62  ;;  %v2152_v18 = vsel %vm2139_vm10, %v2100_v51, %v2116_v55  ;;  %5292 = vmatprep.subr.bf16.mxu1 %v6890_v24  ;;  %5576 = vst [vmem:[%s11500_s3 + $0x2b0] sm:$0xff] %v4906_v0  ;;  %v4795_v62 = vpop.f32.mrf.mxu0  ;;  %v2263_v30 = vmul.f32 %v10081_v20, %v2161_v1  ;;  %v6914_v51 = vld [vmem:[#allocation3 + $0x114] ss:$56 sps:$4 sm:$0xff]   ;;  %v10889_v59 = vld [vmem:[%s11499_s1 + $0x30] ss:$8 sps:$4 sm:$0xff]  }
 0x374   :  { %v2257_v60 = vmul.f32 %v10092_v7, %v2152_v18  ;;  %v2258_v6 = vmul.f32 %v10096_v4, %v2144_v37  ;;  %5293 = vmatpush2.bf16.msra.mxu1 %v6888_v49  ;;  %5575 = vst [vmem:[%s11500_s3 + $0x2a8] sm:$0xff] %v4795_v62  ;;  %v4908_v35 = vpop.f32.mrf.mxu1  ;;  %v6920_v32 = vld [vmem:[#allocation3 + $0x34] ss:$56 sps:$4 sm:$0xff]   ;;  %v6923_v55 = vld [vmem:[#allocation3 + $0x5e4] ss:$56 sps:$4 sm:$0xff]  }
 0x375   :  { %v2118_v56 = vpop.permute.xlu1 %2117  ;;  %5577 = vst [vmem:[%s11500_s3 + $0x2b8] sm:$0xff] %v4908_v35  ;;  %v4797_v15 = vpop.f32.mrf.mxu0  ;;  %v10897_v23 = vld [vmem:[%s11499_s1 + $0x44] ss:$8 sps:$4 sm:$0xff]   ;;  %v6921_v49 = vld [vmem:[#allocation3 + $0x5e0] ss:$56 sps:$4 sm:$0xff]  }
 0x376   :  { %v6469_v61 = vpack.c.bf16 %v2257_v60, %v2256_v40  ;;  %v6470_v21 = vpack.c.bf16 %v2258_v6, %v2258_v6  ;;  %v2145_v47 = vsel %vm2139_vm10, %v2118_v56, %v11814_v44  ;;  %v2153_v19 = vsel %vm2139_vm10, %v2102_v46, %v2118_v56  ;;  %5581 = vst [vmem:[%s11500_s3 + $0x2d8] sm:$0xff] %v4797_v15  ;;  %v4910_v53 = vpop.f32.mrf.mxu1  ;;  %v6918_v46 = vld [vmem:[#allocation3 + $0x30] ss:$56 sps:$4 sm:$0xff]   ;;  %v6926_v24 = vld [vmem:[#allocation3 + $0x574] ss:$56 sps:$4 sm:$0xff]  }
 0x377   :  { %v2264_v34 = vmul.f32 %v10092_v7, %v2153_v19  ;;  %v2265_v42 = vmul.f32 %v10096_v4, %v2145_v47  ;;  %5583 = vst [vmem:[%s11500_s3 + $0x2e8] sm:$0xff] %v4910_v53  ;;  %v4799_v26 = vpop.f32.mrf.mxu0  ;;  %v6891_v7 = vld [vmem:[#allocation3 + $0x3a0] ss:$56 sps:$4 sm:$0xff]   ;;  %v6924_v37 = vld [vmem:[#allocation3 + $0x570] ss:$56 sps:$4 sm:$0xff]  }
 0x378   :  { %2474 = vst [vmem:[#allocation3 + $0x3ac] sm:$0xff] %v6469_v61  ;;  %2475 = vst [vmem:[#allocation3 + $0x3b4] sm:$0xf] %v6470_v21  ;;  %v4912_v20 = vpop.f32.mrf.mxu1  ;;  %v10905_v48 = vld [vmem:[%s11499_s1 + $0x40] ss:$8 sps:$4 sm:$0xff]  }
 0x379   :  { %v6473_v28 = vpack.c.bf16 %v2264_v34, %v2263_v30  ;;  %v6474_v11 = vpack.c.bf16 %v2265_v42, %v2265_v42  ;;  %5582 = vst [vmem:[%s11500_s3 + $0x2e0] sm:$0xff] %v4799_v26  ;;  %5584 = vst [vmem:[%s11500_s3 + $0x2f0] sm:$0xff] %v4912_v20  ;;  %v4803_v54 = vpop.f32.mrf.mxu0  ;;  %v10913_v18 = vld [vmem:[%s11499_s1 + $0x54] ss:$8 sps:$4 sm:$0xff]   ;;  %v6927_v40 = vld [vmem:[#allocation3 + $0x500] ss:$56 sps:$4 sm:$0xff]  }
 0x37a   :  { %v6893_v4 = vld [vmem:[#allocation3 + $0x3a4] ss:$56 sps:$4 sm:$0xff]   ;;  %5588 = vst [vmem:[%s11500_s3 + $0x310] sm:$0xff] %v4803_v54  ;;  %v4916_v52 = vpop.f32.mrf.mxu1  ;;  %v6900_v9 = vld [vmem:[#allocation3 + $0x3a8] ss:$56 sps:$4 sm:$0xff]  }
 0x37b   :  { %2478 = vst [vmem:[#allocation3 + $0x3e4] sm:$0xff] %v6473_v28  ;;  %2479 = vst [vmem:[#allocation3 + $0x3ec] sm:$0xf] %v6474_v11  ;;  %5181 = vmatprep.subr.bf16.mxu0 %v6893_v4  ;;  %v4805_v27 = vpop.f32.mrf.mxu0  ;;  %v6929_v0 = vld [vmem:[#allocation3 + $0x504] ss:$56 sps:$4 sm:$0xff]  }
 0x37c   :  { %5590 = vst [vmem:[%s11500_s3 + $0x320] sm:$0xff] %v4916_v52  ;;  %5182 = vmatpush2.bf16.msra.mxu0 %v6891_v7  ;;  %5589 = vst [vmem:[%s11500_s3 + $0x318] sm:$0xff] %v4805_v27  ;;  %v4918_v25 = vpop.f32.mrf.mxu1  ;;  %v6932_v1 = vld [vmem:[#allocation3 + $0x494] ss:$56 sps:$4 sm:$0xff]   ;;  %v10921_v60 = vld [vmem:[%s11499_s1 + $0x50] ss:$8 sps:$4 sm:$0xff]  }
 0x37d   :  { %5377 = vmatprep.subr.bf16.mxu0 %v6896_v33  ;;  %5591 = vst [vmem:[%s11500_s3 + $0x328] sm:$0xff] %v4918_v25  ;;  %v4807_v29 = vpop.f32.mrf.mxu0  ;;  %v6930_v6 = vld [vmem:[#allocation3 + $0x490] ss:$56 sps:$4 sm:$0xff]   ;;  %v10929_v62 = vld [vmem:[%s11499_s1 + $0x64] ss:$8 sps:$4 sm:$0xff]  }
 0x37e   :  { %5595 = vst [vmem:[%s11500_s3 + $0x348] sm:$0xff] %v4807_v29  ;;  %v4920_v14 = vpop.f32.mrf.mxu1  ;;  %v6935_v56 = vld [vmem:[#allocation3 + $0x424] ss:$56 sps:$4 sm:$0xff]   ;;  %v6933_v61 = vld [vmem:[#allocation3 + $0x420] ss:$56 sps:$4 sm:$0xff]  }
 0x37f   :  { %5184 = vmatmul.mubr.bf16.vlgmr.msra.gmra.mxu0 %v10834_v10  ;;  %5597 = vst [vmem:[%s11500_s3 + $0x358] sm:$0xff] %v4920_v14  ;;  %v4809_v43 = vpop.f32.mrf.mxu0  ;;  %v10940_v44 = vld [vmem:[%s11499_s1 + $0x60] ss:$8 sps:$4 sm:$0xff]   ;;  %v10951_v30 = vld [vmem:[%s11499_s1 + $0x74] ss:$8 sps:$4 sm:$0xff]  }
 0x380   :  { %5378 = vmatpush1.bf16.msra.mxu0 %v6894_v58  ;;  %6188 = vmatprep.mubr.msk.bf16.mxu0 %vm4674_vm7, %v10843_v2  ;;  %5596 = vst [vmem:[%s11500_s3 + $0x350] sm:$0xff] %v4809_v43  ;;  %v4922_v5 = vpop.f32.mrf.mxu1  ;;  %v10968_v53 = vld [vmem:[%s11499_s1 + $0x70] ss:$8 sps:$4 sm:$0xff]   ;;  %v7050_v28 = vld [vmem:[%s11499_s1 + $0x4] ss:$8 sps:$4 sm:$0xff]  }
 0x381   :  { %5379 = vmatprep.subr.bf16.mxu0 %v6899_v31  ;;  %5598 = vst [vmem:[%s11500_s3 + $0x360] sm:$0xff] %v4922_v5 }
 0x382   :  { %v6902_v38 = vld [vmem:[#allocation3 + $0x3ac] ss:$56 sps:$4 sm:$0xff]   ;;  %v6936_v15 = vld [vmem:[#allocation3 + $0x3b0] ss:$56 sps:$4 sm:$0xff]  }
 0x383   :  { %5294 = vmatprep.subr.bf16.mxu1 %v6902_v38  ;;  %v6938_v21 = vld [vmem:[#allocation3 + $0x3b4] ss:$56 sps:$4 sm:$0xff]  }
 0x384   :  { %5295 = vmatpush2.bf16.msra.mxu1 %v6900_v9  ;;  %5380 = vmatpush1.bf16.msra.mxu0 %v6897_v17 }
 0x385   :  { %6547 = vmatprep.subr.bf16.mxu1 %v6896_v33  ;;  %5381 = vmatprep.subr.bf16.mxu0 %v6905_v22 }
 0x387   :  { %5297 = vmatmul.mubr.bf16.vlgmr.msra.gmra.mxu1 %v10834_v10  ;;  %5194 = vmatmul.mubr.bf16.gmra.mxu0 %v10857_v63 }
 0x388   :  { %6561 = vmatpush1.bf16.msra.mxu1 %v6894_v58  ;;  %5382 = vmatpush1.bf16.msra.mxu0 %v6903_v8 }
 0x389   :  { %6548 = vmatprep.subr.bf16.mxu1 %v6899_v31  ;;  %5383 = vmatprep.subr.bf16.mxu0 %v6908_v36 }
 0x38a   :  { %6196 = vmatprep.mubr.msk.bf16.mxu1 %vm4674_vm7, %v10843_v2  ;;  %6189 = vmatprep.mubr.msk.bf16.mxu0 %vm4674_vm7, %v10865_v39 }
 0x38c   :  { %6562 = vmatpush1.bf16.msra.mxu1 %v6897_v17  ;;  %5384 = vmatpush1.bf16.msra.mxu0 %v6906_v13 }
 0x38d   :  { %6549 = vmatprep.subr.bf16.mxu1 %v6905_v22  ;;  %5385 = vmatprep.subr.bf16.mxu0 %v6911_v16 }
 0x38f   :  { %5307 = vmatmul.mubr.bf16.gmra.mxu1 %v10857_v63  ;;  %5204 = vmatmul.mubr.bf16.gmra.mxu0 %v10873_v3 }
 0x390   :  { %6563 = vmatpush1.bf16.msra.mxu1 %v6903_v8  ;;  %5386 = vmatpush1.bf16.msra.mxu0 %v6909_v12 }
 0x391   :  { %6550 = vmatprep.subr.bf16.mxu1 %v6908_v36  ;;  %5387 = vmatprep.subr.bf16.mxu0 %v6914_v51 }
 0x392   :  { %6197 = vmatprep.mubr.msk.bf16.mxu1 %vm4674_vm7, %v10865_v39  ;;  %6190 = vmatprep.mubr.msk.bf16.mxu0 %vm4674_vm7, %v10881_v50 }
 0x394   :  { %6564 = vmatpush1.bf16.msra.mxu1 %v6906_v13  ;;  %5388 = vmatpush1.bf16.msra.mxu0 %v6912_v41 }
 0x395   :  { %6551 = vmatprep.subr.bf16.mxu1 %v6911_v16  ;;  %5389 = vmatprep.subr.bf16.mxu0 %v6917_v57 }
 0x397   :  { %5317 = vmatmul.mubr.bf16.gmra.mxu1 %v10873_v3  ;;  %5214 = vmatmul.mubr.bf16.gmra.mxu0 %v10889_v59 }
 0x398   :  { %6565 = vmatpush1.bf16.msra.mxu1 %v6909_v12  ;;  %5390 = vmatpush1.bf16.msra.mxu0 %v6915_v45 }
 0x399   :  { %6552 = vmatprep.subr.bf16.mxu1 %v6914_v51  ;;  %5391 = vmatprep.subr.bf16.mxu0 %v6920_v32 }
 0x39a   :  { %6198 = vmatprep.mubr.msk.bf16.mxu1 %vm4674_vm7, %v10881_v50  ;;  %6191 = vmatprep.mubr.msk.bf16.mxu0 %vm4674_vm7, %v10897_v23 }
 0x39c   :  { %6566 = vmatpush1.bf16.msra.mxu1 %v6912_v41  ;;  %5392 = vmatpush1.bf16.msra.mxu0 %v6918_v46 }
 0x39d   :  { %6553 = vmatprep.subr.bf16.mxu1 %v6917_v57  ;;  %5397 = vmatprep.subr.bf16.mxu0 %v6923_v55 }
 0x39f   :  { %5327 = vmatmul.mubr.bf16.gmra.mxu1 %v10889_v59  ;;  %5224 = vmatmul.mubr.bf16.gmra.mxu0 %v10905_v48 }
 0x3a0   :  { %6567 = vmatpush1.bf16.msra.mxu1 %v6915_v45  ;;  %5398 = vmatpush2.bf16.msra.mxu0 %v6921_v49 }
 0x3a1   :  { %6554 = vmatprep.subr.bf16.mxu1 %v6920_v32  ;;  %5399 = vmatprep.subr.bf16.mxu0 %v6926_v24 }
 0x3a2   :  { %6199 = vmatprep.mubr.msk.bf16.mxu1 %vm4674_vm7, %v10897_v23  ;;  %6192 = vmatprep.mubr.msk.bf16.mxu0 %vm4674_vm7, %v10913_v18 }
 0x3a4   :  { %6568 = vmatpush1.bf16.msra.mxu1 %v6918_v46  ;;  %5400 = vmatpush2.bf16.msra.mxu0 %v6924_v37 }
 0x3a5   :  { %6555 = vmatprep.subr.bf16.mxu1 %v6923_v55  ;;  %5401 = vmatprep.subr.bf16.mxu0 %v6929_v0 }
 0x3a7   :  { %5337 = vmatmul.mubr.bf16.gmra.mxu1 %v10905_v48  ;;  %5234 = vmatmul.mubr.bf16.gmra.mxu0 %v10921_v60 }
 0x3a8   :  { %6569 = vmatpush2.bf16.msra.mxu1 %v6921_v49  ;;  %5402 = vmatpush2.bf16.msra.mxu0 %v6927_v40 }
 0x3a9   :  { %6556 = vmatprep.subr.bf16.mxu1 %v6926_v24  ;;  %5403 = vmatprep.subr.bf16.mxu0 %v6932_v1 }
 0x3aa   :  { %6200 = vmatprep.mubr.msk.bf16.mxu1 %vm4674_vm7, %v10913_v18  ;;  %6193 = vmatprep.mubr.msk.bf16.mxu0 %vm4674_vm7, %v10929_v62 }
 0x3ab   :  { %v4959_v35 = vpop.f32.mrf.mxu0 }
 0x3ac   :  { %6570 = vmatpush2.bf16.msra.mxu1 %v6924_v37  ;;  %5404 = vmatpush2.bf16.msra.mxu0 %v6930_v6  ;;  %5494 = vst [vmem:[%s11500_s3 + $0x20] sm:$0xff] %v4959_v35 }
 0x3ad   :  { %6557 = vmatprep.subr.bf16.mxu1 %v6929_v0  ;;  %5405 = vmatprep.subr.bf16.mxu0 %v6935_v56  ;;  %v4961_v47 = vpop.f32.mrf.mxu0 }
 0x3ae   :  { %5495 = vst [vmem:[%s11500_s3 + $0x28] sm:$0xff] %v4961_v47 }
 0x3af   :  { %5347 = vmatmul.mubr.bf16.gmra.mxu1 %v10921_v60  ;;  %5244 = vmatmul.mubr.bf16.gmra.mxu0 %v10940_v44  ;;  %v4963_v19 = vpop.f32.mrf.mxu0 }
 0x3b0   :  { %6571 = vmatpush2.bf16.msra.mxu1 %v6927_v40  ;;  %5406 = vmatpush2.bf16.msra.mxu0 %v6933_v61  ;;  %5501 = vst [vmem:[%s11500_s3 + $0x58] sm:$0xff] %v4963_v19 }
 0x3b1   :  { %6558 = vmatprep.subr.bf16.mxu1 %v6932_v1  ;;  %5407 = vmatprep.subr.bf16.mxu0 %v6938_v21  ;;  %v4965_v34 = vpop.f32.mrf.mxu0 }
 0x3b2   :  { %6201 = vmatprep.mubr.msk.bf16.mxu1 %vm4674_vm7, %v10929_v62  ;;  %6194 = vmatprep.mubr.msk.bf16.mxu0 %vm4674_vm7, %v10951_v30  ;;  %5502 = vst [vmem:[%s11500_s3 + $0x60] sm:$0xff] %v4965_v34 }
 0x3b4   :  { %6572 = vmatpush2.bf16.msra.mxu1 %v6930_v6  ;;  %5408 = vmatpush2.bf16.msra.mxu0 %v6936_v15 }
 0x3b5   :  { %6559 = vmatprep.subr.bf16.mxu1 %v6935_v56  ;;  %v4969_v42 = vpop.f32.mrf.mxu0 }
 0x3b6   :  { %5508 = vst [vmem:[%s11500_s3 + $0x90] sm:$0xff] %v4969_v42 }
 0x3b7   :  { %5357 = vmatmul.mubr.bf16.gmra.mxu1 %v10940_v44  ;;  %5254 = vmatmul.mubr.bf16.gmra.mxu0 %v10968_v53  ;;  %v4971_v26 = vpop.f32.mrf.mxu0 }
 0x3b8   :  { %6573 = vmatpush2.bf16.msra.mxu1 %v6933_v61  ;;  %6202 = vmatprep.mubr.msk.bf16.mxu1 %vm4674_vm7, %v10951_v30  ;;  %5509 = vst [vmem:[%s11500_s3 + $0x98] sm:$0xff] %v4971_v26 }
 0x3b9   :  { %6560 = vmatprep.subr.bf16.mxu1 %v6938_v21  ;;  %6203 = vmatprep.mubr.msk.bf16.mxu0 %vm4674_vm7, %v7050_v28  ;;  %v5072_v11 = vpop.f32.mrf.mxu1  ;;  %v4973_v20 = vpop.f32.mrf.mxu0 }
 0x3ba   :  { %5496 = vst.msk [vmem:[%s11500_s3 + $0x30] sm:$0xff] %vm77_vm0, %v5072_v11  ;;  %5515 = vst [vmem:[%s11500_s3 + $0xc8] sm:$0xff] %v4973_v20 }
 0x3bb   :  { %v5074_v7 = vpop.f32.mrf.mxu1  ;;  %v4975_v4 = vpop.f32.mrf.mxu0 }
 0x3bc   :  { %6574 = vmatpush2.bf16.msra.mxu1 %v6936_v15  ;;  %6211 = vst [vmem:[%s11500_s3 + $0x380] sm:$0xff] %v5074_v7  ;;  %5516 = vst [vmem:[%s11500_s3 + $0xd0] sm:$0xff] %v4975_v4 }
 0x3bd   :  { %v5076_v54 = vpop.f32.mrf.mxu1  ;;  %v4979_v52 = vpop.f32.mrf.mxu0 }
 0x3be   :  { %5503 = vst.msk [vmem:[%s11500_s3 + $0x68] sm:$0xff] %vm77_vm0, %v5076_v54  ;;  %5522 = vst [vmem:[%s11500_s3 + $0x100] sm:$0xff] %v4979_v52 }
 0x3bf   :  { %5367 = vmatmul.mubr.bf16.gmra.mxu1 %v10968_v53  ;;  %5410 = vmatmul.mubr.bf16.vlgmr.msra.gmra.mxu0 %v10834_v10  ;;  %v5078_v33 = vpop.f32.mrf.mxu1  ;;  %v4981_v27 = vpop.f32.mrf.mxu0 }
 0x3c0   :  { %6207 = vmatprep.mubr.msk.bf16.mxu1 %vm4674_vm7, %v10897_v23  ;;  %6204 = vmatprep.mubr.msk.bf16.mxu0 %vm4674_vm7, %v10843_v2  ;;  %6218 = vst [vmem:[%s11500_s3 + $0x3b8] sm:$0xff] %v5078_v33  ;;  %5523 = vst [vmem:[%s11500_s3 + $0x108] sm:$0xff] %v4981_v27 }
 0x3c1   :  { %v5082_v25 = vpop.f32.mrf.mxu1  ;;  %v4983_v29 = vpop.f32.mrf.mxu0 }
 0x3c2   :  { %5510 = vst.msk [vmem:[%s11500_s3 + $0xa0] sm:$0xff] %vm77_vm0, %v5082_v25  ;;  %5529 = vst [vmem:[%s11500_s3 + $0x138] sm:$0xff] %v4983_v29 }
 0x3c3   :  { %v5084_v58 = vpop.f32.mrf.mxu1  ;;  %v4985_v14 = vpop.f32.mrf.mxu0 }
 0x3c4   :  { %6225 = vst [vmem:[%s11500_s3 + $0x3f0] sm:$0xff] %v5084_v58  ;;  %5530 = vst [vmem:[%s11500_s3 + $0x140] sm:$0xff] %v4985_v14 }
 0x3c5   :  { %v5086_v10 = vpop.f32.mrf.mxu1  ;;  %v4989_v31 = vpop.f32.mrf.mxu0 }
 0x3c6   :  { %5517 = vst.msk [vmem:[%s11500_s3 + $0xd8] sm:$0xff] %vm77_vm0, %v5086_v10  ;;  %5536 = vst [vmem:[%s11500_s3 + $0x170] sm:$0xff] %v4989_v31 }
 0x3c7   :  { %5450 = vmatmul.mubr.bf16.vlgmr.msra.gmra.mxu1 %v10905_v48  ;;  %5420 = vmatmul.mubr.bf16.gmra.mxu0 %v10857_v63  ;;  %v5088_v43 = vpop.f32.mrf.mxu1  ;;  %v4991_v2 = vpop.f32.mrf.mxu0 }
 0x3c8   :  { %6208 = vmatprep.mubr.msk.bf16.mxu1 %vm4674_vm7, %v10913_v18  ;;  %6205 = vmatprep.mubr.msk.bf16.mxu0 %vm4674_vm7, %v10865_v39  ;;  %6232 = vst [vmem:[%s11500_s3 + $0x428] sm:$0xff] %v5088_v43  ;;  %5537 = vst [vmem:[%s11500_s3 + $0x178] sm:$0xff] %v4991_v2 }
 0x3c9   :  { %v5092_v5 = vpop.f32.mrf.mxu1  ;;  %v4993_v9 = vpop.f32.mrf.mxu0 }
 0x3ca   :  { %5524 = vst.msk [vmem:[%s11500_s3 + $0x110] sm:$0xff] %vm77_vm0, %v5092_v5  ;;  %5543 = vst [vmem:[%s11500_s3 + $0x1a8] sm:$0xff] %v4993_v9 }
 0x3cb   :  { %v5094_v38 = vpop.f32.mrf.mxu1  ;;  %v4995_v17 = vpop.f32.mrf.mxu0 }
 0x3cc   :  { %6239 = vst [vmem:[%s11500_s3 + $0x460] sm:$0xff] %v5094_v38  ;;  %5544 = vst [vmem:[%s11500_s3 + $0x1b0] sm:$0xff] %v4995_v17 }
 0x3cd   :  { %v5096_v22 = vpop.f32.mrf.mxu1  ;;  %v4999_v8 = vpop.f32.mrf.mxu0 }
 0x3ce   :  { %5531 = vst.msk [vmem:[%s11500_s3 + $0x148] sm:$0xff] %vm77_vm0, %v5096_v22  ;;  %5550 = vst [vmem:[%s11500_s3 + $0x1e0] sm:$0xff] %v4999_v8 }
 0x3cf   :  { %5460 = vmatmul.mubr.bf16.gmra.mxu1 %v10921_v60  ;;  %5430 = vmatmul.mubr.bf16.gmra.mxu0 %v10873_v3  ;;  %v5098_v36 = vpop.f32.mrf.mxu1  ;;  %v5001_v63 = vpop.f32.mrf.mxu0 }
 0x3d0   :  { %6209 = vmatprep.mubr.msk.bf16.mxu1 %vm4674_vm7, %v10929_v62  ;;  %6206 = vmatprep.mubr.msk.bf16.mxu0 %vm4674_vm7, %v10881_v50  ;;  %6246 = vst [vmem:[%s11500_s3 + $0x498] sm:$0xff] %v5098_v36  ;;  %5551 = vst [vmem:[%s11500_s3 + $0x1e8] sm:$0xff] %v5001_v63 }
 0x3d1   :  { %v5102_v13 = vpop.f32.mrf.mxu1  ;;  %v5003_v39 = vpop.f32.mrf.mxu0 }
 0x3d2   :  { %5538 = vst.msk [vmem:[%s11500_s3 + $0x180] sm:$0xff] %vm77_vm0, %v5102_v13  ;;  %5557 = vst [vmem:[%s11500_s3 + $0x218] sm:$0xff] %v5003_v39 }
 0x3d3   :  { %v5104_v16 = vpop.f32.mrf.mxu1  ;;  %v5005_v12 = vpop.f32.mrf.mxu0 }
 0x3d4   :  { %6253 = vst [vmem:[%s11500_s3 + $0x4d0] sm:$0xff] %v5104_v16  ;;  %5558 = vst [vmem:[%s11500_s3 + $0x220] sm:$0xff] %v5005_v12 }
 0x3d5   :  { %v5106_v51 = vpop.f32.mrf.mxu1  ;;  %v5009_v3 = vpop.f32.mrf.mxu0 }
 0x3d6   :  { %5545 = vst.msk [vmem:[%s11500_s3 + $0x1b8] sm:$0xff] %vm77_vm0, %v5106_v51  ;;  %5564 = vst [vmem:[%s11500_s3 + $0x250] sm:$0xff] %v5009_v3 }
 0x3d7   :  { %5470 = vmatmul.mubr.bf16.gmra.mxu1 %v10940_v44  ;;  %5440 = vmatmul.mubr.bf16.gmra.mxu0 %v10889_v59  ;;  %v5108_v41 = vpop.f32.mrf.mxu1  ;;  %v5011_v50 = vpop.f32.mrf.mxu0 }
 0x3d8   :  { %6210 = vmatprep.mubr.msk.bf16.mxu1 %vm4674_vm7, %v10951_v30  ;;  %6260 = vst [vmem:[%s11500_s3 + $0x508] sm:$0xff] %v5108_v41  ;;  %5565 = vst [vmem:[%s11500_s3 + $0x258] sm:$0xff] %v5011_v50 }
 0x3d9   :  { %v5112_v57 = vpop.f32.mrf.mxu1  ;;  %v5013_v45 = vpop.f32.mrf.mxu0 }
 0x3da   :  { %5552 = vst.msk [vmem:[%s11500_s3 + $0x1f0] sm:$0xff] %vm77_vm0, %v5112_v57  ;;  %5571 = vst [vmem:[%s11500_s3 + $0x288] sm:$0xff] %v5013_v45 }
 0x3db   :  { %v5114_v32 = vpop.f32.mrf.mxu1  ;;  %v5015_v59 = vpop.f32.mrf.mxu0 }
 0x3dc   :  { %6267 = vst [vmem:[%s11500_s3 + $0x540] sm:$0xff] %v5114_v32  ;;  %5572 = vst [vmem:[%s11500_s3 + $0x290] sm:$0xff] %v5015_v59 }
 0x3dd   :  { %v5116_v46 = vpop.f32.mrf.mxu1  ;;  %v5019_v23 = vpop.f32.mrf.mxu0 }
 0x3de   :  { %5559 = vst.msk [vmem:[%s11500_s3 + $0x228] sm:$0xff] %vm77_vm0, %v5116_v46  ;;  %5578 = vst [vmem:[%s11500_s3 + $0x2c0] sm:$0xff] %v5019_v23 }
 0x3df   :  { %5480 = vmatmul.mubr.bf16.gmra.mxu1 %v10968_v53  ;;  %v5118_v55 = vpop.f32.mrf.mxu1  ;;  %v5021_v49 = vpop.f32.mrf.mxu0 }
 0x3e0   :  { %6274 = vst [vmem:[%s11500_s3 + $0x578] sm:$0xff] %v5118_v55  ;;  %5579 = vst [vmem:[%s11500_s3 + $0x2c8] sm:$0xff] %v5021_v49 }
 0x3e1   :  { %v5122_v24 = vpop.f32.mrf.mxu1  ;;  %v5023_v48 = vpop.f32.mrf.mxu0 }
 0x3e2   :  { %5566 = vst.msk [vmem:[%s11500_s3 + $0x260] sm:$0xff] %vm77_vm0, %v5122_v24  ;;  %5585 = vst [vmem:[%s11500_s3 + $0x2f8] sm:$0xff] %v5023_v48 }
 0x3e3   :  { %v5124_v37 = vpop.f32.mrf.mxu1  ;;  %v5025_v18 = vpop.f32.mrf.mxu0 }
 0x3e4   :  { %6281 = vst [vmem:[%s11500_s3 + $0x5b0] sm:$0xff] %v5124_v37  ;;  %5586 = vst [vmem:[%s11500_s3 + $0x300] sm:$0xff] %v5025_v18 }
 0x3e5   :  { %v5126_v0 = vpop.f32.mrf.mxu1 }
 0x3e6   :  { %5573 = vst.msk [vmem:[%s11500_s3 + $0x298] sm:$0xff] %vm77_vm0, %v5126_v0  ;;  %v5029_v40 = vpop.f32.mrf.mxu0 }
 0x3e7   :  { %v5128_v1 = vpop.f32.mrf.mxu1  ;;  %5592 = vst [vmem:[%s11500_s3 + $0x330] sm:$0xff] %v5029_v40 }
 0x3e8   :  { %6288 = vst [vmem:[%s11500_s3 + $0x5e8] sm:$0xff] %v5128_v1  ;;  %v5031_v60 = vpop.f32.mrf.mxu0 }
 0x3e9   :  { %5593 = vst [vmem:[%s11500_s3 + $0x338] sm:$0xff] %v5031_v60 }
 0x3ea   :  { %v5132_v6 = vpop.f32.mrf.mxu1  ;;  %v5033_v62 = vpop.f32.mrf.mxu0 }
 0x3eb   :  { %5580 = vst.msk [vmem:[%s11500_s3 + $0x2d0] sm:$0xff] %vm77_vm0, %v5132_v6  ;;  %5599 = vst [vmem:[%s11500_s3 + $0x368] sm:$0xff] %v5033_v62 }
 0x3ec   :  { %v5134_v56 = vpop.f32.mrf.mxu1  ;;  %v5035_v35 = vpop.f32.mrf.mxu0 }
 0x3ed   :  { %6295 = vst [vmem:[%s11500_s3 + $0x620] sm:$0xff] %v5134_v56  ;;  %5600 = vst [vmem:[%s11500_s3 + $0x370] sm:$0xff] %v5035_v35 }
 0x3ee   :  { %v5136_v61 = vpop.f32.mrf.mxu1 }
 0x3ef   :  { %5587 = vst.msk [vmem:[%s11500_s3 + $0x308] sm:$0xff] %vm77_vm0, %v5136_v61 }
 0x3f0   :  { %v5138_v21 = vpop.f32.mrf.mxu1 }
 0x3f1   :  { %6302 = vst [vmem:[%s11500_s3 + $0x658] sm:$0xff] %v5138_v21 }
 0x3f2   :  { %v5142_v44 = vpop.f32.mrf.mxu1 }
 0x3f3   :  { %5594 = vst.msk [vmem:[%s11500_s3 + $0x340] sm:$0xff] %vm77_vm0, %v5142_v44 }
 0x3f4   :  { %v5144_v47 = vpop.f32.mrf.mxu1 }
 0x3f5   :  { %6309 = vst [vmem:[%s11500_s3 + $0x690] sm:$0xff] %v5144_v47 }
 0x3f6   :  { %v5146_v19 = vpop.f32.mrf.mxu1 }
 0x3f7   :  { %5601 = vst.msk [vmem:[%s11500_s3 + $0x378] sm:$0xff] %vm77_vm0, %v5146_v19 }
 0x3f8   :  { %v5148_v15 = vpop.f32.mrf.mxu1 }
 0x3f9   :  { %6316 = vst [vmem:[%s11500_s3 + $0x6c8] sm:$0xff] %v5148_v15 }
 0x43f   :  { %v5185_v30 = vpop.f32.mrf.mxu0 }
 0x440   :  { %6212 = vst [vmem:[%s11500_s3 + $0x388] sm:$0xff] %v5185_v30 }
 0x441   :  { %v5187_v34 = vpop.f32.mrf.mxu0 }
 0x442   :  { %6213 = vst [vmem:[%s11500_s3 + $0x390] sm:$0xff] %v5187_v34 }
 0x443   :  { %v5189_v42 = vpop.f32.mrf.mxu0 }
 0x444   :  { %6219 = vst [vmem:[%s11500_s3 + $0x3c0] sm:$0xff] %v5189_v42 }
 0x445   :  { %v5191_v53 = vpop.f32.mrf.mxu0 }
 0x446   :  { %6220 = vst [vmem:[%s11500_s3 + $0x3c8] sm:$0xff] %v5191_v53 }
 0x447   :  { %v5298_v26 = vpop.f32.mrf.mxu1  ;;  %v5195_v28 = vpop.f32.mrf.mxu0 }
 0x448   :  { %6214 = vst [vmem:[%s11500_s3 + $0x398] sm:$0xff] %v5298_v26  ;;  %6226 = vst [vmem:[%s11500_s3 + $0x3f8] sm:$0xff] %v5195_v28 }
 0x449   :  { %v5300_v11 = vpop.f32.mrf.mxu1  ;;  %v5197_v20 = vpop.f32.mrf.mxu0 }
 0x44a   :  { %6215 = vst [vmem:[%s11500_s3 + $0x3a0] sm:$0xff] %v5300_v11  ;;  %6227 = vst [vmem:[%s11500_s3 + $0x400] sm:$0xff] %v5197_v20 }
 0x44b   :  { %v5302_v7 = vpop.f32.mrf.mxu1  ;;  %v5199_v4 = vpop.f32.mrf.mxu0 }
 0x44c   :  { %6221 = vst [vmem:[%s11500_s3 + $0x3d0] sm:$0xff] %v5302_v7  ;;  %6233 = vst [vmem:[%s11500_s3 + $0x430] sm:$0xff] %v5199_v4 }
 0x44d   :  { %v5304_v54 = vpop.f32.mrf.mxu1  ;;  %v5201_v52 = vpop.f32.mrf.mxu0 }
 0x44e   :  { %6222 = vst [vmem:[%s11500_s3 + $0x3d8] sm:$0xff] %v5304_v54  ;;  %6234 = vst [vmem:[%s11500_s3 + $0x438] sm:$0xff] %v5201_v52 }
 0x44f   :  { %v5308_v33 = vpop.f32.mrf.mxu1  ;;  %v5205_v27 = vpop.f32.mrf.mxu0 }
 0x450   :  { %6228 = vst [vmem:[%s11500_s3 + $0x408] sm:$0xff] %v5308_v33  ;;  %6240 = vst [vmem:[%s11500_s3 + $0x468] sm:$0xff] %v5205_v27 }
 0x451   :  { %v5310_v25 = vpop.f32.mrf.mxu1  ;;  %v5207_v29 = vpop.f32.mrf.mxu0 }
 0x452   :  { %6229 = vst [vmem:[%s11500_s3 + $0x410] sm:$0xff] %v5310_v25  ;;  %6241 = vst [vmem:[%s11500_s3 + $0x470] sm:$0xff] %v5207_v29 }
 0x453   :  { %v5312_v58 = vpop.f32.mrf.mxu1  ;;  %v5209_v14 = vpop.f32.mrf.mxu0 }
 0x454   :  { %6235 = vst [vmem:[%s11500_s3 + $0x440] sm:$0xff] %v5312_v58  ;;  %6247 = vst [vmem:[%s11500_s3 + $0x4a0] sm:$0xff] %v5209_v14 }
 0x455   :  { %v5314_v10 = vpop.f32.mrf.mxu1  ;;  %v5211_v31 = vpop.f32.mrf.mxu0 }
 0x456   :  { %6236 = vst [vmem:[%s11500_s3 + $0x448] sm:$0xff] %v5314_v10  ;;  %6248 = vst [vmem:[%s11500_s3 + $0x4a8] sm:$0xff] %v5211_v31 }
 0x457   :  { %v5318_v43 = vpop.f32.mrf.mxu1  ;;  %v5215_v2 = vpop.f32.mrf.mxu0 }
 0x458   :  { %6242 = vst [vmem:[%s11500_s3 + $0x478] sm:$0xff] %v5318_v43  ;;  %6254 = vst [vmem:[%s11500_s3 + $0x4d8] sm:$0xff] %v5215_v2 }
 0x459   :  { %v5320_v5 = vpop.f32.mrf.mxu1  ;;  %v5217_v9 = vpop.f32.mrf.mxu0 }
 0x45a   :  { %6243 = vst [vmem:[%s11500_s3 + $0x480] sm:$0xff] %v5320_v5  ;;  %6255 = vst [vmem:[%s11500_s3 + $0x4e0] sm:$0xff] %v5217_v9 }
 0x45b   :  { %v5322_v38 = vpop.f32.mrf.mxu1  ;;  %v5219_v17 = vpop.f32.mrf.mxu0 }
 0x45c   :  { %6249 = vst [vmem:[%s11500_s3 + $0x4b0] sm:$0xff] %v5322_v38  ;;  %6261 = vst [vmem:[%s11500_s3 + $0x510] sm:$0xff] %v5219_v17 }
 0x45d   :  { %v5324_v22 = vpop.f32.mrf.mxu1  ;;  %v5221_v8 = vpop.f32.mrf.mxu0 }
 0x45e   :  { %6250 = vst [vmem:[%s11500_s3 + $0x4b8] sm:$0xff] %v5324_v22  ;;  %6262 = vst [vmem:[%s11500_s3 + $0x518] sm:$0xff] %v5221_v8 }
 0x45f   :  { %v5328_v36 = vpop.f32.mrf.mxu1  ;;  %v5225_v63 = vpop.f32.mrf.mxu0 }
 0x460   :  { %6256 = vst [vmem:[%s11500_s3 + $0x4e8] sm:$0xff] %v5328_v36  ;;  %6268 = vst [vmem:[%s11500_s3 + $0x548] sm:$0xff] %v5225_v63 }
 0x461   :  { %v5330_v13 = vpop.f32.mrf.mxu1  ;;  %v5227_v39 = vpop.f32.mrf.mxu0 }
 0x462   :  { %6257 = vst [vmem:[%s11500_s3 + $0x4f0] sm:$0xff] %v5330_v13  ;;  %6269 = vst [vmem:[%s11500_s3 + $0x550] sm:$0xff] %v5227_v39 }
 0x463   :  { %v5332_v16 = vpop.f32.mrf.mxu1  ;;  %v5229_v12 = vpop.f32.mrf.mxu0 }
 0x464   :  { %6263 = vst [vmem:[%s11500_s3 + $0x520] sm:$0xff] %v5332_v16  ;;  %6275 = vst [vmem:[%s11500_s3 + $0x580] sm:$0xff] %v5229_v12 }
 0x465   :  { %v5334_v51 = vpop.f32.mrf.mxu1  ;;  %v5231_v3 = vpop.f32.mrf.mxu0 }
 0x466   :  { %6264 = vst [vmem:[%s11500_s3 + $0x528] sm:$0xff] %v5334_v51  ;;  %6276 = vst [vmem:[%s11500_s3 + $0x588] sm:$0xff] %v5231_v3 }
 0x467   :  { %v5338_v41 = vpop.f32.mrf.mxu1  ;;  %v5235_v50 = vpop.f32.mrf.mxu0 }
 0x468   :  { %6270 = vst [vmem:[%s11500_s3 + $0x558] sm:$0xff] %v5338_v41  ;;  %6282 = vst [vmem:[%s11500_s3 + $0x5b8] sm:$0xff] %v5235_v50 }
 0x469   :  { %v5340_v57 = vpop.f32.mrf.mxu1  ;;  %v5237_v45 = vpop.f32.mrf.mxu0 }
 0x46a   :  { %6271 = vst [vmem:[%s11500_s3 + $0x560] sm:$0xff] %v5340_v57  ;;  %6283 = vst [vmem:[%s11500_s3 + $0x5c0] sm:$0xff] %v5237_v45 }
 0x46b   :  { %v5342_v32 = vpop.f32.mrf.mxu1  ;;  %v5239_v59 = vpop.f32.mrf.mxu0 }
 0x46c   :  { %6277 = vst [vmem:[%s11500_s3 + $0x590] sm:$0xff] %v5342_v32  ;;  %6289 = vst [vmem:[%s11500_s3 + $0x5f0] sm:$0xff] %v5239_v59 }
 0x46d   :  { %v5344_v46 = vpop.f32.mrf.mxu1  ;;  %v5241_v23 = vpop.f32.mrf.mxu0 }
 0x46e   :  { %6278 = vst [vmem:[%s11500_s3 + $0x598] sm:$0xff] %v5344_v46  ;;  %6290 = vst [vmem:[%s11500_s3 + $0x5f8] sm:$0xff] %v5241_v23 }
 0x46f   :  { %v5348_v55 = vpop.f32.mrf.mxu1  ;;  %v5245_v49 = vpop.f32.mrf.mxu0 }
 0x470   :  { %6284 = vst [vmem:[%s11500_s3 + $0x5c8] sm:$0xff] %v5348_v55  ;;  %6296 = vst [vmem:[%s11500_s3 + $0x628] sm:$0xff] %v5245_v49 }
 0x471   :  { %v5350_v24 = vpop.f32.mrf.mxu1  ;;  %v5247_v48 = vpop.f32.mrf.mxu0 }
 0x472   :  { %6285 = vst [vmem:[%s11500_s3 + $0x5d0] sm:$0xff] %v5350_v24  ;;  %6297 = vst [vmem:[%s11500_s3 + $0x630] sm:$0xff] %v5247_v48 }
 0x473   :  { %v5352_v37 = vpop.f32.mrf.mxu1  ;;  %v5249_v18 = vpop.f32.mrf.mxu0 }
 0x474   :  { %6291 = vst [vmem:[%s11500_s3 + $0x600] sm:$0xff] %v5352_v37  ;;  %6303 = vst [vmem:[%s11500_s3 + $0x660] sm:$0xff] %v5249_v18 }
 0x475   :  { %v5354_v0 = vpop.f32.mrf.mxu1  ;;  %v5251_v40 = vpop.f32.mrf.mxu0 }
 0x476   :  { %6292 = vst [vmem:[%s11500_s3 + $0x608] sm:$0xff] %v5354_v0  ;;  %6304 = vst [vmem:[%s11500_s3 + $0x668] sm:$0xff] %v5251_v40 }
 0x477   :  { %v5358_v1 = vpop.f32.mrf.mxu1  ;;  %v5255_v60 = vpop.f32.mrf.mxu0 }
 0x478   :  { %6298 = vst [vmem:[%s11500_s3 + $0x638] sm:$0xff] %v5358_v1  ;;  %6310 = vst [vmem:[%s11500_s3 + $0x698] sm:$0xff] %v5255_v60 }
 0x479   :  { %v5360_v6 = vpop.f32.mrf.mxu1  ;;  %v5257_v62 = vpop.f32.mrf.mxu0 }
 0x47a   :  { %6299 = vst [vmem:[%s11500_s3 + $0x640] sm:$0xff] %v5360_v6  ;;  %6311 = vst [vmem:[%s11500_s3 + $0x6a0] sm:$0xff] %v5257_v62 }
 0x47b   :  { %v5362_v56 = vpop.f32.mrf.mxu1  ;;  %v5259_v35 = vpop.f32.mrf.mxu0 }
 0x47c   :  { %6305 = vst [vmem:[%s11500_s3 + $0x670] sm:$0xff] %v5362_v56  ;;  %6317 = vst [vmem:[%s11500_s3 + $0x6d0] sm:$0xff] %v5259_v35 }
 0x47d   :  { %v5364_v61 = vpop.f32.mrf.mxu1  ;;  %v5261_v21 = vpop.f32.mrf.mxu0 }
 0x47e   :  { %6306 = vst [vmem:[%s11500_s3 + $0x678] sm:$0xff] %v5364_v61  ;;  %6318 = vst [vmem:[%s11500_s3 + $0x6d8] sm:$0xff] %v5261_v21 }
 0x47f   :  { %v5368_v44 = vpop.f32.mrf.mxu1  ;;  %v5411_v47 = vpop.f32.mrf.mxu0 }
 0x480   :  { %6312 = vst [vmem:[%s11500_s3 + $0x6a8] sm:$0xff] %v5368_v44  ;;  %6216 = vst [vmem:[%s11500_s3 + $0x3a8] sm:$0xff] %v5411_v47 }
 0x481   :  { %v5370_v19 = vpop.f32.mrf.mxu1  ;;  %v5413_v15 = vpop.f32.mrf.mxu0 }
 0x482   :  { %6313 = vst [vmem:[%s11500_s3 + $0x6b0] sm:$0xff] %v5370_v19  ;;  %6217 = vst.msk [vmem:[%s11500_s3 + $0x3b0] sm:$0xff] %vm77_vm0, %v5413_v15 }
 0x483   :  { %v5372_v30 = vpop.f32.mrf.mxu1  ;;  %v5415_v34 = vpop.f32.mrf.mxu0 }
 0x484   :  { %6319 = vst [vmem:[%s11500_s3 + $0x6e0] sm:$0xff] %v5372_v30  ;;  %6223 = vst [vmem:[%s11500_s3 + $0x3e0] sm:$0xff] %v5415_v34 }
 0x485   :  { %v5374_v42 = vpop.f32.mrf.mxu1  ;;  %v5417_v53 = vpop.f32.mrf.mxu0 }
 0x486   :  { %6320 = vst [vmem:[%s11500_s3 + $0x6e8] sm:$0xff] %v5374_v42  ;;  %6224 = vst.msk [vmem:[%s11500_s3 + $0x3e8] sm:$0xff] %vm77_vm0, %v5417_v53 }
 0x487   :  { %v5451_v26 = vpop.f32.mrf.mxu1  ;;  %v5421_v28 = vpop.f32.mrf.mxu0 }
 0x488   :  { %6272 = vst [vmem:[%s11500_s3 + $0x568] sm:$0xff] %v5451_v26  ;;  %6230 = vst [vmem:[%s11500_s3 + $0x418] sm:$0xff] %v5421_v28 }
 0x489   :  { %v5453_v11 = vpop.f32.mrf.mxu1  ;;  %v5423_v20 = vpop.f32.mrf.mxu0 }
 0x48a   :  { %6273 = vst.msk [vmem:[%s11500_s3 + $0x570] sm:$0xff] %vm77_vm0, %v5453_v11  ;;  %6231 = vst.msk [vmem:[%s11500_s3 + $0x420] sm:$0xff] %vm77_vm0, %v5423_v20 }
 0x48b   :  { %v5455_v7 = vpop.f32.mrf.mxu1  ;;  %v5425_v4 = vpop.f32.mrf.mxu0 }
 0x48c   :  { %6279 = vst [vmem:[%s11500_s3 + $0x5a0] sm:$0xff] %v5455_v7  ;;  %6237 = vst [vmem:[%s11500_s3 + $0x450] sm:$0xff] %v5425_v4 }
 0x48d   :  { %v5457_v54 = vpop.f32.mrf.mxu1  ;;  %v5427_v52 = vpop.f32.mrf.mxu0 }
 0x48e   :  { %6280 = vst.msk [vmem:[%s11500_s3 + $0x5a8] sm:$0xff] %vm77_vm0, %v5457_v54  ;;  %6238 = vst.msk [vmem:[%s11500_s3 + $0x458] sm:$0xff] %vm77_vm0, %v5427_v52 }
 0x48f   :  { %v5461_v33 = vpop.f32.mrf.mxu1  ;;  %v5431_v27 = vpop.f32.mrf.mxu0 }
 0x490   :  { %6286 = vst [vmem:[%s11500_s3 + $0x5d8] sm:$0xff] %v5461_v33  ;;  %6244 = vst [vmem:[%s11500_s3 + $0x488] sm:$0xff] %v5431_v27 }
 0x491   :  { %v5463_v25 = vpop.f32.mrf.mxu1  ;;  %v5433_v29 = vpop.f32.mrf.mxu0 }
 0x492   :  { %6287 = vst.msk [vmem:[%s11500_s3 + $0x5e0] sm:$0xff] %vm77_vm0, %v5463_v25  ;;  %6245 = vst.msk [vmem:[%s11500_s3 + $0x490] sm:$0xff] %vm77_vm0, %v5433_v29 }
 0x493   :  { %v5465_v58 = vpop.f32.mrf.mxu1  ;;  %v5435_v14 = vpop.f32.mrf.mxu0 }
 0x494   :  { %6293 = vst [vmem:[%s11500_s3 + $0x610] sm:$0xff] %v5465_v58  ;;  %6251 = vst [vmem:[%s11500_s3 + $0x4c0] sm:$0xff] %v5435_v14 }
 0x495   :  { %v5467_v10 = vpop.f32.mrf.mxu1  ;;  %v5437_v31 = vpop.f32.mrf.mxu0 }
 0x496   :  { %6294 = vst.msk [vmem:[%s11500_s3 + $0x618] sm:$0xff] %vm77_vm0, %v5467_v10  ;;  %6252 = vst.msk [vmem:[%s11500_s3 + $0x4c8] sm:$0xff] %vm77_vm0, %v5437_v31 }
 0x497   :  { %v5471_v43 = vpop.f32.mrf.mxu1  ;;  %v5441_v2 = vpop.f32.mrf.mxu0 }
 0x498   :  { %6300 = vst [vmem:[%s11500_s3 + $0x648] sm:$0xff] %v5471_v43  ;;  %6258 = vst [vmem:[%s11500_s3 + $0x4f8] sm:$0xff] %v5441_v2 }
 0x499   :  { %v5473_v5 = vpop.f32.mrf.mxu1  ;;  %v5443_v9 = vpop.f32.mrf.mxu0 }
 0x49a   :  { %6301 = vst.msk [vmem:[%s11500_s3 + $0x650] sm:$0xff] %vm77_vm0, %v5473_v5  ;;  %6259 = vst.msk [vmem:[%s11500_s3 + $0x500] sm:$0xff] %vm77_vm0, %v5443_v9 }
 0x49b   :  { %v5475_v38 = vpop.f32.mrf.mxu1  ;;  %v5445_v17 = vpop.f32.mrf.mxu0 }
 0x49c   :  { %6307 = vst [vmem:[%s11500_s3 + $0x680] sm:$0xff] %v5475_v38  ;;  %6265 = vst [vmem:[%s11500_s3 + $0x530] sm:$0xff] %v5445_v17 }
 0x49d   :  { %v5477_v22 = vpop.f32.mrf.mxu1  ;;  %v5447_v8 = vpop.f32.mrf.mxu0 }
 0x49e   :  { %6308 = vst.msk [vmem:[%s11500_s3 + $0x688] sm:$0xff] %vm77_vm0, %v5477_v22  ;;  %6266 = vst.msk [vmem:[%s11500_s3 + $0x538] sm:$0xff] %vm77_vm0, %v5447_v8 }
 0x49f   :  { %v5481_v36 = vpop.f32.mrf.mxu1 }
 0x4a0   :  { %6314 = vst [vmem:[%s11500_s3 + $0x6b8] sm:$0xff] %v5481_v36 }
 0x4a1   :  { %v5483_v63 = vpop.f32.mrf.mxu1 }
 0x4a2   :  { %6315 = vst.msk [vmem:[%s11500_s3 + $0x6c0] sm:$0xff] %vm77_vm0, %v5483_v63 }
 0x4a3   :  { %v5485_v13 = vpop.f32.mrf.mxu1 }
 0x4a4   :  { %6321 = vst [vmem:[%s11500_s3 + $0x6f0] sm:$0xff] %v5485_v13 }
 0x4a5   :  { %v5487_v39 = vpop.f32.mrf.mxu1 }
 0x4a6   :  { %6322 = vst.msk [vmem:[%s11500_s3 + $0x6f8] sm:$0xff] %vm77_vm0, %v5487_v39 }

// kernel: _lambda_.1
= control target key start
LH: loop header
LB: loop body
LE: loop exit
PB: predicated region body
PF: predicated region fallthrough
CT: control target
= control target key end

     0   :  { %vm77_vm0 = vcmask 130048   ;;  %s7616_s18 = smov 112   ;;  %s7617_s16 = smov 31   ;;  %vm176_vm1 = vcmask 916480   ;;  %vm193_vm2 = vcmask 1047680   ;;  %vm441_vm3 = vcmask 252928   ;;  %s11428_s0 = inlined_call_operand.vmem [shape: f32[64,784], index: 0, kind: input, shape index: {}]   ;;  %s11429_s2 = inlined_call_operand.vmem [shape: f32[7,896], index: 2, kind: input, shape index: {}]   ;;  %s11430_s1 = inlined_call_operand.vmem [shape: bf16[128,224], index: 1, kind: input, shape index: {}]   ;;  %s11431_s3 = inlined_call_operand.vmem [shape: f32[2,128,784], index: 3, kind: output, shape index: {}]  }
   0x1   :  { %v7647_v0 = vld [vmem:[%s11428_s0 + $0x60] sm:$0xff]  ;;  %v7652_v1 = vld [vmem:[%s11428_s0 + $0x28] sm:$0xff]  ;;  %v21_v3 = vld [vmem:[%s11428_s0 + $0x30] sm:$0xff]  ;;  %s7618_s28 = smov 30   ;;  %s7619_s8 = smov 29   ;;  %vm966_vm4 = vcmask 244736  }
   0x2   :  { %v28_v2 = vld [vmem:[%s11428_s0 + $0x68] sm:$0xff]  ;;  %148 = vrot.lane.b32.xlu1 %v7647_v0, %s7616_s18  ;;  %84 = vst [vmem:[#allocation2 + $0x60] sm:$0xff] %v7647_v0  ;;  %144 = vrot.lane.b32.xlu0 %v7652_v1, %s7616_s18  ;;  %76 = vst [vmem:[#allocation2 + $0x28] sm:$0xff] %v7652_v1  ;;  %v35_v4 = vld [vmem:[%s11428_s0 + $0xa0] sm:$0xff]  ;;  %s7620_s9 = smov 28   ;;  %s7621_s10 = smov 25  }
   0x3   :  { %85 = vst.msk [vmem:[#allocation2 + $0x68] sm:$0xff] %vm77_vm0, %v28_v2  ;;  %78 = vst.msk [vmem:[#allocation2 + $0x30] sm:$0xff] %vm77_vm0, %v21_v3  ;;  %v7675_v5 = vld [vmem:[%s11428_s0 + $0x98] sm:$0xff]  ;;  %v7683_v7 = vld [vmem:[%s11428_s0 + $0xd0] sm:$0xff]  ;;  %s7622_s11 = smov 26   ;;  %vm2016_vm5 = vcmask 228352  }
   0x4   :  { %92 = vst.msk [vmem:[#allocation2 + $0xa0] sm:$0xff] %vm77_vm0, %v35_v4  ;;  %v42_v6 = vld [vmem:[%s11428_s0 + $0xd8] sm:$0xff]  ;;  %91 = vst [vmem:[#allocation2 + $0x98] sm:$0xff] %v7675_v5  ;;  %v7691_v8 = vld [vmem:[%s11428_s0 + $0x110] sm:$0xff]  ;;  %s7623_s12 = smov 27   ;;  %vm1491_vm6 = vcmask 236544  }
   0x5   :  { %99 = vst.msk [vmem:[#allocation2 + $0xd8] sm:$0xff] %vm77_vm0, %v42_v6  ;;  %98 = vst [vmem:[#allocation2 + $0xd0] sm:$0xff] %v7683_v7  ;;  %v7696_v9 = vld [vmem:[%s11428_s0 + $0x108] sm:$0xff]  ;;  %v7711_v11 = vld [vmem:[%s11428_s0 + $0x140] sm:$0xff]  ;;  %vm3507_vm7 = vcmask 203776   ;;  %vm5176_vm8 = vcmask 785408  }
   0x6   :  { %v7701_v10 = vld [vmem:[%s11428_s0 + $0x148] sm:$0xff]  ;;  %106 = vst.msk [vmem:[#allocation2 + $0x110] sm:$0xff] %vm77_vm0, %v7691_v8  ;;  %105 = vst [vmem:[#allocation2 + $0x108] sm:$0xff] %v7696_v9  ;;  %v7716_v12 = vld [vmem:[%s11428_s0 + $0x180] sm:$0xff]  ;;  %150 = vrot.lane.b32.xlu1 %v28_v2, %s7616_s18  ;;  %146 = vrot.lane.b32.xlu0 %v21_v3, %s7616_s18  ;;  %vm2982_vm9 = vcmask 211968   ;;  %vm2457_vm10 = vcmask 220160  }
   0x7   :  { %113 = vst.msk [vmem:[#allocation2 + $0x148] sm:$0xff] %vm77_vm0, %v7701_v10  ;;  %11542 = vst [vmem:[#allocation4_spill] sm:$0xff] %v7711_v11  ;;  %v7721_v13 = vld [vmem:[%s11428_s0 + $0x178] sm:$0xff]  ;;  %v7737_v15 = vld [vmem:[%s11428_s0 + $0x1b0] sm:$0xff] }
   0x8   :  { %112 = vst [vmem:[#allocation2 + $0x140] sm:$0xff] %v7711_v11  ;;  %120 = vst.msk [vmem:[#allocation2 + $0x180] sm:$0xff] %vm77_vm0, %v7716_v12  ;;  %v7732_v14 = vld [vmem:[%s11428_s0 + $0x1b8] sm:$0xff]  ;;  %v7745_v16 = vld [vmem:[%s11428_s0 + $0x8] sm:$0xff] }
   0x9   :  { %119 = vst [vmem:[#allocation2 + $0x178] sm:$0xff] %v7721_v13  ;;  %127 = vst.msk [vmem:[#allocation2 + $0x1b8] sm:$0xff] %vm77_vm0, %v7732_v14  ;;  %v7750_v17 = vld [vmem:[%s11428_s0] sm:$0xff]  ;;  %v7755_v18 = vld [vmem:[%s11428_s0 + $0x18] sm:$0xff] }
   0xa   :  { %126 = vst [vmem:[#allocation2 + $0x1b0] sm:$0xff] %v7737_v15  ;;  %72 = vst [vmem:[#allocation2 + $0x8] sm:$0xff] %v7745_v16  ;;  %v7763_v19 = vld [vmem:[%s11428_s0 + $0x10] sm:$0xff]  ;;  %v7768_v20 = vld [vmem:[%s11428_s0 + $0x20] sm:$0xff]  ;;  %154 = vrot.lane.b32.xlu1 %v35_v4, %s7616_s18  ;;  %152 = vrot.lane.b32.xlu0 %v7675_v5, %s7616_s18 }
   0xb   :  { %71 = vst [vmem:[#allocation2] sm:$0xff] %v7750_v17  ;;  %74 = vst [vmem:[#allocation2 + $0x18] sm:$0xff] %v7755_v18  ;;  %v7773_v21 = vld [vmem:[%s11428_s0 + $0x40] sm:$0xff]  ;;  %v7781_v22 = vld [vmem:[%s11428_s0 + $0x38] sm:$0xff] }
   0xc   :  { %73 = vst [vmem:[#allocation2 + $0x10] sm:$0xff] %v7763_v19  ;;  %75 = vst [vmem:[#allocation2 + $0x20] sm:$0xff] %v7768_v20  ;;  %v7786_v23 = vld [vmem:[%s11428_s0 + $0x50] sm:$0xff]  ;;  %v7791_v24 = vld [vmem:[%s11428_s0 + $0x48] sm:$0xff] }
   0xd   :  { %80 = vst [vmem:[#allocation2 + $0x40] sm:$0xff] %v7773_v21  ;;  %79 = vst [vmem:[#allocation2 + $0x38] sm:$0xff] %v7781_v22  ;;  %v7802_v25 = vld [vmem:[%s11428_s0 + $0x58] sm:$0xff]  ;;  %v7814_v27 = vld [vmem:[%s11428_s0 + $0x70] sm:$0xff] }
   0xe   :  { %82 = vst [vmem:[#allocation2 + $0x50] sm:$0xff] %v7786_v23  ;;  %81 = vst [vmem:[#allocation2 + $0x48] sm:$0xff] %v7791_v24  ;;  %v7807_v26 = vld [vmem:[%s11428_s0 + $0x78] sm:$0xff]  ;;  %v7819_v28 = vld [vmem:[%s11428_s0 + $0x88] sm:$0xff]  ;;  %158 = vrot.lane.b32.xlu1 %v42_v6, %s7616_s18  ;;  %156 = vrot.lane.b32.xlu0 %v7683_v7, %s7616_s18 }
   0xf   :  { %83 = vst [vmem:[#allocation2 + $0x58] sm:$0xff] %v7802_v25  ;;  %87 = vst [vmem:[#allocation2 + $0x78] sm:$0xff] %v7807_v26  ;;  %v7824_v29 = vld [vmem:[%s11428_s0 + $0x80] sm:$0xff]  ;;  %v7832_v30 = vld [vmem:[%s11428_s0 + $0x90] sm:$0xff] }
  0x10   :  { %86 = vst [vmem:[#allocation2 + $0x70] sm:$0xff] %v7814_v27  ;;  %89 = vst [vmem:[#allocation2 + $0x88] sm:$0xff] %v7819_v28  ;;  %v7837_v31 = vld [vmem:[%s11428_s0 + $0xb0] sm:$0xff]  ;;  %v7842_v32 = vld [vmem:[%s11428_s0 + $0xa8] sm:$0xff] }
  0x11   :  { %88 = vst [vmem:[#allocation2 + $0x80] sm:$0xff] %v7824_v29  ;;  %90 = vst [vmem:[#allocation2 + $0x90] sm:$0xff] %v7832_v30  ;;  %v7850_v33 = vld [vmem:[%s11428_s0 + $0xc0] sm:$0xff]  ;;  %v7855_v34 = vld [vmem:[%s11428_s0 + $0xb8] sm:$0xff] }
  0x12   :  { %94 = vst [vmem:[#allocation2 + $0xb0] sm:$0xff] %v7837_v31  ;;  %93 = vst [vmem:[#allocation2 + $0xa8] sm:$0xff] %v7842_v32  ;;  %v7860_v35 = vld [vmem:[%s11428_s0 + $0xc8] sm:$0xff]  ;;  %v7876_v37 = vld [vmem:[%s11428_s0 + $0xe0] sm:$0xff]  ;;  %162 = vrot.lane.b32.xlu1 %v7691_v8, %s7616_s18  ;;  %160 = vrot.lane.b32.xlu0 %v7696_v9, %s7616_s18 }
  0x13   :  { %96 = vst [vmem:[#allocation2 + $0xc0] sm:$0xff] %v7850_v33  ;;  %95 = vst [vmem:[#allocation2 + $0xb8] sm:$0xff] %v7855_v34  ;;  %v7871_v36 = vld [vmem:[%s11428_s0 + $0xe8] sm:$0xff]  ;;  %v7883_v38 = vld [vmem:[%s11428_s0 + $0xf8] sm:$0xff] }
  0x14   :  { %97 = vst [vmem:[#allocation2 + $0xc8] sm:$0xff] %v7860_v35  ;;  %101 = vst [vmem:[#allocation2 + $0xe8] sm:$0xff] %v7871_v36  ;;  %v7888_v39 = vld [vmem:[%s11428_s0 + $0xf0] sm:$0xff]  ;;  %v7893_v40 = vld [vmem:[%s11428_s0 + $0x100] sm:$0xff] }
  0x15   :  { %100 = vst [vmem:[#allocation2 + $0xe0] sm:$0xff] %v7876_v37  ;;  %103 = vst [vmem:[#allocation2 + $0xf8] sm:$0xff] %v7883_v38  ;;  %v7901_v41 = vld [vmem:[%s11428_s0 + $0x120] sm:$0xff]  ;;  %v7906_v42 = vld [vmem:[%s11428_s0 + $0x118] sm:$0xff] }
  0x16   :  { %102 = vst [vmem:[#allocation2 + $0xf0] sm:$0xff] %v7888_v39  ;;  %104 = vst [vmem:[#allocation2 + $0x100] sm:$0xff] %v7893_v40  ;;  %v7911_v43 = vld [vmem:[%s11428_s0 + $0x130] sm:$0xff]  ;;  %v7919_v44 = vld [vmem:[%s11428_s0 + $0x128] sm:$0xff]  ;;  %166 = vrot.lane.b32.xlu1 %v7701_v10, %s7616_s18  ;;  %164 = vrot.lane.b32.xlu0 %v7711_v11, %s7616_s18 }
  0x17   :  { %11543 = vst [vmem:[#allocation5_spill] sm:$0xff] %v7901_v41  ;;  %11544 = vst [vmem:[#allocation6_spill] sm:$0xff] %v7906_v42  ;;  %v7924_v45 = vld [vmem:[%s11428_s0 + $0x138] sm:$0xff]  ;;  %v7941_v47 = vld [vmem:[%s11428_s0 + $0x150] sm:$0xff] }
  0x18   :  { %11545 = vst [vmem:[#allocation7_spill] sm:$0xff] %v7911_v43  ;;  %108 = vst [vmem:[#allocation2 + $0x120] sm:$0xff] %v7901_v41  ;;  %v7929_v46 = vld [vmem:[%s11428_s0 + $0x158] sm:$0xff]  ;;  %v7946_v48 = vld [vmem:[%s11428_s0 + $0x168] sm:$0xff] }
  0x19   :  { %107 = vst [vmem:[#allocation2 + $0x118] sm:$0xff] %v7906_v42  ;;  %110 = vst [vmem:[#allocation2 + $0x130] sm:$0xff] %v7911_v43  ;;  %v7953_v49 = vld [vmem:[%s11428_s0 + $0x160] sm:$0xff]  ;;  %v7963_v50 = vld [vmem:[%s11428_s0 + $0x170] sm:$0xff] }
  0x1a   :  { %11546 = vst [vmem:[#allocation8_spill] sm:$0xff] %v7919_v44  ;;  %11547 = vst [vmem:[#allocation9_spill] sm:$0xff] %v7924_v45  ;;  %170 = vrot.lane.b32.xlu1 %v7716_v12, %s7616_s18  ;;  %168 = vrot.lane.b32.xlu0 %v7721_v13, %s7616_s18  ;;  %v7973_v51 = vld [vmem:[%s11428_s0 + $0x188] sm:$0xff]  ;;  %v7983_v52 = vld [vmem:[%s11428_s0 + $0x190] sm:$0xff] }
  0x1b   :  { %11548 = vst [vmem:[#allocation10_spill] sm:$0xff] %v7929_v46  ;;  %109 = vst [vmem:[#allocation2 + $0x128] sm:$0xff] %v7919_v44  ;;  %v7989_v53 = vld [vmem:[%s11428_s0 + $0x198] sm:$0xff]  ;;  %v7999_v54 = vld [vmem:[%s11428_s0 + $0x1a0] sm:$0xff] }
  0x1c   :  { %111 = vst [vmem:[#allocation2 + $0x138] sm:$0xff] %v7924_v45  ;;  %115 = vst [vmem:[#allocation2 + $0x158] sm:$0xff] %v7929_v46  ;;  %v8005_v55 = vld [vmem:[%s11428_s0 + $0x1a8] sm:$0xff] }
  0x1d   :  { %11549 = vst [vmem:[#allocation11_spill] sm:$0xff] %v7941_v47  ;;  %11550 = vst [vmem:[#allocation12_spill] sm:$0xff] %v7946_v48 }
  0x1e   :  { %114 = vst [vmem:[#allocation2 + $0x150] sm:$0xff] %v7941_v47  ;;  %117 = vst [vmem:[#allocation2 + $0x168] sm:$0xff] %v7946_v48  ;;  %174 = vrot.lane.b32.xlu1 %v7732_v14, %s7616_s18  ;;  %172 = vrot.lane.b32.xlu0 %v7737_v15, %s7616_s18 }
  0x1f   :  { %11551 = vst [vmem:[#allocation13_spill] sm:$0xff] %v7953_v49  ;;  %116 = vst [vmem:[#allocation2 + $0x160] sm:$0xff] %v7953_v49 }
  0x20   :  { %118 = vst [vmem:[#allocation2 + $0x170] sm:$0xff] %v7963_v50  ;;  %11552 = vst [vmem:[#allocation14_spill] sm:$0xff] %v7973_v51 }
  0x21   :  { %121 = vst [vmem:[#allocation2 + $0x188] sm:$0xff] %v7973_v51  ;;  %11553 = vst [vmem:[#allocation15_spill] sm:$0xff] %v7983_v52 }
  0x22   :  { %122 = vst [vmem:[#allocation2 + $0x190] sm:$0xff] %v7983_v52  ;;  %11554 = vst [vmem:[#allocation16_spill] sm:$0xff] %v7989_v53  ;;  %347 = vrot.lane.b32.xlu1 %v7745_v16, %s7617_s16  ;;  %345 = vrot.lane.b32.xlu0 %v7750_v17, %s7617_s16 }
  0x23   :  { %123 = vst [vmem:[#allocation2 + $0x198] sm:$0xff] %v7989_v53  ;;  %124 = vst [vmem:[#allocation2 + $0x1a0] sm:$0xff] %v7999_v54 }
  0x24   :  { %125 = vst [vmem:[#allocation2 + $0x1a8] sm:$0xff] %v8005_v55 }
  0x26   :  { %351 = vrot.lane.b32.xlu1 %v7755_v18, %s7617_s16  ;;  %349 = vrot.lane.b32.xlu0 %v7763_v19, %s7617_s16 }
  0x2a   :  { %355 = vrot.lane.b32.xlu1 %v7652_v1, %s7617_s16  ;;  %353 = vrot.lane.b32.xlu0 %v7768_v20, %s7617_s16 }
  0x2e   :  { %359 = vrot.lane.b32.xlu1 %v7773_v21, %s7617_s16  ;;  %357 = vrot.lane.b32.xlu0 %v7781_v22, %s7617_s16 }
  0x32   :  { %363 = vrot.lane.b32.xlu1 %v7786_v23, %s7617_s16  ;;  %361 = vrot.lane.b32.xlu0 %v7791_v24, %s7617_s16 }
  0x36   :  { %367 = vrot.lane.b32.xlu1 %v7647_v0, %s7617_s16  ;;  %365 = vrot.lane.b32.xlu0 %v7802_v25, %s7617_s16 }
  0x3a   :  { %371 = vrot.lane.b32.xlu1 %v7807_v26, %s7617_s16  ;;  %369 = vrot.lane.b32.xlu0 %v7814_v27, %s7617_s16 }
  0x3e   :  { %375 = vrot.lane.b32.xlu1 %v7819_v28, %s7617_s16  ;;  %373 = vrot.lane.b32.xlu0 %v7824_v29, %s7617_s16 }
  0x42   :  { %379 = vrot.lane.b32.xlu1 %v7675_v5, %s7617_s16  ;;  %377 = vrot.lane.b32.xlu0 %v7832_v30, %s7617_s16 }
  0x46   :  { %383 = vrot.lane.b32.xlu1 %v7837_v31, %s7617_s16  ;;  %381 = vrot.lane.b32.xlu0 %v7842_v32, %s7617_s16 }
  0x4a   :  { %387 = vrot.lane.b32.xlu1 %v7850_v33, %s7617_s16  ;;  %385 = vrot.lane.b32.xlu0 %v7855_v34, %s7617_s16 }
  0x4e   :  { %391 = vrot.lane.b32.xlu1 %v7683_v7, %s7617_s16  ;;  %389 = vrot.lane.b32.xlu0 %v7860_v35, %s7617_s16 }
  0x52   :  { %395 = vrot.lane.b32.xlu1 %v7871_v36, %s7617_s16  ;;  %393 = vrot.lane.b32.xlu0 %v7876_v37, %s7617_s16 }
  0x56   :  { %399 = vrot.lane.b32.xlu1 %v7883_v38, %s7617_s16  ;;  %397 = vrot.lane.b32.xlu0 %v7888_v39, %s7617_s16 }
  0x5a   :  { %403 = vrot.lane.b32.xlu1 %v7696_v9, %s7617_s16  ;;  %401 = vrot.lane.b32.xlu0 %v7893_v40, %s7617_s16 }
  0x5e   :  { %407 = vrot.lane.b32.xlu1 %v7901_v41, %s7617_s16  ;;  %405 = vrot.lane.b32.xlu0 %v7906_v42, %s7617_s16 }
  0x62   :  { %411 = vrot.lane.b32.xlu1 %v7911_v43, %s7617_s16  ;;  %409 = vrot.lane.b32.xlu0 %v7919_v44, %s7617_s16 }
  0x66   :  { %415 = vrot.lane.b32.xlu1 %v7711_v11, %s7617_s16  ;;  %413 = vrot.lane.b32.xlu0 %v7924_v45, %s7617_s16 }
  0x6a   :  { %419 = vrot.lane.b32.xlu1 %v7929_v46, %s7617_s16  ;;  %417 = vrot.lane.b32.xlu0 %v7941_v47, %s7617_s16 }
  0x6e   :  { %423 = vrot.lane.b32.xlu1 %v7946_v48, %s7617_s16  ;;  %421 = vrot.lane.b32.xlu0 %v7953_v49, %s7617_s16 }
  0x74   :  { %v149_v56 = vpop.permute.xlu1 %148  ;;  %v145_v57 = vpop.permute.xlu0 %144 }
  0x78   :  { %v151_v58 = vpop.permute.xlu1 %150  ;;  %v147_v59 = vpop.permute.xlu0 %146 }
  0x79   :  { %v178_v60 = vsel %vm176_vm1, %v149_v56, %v151_v58  ;;  %v177_v61 = vsel %vm176_vm1, %v145_v57, %v147_v59 }
  0x7a   :  { %195 = vst.msk [vmem:[#allocation2 + $0x68] sm:$0xff] %vm193_vm2, %v178_v60  ;;  %194 = vst.msk [vmem:[#allocation2 + $0x30] sm:$0xff] %vm193_vm2, %v177_v61 }
  0x7c   :  { %v155_v62 = vpop.permute.xlu1 %154  ;;  %v153_v63 = vpop.permute.xlu0 %152 }
  0x7d   :  { %v179_v2 = vsel %vm176_vm1, %v153_v63, %v155_v62  ;;  %v554_v62 = vlaneseq }
  0x7e   :  { %196 = vst.msk [vmem:[#allocation2 + $0xa0] sm:$0xff] %vm193_vm2, %v179_v2 }
  0x80   :  { %v159_v3 = vpop.permute.xlu1 %158  ;;  %v157_v4 = vpop.permute.xlu0 %156 }
  0x81   :  { %v180_v6 = vsel %vm176_vm1, %v157_v4, %v159_v3  ;;  %v8091_v8 = vld [vmem:[#allocation2 + $0x68] sm:$0xff]  ;;  %v8093_v10 = vld [vmem:[#allocation2 + $0x30] sm:$0xff] }
  0x82   :  { %11555 = vst [vmem:[#allocation17_spill] sm:$0xff] %v8091_v8  ;;  %11556 = vst [vmem:[#allocation18_spill] sm:$0xff] %v8093_v10  ;;  %275 = vrot.lane.b32.xlu1 %v8091_v8, %s7617_s16  ;;  %273 = vrot.lane.b32.xlu0 %v8093_v10, %s7617_s16 }
  0x83   :  { %197 = vst.msk [vmem:[#allocation2 + $0xd8] sm:$0xff] %vm193_vm2, %v180_v6  ;;  %v8118_v6 = vshrl.u32 %v554_v62, 7  ;;  %v8137_v62 = vld [vmem:[%s11429_s2 + $0x18] sm:$0x7f] }
  0x84   :  { %v163_v12 = vpop.permute.xlu1 %162  ;;  %v161_v14 = vpop.permute.xlu0 %160  ;;  %11560 = vst [vmem:[#allocation22_spill] sm:$0xff] %v8137_v62 }
  0x85   :  { %v181_v56 = vsel %vm176_vm1, %v161_v14, %v163_v12  ;;  %v8101_v57 = vld [vmem:[#allocation2 + $0xa0] sm:$0xff]  ;;  %11558 = vst [vmem:[#allocation20_spill] sm:$0xff] %v8118_v6 }
  0x86   :  { %11557 = vst [vmem:[#allocation19_spill] sm:$0xff] %v8101_v57  ;;  %198 = vst.msk [vmem:[#allocation2 + $0x110] sm:$0xff] %vm193_vm2, %v181_v56  ;;  %277 = vrot.lane.b32.xlu0 %v8101_v57, %s7617_s16 }
  0x88   :  { %v167_v58 = vpop.permute.xlu1 %166  ;;  %v165_v59 = vpop.permute.xlu0 %164 }
  0x89   :  { %v182_v60 = vsel %vm176_vm1, %v165_v59, %v167_v58  ;;  %v8127_v59 = vsub.s32 0, %v8118_v6  ;;  %v8163_v6 = vld [vmem:[%s11429_s2 + $0x28] sm:$0x7f] }
  0x8a   :  { %v8107_v61 = vld [vmem:[#allocation2 + $0xd8] sm:$0xff]  ;;  %199 = vst.msk [vmem:[#allocation2 + $0x148] sm:$0xff] %vm193_vm2, %v182_v60  ;;  %v8132_v60 = vld [vmem:[%s11429_s2 + $0x10] sm:$0x7f]  ;;  %11563 = vst [vmem:[#allocation25_spill] sm:$0xff] %v8163_v6 }
  0x8b   :  { %279 = vrot.lane.b32.xlu1 %v8107_v61, %s7617_s16  ;;  %11559 = vst [vmem:[#allocation21_spill] sm:$0xff] %v8132_v60  ;;  %v8182_v43 = vrot.slane %v8163_v6, %v8127_v59 }
  0x8c   :  { %v171_v63 = vpop.permute.xlu1 %170  ;;  %v169_v2 = vpop.permute.xlu0 %168 }
  0x8d   :  { %v183_v3 = vsel %vm176_vm1, %v169_v2, %v171_v63  ;;  %v8113_v4 = vld [vmem:[#allocation2 + $0x110] sm:$0xff] }
  0x8e   :  { %200 = vst.msk [vmem:[#allocation2 + $0x180] sm:$0xff] %vm193_vm2, %v183_v3  ;;  %281 = vrot.lane.b32.xlu0 %v8113_v4, %s7617_s16 }
  0x90   :  { %v175_v12 = vpop.permute.xlu1 %174  ;;  %v173_v14 = vpop.permute.xlu0 %172 }
  0x91   :  { %v184_v56 = vsel %vm176_vm1, %v173_v14, %v175_v12  ;;  %v8121_v58 = vld [vmem:[#allocation2 + $0x148] sm:$0xff]  ;;  %v8149_v12 = vrot.slane %v8132_v60, %v8127_v59  ;;  %v8153_v14 = vrot.slane %v8137_v62, %v8127_v59 }
  0x92   :  { %201 = vst.msk [vmem:[#allocation2 + $0x1b8] sm:$0xff] %vm193_vm2, %v184_v56  ;;  %283 = vrot.lane.b32.xlu1 %v8121_v58, %s7617_s16  ;;  %v8158_v56 = vld [vmem:[%s11429_s2 + $0x20] sm:$0x7f] }
  0x93   :  { %11562 = vst [vmem:[#allocation24_spill] sm:$0xff] %v8158_v56  ;;  %v8172_v47 = vrot.slane %v8158_v56, %v8127_v59 }
  0x94   :  { %v8139_v63 = vpop.permute.xlu1 %347  ;;  %v8141_v2 = vpop.permute.xlu0 %345 }
  0x95   :  { %v8143_v3 = vld [vmem:[#allocation2 + $0x180] sm:$0xff] }
  0x96   :  { %11561 = vst [vmem:[#allocation23_spill] sm:$0xff] %v8143_v3  ;;  %285 = vrot.lane.b32.xlu0 %v8143_v3, %s7617_s16 }
  0x98   :  { %v352_v48 = vpop.permute.xlu1 %351  ;;  %v350_v49 = vpop.permute.xlu0 %349 }
  0x99   :  { %v8165_v46 = vld [vmem:[#allocation2 + $0x1b8] sm:$0xff]  ;;  %v443_v60 = vsel %vm441_vm3, %v8139_v63, %v350_v49  ;;  %v444_v62 = vsel %vm441_vm3, %v350_v49, %v352_v48 }
  0x9a   :  { %11564 = vst [vmem:[#allocation26_spill] sm:$0xff] %v8165_v46  ;;  %287 = vrot.lane.b32.xlu1 %v8165_v46, %s7617_s16  ;;  %425 = vrot.lane.b32.xlu0 %v7963_v50, %s7617_s16  ;;  %v584_v11 = vmul.f32 %v8149_v12, %v443_v60  ;;  %v585_v45 = vmul.f32 %v8153_v14, %v444_v62 }
  0x9c   :  { %v6826_v44 = vpack.c.bf16 %v585_v45, %v584_v11  ;;  %v8184_v49 = vpop.permute.xlu1 %355  ;;  %v354_v41 = vpop.permute.xlu0 %353 }
  0x9d   :  { %v445_v56 = vsel %vm441_vm3, %v352_v48, %v354_v41  ;;  %v446_v42 = vsel %vm441_vm3, %v354_v41, %v8184_v49 }
  0x9e   :  { %427 = vrot.lane.b32.xlu1 %v7721_v13, %s7617_s16  ;;  %429 = vrot.lane.b32.xlu0 %v7973_v51, %s7617_s16  ;;  %727 = vst [vmem:[#allocation3 + $0x8] sm:$0xff] %v6826_v44  ;;  %v586_v60 = vmul.f32 %v8172_v47, %v445_v56  ;;  %v587_v62 = vmul.f32 %v8182_v43, %v446_v42 }
  0xa0   :  { %v6827_v11 = vpack.c.bf16 %v587_v62, %v586_v60  ;;  %v8195_v45 = vpop.permute.xlu1 %359  ;;  %v8197_v6 = vpop.permute.xlu0 %357 }
  0xa2   :  { %431 = vrot.lane.b32.xlu1 %v7983_v52, %s7617_s16  ;;  %433 = vrot.lane.b32.xlu0 %v7989_v53, %s7617_s16  ;;  %728 = vst [vmem:[#allocation3 + $0x10] sm:$0xff] %v6827_v11 }
  0xa4   :  { %v364_v41 = vpop.permute.xlu1 %363  ;;  %v362_v48 = vpop.permute.xlu0 %361 }
  0xa5   :  { %v449_v44 = vsel %vm441_vm3, %v8195_v45, %v362_v48  ;;  %v450_v56 = vsel %vm441_vm3, %v362_v48, %v364_v41 }
  0xa6   :  { %435 = vrot.lane.b32.xlu1 %v7999_v54, %s7617_s16  ;;  %437 = vrot.lane.b32.xlu0 %v8005_v55, %s7617_s16  ;;  %v591_v42 = vmul.f32 %v8149_v12, %v449_v44  ;;  %v592_v60 = vmul.f32 %v8153_v14, %v450_v56 }
  0xa8   :  { %v6830_v62 = vpack.c.bf16 %v592_v60, %v591_v42  ;;  %v8212_v53 = vpop.permute.xlu1 %367  ;;  %v366_v11 = vpop.permute.xlu0 %365 }
  0xa9   :  { %v451_v52 = vsel %vm441_vm3, %v364_v41, %v366_v11  ;;  %v452_v51 = vsel %vm441_vm3, %v366_v11, %v8212_v53 }
  0xaa   :  { %439 = vrot.lane.b32.xlu1 %v7737_v15, %s7617_s16  ;;  %846 = vrot.lane.b32.xlu0 %v8093_v10, %s7618_s28  ;;  %731 = vst [vmem:[#allocation3 + $0x40] sm:$0xff] %v6830_v62  ;;  %v593_v48 = vmul.f32 %v8172_v47, %v451_v52  ;;  %v594_v44 = vmul.f32 %v8182_v43, %v452_v51 }
  0xac   :  { %v6831_v56 = vpack.c.bf16 %v594_v44, %v593_v48  ;;  %v8223_v42 = vpop.permute.xlu1 %371  ;;  %v8225_v60 = vpop.permute.xlu0 %369 }
  0xae   :  { %848 = vrot.lane.b32.xlu1 %v8091_v8, %s7618_s28  ;;  %850 = vrot.lane.b32.xlu0 %v8101_v57, %s7618_s28  ;;  %732 = vst [vmem:[#allocation3 + $0x48] sm:$0xff] %v6831_v56 }
  0xb0   :  { %v376_v41 = vpop.permute.xlu1 %375  ;;  %v374_v11 = vpop.permute.xlu0 %373 }
  0xb1   :  { %v455_v62 = vsel %vm441_vm3, %v8223_v42, %v374_v11  ;;  %v456_v52 = vsel %vm441_vm3, %v374_v11, %v376_v41 }
  0xb2   :  { %852 = vrot.lane.b32.xlu1 %v8107_v61, %s7618_s28  ;;  %854 = vrot.lane.b32.xlu0 %v8113_v4, %s7618_s28  ;;  %v598_v51 = vmul.f32 %v8149_v12, %v455_v62  ;;  %v599_v48 = vmul.f32 %v8153_v14, %v456_v52 }
  0xb4   :  { %v6834_v44 = vpack.c.bf16 %v599_v48, %v598_v51  ;;  %v8240_v57 = vpop.permute.xlu1 %379  ;;  %v378_v56 = vpop.permute.xlu0 %377 }
  0xb5   :  { %v457_v8 = vsel %vm441_vm3, %v376_v41, %v378_v56  ;;  %v458_v10 = vsel %vm441_vm3, %v378_v56, %v8240_v57 }
  0xb6   :  { %856 = vrot.lane.b32.xlu1 %v8121_v58, %s7618_s28  ;;  %858 = vrot.lane.b32.xlu0 %v8143_v3, %s7618_s28  ;;  %735 = vst [vmem:[#allocation3 + $0x78] sm:$0xff] %v6834_v44  ;;  %v600_v11 = vmul.f32 %v8172_v47, %v457_v8  ;;  %v601_v62 = vmul.f32 %v8182_v43, %v458_v10 }
  0xb8   :  { %v6835_v52 = vpack.c.bf16 %v601_v62, %v600_v11  ;;  %v8251_v51 = vpop.permute.xlu1 %383  ;;  %v8253_v48 = vpop.permute.xlu0 %381 }
  0xba   :  { %860 = vrot.lane.b32.xlu1 %v8165_v46, %s7618_s28  ;;  %870 = vrot.lane.b32.xlu0 %v7750_v17, %s7618_s28  ;;  %736 = vst [vmem:[#allocation3 + $0x80] sm:$0xff] %v6835_v52 }
  0xbc   :  { %v388_v41 = vpop.permute.xlu1 %387  ;;  %v386_v56 = vpop.permute.xlu0 %385 }
  0xbd   :  { %v461_v44 = vsel %vm441_vm3, %v8251_v51, %v386_v56  ;;  %v462_v8 = vsel %vm441_vm3, %v386_v56, %v388_v41 }
  0xbe   :  { %872 = vrot.lane.b32.xlu1 %v7745_v16, %s7618_s28  ;;  %874 = vrot.lane.b32.xlu0 %v7763_v19, %s7618_s28  ;;  %v605_v10 = vmul.f32 %v8149_v12, %v461_v44  ;;  %v606_v11 = vmul.f32 %v8153_v14, %v462_v8 }
  0xc0   :  { %v6838_v62 = vpack.c.bf16 %v606_v11, %v605_v10  ;;  %v8268_v17 = vpop.permute.xlu1 %391  ;;  %v390_v52 = vpop.permute.xlu0 %389 }
  0xc1   :  { %v463_v46 = vsel %vm441_vm3, %v388_v41, %v390_v52  ;;  %v464_v3 = vsel %vm441_vm3, %v390_v52, %v8268_v17 }
  0xc2   :  { %876 = vrot.lane.b32.xlu1 %v7755_v18, %s7618_s28  ;;  %878 = vrot.lane.b32.xlu0 %v7768_v20, %s7618_s28  ;;  %739 = vst [vmem:[#allocation3 + $0xb0] sm:$0xff] %v6838_v62  ;;  %v607_v16 = vmul.f32 %v8172_v47, %v463_v46  ;;  %v608_v19 = vmul.f32 %v8182_v43, %v464_v3 }
  0xc4   :  { %v6839_v56 = vpack.c.bf16 %v608_v19, %v607_v16  ;;  %v8279_v44 = vpop.permute.xlu1 %395  ;;  %v8281_v8 = vpop.permute.xlu0 %393 }
  0xc6   :  { %880 = vrot.lane.b32.xlu1 %v7652_v1, %s7618_s28  ;;  %882 = vrot.lane.b32.xlu0 %v7781_v22, %s7618_s28  ;;  %740 = vst [vmem:[#allocation3 + $0xb8] sm:$0xff] %v6839_v56 }
  0xc8   :  { %v400_v18 = vpop.permute.xlu1 %399  ;;  %v398_v41 = vpop.permute.xlu0 %397 }
  0xc9   :  { %v467_v20 = vsel %vm441_vm3, %v8279_v44, %v398_v41  ;;  %v468_v46 = vsel %vm441_vm3, %v398_v41, %v400_v18 }
  0xca   :  { %884 = vrot.lane.b32.xlu1 %v7773_v21, %s7618_s28  ;;  %886 = vrot.lane.b32.xlu0 %v7791_v24, %s7618_s28  ;;  %v612_v3 = vmul.f32 %v8149_v12, %v467_v20  ;;  %v613_v1 = vmul.f32 %v8153_v14, %v468_v46 }
  0xcc   :  { %v6842_v10 = vpack.c.bf16 %v613_v1, %v612_v3  ;;  %v8296_v22 = vpop.permute.xlu1 %403  ;;  %v402_v11 = vpop.permute.xlu0 %401 }
  0xcd   :  { %v469_v62 = vsel %vm441_vm3, %v400_v18, %v402_v11  ;;  %v470_v52 = vsel %vm441_vm3, %v402_v11, %v8296_v22 }
  0xce   :  { %888 = vrot.lane.b32.xlu1 %v7786_v23, %s7618_s28  ;;  %890 = vrot.lane.b32.xlu0 %v7802_v25, %s7618_s28  ;;  %831 = vst [vmem:[#allocation3 + $0x24] sm:$0xff] %v6842_v10  ;;  %v614_v21 = vmul.f32 %v8172_v47, %v469_v62  ;;  %v615_v24 = vmul.f32 %v8182_v43, %v470_v52 }
  0xd0   :  { %v6843_v16 = vpack.c.bf16 %v615_v24, %v614_v21  ;;  %v8307_v19 = vpop.permute.xlu1 %407  ;;  %v8309_v56 = vpop.permute.xlu0 %405 }
  0xd2   :  { %892 = vrot.lane.b32.xlu1 %v7647_v0, %s7618_s28  ;;  %894 = vrot.lane.b32.xlu0 %v7814_v27, %s7618_s28  ;;  %832 = vst [vmem:[#allocation3 + $0x2c] sm:$0xff] %v6843_v16 }
  0xd4   :  { %v412_v23 = vpop.permute.xlu1 %411  ;;  %v410_v18 = vpop.permute.xlu0 %409 }
  0xd5   :  { %v473_v25 = vsel %vm441_vm3, %v8307_v19, %v410_v18  ;;  %v474_v41 = vsel %vm441_vm3, %v410_v18, %v412_v23 }
  0xd6   :  { %896 = vrot.lane.b32.xlu1 %v7807_v26, %s7618_s28  ;;  %898 = vrot.lane.b32.xlu0 %v7824_v29, %s7618_s28  ;;  %v619_v20 = vmul.f32 %v8149_v12, %v473_v25  ;;  %v620_v0 = vmul.f32 %v8153_v14, %v474_v41 }
  0xd8   :  { %v6846_v46 = vpack.c.bf16 %v620_v0, %v619_v20  ;;  %v8324_v27 = vpop.permute.xlu1 %415  ;;  %v414_v3 = vpop.permute.xlu0 %413 }
  0xd9   :  { %v475_v1 = vsel %vm441_vm3, %v412_v23, %v414_v3  ;;  %v476_v10 = vsel %vm441_vm3, %v414_v3, %v8324_v27 }
  0xda   :  { %900 = vrot.lane.b32.xlu1 %v7819_v28, %s7618_s28  ;;  %902 = vrot.lane.b32.xlu0 %v7832_v30, %s7618_s28  ;;  %835 = vst [vmem:[#allocation3 + $0x5c] sm:$0xff] %v6846_v46  ;;  %v621_v26 = vmul.f32 %v8172_v47, %v475_v1  ;;  %v622_v29 = vmul.f32 %v8182_v43, %v476_v10 }
  0xdc   :  { %v6847_v11 = vpack.c.bf16 %v622_v29, %v621_v26  ;;  %v8335_v62 = vpop.permute.xlu1 %419  ;;  %v8337_v52 = vpop.permute.xlu0 %417 }
  0xde   :  { %904 = vrot.lane.b32.xlu1 %v7675_v5, %s7618_s28  ;;  %906 = vrot.lane.b32.xlu0 %v7842_v32, %s7618_s28  ;;  %836 = vst [vmem:[#allocation3 + $0x64] sm:$0xff] %v6847_v11 }
  0xe0   :  { %v8343_v28 = vpop.permute.xlu1 %423  ;;  %v422_v30 = vpop.permute.xlu0 %421 }
  0xe1   :  { %v479_v21 = vsel %vm441_vm3, %v8335_v62, %v422_v30  ;;  %v480_v24 = vsel %vm441_vm3, %v422_v30, %v8343_v28  ;;  %v11566_v30 = vld [vmem:[#allocation5_spill] sm:$0xff] }
  0xe2   :  { %908 = vrot.lane.b32.xlu1 %v7837_v31, %s7618_s28  ;;  %910 = vrot.lane.b32.xlu0 %v7855_v34, %s7618_s28  ;;  %v626_v5 = vmul.f32 %v8149_v12, %v479_v21  ;;  %v627_v32 = vmul.f32 %v8153_v14, %v480_v24  ;;  %v8366_v31 = vld [vmem:[%s11429_s2 + $0x8] sm:$0x7f]  ;;  %v11567_v21 = vld [vmem:[#allocation8_spill] sm:$0xff] }
  0xe3   :  { %v8384_v34 = vrot.slane %v8366_v31, %v8127_v59 }
  0xe4   :  { %v6850_v16 = vpack.c.bf16 %v627_v32, %v626_v5 }
  0xe6   :  { %912 = vrot.lane.b32.xlu1 %v7850_v33, %s7618_s28  ;;  %914 = vrot.lane.b32.xlu0 %v7860_v35, %s7618_s28  ;;  %839 = vst [vmem:[#allocation3 + $0x94] sm:$0xff] %v6850_v16  ;;  %v8375_v33 = vld [vmem:[%s11429_s2] sm:$0x7f]  ;;  %v442_v35 = vsel %vm441_vm3, %v8141_v2, %v8139_v63 }
  0xe7   :  { %v583_v63 = vmul.f32 %v8384_v34, %v442_v35 }
  0xea   :  { %916 = vrot.lane.b32.xlu1 %v7683_v7, %s7618_s28  ;;  %918 = vrot.lane.b32.xlu0 %v7876_v37, %s7618_s28  ;;  %v8380_v7 = vld [vmem:[%s11429_s2 + $0x30] sm:$0x7f]  ;;  %v8398_v37 = vrot.slane %v8375_v33, %v8127_v59 }
  0xee   :  { %920 = vrot.lane.b32.xlu1 %v7871_v36, %s7618_s28  ;;  %922 = vrot.lane.b32.xlu0 %v7888_v39, %s7618_s28  ;;  %v448_v36 = vsel %vm441_vm3, %v8197_v6, %v8195_v45  ;;  %v8402_v39 = vrot.slane %v8380_v7, %v8127_v59 }
  0xef   :  { %v590_v23 = vmul.f32 %v8384_v34, %v448_v36 }
  0xf2   :  { %924 = vrot.lane.b32.xlu1 %v7883_v38, %s7618_s28  ;;  %926 = vrot.lane.b32.xlu0 %v7893_v40, %s7618_s28 }
  0xf4   :  { %v276_v18 = vpop.permute.xlu1 %275  ;;  %v274_v45 = vpop.permute.xlu0 %273 }
  0xf5   :  { %v453_v38 = vsel %vm441_vm3, %v8212_v53, %v276_v18  ;;  %v547_v40 = vsel %vm441_vm3, %v276_v18, %v8197_v6  ;;  %v447_v25 = vsel %vm441_vm3, %v8184_v49, %v274_v45  ;;  %v546_v41 = vsel %vm441_vm3, %v274_v45, %v8141_v2  ;;  %v11565_v6 = vld [vmem:[#allocation6_spill] sm:$0xff] }
  0xf6   :  { %v589_v59 = vmul.f32 %v8398_v37, %v547_v40  ;;  %v595_v20 = vmul.f32 %v8402_v39, %v453_v38  ;;  %v582_v0 = vmul.f32 %v8398_v37, %v546_v41  ;;  %v588_v46 = vmul.f32 %v8402_v39, %v447_v25  ;;  %928 = vrot.lane.b32.xlu1 %v7696_v9, %s7618_s28 }
  0xf7   :  { %v454_v53 = vsel %vm441_vm3, %v8225_v60, %v8223_v42  ;;  %930 = vrot.lane.b32.xlu0 %v11565_v6, %s7618_s28 }
  0xf8   :  { %v6829_v49 = vpack.c.bf16 %v590_v23, %v589_v59  ;;  %v6832_v2 = vpack.c.bf16 %v595_v20, %v595_v20  ;;  %v6825_v3 = vpack.c.bf16 %v583_v63, %v582_v0  ;;  %v6828_v1 = vpack.c.bf16 %v588_v46, %v588_v46  ;;  %v278_v10 = vpop.permute.xlu0 %277  ;;  %v11568_v63 = vld [vmem:[#allocation7_spill] sm:$0xff]  ;;  %v11570_v59 = vld [vmem:[#allocation4_spill] sm:$0xff] }
  0xf9   :  { %v459_v26 = vsel %vm441_vm3, %v8240_v57, %v278_v10  ;;  %v548_v29 = vsel %vm441_vm3, %v278_v10, %v8225_v60  ;;  %v597_v9 = vmul.f32 %v8384_v34, %v454_v53  ;;  %v460_v57 = vsel %vm441_vm3, %v8253_v48, %v8251_v51 }
  0xfa   :  { %730 = vst [vmem:[#allocation3 + $0x38] sm:$0xff] %v6829_v49  ;;  %733 = vst [vmem:[#allocation3 + $0x50] sm:$0xf] %v6832_v2  ;;  %v596_v42 = vmul.f32 %v8398_v37, %v548_v29  ;;  %v602_v11 = vmul.f32 %v8402_v39, %v459_v26  ;;  %932 = vrot.lane.b32.xlu1 %v11566_v30, %s7618_s28  ;;  %v604_v35 = vmul.f32 %v8384_v34, %v460_v57 }
  0xfb   :  { %726 = vst [vmem:[#allocation3] sm:$0xff] %v6825_v3  ;;  %729 = vst [vmem:[#allocation3 + $0x18] sm:$0xf] %v6828_v1  ;;  %934 = vrot.lane.b32.xlu0 %v11567_v21, %s7618_s28  ;;  %v466_v23 = vsel %vm441_vm3, %v8281_v8, %v8279_v44  ;;  %v472_v20 = vsel %vm441_vm3, %v8309_v56, %v8307_v19  ;;  %v11572_v3 = vld [vmem:[#allocation10_spill] sm:$0xff]  ;;  %v478_v1 = vsel %vm441_vm3, %v8337_v52, %v8335_v62 }
  0xfc   :  { %v6833_v60 = vpack.c.bf16 %v597_v9, %v596_v42  ;;  %v6836_v24 = vpack.c.bf16 %v602_v11, %v602_v11  ;;  %v611_v25 = vmul.f32 %v8384_v34, %v466_v23  ;;  %v618_v49 = vmul.f32 %v8384_v34, %v472_v20  ;;  %v11574_v11 = vld [vmem:[#allocation12_spill] sm:$0xff]  ;;  %v11575_v21 = vld [vmem:[#allocation14_spill] sm:$0xff] }
  0xfd   :  { %v280_v5 = vpop.permute.xlu1 %279  ;;  %v625_v9 = vmul.f32 %v8384_v34, %v478_v1 }
  0xfe   :  { %v465_v32 = vsel %vm441_vm3, %v8268_v17, %v280_v5  ;;  %v549_v16 = vsel %vm441_vm3, %v280_v5, %v8253_v48  ;;  %734 = vst [vmem:[#allocation3 + $0x70] sm:$0xff] %v6833_v60  ;;  %737 = vst [vmem:[#allocation3 + $0x88] sm:$0xf] %v6836_v24  ;;  %936 = vrot.lane.b32.xlu1 %v11568_v63, %s7618_s28  ;;  %v11569_v17 = vld [vmem:[#allocation9_spill] sm:$0xff] }
  0xff   :  { %v603_v36 = vmul.f32 %v8398_v37, %v549_v16  ;;  %v609_v51 = vmul.f32 %v8402_v39, %v465_v32  ;;  %938 = vrot.lane.b32.xlu0 %v11569_v17, %s7618_s28 }
 0x100   :  { %v282_v45 = vpop.permute.xlu0 %281 }
 0x101   :  { %v6837_v18 = vpack.c.bf16 %v604_v35, %v603_v36  ;;  %v6840_v48 = vpack.c.bf16 %v609_v51, %v609_v51  ;;  %v471_v38 = vsel %vm441_vm3, %v8296_v22, %v282_v45  ;;  %v550_v40 = vsel %vm441_vm3, %v282_v45, %v8281_v8  ;;  %v11571_v22 = vld [vmem:[#allocation11_spill] sm:$0xff]  ;;  %v11577_v36 = vld [vmem:[#allocation16_spill] sm:$0xff] }
 0x102   :  { %v610_v41 = vmul.f32 %v8398_v37, %v550_v40  ;;  %v616_v44 = vmul.f32 %v8402_v39, %v471_v38  ;;  %940 = vrot.lane.b32.xlu1 %v11570_v59, %s7618_s28 }
 0x103   :  { %738 = vst [vmem:[#allocation3 + $0xa8] sm:$0xff] %v6837_v18  ;;  %741 = vst [vmem:[#allocation3 + $0xc0] sm:$0xf] %v6840_v48  ;;  %942 = vrot.lane.b32.xlu0 %v11571_v22, %s7618_s28 }
 0x104   :  { %v6841_v0 = vpack.c.bf16 %v611_v25, %v610_v41  ;;  %v6844_v8 = vpack.c.bf16 %v616_v44, %v616_v44  ;;  %v284_v46 = vpop.permute.xlu1 %283 }
 0x105   :  { %v477_v53 = vsel %vm441_vm3, %v8324_v27, %v284_v46  ;;  %v551_v6 = vsel %vm441_vm3, %v284_v46, %v8309_v56  ;;  %v11573_v27 = vld [vmem:[#allocation13_spill] sm:$0xff] }
 0x106   :  { %830 = vst [vmem:[#allocation3 + $0x1c] sm:$0xff] %v6841_v0  ;;  %833 = vst [vmem:[#allocation3 + $0x34] sm:$0xf] %v6844_v8  ;;  %v617_v2 = vmul.f32 %v8398_v37, %v551_v6  ;;  %v623_v19 = vmul.f32 %v8402_v39, %v477_v53  ;;  %944 = vrot.lane.b32.xlu1 %v11572_v3, %s7618_s28  ;;  %v11579_v46 = vld [vmem:[#allocation17_spill] sm:$0xff]  ;;  %v11580_v53 = vld [vmem:[#allocation19_spill] sm:$0xff] }
 0x107   :  { %946 = vrot.lane.b32.xlu0 %v11573_v27, %s7618_s28  ;;  %v11582_v27 = vld [vmem:[#allocation26_spill] sm:$0xff] }
 0x108   :  { %v6845_v10 = vpack.c.bf16 %v618_v49, %v617_v2  ;;  %v6848_v56 = vpack.c.bf16 %v623_v19, %v623_v19  ;;  %v286_v26 = vpop.permute.xlu0 %285 }
 0x109   :  { %v552_v29 = vsel %vm441_vm3, %v286_v26, %v8337_v52 }
 0x10a   :  { %834 = vst [vmem:[#allocation3 + $0x54] sm:$0xff] %v6845_v10  ;;  %837 = vst [vmem:[#allocation3 + $0x6c] sm:$0xf] %v6848_v56  ;;  %v624_v42 = vmul.f32 %v8398_v37, %v552_v29  ;;  %948 = vrot.lane.b32.xlu1 %v11574_v11, %s7618_s28  ;;  %v11583_v10 = vld [vmem:[#allocation20_spill] sm:$0xff]  ;;  %v7085_v11 = vpack.i.bf16 %v8107_v61, %v11580_v53 }
 0x10b   :  { %950 = vrot.lane.b32.xlu0 %v7963_v50, %s7618_s28  ;;  %v1081_v56 = vsub.s32 1, %v11583_v10 }
 0x10c   :  { %v6849_v62 = vpack.c.bf16 %v625_v9, %v624_v42  ;;  %v288_v30 = vpop.permute.xlu1 %287  ;;  %v426_v57 = vpop.permute.xlu0 %425 }
 0x10d   :  { %v481_v52 = vsel %vm441_vm3, %v8343_v28, %v426_v57 }
 0x10e   :  { %838 = vst [vmem:[#allocation3 + $0x8c] sm:$0xff] %v6849_v62  ;;  %952 = vrot.lane.b32.xlu1 %v7721_v13, %s7618_s28  ;;  %v628_v50 = vmul.f32 %v8172_v47, %v481_v52  ;;  %v11576_v13 = vld [vmem:[#allocation15_spill] sm:$0xff]  ;;  %v8570_v62 = vrot.slane %v8375_v33, %v1081_v56  ;;  %v8578_v52 = vld [vmem:[#allocation2 + $0x80] sm:$0xff]  ;;  %v8587_v33 = vld [vmem:[#allocation2 + $0xa8] sm:$0xff] }
 0x10f   :  { %954 = vrot.lane.b32.xlu0 %v11575_v21, %s7618_s28 }
 0x110   :  { %v428_v60 = vpop.permute.xlu1 %427  ;;  %v430_v24 = vpop.permute.xlu0 %429 }
 0x111   :  { %v482_v5 = vsel %vm441_vm3, %v426_v57, %v428_v60  ;;  %v483_v32 = vsel %vm441_vm3, %v428_v60, %v286_v26  ;;  %v553_v28 = vsel %vm441_vm3, %v288_v30, %v430_v24  ;;  %v8559_v26 = vld [vmem:[#allocation2 + $0x78] sm:$0xff]  ;;  %v8576_v57 = vld [vmem:[#allocation2 + $0x88] sm:$0xff] }
 0x112   :  { %v629_v16 = vmul.f32 %v8182_v43, %v482_v5  ;;  %v630_v35 = vmul.f32 %v8402_v39, %v483_v32  ;;  %956 = vrot.lane.b32.xlu1 %v11576_v13, %s7618_s28  ;;  %v631_v48 = vmul.f32 %v8398_v37, %v553_v28  ;;  %v7095_v21 = vpack.i.bf16 %v8576_v57, %v8578_v52  ;;  %v11585_v28 = vld [vmem:[#allocation22_spill] sm:$0xff] }
 0x113   :  { %958 = vrot.lane.b32.xlu0 %v11577_v36, %s7618_s28  ;;  %v8599_v36 = vrot.slane %v11585_v28, %v1081_v56 }
 0x114   :  { %v6851_v51 = vpack.c.bf16 %v629_v16, %v628_v50  ;;  %v6852_v63 = vpack.c.bf16 %v630_v35, %v630_v35  ;;  %v432_v23 = vpop.permute.xlu1 %431  ;;  %v434_v17 = vpop.permute.xlu0 %433  ;;  %v11584_v50 = vld [vmem:[#allocation21_spill] sm:$0xff] }
 0x115   :  { %v484_v18 = vsel %vm441_vm3, %v430_v24, %v432_v23  ;;  %v485_v38 = vsel %vm441_vm3, %v432_v23, %v434_v17  ;;  %v8593_v16 = vrot.slane %v11584_v50, %v1081_v56 }
 0x116   :  { %840 = vst [vmem:[#allocation3 + $0x9c] sm:$0xff] %v6851_v51  ;;  %841 = vst [vmem:[#allocation3 + $0xa4] sm:$0xf] %v6852_v63  ;;  %v632_v45 = vmul.f32 %v8384_v34, %v484_v18  ;;  %960 = vrot.lane.b32.xlu1 %v7999_v54, %s7618_s28  ;;  %v633_v59 = vmul.f32 %v8149_v12, %v485_v38  ;;  %v11578_v34 = vld [vmem:[#allocation18_spill] sm:$0xff]  ;;  %v8601_v51 = vld [vmem:[#allocation2 + $0xc0] sm:$0xff] }
 0x117   :  { %962 = vrot.lane.b32.xlu0 %v8005_v55, %s7618_s28  ;;  %v8603_v63 = vld [vmem:[#allocation2 + $0xb8] sm:$0xff] }
 0x118   :  { %v6853_v40 = vpack.c.bf16 %v632_v45, %v631_v48  ;;  %v436_v25 = vpop.permute.xlu1 %435  ;;  %v438_v41 = vpop.permute.xlu0 %437  ;;  %v7105_v23 = vpack.i.bf16 %v8601_v51, %v8603_v63 }
 0x119   :  { %v486_v44 = vsel %vm441_vm3, %v434_v17, %v436_v25  ;;  %v487_v54 = vsel %vm441_vm3, %v436_v25, %v438_v41 }
 0x11a   :  { %842 = vst [vmem:[#allocation3 + $0xc4] sm:$0xff] %v6853_v40  ;;  %v634_v37 = vmul.f32 %v8153_v14, %v486_v44  ;;  %964 = vrot.lane.b32.xlu1 %v7737_v15, %s7618_s28  ;;  %v635_v12 = vmul.f32 %v8172_v47, %v487_v54  ;;  %v11586_v40 = vld [vmem:[#allocation24_spill] sm:$0xff]  ;;  %v11587_v44 = vld [vmem:[#allocation25_spill] sm:$0xff] }
 0x11b   :  { %1371 = vrot.lane.b32.xlu0 %v11578_v34, %s7619_s8  ;;  %v8611_v25 = vrot.slane %v11586_v40, %v1081_v56 }
 0x11c   :  { %v6854_v55 = vpack.c.bf16 %v634_v37, %v633_v59  ;;  %v440_v20 = vpop.permute.xlu1 %439  ;;  %v8521_v22 = vpop.permute.xlu0 %846  ;;  %v8616_v59 = vrot.slane %v11587_v44, %v1081_v56 }
 0x11d   :  { %v488_v0 = vsel %vm441_vm3, %v438_v41, %v440_v20  ;;  %v489_v8 = vsel %vm441_vm3, %v440_v20, %v288_v30  ;;  %v8574_v30 = vrot.slane %v8366_v31, %v1081_v56  ;;  %v7110_v41 = vpack.i.bf16 %v11579_v46, %v11578_v34  ;;  %v8624_v20 = vld [vmem:[#allocation2 + $0x8] sm:$0xff] }
 0x11e   :  { %843 = vst [vmem:[#allocation3 + $0xcc] sm:$0xff] %v6854_v55  ;;  %v636_v14 = vmul.f32 %v8182_v43, %v488_v0  ;;  %v637_v15 = vmul.f32 %v8402_v39, %v489_v8  ;;  %1373 = vrot.lane.b32.xlu1 %v11579_v46, %s7619_s8  ;;  %v11581_v39 = vld [vmem:[#allocation23_spill] sm:$0xff]  ;;  %v8622_v55 = vrot.slane %v8380_v7, %v1081_v56  ;;  %v8643_v56 = vld [vmem:[#allocation2 + $0x40] sm:$0xff] }
 0x11f   :  { %1375 = vrot.lane.b32.xlu0 %v11580_v53, %s7619_s8  ;;  %v8630_v8 = vld [vmem:[#allocation2 + $0x18] sm:$0xff] }
 0x120   :  { %v6855_v6 = vpack.c.bf16 %v636_v14, %v635_v12  ;;  %v6856_v49 = vpack.c.bf16 %v637_v15, %v637_v15  ;;  %v8532_v2 = vpop.permute.xlu1 %848  ;;  %v8534_v19 = vpop.permute.xlu0 %850  ;;  %v8632_v12 = vld [vmem:[#allocation2 + $0x10] sm:$0xff] }
 0x121   :  { %v7120_v14 = vpack.i.bf16 %v8630_v8, %v8632_v12 }
 0x122   :  { %844 = vst [vmem:[#allocation3 + $0xd4] sm:$0xff] %v6855_v6  ;;  %845 = vst [vmem:[#allocation3 + $0xdc] sm:$0xf] %v6856_v49  ;;  %1377 = vrot.lane.b32.xlu1 %v8107_v61, %s7619_s8  ;;  %v8585_v61 = vld [vmem:[#allocation2 + $0xb0] sm:$0xff] }
 0x123   :  { %1379 = vrot.lane.b32.xlu0 %v8113_v4, %s7619_s8  ;;  %v8555_v4 = vld [vmem:[#allocation2] sm:$0xff]  ;;  %v7100_v31 = vpack.i.bf16 %v8585_v61, %v8587_v33 }
 0x124   :  { %v8540_v43 = vpop.permute.xlu1 %852  ;;  %v8542_v47 = vpop.permute.xlu0 %854  ;;  %v7115_v0 = vpack.i.bf16 %v8624_v20, %v8555_v4 }
 0x126   :  { %1381 = vrot.lane.b32.xlu1 %v8121_v58, %s7619_s8  ;;  %v8561_v58 = vld [vmem:[#allocation2 + $0x70] sm:$0xff] }
 0x127   :  { %1383 = vrot.lane.b32.xlu0 %v11581_v39, %s7619_s8  ;;  %v7090_v29 = vpack.i.bf16 %v8559_v26, %v8561_v58 }
 0x128   :  { %v8548_v3 = vpop.permute.xlu1 %856  ;;  %v8550_v1 = vpop.permute.xlu0 %858 }
 0x12a   :  { %1385 = vrot.lane.b32.xlu1 %v11582_v27, %s7619_s8 }
 0x12b   :  { %1395 = vrot.lane.b32.xlu0 %v8555_v4, %s7619_s8 }
 0x12c   :  { %v8565_v9 = vpop.permute.xlu1 %860  ;;  %v871_v42 = vpop.permute.xlu0 %870 }
 0x12d   :  { %v1071_v60 = vsel %vm966_vm4, %v8521_v22, %v871_v42 }
 0x12e   :  { %7086 = vrot.lane.b32.xlu1 %v7085_v11, %s7620_s9  ;;  %v1107_v35 = vmul.f32 %v8570_v62, %v1071_v60 }
 0x12f   :  { %7091 = vrot.lane.b32.xlu0 %v7090_v29, %s7620_s9  ;;  %v8645_v29 = vld [vmem:[#allocation2 + $0x38] sm:$0xff] }
 0x130   :  { %v873_v24 = vpop.permute.xlu1 %872  ;;  %v875_v5 = vpop.permute.xlu0 %874 }
 0x131   :  { %v967_v32 = vsel %vm966_vm4, %v871_v42, %v873_v24  ;;  %v968_v17 = vsel %vm966_vm4, %v873_v24, %v875_v5  ;;  %v7125_v42 = vpack.i.bf16 %v8643_v56, %v8645_v29 }
 0x132   :  { %v1108_v13 = vmul.f32 %v8574_v30, %v967_v32  ;;  %7096 = vrot.lane.b32.xlu1 %v7095_v21, %s7620_s9  ;;  %v1109_v37 = vmul.f32 %v8593_v16, %v968_v17  ;;  %v8654_v21 = vld [vmem:[#allocation2 + $0x48] sm:$0xff] }
 0x133   :  { %7101 = vrot.lane.b32.xlu0 %v7100_v31, %s7620_s9 }
 0x134   :  { %v6857_v18 = vpack.c.bf16 %v1108_v13, %v1107_v35  ;;  %v877_v48 = vpop.permute.xlu1 %876  ;;  %v879_v45 = vpop.permute.xlu0 %878 }
 0x135   :  { %v969_v38 = vsel %vm966_vm4, %v875_v5, %v877_v48  ;;  %v970_v34 = vsel %vm966_vm4, %v877_v48, %v879_v45 }
 0x136   :  { %1251 = vst [vmem:[#allocation3 + $0xe0] sm:$0xff] %v6857_v18  ;;  %v1110_v54 = vmul.f32 %v8599_v36, %v969_v38  ;;  %7106 = vrot.lane.b32.xlu1 %v7105_v23, %s7620_s9  ;;  %v1111_v49 = vmul.f32 %v8611_v25, %v970_v34 }
 0x137   :  { %7111 = vrot.lane.b32.xlu0 %v7110_v41, %s7620_s9 }
 0x138   :  { %v6858_v15 = vpack.c.bf16 %v1110_v54, %v1109_v37  ;;  %v881_v46 = vpop.permute.xlu1 %880  ;;  %v883_v7 = vpop.permute.xlu0 %882 }
 0x139   :  { %v971_v53 = vsel %vm966_vm4, %v879_v45, %v881_v46  ;;  %v972_v6 = vsel %vm966_vm4, %v881_v46, %v8521_v22  ;;  %v1072_v11 = vsel %vm966_vm4, %v8532_v2, %v883_v7  ;;  %v8652_v22 = vld [vmem:[#allocation2 + $0x50] sm:$0xff] }
 0x13a   :  { %1252 = vst [vmem:[#allocation3 + $0xe8] sm:$0xff] %v6858_v15  ;;  %v1112_v39 = vmul.f32 %v8616_v59, %v971_v53  ;;  %v1113_v27 = vmul.f32 %v8622_v55, %v972_v6  ;;  %7116 = vrot.lane.b32.xlu1 %v7115_v0, %s7620_s9  ;;  %v7130_v60 = vpack.i.bf16 %v8652_v22, %v8654_v21 }
 0x13b   :  { %7121 = vrot.lane.b32.xlu0 %v7120_v14, %s7620_s9  ;;  %v1114_v35 = vmul.f32 %v8570_v62, %v1072_v11 }
 0x13c   :  { %v6859_v31 = vpack.c.bf16 %v1112_v39, %v1111_v49  ;;  %v6860_v24 = vpack.c.bf16 %v1113_v27, %v1113_v27  ;;  %v885_v5 = vpop.permute.xlu1 %884  ;;  %v887_v32 = vpop.permute.xlu0 %886 }
 0x13d   :  { %v973_v50 = vsel %vm966_vm4, %v883_v7, %v885_v5  ;;  %v974_v28 = vsel %vm966_vm4, %v885_v5, %v887_v32 }
 0x13e   :  { %1253 = vst [vmem:[#allocation3 + $0xf0] sm:$0xff] %v6859_v31  ;;  %1254 = vst [vmem:[#allocation3 + $0xf8] sm:$0xf] %v6860_v24  ;;  %v1115_v13 = vmul.f32 %v8574_v30, %v973_v50  ;;  %7126 = vrot.lane.b32.xlu1 %v7125_v42, %s7620_s9  ;;  %v1116_v45 = vmul.f32 %v8593_v16, %v974_v28 }
 0x13f   :  { %7131 = vrot.lane.b32.xlu0 %v7130_v60, %s7620_s9 }
 0x140   :  { %v6861_v23 = vpack.c.bf16 %v1115_v13, %v1114_v35  ;;  %v889_v17 = vpop.permute.xlu1 %888  ;;  %v891_v18 = vpop.permute.xlu0 %890 }
 0x141   :  { %v975_v48 = vsel %vm966_vm4, %v887_v32, %v889_v17  ;;  %v976_v40 = vsel %vm966_vm4, %v889_v17, %v891_v18 }
 0x142   :  { %1255 = vst [vmem:[#allocation3 + $0x118] sm:$0xff] %v6861_v23  ;;  %v1117_v38 = vmul.f32 %v8599_v36, %v975_v48  ;;  %1419 = vrot.lane.b32.xlu1 %v8561_v58, %s7619_s8  ;;  %v1118_v34 = vmul.f32 %v8611_v25, %v976_v40 }
 0x143   :  { %1421 = vrot.lane.b32.xlu0 %v8559_v26, %s7619_s8 }
 0x144   :  { %v6862_v41 = vpack.c.bf16 %v1117_v38, %v1116_v45  ;;  %v893_v44 = vpop.permute.xlu1 %892  ;;  %v895_v37 = vpop.permute.xlu0 %894 }
 0x145   :  { %v977_v54 = vsel %vm966_vm4, %v891_v18, %v893_v44  ;;  %v978_v0 = vsel %vm966_vm4, %v893_v44, %v8532_v2  ;;  %v1073_v46 = vsel %vm966_vm4, %v8534_v19, %v895_v37 }
 0x146   :  { %1256 = vst [vmem:[#allocation3 + $0x120] sm:$0xff] %v6862_v41  ;;  %v1119_v14 = vmul.f32 %v8616_v59, %v977_v54  ;;  %v1120_v15 = vmul.f32 %v8622_v55, %v978_v0  ;;  %1423 = vrot.lane.b32.xlu1 %v8578_v52, %s7619_s8  ;;  %v8686_v39 = vmul.f32 %v8570_v62, %v1073_v46 }
 0x147   :  { %1425 = vrot.lane.b32.xlu0 %v8576_v57, %s7619_s8 }
 0x148   :  { %v6863_v7 = vpack.c.bf16 %v1119_v14, %v1118_v34  ;;  %v6864_v53 = vpack.c.bf16 %v1120_v15, %v1120_v15  ;;  %v897_v6 = vpop.permute.xlu1 %896  ;;  %v899_v2 = vpop.permute.xlu0 %898 }
 0x149   :  { %v979_v49 = vsel %vm966_vm4, %v895_v37, %v897_v6  ;;  %v980_v42 = vsel %vm966_vm4, %v897_v6, %v899_v2 }
 0x14a   :  { %1257 = vst [vmem:[#allocation3 + $0x128] sm:$0xff] %v6863_v7  ;;  %1258 = vst [vmem:[#allocation3 + $0x130] sm:$0xf] %v6864_v53  ;;  %v8689_v27 = vmul.f32 %v8574_v30, %v979_v49  ;;  %1431 = vrot.lane.b32.xlu1 %v8587_v33, %s7619_s8  ;;  %v8698_v24 = vmul.f32 %v8593_v16, %v980_v42 }
 0x14b   :  { %1433 = vrot.lane.b32.xlu0 %v8585_v61, %s7619_s8 }
 0x14c   :  { %v901_v11 = vpop.permute.xlu1 %900  ;;  %v903_v60 = vpop.permute.xlu0 %902 }
 0x14d   :  { %v981_v31 = vsel %vm966_vm4, %v899_v2, %v901_v11  ;;  %v982_v32 = vsel %vm966_vm4, %v901_v11, %v903_v60 }
 0x14e   :  { %v8701_v5 = vmul.f32 %v8599_v36, %v981_v31  ;;  %1435 = vrot.lane.b32.xlu1 %v8603_v63, %s7619_s8  ;;  %v1125_v23 = vmul.f32 %v8611_v25, %v982_v32 }
 0x14f   :  { %1437 = vrot.lane.b32.xlu0 %v8601_v51, %s7619_s8 }
 0x150   :  { %v905_v50 = vpop.permute.xlu1 %904  ;;  %v907_v35 = vpop.permute.xlu0 %906 }
 0x151   :  { %v983_v13 = vsel %vm966_vm4, %v903_v60, %v905_v50  ;;  %v984_v28 = vsel %vm966_vm4, %v905_v50, %v8534_v19  ;;  %v1074_v48 = vsel %vm966_vm4, %v8540_v43, %v907_v35 }
 0x152   :  { %v1126_v17 = vmul.f32 %v8616_v59, %v983_v13  ;;  %v1127_v18 = vmul.f32 %v8622_v55, %v984_v28  ;;  %1397 = vrot.lane.b32.xlu1 %v8624_v20, %s7619_s8  ;;  %v8722_v44 = vmul.f32 %v8570_v62, %v1074_v48 }
 0x153   :  { %1399 = vrot.lane.b32.xlu0 %v8632_v12, %s7619_s8 }
 0x154   :  { %v6867_v45 = vpack.c.bf16 %v1126_v17, %v1125_v23  ;;  %v6868_v38 = vpack.c.bf16 %v1127_v18, %v1127_v18  ;;  %v909_v40 = vpop.permute.xlu1 %908  ;;  %v911_v41 = vpop.permute.xlu0 %910 }
 0x155   :  { %v985_v19 = vsel %vm966_vm4, %v907_v35, %v909_v40  ;;  %v986_v54 = vsel %vm966_vm4, %v909_v40, %v911_v41  ;;  %v8758_v35 = vld [vmem:[#allocation2 + $0xa0] sm:$0xff]  ;;  %v8769_v40 = vld [vmem:[#allocation2 + $0xd8] sm:$0xff] }
 0x156   :  { %1261 = vst [vmem:[#allocation3 + $0x160] sm:$0xff] %v6867_v45  ;;  %1262 = vst [vmem:[#allocation3 + $0x168] sm:$0xf] %v6868_v38  ;;  %v8725_v37 = vmul.f32 %v8574_v30, %v985_v19  ;;  %1401 = vrot.lane.b32.xlu1 %v8630_v8, %s7619_s8  ;;  %v8734_v15 = vmul.f32 %v8593_v16, %v986_v54 }
 0x157   :  { %1407 = vrot.lane.b32.xlu0 %v8645_v29, %s7619_s8 }
 0x158   :  { %v913_v0 = vpop.permute.xlu1 %912  ;;  %v915_v34 = vpop.permute.xlu0 %914 }
 0x159   :  { %v987_v14 = vsel %vm966_vm4, %v911_v41, %v913_v0  ;;  %v988_v53 = vsel %vm966_vm4, %v913_v0, %v915_v34 }
 0x15a   :  { %v8737_v46 = vmul.f32 %v8599_v36, %v987_v14  ;;  %1409 = vrot.lane.b32.xlu1 %v8643_v56, %s7619_s8  ;;  %v1132_v60 = vmul.f32 %v8611_v25, %v988_v53 }
 0x15b   :  { %1411 = vrot.lane.b32.xlu0 %v8654_v21, %s7619_s8 }
 0x15c   :  { %v917_v2 = vpop.permute.xlu1 %916  ;;  %v919_v49 = vpop.permute.xlu0 %918 }
 0x15d   :  { %v989_v42 = vsel %vm966_vm4, %v915_v34, %v917_v2  ;;  %v990_v11 = vsel %vm966_vm4, %v917_v2, %v8540_v43  ;;  %v1075_v50 = vsel %vm966_vm4, %v8542_v47, %v919_v49 }
 0x15e   :  { %v1133_v31 = vmul.f32 %v8616_v59, %v989_v42  ;;  %v1134_v32 = vmul.f32 %v8622_v55, %v990_v11  ;;  %1413 = vrot.lane.b32.xlu1 %v8652_v22, %s7619_s8  ;;  %v1135_v45 = vmul.f32 %v8570_v62, %v1075_v50 }
 0x15f   :  { %3391 = vrot.lane.b32.xlu0 %v8758_v35, %s7621_s10 }
 0x160   :  { %v6871_v28 = vpack.c.bf16 %v1133_v31, %v1132_v60  ;;  %v6872_v23 = vpack.c.bf16 %v1134_v32, %v1134_v32  ;;  %v921_v17 = vpop.permute.xlu1 %920  ;;  %v923_v18 = vpop.permute.xlu0 %922 }
 0x161   :  { %v991_v48 = vsel %vm966_vm4, %v919_v49, %v921_v17  ;;  %v992_v41 = vsel %vm966_vm4, %v921_v17, %v923_v18 }
 0x162   :  { %1265 = vst [vmem:[#allocation3 + $0x198] sm:$0xff] %v6871_v28  ;;  %1266 = vst [vmem:[#allocation3 + $0x1a0] sm:$0xf] %v6872_v23  ;;  %v1136_v38 = vmul.f32 %v8574_v30, %v991_v48  ;;  %3393 = vrot.lane.b32.xlu1 %v8769_v40, %s7621_s10  ;;  %v1137_v14 = vmul.f32 %v8593_v16, %v992_v41 }
 0x163   :  { %3435 = vrot.lane.b32.xlu0 %v8561_v58, %s7621_s10 }
 0x164   :  { %v6873_v19 = vpack.c.bf16 %v1136_v38, %v1135_v45  ;;  %v925_v54 = vpop.permute.xlu1 %924  ;;  %v927_v0 = vpop.permute.xlu0 %926 }
 0x165   :  { %v993_v34 = vsel %vm966_vm4, %v923_v18, %v925_v54  ;;  %v994_v2 = vsel %vm966_vm4, %v925_v54, %v927_v0 }
 0x166   :  { %1355 = vst [vmem:[#allocation3 + $0xfc] sm:$0xff] %v6873_v19  ;;  %v1138_v53 = vmul.f32 %v8599_v36, %v993_v34  ;;  %3437 = vrot.lane.b32.xlu1 %v8559_v26, %s7621_s10  ;;  %v1139_v32 = vmul.f32 %v8611_v25, %v994_v2 }
 0x167   :  { %3439 = vrot.lane.b32.xlu0 %v8578_v52, %s7621_s10 }
 0x168   :  { %v6874_v49 = vpack.c.bf16 %v1138_v53, %v1137_v14  ;;  %v929_v42 = vpop.permute.xlu1 %928 }
 0x169   :  { %v995_v11 = vsel %vm966_vm4, %v927_v0, %v929_v42  ;;  %v996_v60 = vsel %vm966_vm4, %v929_v42, %v8542_v47  ;;  %v931_v31 = vpop.permute.xlu0 %930  ;;  %v8810_v42 = vld [vmem:[#allocation2 + $0x30] sm:$0xff] }
 0x16a   :  { %1356 = vst [vmem:[#allocation3 + $0x104] sm:$0xff] %v6874_v49  ;;  %v1140_v50 = vmul.f32 %v8616_v59, %v995_v11  ;;  %v1141_v28 = vmul.f32 %v8622_v55, %v996_v60  ;;  %3441 = vrot.lane.b32.xlu1 %v8576_v57, %s7621_s10  ;;  %v1076_v23 = vsel %vm966_vm4, %v8548_v3, %v931_v31 }
 0x16b   :  { %3447 = vrot.lane.b32.xlu0 %v8587_v33, %s7621_s10  ;;  %v1142_v38 = vmul.f32 %v8570_v62, %v1076_v23 }
 0x16c   :  { %v6875_v17 = vpack.c.bf16 %v1140_v50, %v1139_v32  ;;  %v6876_v18 = vpack.c.bf16 %v1141_v28, %v1141_v28  ;;  %v933_v47 = vpop.permute.xlu1 %932 }
 0x16d   :  { %v997_v48 = vsel %vm966_vm4, %v931_v31, %v933_v47  ;;  %v935_v45 = vpop.permute.xlu0 %934 }
 0x16e   :  { %1357 = vst [vmem:[#allocation3 + $0x10c] sm:$0xff] %v6875_v17  ;;  %1358 = vst [vmem:[#allocation3 + $0x114] sm:$0xf] %v6876_v18  ;;  %v1143_v41 = vmul.f32 %v8574_v30, %v997_v48  ;;  %3449 = vrot.lane.b32.xlu1 %v8585_v61, %s7621_s10  ;;  %v998_v19 = vsel %vm966_vm4, %v933_v47, %v935_v45  ;;  %v8820_v18 = vld [vmem:[#allocation2 + $0x68] sm:$0xff] }
 0x16f   :  { %3451 = vrot.lane.b32.xlu0 %v8603_v63, %s7621_s10  ;;  %v1144_v53 = vmul.f32 %v8593_v16, %v998_v19 }
 0x170   :  { %v6877_v54 = vpack.c.bf16 %v1143_v41, %v1142_v38  ;;  %v937_v0 = vpop.permute.xlu1 %936 }
 0x171   :  { %v999_v34 = vsel %vm966_vm4, %v935_v45, %v937_v0  ;;  %v939_v14 = vpop.permute.xlu0 %938 }
 0x172   :  { %1359 = vst [vmem:[#allocation3 + $0x134] sm:$0xff] %v6877_v54  ;;  %v1145_v2 = vmul.f32 %v8599_v36, %v999_v34  ;;  %3453 = vrot.lane.b32.xlu1 %v8601_v51, %s7621_s10  ;;  %v1000_v49 = vsel %vm966_vm4, %v937_v0, %v939_v14 }
 0x173   :  { %3387 = vrot.lane.b32.xlu0 %v8810_v42, %s7621_s10  ;;  %v1146_v28 = vmul.f32 %v8611_v25, %v1000_v49 }
 0x174   :  { %v6878_v11 = vpack.c.bf16 %v1145_v2, %v1144_v53  ;;  %v941_v60 = vpop.permute.xlu1 %940 }
 0x175   :  { %v1001_v31 = vsel %vm966_vm4, %v939_v14, %v941_v60  ;;  %v1002_v32 = vsel %vm966_vm4, %v941_v60, %v8548_v3  ;;  %v943_v50 = vpop.permute.xlu0 %942 }
 0x176   :  { %1360 = vst [vmem:[#allocation3 + $0x13c] sm:$0xff] %v6878_v11  ;;  %v1147_v23 = vmul.f32 %v8616_v59, %v1001_v31  ;;  %v1148_v17 = vmul.f32 %v8622_v55, %v1002_v32  ;;  %3389 = vrot.lane.b32.xlu1 %v8820_v18, %s7621_s10  ;;  %v1077_v47 = vsel %vm966_vm4, %v8550_v1, %v943_v50 }
 0x177   :  { %3411 = vrot.lane.b32.xlu0 %v8555_v4, %s7621_s10  ;;  %v1149_v19 = vmul.f32 %v8570_v62, %v1077_v47 }
 0x178   :  { %v6879_v3 = vpack.c.bf16 %v1147_v23, %v1146_v28  ;;  %v6880_v48 = vpack.c.bf16 %v1148_v17, %v1148_v17  ;;  %v945_v45 = vpop.permute.xlu1 %944 }
 0x179   :  { %v1003_v38 = vsel %vm966_vm4, %v943_v50, %v945_v45  ;;  %v947_v41 = vpop.permute.xlu0 %946 }
 0x17a   :  { %1361 = vst [vmem:[#allocation3 + $0x144] sm:$0xff] %v6879_v3  ;;  %1362 = vst [vmem:[#allocation3 + $0x14c] sm:$0xf] %v6880_v48  ;;  %v1150_v54 = vmul.f32 %v8574_v30, %v1003_v38  ;;  %3413 = vrot.lane.b32.xlu1 %v8624_v20, %s7621_s10  ;;  %v1004_v0 = vsel %vm966_vm4, %v945_v45, %v947_v41 }
 0x17b   :  { %3415 = vrot.lane.b32.xlu0 %v8632_v12, %s7621_s10  ;;  %v1151_v49 = vmul.f32 %v8593_v16, %v1004_v0 }
 0x17c   :  { %v6881_v34 = vpack.c.bf16 %v1150_v54, %v1149_v19  ;;  %v949_v14 = vpop.permute.xlu1 %948 }
 0x17d   :  { %v1005_v53 = vsel %vm966_vm4, %v947_v41, %v949_v14  ;;  %v951_v2 = vpop.permute.xlu0 %950 }
 0x17e   :  { %1363 = vst [vmem:[#allocation3 + $0x16c] sm:$0xff] %v6881_v34  ;;  %v1152_v11 = vmul.f32 %v8599_v36, %v1005_v53  ;;  %3417 = vrot.lane.b32.xlu1 %v8630_v8, %s7621_s10  ;;  %v1006_v60 = vsel %vm966_vm4, %v949_v14, %v951_v2 }
 0x17f   :  { %3423 = vrot.lane.b32.xlu0 %v8645_v29, %s7621_s10  ;;  %v1153_v17 = vmul.f32 %v8611_v25, %v1006_v60 }
 0x180   :  { %v6882_v31 = vpack.c.bf16 %v1152_v11, %v1151_v49  ;;  %v953_v32 = vpop.permute.xlu1 %952 }
 0x181   :  { %v1007_v50 = vsel %vm966_vm4, %v951_v2, %v953_v32  ;;  %v1008_v28 = vsel %vm966_vm4, %v953_v32, %v8550_v1  ;;  %v955_v23 = vpop.permute.xlu0 %954 }
 0x182   :  { %1364 = vst [vmem:[#allocation3 + $0x174] sm:$0xff] %v6882_v31  ;;  %v1154_v47 = vmul.f32 %v8616_v59, %v1007_v50  ;;  %v1155_v3 = vmul.f32 %v8622_v55, %v1008_v28  ;;  %3425 = vrot.lane.b32.xlu1 %v8643_v56, %s7621_s10  ;;  %v1078_v48 = vsel %vm966_vm4, %v8565_v9, %v955_v23 }
 0x183   :  { %3427 = vrot.lane.b32.xlu0 %v8654_v21, %s7621_s10  ;;  %v1156_v54 = vmul.f32 %v8570_v62, %v1078_v48 }
 0x184   :  { %v6883_v45 = vpack.c.bf16 %v1154_v47, %v1153_v17  ;;  %v6884_v38 = vpack.c.bf16 %v1155_v3, %v1155_v3  ;;  %v957_v1 = vpop.permute.xlu1 %956 }
 0x185   :  { %v1009_v41 = vsel %vm966_vm4, %v955_v23, %v957_v1  ;;  %v959_v19 = vpop.permute.xlu0 %958 }
 0x186   :  { %1365 = vst [vmem:[#allocation3 + $0x17c] sm:$0xff] %v6883_v45  ;;  %1366 = vst [vmem:[#allocation3 + $0x184] sm:$0xf] %v6884_v38  ;;  %v1157_v0 = vmul.f32 %v8574_v30, %v1009_v41  ;;  %3429 = vrot.lane.b32.xlu1 %v8652_v22, %s7621_s10  ;;  %v1010_v34 = vsel %vm966_vm4, %v957_v1, %v959_v19 }
 0x187   :  { %2866 = vrot.lane.b32.xlu0 %v8758_v35, %s7622_s11  ;;  %v1158_v11 = vmul.f32 %v8593_v16, %v1010_v34 }
 0x188   :  { %v6885_v14 = vpack.c.bf16 %v1157_v0, %v1156_v54  ;;  %v961_v53 = vpop.permute.xlu1 %960 }
 0x189   :  { %v1011_v2 = vsel %vm966_vm4, %v959_v19, %v961_v53  ;;  %v963_v49 = vpop.permute.xlu0 %962 }
 0x18a   :  { %1367 = vst [vmem:[#allocation3 + $0x1a4] sm:$0xff] %v6885_v14  ;;  %v1159_v62 = vmul.f32 %v8599_v36, %v1011_v2  ;;  %2868 = vrot.lane.b32.xlu1 %v8769_v40, %s7622_s11  ;;  %v1012_v30 = vsel %vm966_vm4, %v961_v53, %v963_v49 }
 0x18b   :  { %2910 = vrot.lane.b32.xlu0 %v8561_v58, %s7622_s11  ;;  %v1160_v16 = vmul.f32 %v8611_v25, %v1012_v30 }
 0x18c   :  { %v6886_v60 = vpack.c.bf16 %v1159_v62, %v1158_v11  ;;  %v965_v31 = vpop.permute.xlu1 %964 }
 0x18d   :  { %v1013_v32 = vsel %vm966_vm4, %v963_v49, %v965_v31  ;;  %v1014_v50 = vsel %vm966_vm4, %v965_v31, %v8565_v9  ;;  %v8875_v28 = vpop.permute.xlu0 %1371 }
 0x18e   :  { %11588 = vst [vmem:[#allocation6_spill] sm:$0xff] %v8875_v28  ;;  %1368 = vst [vmem:[#allocation3 + $0x1ac] sm:$0xff] %v6886_v60  ;;  %v1161_v36 = vmul.f32 %v8616_v59, %v1013_v32  ;;  %v1162_v23 = vmul.f32 %v8622_v55, %v1014_v50  ;;  %2912 = vrot.lane.b32.xlu1 %v8559_v26, %s7622_s11 }
 0x18f   :  { %2914 = vrot.lane.b32.xlu0 %v8578_v52, %s7622_s11 }
 0x190   :  { %v6887_v17 = vpack.c.bf16 %v1161_v36, %v1160_v16  ;;  %v6888_v47 = vpack.c.bf16 %v1162_v23, %v1162_v23  ;;  %v8884_v3 = vpop.permute.xlu1 %1373 }
 0x191   :  { %11589 = vst [vmem:[#allocation5_spill] sm:$0xff] %v8884_v3  ;;  %v8886_v9 = vpop.permute.xlu0 %1375 }
 0x192   :  { %1369 = vst [vmem:[#allocation3 + $0x1b4] sm:$0xff] %v6887_v17  ;;  %1370 = vst [vmem:[#allocation3 + $0x1bc] sm:$0xf] %v6888_v47  ;;  %2916 = vrot.lane.b32.xlu1 %v8576_v57, %s7622_s11 }
 0x193   :  { %2922 = vrot.lane.b32.xlu0 %v8587_v33, %s7622_s11 }
 0x194   :  { %v8892_v25 = vpop.permute.xlu1 %1377 }
 0x195   :  { %v8894_v59 = vpop.permute.xlu0 %1379 }
 0x196   :  { %11590 = vst [vmem:[#allocation8_spill] sm:$0xff] %v8894_v59  ;;  %2924 = vrot.lane.b32.xlu1 %v8585_v61, %s7622_s11 }
 0x197   :  { %2926 = vrot.lane.b32.xlu0 %v8603_v63, %s7622_s11 }
 0x198   :  { %v8900_v55 = vpop.permute.xlu1 %1381 }
 0x199   :  { %11591 = vst [vmem:[#allocation7_spill] sm:$0xff] %v8900_v55  ;;  %v8902_v48 = vpop.permute.xlu0 %1383  ;;  %v9034_v55 = vld [vmem:[%s11429_s2 + $0x18] sm:$0x7f] }
 0x19a   :  { %2928 = vrot.lane.b32.xlu1 %v8601_v51, %s7622_s11 }
 0x19b   :  { %2862 = vrot.lane.b32.xlu0 %v8810_v42, %s7622_s11 }
 0x19c   :  { %v8908_v45 = vpop.permute.xlu1 %1385 }
 0x19d   :  { %11592 = vst [vmem:[#allocation9_spill] sm:$0xff] %v8908_v45  ;;  %v8910_v38 = vpop.permute.xlu0 %1395 }
 0x19e   :  { %2864 = vrot.lane.b32.xlu1 %v8820_v18, %s7622_s11 }
 0x19f   :  { %2886 = vrot.lane.b32.xlu0 %v8555_v4, %s7622_s11 }
 0x1a0   :  { %v8916_v1 = vpop.permute.xlu1 %7086 }
 0x1a1   :  { %v11461_v41 = vunpack.i.l.bf16 %v8916_v1  ;;  %v7092_v19 = vpop.permute.xlu0 %7091  ;;  %v11459_v62 = vunpack.i.h.bf16 %v8916_v1 }
 0x1a2   :  { %v7094_v54 = vunpack.i.h.bf16 %v7092_v19  ;;  %v7093_v0 = vunpack.i.l.bf16 %v7092_v19  ;;  %2888 = vrot.lane.b32.xlu1 %v8624_v20, %s7622_s11 }
 0x1a3   :  { %2890 = vrot.lane.b32.xlu0 %v8632_v12, %s7622_s11 }
 0x1a4   :  { %v2029_v34 = vsel %vm2016_vm5, %v7093_v0, %v7094_v54  ;;  %v2123_v14 = vsel %vm2016_vm5, %v11461_v41, %v7093_v0  ;;  %v8927_v53 = vpop.permute.xlu1 %7096 }
 0x1a5   :  { %v11460_v2 = vunpack.i.h.bf16 %v8927_v53  ;;  %v7098_v49 = vunpack.i.l.bf16 %v8927_v53  ;;  %v7102_v11 = vpop.permute.xlu0 %7101 }
 0x1a6   :  { %v7104_v30 = vunpack.i.h.bf16 %v7102_v11  ;;  %v7103_v60 = vunpack.i.l.bf16 %v7102_v11  ;;  %2892 = vrot.lane.b32.xlu1 %v8630_v8, %s7622_s11 }
 0x1a7   :  { %v2030_v31 = vsel %vm2016_vm5, %v7094_v54, %v7098_v49  ;;  %v2031_v32 = vsel %vm2016_vm5, %v7098_v49, %v11460_v2  ;;  %2898 = vrot.lane.b32.xlu0 %v8645_v29, %s7622_s11 }
 0x1a8   :  { %v2035_v50 = vsel %vm2016_vm5, %v7103_v60, %v7104_v30  ;;  %v2124_v16 = vsel %vm2016_vm5, %v11459_v62, %v7103_v60  ;;  %v8944_v36 = vpop.permute.xlu1 %7106 }
 0x1a9   :  { %v11462_v23 = vunpack.i.h.bf16 %v8944_v36  ;;  %v7108_v17 = vunpack.i.l.bf16 %v8944_v36  ;;  %v8948_v47 = vpop.permute.xlu0 %7111  ;;  %v7556_v0 = vpack.c.bf16 %v2035_v50, %v2029_v34  ;;  %v7557_v49 = vpack.c.bf16 %v2124_v16, %v2123_v14 }
 0x1aa   :  { %2900 = vrot.lane.b32.xlu1 %v8643_v56, %s7622_s11  ;;  %v11464_v60 = vunpack.i.l.bf16 %v8948_v47  ;;  %v8972_v50 = vsub.s32 2, %v11583_v10 }
 0x1ab   :  { %v2036_v19 = vsel %vm2016_vm5, %v7104_v30, %v7108_v17  ;;  %v2037_v54 = vsel %vm2016_vm5, %v7108_v17, %v11462_v23  ;;  %2902 = vrot.lane.b32.xlu0 %v8654_v21, %s7622_s11  ;;  %5201 = vmatprep.subr.bf16.mxu0 %v7556_v0 }
 0x1ac   :  { %v7117_v11 = vpop.permute.xlu1 %7116  ;;  %5202 = vmatpush1.bf16.msra.mxu0 %v7557_v49  ;;  %v7558_v17 = vpack.c.bf16 %v2037_v54, %v2031_v32  ;;  %v7559_v23 = vpack.c.bf16 %v2036_v19, %v2030_v31  ;;  %v11463_v19 = vunpack.i.h.bf16 %v8948_v47 }
 0x1ad   :  { %v7119_v62 = vunpack.i.h.bf16 %v7117_v11  ;;  %v7118_v2 = vunpack.i.l.bf16 %v7117_v11  ;;  %v8959_v41 = vpop.permute.xlu0 %7121 }
 0x1ae   :  { %v11465_v13 = vunpack.i.h.bf16 %v8959_v41  ;;  %v7123_v30 = vunpack.i.l.bf16 %v8959_v41  ;;  %2904 = vrot.lane.b32.xlu1 %v8652_v22, %s7622_s11  ;;  %5314 = vmatprep.subr.bf16.mxu1 %v7558_v17 }
 0x1af   :  { %v2017_v34 = vsel %vm2016_vm5, %v7118_v2, %v7119_v62  ;;  %v2121_v14 = vsel %vm2016_vm5, %v11464_v60, %v7118_v2  ;;  %2341 = vrot.lane.b32.xlu0 %v8758_v35, %s7623_s12  ;;  %5315 = vmatpush1.bf16.msra.mxu1 %v7559_v23  ;;  %v8994_v23 = vld [vmem:[%s11429_s2 + $0x8] sm:$0x7f] }
 0x1b0   :  { %v2018_v16 = vsel %vm2016_vm5, %v7119_v62, %v7123_v30  ;;  %v2019_v32 = vsel %vm2016_vm5, %v7123_v30, %v11465_v13  ;;  %v7127_v31 = vpop.permute.xlu1 %7126  ;;  %v8998_v30 = vrot.slane %v8994_v23, %v8972_v50  ;;  %v9018_v13 = vld [vmem:[%s11429_s2 + $0x10] sm:$0x7f] }
 0x1b1   :  { %v7129_v54 = vunpack.i.h.bf16 %v7127_v31  ;;  %v7128_v0 = vunpack.i.l.bf16 %v7127_v31  ;;  %v8979_v2 = vpop.permute.xlu0 %7131  ;;  %v9022_v43 = vrot.slane %v9018_v13, %v8972_v50 }
 0x1b2   :  { %v11466_v35 = vunpack.i.h.bf16 %v8979_v2  ;;  %v7133_v49 = vunpack.i.l.bf16 %v8979_v2  ;;  %2343 = vrot.lane.b32.xlu1 %v8769_v40, %s7623_s12  ;;  %v9003_v40 = vld [vmem:[%s11429_s2] sm:$0x7f] }
 0x1b3   :  { %v2023_v62 = vsel %vm2016_vm5, %v7128_v0, %v7129_v54  ;;  %v2122_v11 = vsel %vm2016_vm5, %v11463_v19, %v7128_v0  ;;  %2385 = vrot.lane.b32.xlu0 %v8561_v58, %s7623_s12  ;;  %v9007_v17 = vrot.slane %v9003_v40, %v8972_v50  ;;  %11593 = vst [vmem:[#allocation4_spill] sm:$0xff] %v9022_v43 }
 0x1b4   :  { %v2024_v58 = vsel %vm2016_vm5, %v7129_v54, %v7133_v49  ;;  %v2025_v31 = vsel %vm2016_vm5, %v7133_v49, %v11466_v35  ;;  %v1420_v0 = vpop.permute.xlu1 %1419  ;;  %v7560_v49 = vpack.c.bf16 %v2023_v62, %v2017_v34  ;;  %v7561_v35 = vpack.c.bf16 %v2122_v11, %v2121_v14 }
 0x1b5   :  { %v1598_v19 = vsel %vm1491_vm6, %v8886_v9, %v1420_v0  ;;  %v1422_v60 = vpop.permute.xlu0 %1421  ;;  %v7563_v59 = vpack.c.bf16 %v2024_v58, %v2018_v16 }
 0x1b6   :  { %v1646_v54 = vmul.f32 %v9007_v17, %v1598_v19  ;;  %v1504_v6 = vsel %vm1491_vm6, %v1420_v0, %v1422_v60  ;;  %2387 = vrot.lane.b32.xlu1 %v8559_v26, %s7623_s12  ;;  %v9038_v19 = vrot.slane %v9034_v55, %v8972_v50  ;;  %v7562_v0 = vpack.c.bf16 %v2025_v31, %v2019_v32 }
 0x1b7   :  { %v1647_v7 = vmul.f32 %v8998_v30, %v1504_v6  ;;  %2389 = vrot.lane.b32.xlu0 %v8578_v52, %s7623_s12  ;;  %5203 = vmatprep.subr.bf16.mxu0 %v7560_v49 }
 0x1b8   :  { %11594 = vst [vmem:[#allocation11_spill] sm:$0xff] %v9038_v19  ;;  %v1424_v45 = vpop.permute.xlu1 %1423  ;;  %5316 = vmatprep.subr.bf16.mxu1 %v7562_v0  ;;  %5204 = vmatpush1.bf16.msra.mxu0 %v7561_v35 }
 0x1b9   :  { %v1505_v26 = vsel %vm1491_vm6, %v1422_v60, %v1424_v45  ;;  %v9041_v34 = vpop.permute.xlu0 %1425  ;;  %5317 = vmatpush1.bf16.msra.mxu1 %v7563_v59 }
 0x1ba   :  { %v1648_v52 = vmul.f32 %v9022_v43, %v1505_v26  ;;  %v1506_v6 = vsel %vm1491_vm6, %v1424_v45, %v9041_v34  ;;  %2391 = vrot.lane.b32.xlu1 %v8576_v57, %s7623_s12 }
 0x1bb   :  { %v1649_v14 = vmul.f32 %v9038_v19, %v1506_v6  ;;  %2397 = vrot.lane.b32.xlu0 %v8587_v33, %s7623_s12 }
 0x1bc   :  { %v1432_v16 = vpop.permute.xlu1 %1431 }
 0x1bd   :  { %v1599_v60 = vsel %vm1491_vm6, %v8892_v25, %v1432_v16  ;;  %v1434_v32 = vpop.permute.xlu0 %1433 }
 0x1be   :  { %v1653_v35 = vmul.f32 %v9007_v17, %v1599_v60  ;;  %v1510_v62 = vsel %vm1491_vm6, %v1432_v16, %v1434_v32  ;;  %2399 = vrot.lane.b32.xlu1 %v8585_v61, %s7623_s12  ;;  %v1596_v61 = vsel %vm1491_vm6, %v8875_v28, %v8910_v38 }
 0x1bf   :  { %v1654_v57 = vmul.f32 %v8998_v30, %v1510_v62  ;;  %2401 = vrot.lane.b32.xlu0 %v8603_v63, %s7623_s12  ;;  %v1632_v16 = vmul.f32 %v9007_v17, %v1596_v61 }
 0x1c0   :  { %v1436_v59 = vpop.permute.xlu1 %1435  ;;  %v7565_v49 = vpack.c.bf16 %v1653_v35, %v1646_v54 }
 0x1c1   :  { %v1511_v33 = vsel %vm1491_vm6, %v1434_v32, %v1436_v59  ;;  %v9061_v45 = vpop.permute.xlu0 %1437  ;;  %v7564_v63 = vpack.c.bf16 %v1654_v57, %v1647_v7 }
 0x1c2   :  { %v1655_v11 = vmul.f32 %v9022_v43, %v1511_v33  ;;  %v1512_v58 = vsel %vm1491_vm6, %v1436_v59, %v9061_v45  ;;  %2403 = vrot.lane.b32.xlu1 %v8601_v51, %s7623_s12 }
 0x1c3   :  { %v1656_v31 = vmul.f32 %v9038_v19, %v1512_v58  ;;  %2337 = vrot.lane.b32.xlu0 %v8810_v42, %s7623_s12  ;;  %5205 = vmatprep.subr.bf16.mxu0 %v7564_v63  ;;  %v9110_v58 = vsub.s32 6, %v11583_v10 }
 0x1c4   :  { %v1398_v0 = vpop.permute.xlu1 %1397  ;;  %5206 = vmatpush1.bf16.msra.mxu0 %v7565_v49  ;;  %v7567_v42 = vpack.c.bf16 %v1655_v11, %v1648_v52  ;;  %v7243_v49 = vld [vmem:[%s11430_s1 + $0x4] ss:$8 sps:$4 sm:$0xff]  }
 0x1c5   :  { %v1492_v26 = vsel %vm1491_vm6, %v8910_v38, %v1398_v0  ;;  %v1400_v6 = vpop.permute.xlu0 %1399  ;;  %v7566_v7 = vpack.c.bf16 %v1656_v31, %v1649_v14  ;;  %11598 = vst [vmem:[#allocation14_spill] sm:$0xff] %v9110_v58  ;;  %6657 = vmatprep.mubr.msk.bf16.mxu0 %vm5176_vm8, %v7243_v49  ;;  %6665 = vmatprep.mubr.msk.bf16.mxu1 %vm5176_vm8, %v7243_v49 }
 0x1c6   :  { %v1633_v51 = vmul.f32 %v8998_v30, %v1492_v26  ;;  %2339 = vrot.lane.b32.xlu1 %v8820_v18, %s7623_s12  ;;  %v1493_v60 = vsel %vm1491_vm6, %v1398_v0, %v1400_v6  ;;  %v9125_v0 = vrot.slane %v9003_v40, %v9110_v58 }
 0x1c7   :  { %2361 = vrot.lane.b32.xlu0 %v8555_v4, %s7623_s12  ;;  %5318 = vmatprep.subr.bf16.mxu1 %v7566_v7  ;;  %v1634_v35 = vmul.f32 %v9022_v43, %v1493_v60  ;;  %v9141_v60 = vld [vmem:[#allocation2 + $0x90] sm:$0xff] }
 0x1c8   :  { %v9083_v54 = vpop.permute.xlu1 %1401  ;;  %5319 = vmatpush1.bf16.msra.mxu1 %v7567_v42  ;;  %v11600_v42 = vpack.c.bf16 %v8725_v37, %v8689_v27  ;;  %v9162_v37 = vrot.slane %v9018_v13, %v9110_v58 }
 0x1c9   :  { %11595 = vst [vmem:[#allocation10_spill] sm:$0xff] %v9083_v54  ;;  %v1494_v38 = vsel %vm1491_vm6, %v1400_v6, %v9083_v54  ;;  %v1408_v32 = vpop.permute.xlu0 %1407  ;;  %v9127_v6 = vld [vmem:[#allocation2 + $0x180] sm:$0xff] }
 0x1ca   :  { %v1635_v62 = vmul.f32 %v9038_v19, %v1494_v38  ;;  %2363 = vrot.lane.b32.xlu1 %v8624_v20, %s7623_s12  ;;  %v1597_v4 = vsel %vm1491_vm6, %v8884_v3, %v1408_v32  ;;  %11601 = vst [vmem:[#allocation16_spill] sm:$0xff] %v9162_v37  ;;  %v9251_v3 = vld [vmem:[#allocation2 + $0x118] sm:$0xff] }
 0x1cb   :  { %2365 = vrot.lane.b32.xlu0 %v8632_v12, %s7623_s12  ;;  %v1639_v57 = vmul.f32 %v9007_v17, %v1597_v4  ;;  %v7225_v4 = vld [vmem:[#allocation3 + $0xe4] ss:$56 sps:$4 sm:$0xff]  }
 0x1cc   :  { %v1410_v18 = vpop.permute.xlu1 %1409 }
 0x1cd   :  { %v1498_v52 = vsel %vm1491_vm6, %v1408_v32, %v1410_v18  ;;  %v1412_v14 = vpop.permute.xlu0 %1411  ;;  %v7569_v63 = vpack.c.bf16 %v1639_v57, %v1632_v16  ;;  %v9135_v16 = vrot.slane %v8994_v23, %v9110_v58 }
 0x1ce   :  { %v1640_v59 = vmul.f32 %v8998_v30, %v1498_v52  ;;  %2367 = vrot.lane.b32.xlu1 %v8630_v8, %s7623_s12  ;;  %v1499_v20 = vsel %vm1491_vm6, %v1410_v18, %v1412_v14  ;;  %v9153_v52 = vld [vmem:[#allocation2 + $0xc8] sm:$0xff] }
 0x1cf   :  { %2373 = vrot.lane.b32.xlu0 %v8645_v29, %s7623_s12  ;;  %v1641_v61 = vmul.f32 %v9022_v43, %v1499_v20 }
 0x1d0   :  { %v9103_v33 = vpop.permute.xlu1 %1413  ;;  %v7568_v8 = vpack.c.bf16 %v1640_v59, %v1633_v51  ;;  %v9139_v51 = vld [vmem:[#allocation2 + $0x98] sm:$0xff]  ;;  %v11603_v59 = vpack.c.bf16 %v8722_v44, %v8686_v39  ;;  %v9186_v44 = vld [vmem:[#allocation2 + $0x188] sm:$0xff] }
 0x1d1   :  { %11596 = vst [vmem:[#allocation13_spill] sm:$0xff] %v9103_v33  ;;  %v1500_v12 = vsel %vm1491_vm6, %v1412_v14, %v9103_v33  ;;  %v9107_v11 = vpop.permute.xlu0 %3391  ;;  %v7140_v7 = vpack.i.bf16 %v9139_v51, %v9141_v60  ;;  %v7571_v32 = vpack.c.bf16 %v1641_v61, %v1634_v35  ;;  %v9178_v61 = vld [vmem:[#allocation2 + $0x158] sm:$0xff] }
 0x1d2   :  { %11597 = vst [vmem:[#allocation12_spill] sm:$0xff] %v9107_v11  ;;  %v1642_v31 = vmul.f32 %v9038_v19, %v1500_v12  ;;  %2375 = vrot.lane.b32.xlu1 %v8643_v56, %s7623_s12  ;;  %5207 = vmatprep.subr.bf16.mxu0 %v7568_v8  ;;  %v9129_v56 = vld [vmem:[#allocation2 + $0x1b8] sm:$0xff] }
 0x1d3   :  { %2377 = vrot.lane.b32.xlu0 %v8654_v21, %s7623_s12  ;;  %v7135_v21 = vpack.i.bf16 %v9129_v56, %v9127_v6  ;;  %5208 = vmatpush1.bf16.msra.mxu0 %v7569_v63  ;;  %v9188_v63 = vld [vmem:[#allocation2 + $0x190] sm:$0xff] }
 0x1d4   :  { %v9118_v29 = vpop.permute.xlu1 %3393  ;;  %5209 = vmatprep.subr.bf16.mxu0 %v11600_v42  ;;  %v7570_v38 = vpack.c.bf16 %v1642_v31, %v1635_v62  ;;  %v9166_v62 = vrot.slane %v9034_v55, %v9110_v58  ;;  %v9180_v31 = vld [vmem:[#allocation2 + $0x150] sm:$0xff]  ;;  %v7155_v49 = vpack.i.bf16 %v9188_v63, %v9186_v44 }
 0x1d5   :  { %11599 = vst [vmem:[#allocation15_spill] sm:$0xff] %v9118_v29  ;;  %v3436_v26 = vpop.permute.xlu0 %3435  ;;  %v7150_v8 = vpack.i.bf16 %v9178_v61, %v9180_v31  ;;  %v7228_v42 = vld [vmem:[#allocation3 + $0x74] ss:$56 sps:$4 sm:$0xff]   ;;  %v7239_v58 = vld [vmem:[#allocation3 + $0x78] ss:$56 sps:$4 sm:$0xff]  }
 0x1d6   :  { %2379 = vrot.lane.b32.xlu1 %v8652_v22, %s7623_s12  ;;  %v3614_v18 = vsel %vm3507_vm7, %v9107_v11, %v3436_v26  ;;  %v9151_v22 = vld [vmem:[#allocation2 + $0xd0] sm:$0xff]  ;;  %5320 = vmatprep.subr.bf16.mxu1 %v7570_v38  ;;  %11602 = vst [vmem:[#allocation18_spill] sm:$0xff] %v9166_v62 }
 0x1d7   :  { %7136 = vrot.lane.b32.xlu0 %v7135_v21, %s7620_s9  ;;  %v7145_v14 = vpack.i.bf16 %v9151_v22, %v9153_v52  ;;  %5210 = vmatpush1.bf16.msra.mxu0 %v11603_v59  ;;  %v9172_v20 = vmul.f32 %v9125_v0, %v3614_v18  ;;  %v7227_v21 = vld [vmem:[#allocation3 + $0xe0] ss:$56 sps:$4 sm:$0xff]   ;;  %v7230_v18 = vld [vmem:[#allocation3 + $0xec] ss:$56 sps:$4 sm:$0xff]   ;;  %v7236_v19 = vld [vmem:[#allocation3 + $0x7c] ss:$56 sps:$4 sm:$0xff]  }
 0x1d8   :  { %v3438_v57 = vpop.permute.xlu1 %3437  ;;  %5321 = vmatpush1.bf16.msra.mxu1 %v7571_v32  ;;  %5211 = vmatprep.subr.bf16.mxu0 %v7225_v4  ;;  %v11606_v4 = vpack.c.bf16 %v8734_v15, %v8698_v24  ;;  %v7232_v15 = vld [vmem:[#allocation3 + $0x70] ss:$56 sps:$4 sm:$0xff]  }
 0x1d9   :  { %v3520_v27 = vsel %vm3507_vm7, %v3436_v26, %v3438_v57  ;;  %v3440_v35 = vpop.permute.xlu0 %3439  ;;  %v11604_v26 = vpack.c.bf16 %v8737_v46, %v8701_v5 }
 0x1da   :  { %v9175_v12 = vmul.f32 %v9135_v16, %v3520_v27  ;;  %7141 = vrot.lane.b32.xlu1 %v7140_v7, %s7620_s9  ;;  %v3521_v39 = vsel %vm3507_vm7, %v3438_v57, %v3440_v35  ;;  %v9212_v57 = vld [vmem:[#allocation2 + $0x28] sm:$0xff]  ;;  %v9214_v27 = vld [vmem:[#allocation2 + $0x20] sm:$0xff] }
 0x1db   :  { %7146 = vrot.lane.b32.xlu0 %v7145_v14, %s7620_s9  ;;  %5322 = vmatprep.subr.bf16.mxu1 %v11604_v26  ;;  %v9203_v14 = vmul.f32 %v9162_v37, %v3521_v39  ;;  %v7165_v24 = vpack.i.bf16 %v9212_v57, %v9214_v27  ;;  %v9218_v39 = vld [vmem:[#allocation2 + $0x110] sm:$0xff] }
 0x1dc   :  { %v9195_v7 = vpop.permute.xlu1 %3441  ;;  %5212 = vmatpush1.bf16.msra.mxu0 %v7227_v21  ;;  %5323 = vmatpush1.bf16.msra.mxu1 %v11606_v4  ;;  %v7234_v21 = vld [vmem:[#allocation3 + $0x4] ss:$56 sps:$4 sm:$0xff]  }
 0x1dd   :  { %11605 = vst [vmem:[#allocation17_spill] sm:$0xff] %v9195_v7  ;;  %v3522_v38 = vsel %vm3507_vm7, %v3440_v35, %v9195_v7  ;;  %v3448_v32 = vpop.permute.xlu0 %3447  ;;  %5213 = vmatprep.subr.bf16.mxu0 %v7228_v42  ;;  %5324 = vmatprep.subr.bf16.mxu1 %v7230_v18  ;;  %v7233_v35 = vld [vmem:[#allocation3 + $0xe8] ss:$56 sps:$4 sm:$0xff]   ;;  %v9227_v4 = vld [vmem:[#allocation2 + $0x58] sm:$0xff] }
 0x1de   :  { %v9206_v5 = vmul.f32 %v9166_v62, %v3522_v38  ;;  %7151 = vrot.lane.b32.xlu1 %v7150_v8, %s7620_s9  ;;  %v3615_v46 = vsel %vm3507_vm7, %v9118_v29, %v3448_v32  ;;  %v9220_v8 = vld [vmem:[#allocation2 + $0x148] sm:$0xff]  ;;  %v9225_v38 = vld [vmem:[#allocation2 + $0x60] sm:$0xff] }
 0x1df   :  { %7156 = vrot.lane.b32.xlu0 %v7155_v49, %s7620_s9  ;;  %v7160_v26 = vpack.i.bf16 %v9220_v8, %v9218_v39  ;;  %v7170_v18 = vpack.i.bf16 %v9225_v38, %v9227_v4  ;;  %v3669_v43 = vmul.f32 %v9125_v0, %v3615_v46  ;;  %v9238_v7 = vld [vmem:[#allocation2 + $0xe0] sm:$0xff] }
 0x1e0   :  { %v3450_v59 = vpop.permute.xlu1 %3449  ;;  %5214 = vmatpush1.bf16.msra.mxu0 %v7232_v15  ;;  %5325 = vmatpush1.bf16.msra.mxu1 %v7233_v35  ;;  %v7238_v35 = vld [vmem:[#allocation3] ss:$56 sps:$4 sm:$0xff]  }
 0x1e1   :  { %v3526_v49 = vsel %vm3507_vm7, %v3448_v32, %v3450_v59  ;;  %v3452_v42 = vpop.permute.xlu0 %3451  ;;  %5215 = vmatprep.subr.bf16.mxu0 %v7234_v21  ;;  %v9236_v32 = vld [vmem:[#allocation2 + $0xe8] sm:$0xff]  ;;  %5326 = vmatprep.subr.bf16.mxu1 %v7236_v19 }
 0x1e2   :  { %v3670_v29 = vmul.f32 %v9135_v16, %v3526_v49  ;;  %v3527_v11 = vsel %vm3507_vm7, %v3450_v59, %v3452_v42  ;;  %7161 = vrot.lane.b32.xlu1 %v7160_v26, %s7620_s9  ;;  %v7175_v15 = vpack.i.bf16 %v9236_v32, %v9238_v7  ;;  %v7240_v49 = vld [vmem:[#allocation3 + $0xc] ss:$56 sps:$4 sm:$0xff]  }
 0x1e3   :  { %7166 = vrot.lane.b32.xlu0 %v7165_v24, %s7620_s9  ;;  %v3671_v59 = vmul.f32 %v9162_v37, %v3527_v11  ;;  %v9249_v24 = vld [vmem:[#allocation2 + $0x120] sm:$0xff] }
 0x1e4   :  { %v9242_v46 = vpop.permute.xlu1 %3453  ;;  %v7180_v33 = vpack.i.bf16 %v9249_v24, %v9251_v3  ;;  %5216 = vmatpush1.bf16.msra.mxu0 %v7238_v35  ;;  %5327 = vmatpush1.bf16.msra.mxu1 %v7239_v58  ;;  %v7572_v11 = vpack.c.bf16 %v3670_v29, %v9175_v12 }
 0x1e5   :  { %11607 = vst [vmem:[#allocation19_spill] sm:$0xff] %v9242_v46  ;;  %v3528_v26 = vsel %vm3507_vm7, %v3452_v42, %v9242_v46  ;;  %v9247_v21 = vpop.permute.xlu0 %3387  ;;  %5328 = vmatprep.subr.bf16.mxu1 %v7240_v49  ;;  %v7573_v42 = vpack.c.bf16 %v3669_v43, %v9172_v20  ;;  %v7242_v46 = vld [vmem:[#allocation3 + $0x8] ss:$56 sps:$4 sm:$0xff]  }
 0x1e6   :  { %v3672_v19 = vmul.f32 %v9166_v62, %v3528_v26  ;;  %7171 = vrot.lane.b32.xlu1 %v7170_v18, %s7620_s9  ;;  %5221 = vmatprep.subr.bf16.mxu0 %v7572_v11  ;;  %v7575_v18 = vpack.c.bf16 %v3671_v59, %v9203_v14 }
 0x1e7   :  { %7176 = vrot.lane.b32.xlu0 %v7175_v15, %s7620_s9 }
 0x1e8   :  { %v9260_v28 = vpop.permute.xlu1 %3389  ;;  %5222 = vmatpush2.bf16.msra.mxu0 %v7573_v42  ;;  %5329 = vmatpush1.bf16.msra.mxu1 %v7242_v46  ;;  %v7574_v58 = vpack.c.bf16 %v3672_v19, %v9206_v5 }
 0x1e9   :  { %11608 = vst [vmem:[#allocation23_spill] sm:$0xff] %v9260_v28  ;;  %v3412_v54 = vpop.permute.xlu0 %3411 }
 0x1ea   :  { %7181 = vrot.lane.b32.xlu1 %v7180_v33, %s7620_s9  ;;  %v3612_v29 = vsel %vm3507_vm7, %v9247_v21, %v3412_v54  ;;  %5334 = vmatprep.subr.bf16.mxu1 %v7574_v58 }
 0x1eb   :  { %1427 = vrot.lane.b32.xlu0 %v9141_v60, %s7619_s8  ;;  %v3648_v15 = vmul.f32 %v9125_v0, %v3612_v29 }
 0x1ec   :  { %v3414_v43 = vpop.permute.xlu1 %3413  ;;  %5335 = vmatpush2.bf16.msra.mxu1 %v7575_v18 }
 0x1ed   :  { %v3508_v20 = vsel %vm3507_vm7, %v3412_v54, %v3414_v43  ;;  %v3416_v12 = vpop.permute.xlu0 %3415 }
 0x1ee   :  { %v3649_v33 = vmul.f32 %v9135_v16, %v3508_v20  ;;  %1429 = vrot.lane.b32.xlu1 %v9139_v51, %s7619_s8  ;;  %v3509_v14 = vsel %vm3507_vm7, %v3414_v43, %v3416_v12 }
 0x1ef   :  { %1439 = vrot.lane.b32.xlu0 %v9153_v52, %s7619_s8  ;;  %v3650_v46 = vmul.f32 %v9162_v37, %v3509_v14 }
 0x1f0   :  { %v9277_v5 = vpop.permute.xlu1 %3417 }
 0x1f1   :  { %v3510_v35 = vsel %vm3507_vm7, %v3416_v12, %v9277_v5  ;;  %v3424_v54 = vpop.permute.xlu0 %3423  ;;  %v9304_v12 = vsub.s32 5, %v11583_v10 }
 0x1f2   :  { %v3651_v49 = vmul.f32 %v9166_v62, %v3510_v35  ;;  %1441 = vrot.lane.b32.xlu1 %v9151_v22, %s7619_s8  ;;  %v3613_v59 = vsel %vm3507_vm7, %v9260_v28, %v3424_v54 }
 0x1f3   :  { %1467 = vrot.lane.b32.xlu0 %v9180_v31, %s7619_s8  ;;  %v3655_v42 = vmul.f32 %v9125_v0, %v3613_v59  ;;  %11611 = vst [vmem:[#allocation21_spill] sm:$0xff] %v9304_v12 }
 0x1f4   :  { %v3426_v26 = vpop.permute.xlu1 %3425 }
 0x1f5   :  { %v3514_v19 = vsel %vm3507_vm7, %v3424_v54, %v3426_v26  ;;  %v3428_v11 = vpop.permute.xlu0 %3427  ;;  %v7577_v59 = vpack.c.bf16 %v3655_v42, %v3648_v15 }
 0x1f6   :  { %v3656_v58 = vmul.f32 %v9135_v16, %v3514_v19  ;;  %1469 = vrot.lane.b32.xlu1 %v9178_v61, %s7619_s8  ;;  %v3515_v18 = vsel %vm3507_vm7, %v3426_v26, %v3428_v11 }
 0x1f7   :  { %1479 = vrot.lane.b32.xlu0 %v9186_v44, %s7619_s8  ;;  %v3657_v14 = vmul.f32 %v9162_v37, %v3515_v18 }
 0x1f8   :  { %v9297_v29 = vpop.permute.xlu1 %3429  ;;  %v7576_v54 = vpack.c.bf16 %v3656_v58, %v3649_v33  ;;  %v9322_v33 = vrot.slane %v8994_v23, %v9304_v12 }
 0x1f9   :  { %11609 = vst [vmem:[#allocation26_spill] sm:$0xff] %v9297_v29  ;;  %v3516_v43 = vsel %vm3507_vm7, %v3428_v11, %v9297_v29  ;;  %v9301_v20 = vpop.permute.xlu0 %2866  ;;  %v9316_v11 = vrot.slane %v9003_v40, %v9304_v12  ;;  %v7579_v42 = vpack.c.bf16 %v3657_v14, %v3650_v46  ;;  %v9339_v46 = vrot.slane %v9034_v55, %v9304_v12 }
 0x1fa   :  { %11610 = vst [vmem:[#allocation20_spill] sm:$0xff] %v9301_v20  ;;  %v3658_v35 = vmul.f32 %v9166_v62, %v3516_v43  ;;  %1481 = vrot.lane.b32.xlu1 %v9188_v63, %s7619_s8  ;;  %5223 = vmatprep.subr.bf16.mxu0 %v7576_v54  ;;  %11613 = vst [vmem:[#allocation24_spill] sm:$0xff] %v9322_v33 }
 0x1fb   :  { %1403 = vrot.lane.b32.xlu0 %v9214_v27, %s7619_s8  ;;  %5224 = vmatpush2.bf16.msra.mxu0 %v7577_v59  ;;  %11615 = vst [vmem:[#allocation27_spill] sm:$0xff] %v9339_v46 }
 0x1fc   :  { %v9312_v26 = vpop.permute.xlu1 %2868  ;;  %v7578_v15 = vpack.c.bf16 %v3658_v35, %v3651_v49  ;;  %v9333_v49 = vrot.slane %v9018_v13, %v9304_v12 }
 0x1fd   :  { %11612 = vst [vmem:[#allocation22_spill] sm:$0xff] %v9312_v26  ;;  %v2911_v19 = vpop.permute.xlu0 %2910 }
 0x1fe   :  { %1405 = vrot.lane.b32.xlu1 %v9212_v57, %s7619_s8  ;;  %v3089_v58 = vsel %vm2982_vm9, %v9301_v20, %v2911_v19  ;;  %5336 = vmatprep.subr.bf16.mxu1 %v7578_v15  ;;  %11614 = vst [vmem:[#allocation25_spill] sm:$0xff] %v9333_v49 }
 0x1ff   :  { %1415 = vrot.lane.b32.xlu0 %v9227_v4, %s7619_s8  ;;  %5337 = vmatpush2.bf16.msra.mxu1 %v7579_v42  ;;  %v3137_v59 = vmul.f32 %v9316_v11, %v3089_v58 }
 0x200   :  { %v2913_v18 = vpop.permute.xlu1 %2912 }
 0x201   :  { %v2995_v43 = vsel %vm2982_vm9, %v2911_v19, %v2913_v18  ;;  %v2915_v54 = vpop.permute.xlu0 %2914 }
 0x202   :  { %v3138_v62 = vmul.f32 %v9322_v33, %v2995_v43  ;;  %1417 = vrot.lane.b32.xlu1 %v9225_v38, %s7619_s8  ;;  %v2996_v14 = vsel %vm2982_vm9, %v2913_v18, %v2915_v54 }
 0x203   :  { %1443 = vrot.lane.b32.xlu0 %v9238_v7, %s7619_s8  ;;  %v3139_v42 = vmul.f32 %v9333_v49, %v2996_v14 }
 0x204   :  { %v9344_v35 = vpop.permute.xlu1 %2916 }
 0x205   :  { %11616 = vst [vmem:[#allocation28_spill] sm:$0xff] %v9344_v35  ;;  %v2997_v19 = vsel %vm2982_vm9, %v2915_v54, %v9344_v35  ;;  %v2923_v15 = vpop.permute.xlu0 %2922 }
 0x206   :  { %v3140_v58 = vmul.f32 %v9339_v46, %v2997_v19  ;;  %1445 = vrot.lane.b32.xlu1 %v9236_v32, %s7619_s8  ;;  %v3090_v43 = vsel %vm2982_vm9, %v9312_v26, %v2923_v15 }
 0x207   :  { %1455 = vrot.lane.b32.xlu0 %v9251_v3, %s7619_s8  ;;  %v3144_v54 = vmul.f32 %v9316_v11, %v3090_v43 }
 0x208   :  { %v2925_v18 = vpop.permute.xlu1 %2924 }
 0x209   :  { %v3001_v37 = vsel %vm2982_vm9, %v2923_v15, %v2925_v18  ;;  %v2927_v20 = vpop.permute.xlu0 %2926  ;;  %v7581_v28 = vpack.c.bf16 %v3144_v54, %v3137_v59 }
 0x20a   :  { %v3145_v35 = vmul.f32 %v9322_v33, %v3001_v37  ;;  %1457 = vrot.lane.b32.xlu1 %v9249_v24, %s7619_s8  ;;  %v3002_v14 = vsel %vm2982_vm9, %v2925_v18, %v2927_v20 }
 0x20b   :  { %3399 = vrot.lane.b32.xlu0 %v9127_v6, %s7621_s10  ;;  %v3146_v15 = vmul.f32 %v9333_v49, %v3002_v14 }
 0x20c   :  { %v9364_v19 = vpop.permute.xlu1 %2928  ;;  %v7580_v37 = vpack.c.bf16 %v3145_v35, %v3138_v62 }
 0x20d   :  { %v3003_v26 = vsel %vm2982_vm9, %v2927_v20, %v9364_v19  ;;  %v9368_v12 = vpop.permute.xlu0 %2862  ;;  %v7583_v14 = vpack.c.bf16 %v3146_v15, %v3139_v42 }
 0x20e   :  { %11617 = vst [vmem:[#allocation29_spill] sm:$0xff] %v9368_v12  ;;  %v3147_v43 = vmul.f32 %v9339_v46, %v3003_v26  ;;  %3401 = vrot.lane.b32.xlu1 %v9129_v56, %s7621_s10  ;;  %5225 = vmatprep.subr.bf16.mxu0 %v7580_v37 }
 0x20f   :  { %3443 = vrot.lane.b32.xlu0 %v9141_v60, %s7621_s10  ;;  %5226 = vmatpush2.bf16.msra.mxu0 %v7581_v28 }
 0x210   :  { %v9376_v18 = vpop.permute.xlu1 %2864  ;;  %v7582_v20 = vpack.c.bf16 %v3147_v43, %v3140_v58 }
 0x211   :  { %11618 = vst [vmem:[#allocation30_spill] sm:$0xff] %v9376_v18  ;;  %v2887_v29 = vpop.permute.xlu0 %2886 }
 0x212   :  { %3445 = vrot.lane.b32.xlu1 %v9139_v51, %s7621_s10  ;;  %v3087_v26 = vsel %vm2982_vm9, %v9368_v12, %v2887_v29  ;;  %5338 = vmatprep.subr.bf16.mxu1 %v7582_v20 }
 0x213   :  { %3455 = vrot.lane.b32.xlu0 %v9153_v52, %s7621_s10  ;;  %5339 = vmatpush2.bf16.msra.mxu1 %v7583_v14  ;;  %v3123_v54 = vmul.f32 %v9316_v11, %v3087_v26 }
 0x214   :  { %v2889_v62 = vpop.permute.xlu1 %2888 }
 0x215   :  { %v2983_v59 = vsel %vm2982_vm9, %v2887_v29, %v2889_v62  ;;  %v2891_v35 = vpop.permute.xlu0 %2890 }
 0x216   :  { %v3124_v28 = vmul.f32 %v9322_v33, %v2983_v59  ;;  %3457 = vrot.lane.b32.xlu1 %v9151_v22, %s7621_s10  ;;  %v2984_v42 = vsel %vm2982_vm9, %v2889_v62, %v2891_v35 }
 0x217   :  { %3483 = vrot.lane.b32.xlu0 %v9180_v31, %s7621_s10  ;;  %v3125_v43 = vmul.f32 %v9333_v49, %v2984_v42 }
 0x218   :  { %v9392_v58 = vpop.permute.xlu1 %2892 }
 0x219   :  { %11619 = vst [vmem:[#allocation31_spill] sm:$0xff] %v9392_v58  ;;  %v2985_v15 = vsel %vm2982_vm9, %v2891_v35, %v9392_v58  ;;  %v2899_v29 = vpop.permute.xlu0 %2898 }
 0x21a   :  { %v3126_v37 = vmul.f32 %v9339_v46, %v2985_v15  ;;  %3485 = vrot.lane.b32.xlu1 %v9178_v61, %s7621_s10  ;;  %v3088_v20 = vsel %vm2982_vm9, %v9376_v18, %v2899_v29 }
 0x21b   :  { %3495 = vrot.lane.b32.xlu0 %v9186_v44, %s7621_s10  ;;  %v3130_v59 = vmul.f32 %v9316_v11, %v3088_v20 }
 0x21c   :  { %v2901_v14 = vpop.permute.xlu1 %2900 }
 0x21d   :  { %v2989_v26 = vsel %vm2982_vm9, %v2899_v29, %v2901_v14  ;;  %v2903_v62 = vpop.permute.xlu0 %2902  ;;  %v9419_v29 = vsub.s32 4, %v11583_v10  ;;  %v7585_v58 = vpack.c.bf16 %v3130_v59, %v3123_v54 }
 0x21e   :  { %v3131_v35 = vmul.f32 %v9322_v33, %v2989_v26  ;;  %3497 = vrot.lane.b32.xlu1 %v9188_v63, %s7621_s10  ;;  %v2990_v42 = vsel %vm2982_vm9, %v2901_v14, %v2903_v62 }
 0x21f   :  { %3395 = vrot.lane.b32.xlu0 %v9218_v39, %s7621_s10  ;;  %v3132_v20 = vmul.f32 %v9333_v49, %v2990_v42  ;;  %v9431_v10 = vrot.slane %v9003_v40, %v9419_v29 }
 0x220   :  { %v9412_v15 = vpop.permute.xlu1 %2904  ;;  %v7584_v14 = vpack.c.bf16 %v3131_v35, %v3124_v28 }
 0x221   :  { %v2991_v18 = vsel %vm2982_vm9, %v2903_v62, %v9412_v15  ;;  %v9416_v12 = vpop.permute.xlu0 %2341  ;;  %11622 = vst [vmem:[#allocation34_spill] sm:$0xff] %v9431_v10  ;;  %v7587_v28 = vpack.c.bf16 %v3132_v20, %v3125_v43  ;;  %v9454_v43 = vrot.slane %v9034_v55, %v9419_v29 }
 0x222   :  { %11620 = vst [vmem:[#allocation32_spill] sm:$0xff] %v9416_v12  ;;  %v3133_v26 = vmul.f32 %v9339_v46, %v2991_v18  ;;  %3397 = vrot.lane.b32.xlu1 %v9220_v8, %s7621_s10  ;;  %5227 = vmatprep.subr.bf16.mxu0 %v7584_v14  ;;  %v9437_v18 = vrot.slane %v8994_v23, %v9419_v29 }
 0x223   :  { %3419 = vrot.lane.b32.xlu0 %v9214_v27, %s7621_s10  ;;  %5228 = vmatpush2.bf16.msra.mxu0 %v7585_v58  ;;  %v9448_v23 = vrot.slane %v9018_v13, %v9419_v29  ;;  %11625 = vst [vmem:[#allocation37_spill] sm:$0xff] %v9454_v43 }
 0x224   :  { %v9427_v33 = vpop.permute.xlu1 %2343  ;;  %11623 = vst [vmem:[#allocation35_spill] sm:$0xff] %v9437_v18  ;;  %v7586_v54 = vpack.c.bf16 %v3133_v26, %v3126_v37 }
 0x225   :  { %11621 = vst [vmem:[#allocation33_spill] sm:$0xff] %v9427_v33  ;;  %v2386_v62 = vpop.permute.xlu0 %2385  ;;  %11624 = vst [vmem:[#allocation36_spill] sm:$0xff] %v9448_v23 }
 0x226   :  { %3421 = vrot.lane.b32.xlu1 %v9212_v57, %s7621_s10  ;;  %v2564_v59 = vsel %vm2457_vm10, %v9416_v12, %v2386_v62  ;;  %5340 = vmatprep.subr.bf16.mxu1 %v7586_v54 }
 0x227   :  { %3431 = vrot.lane.b32.xlu0 %v9227_v4, %s7621_s10  ;;  %5341 = vmatpush2.bf16.msra.mxu1 %v7587_v28  ;;  %v2612_v42 = vmul.f32 %v9431_v10, %v2564_v59 }
 0x228   :  { %v2388_v58 = vpop.permute.xlu1 %2387 }
 0x229   :  { %v2470_v40 = vsel %vm2457_vm10, %v2386_v62, %v2388_v58  ;;  %v2390_v35 = vpop.permute.xlu0 %2389 }
 0x22a   :  { %v2613_v14 = vmul.f32 %v9437_v18, %v2470_v40  ;;  %3433 = vrot.lane.b32.xlu1 %v9225_v38, %s7621_s10  ;;  %v2471_v37 = vsel %vm2457_vm10, %v2388_v58, %v2390_v35 }
 0x22b   :  { %3459 = vrot.lane.b32.xlu0 %v9238_v7, %s7621_s10  ;;  %v2614_v13 = vmul.f32 %v9448_v23, %v2471_v37 }
 0x22c   :  { %v9459_v20 = vpop.permute.xlu1 %2391 }
 0x22d   :  { %v2472_v26 = vsel %vm2457_vm10, %v2390_v35, %v9459_v20  ;;  %v2398_v62 = vpop.permute.xlu0 %2397 }
 0x22e   :  { %v2615_v54 = vmul.f32 %v9454_v43, %v2472_v26  ;;  %3461 = vrot.lane.b32.xlu1 %v9236_v32, %s7621_s10  ;;  %v2565_v55 = vsel %vm2457_vm10, %v9427_v33, %v2398_v62 }
 0x22f   :  { %3471 = vrot.lane.b32.xlu0 %v9251_v3, %s7621_s10  ;;  %v2619_v40 = vmul.f32 %v9431_v10, %v2565_v55 }
 0x230   :  { %v2400_v28 = vpop.permute.xlu1 %2399 }
 0x231   :  { %v2476_v59 = vsel %vm2457_vm10, %v2398_v62, %v2400_v28  ;;  %v2402_v58 = vpop.permute.xlu0 %2401  ;;  %v7589_v33 = vpack.c.bf16 %v2619_v40, %v2612_v42 }
 0x232   :  { %v2620_v35 = vmul.f32 %v9437_v18, %v2476_v59  ;;  %3473 = vrot.lane.b32.xlu1 %v9249_v24, %s7621_s10  ;;  %v2477_v37 = vsel %vm2457_vm10, %v2400_v28, %v2402_v58 }
 0x233   :  { %2874 = vrot.lane.b32.xlu0 %v9127_v6, %s7622_s11  ;;  %v2621_v62 = vmul.f32 %v9448_v23, %v2477_v37 }
 0x234   :  { %v9479_v26 = vpop.permute.xlu1 %2403  ;;  %v7588_v59 = vpack.c.bf16 %v2620_v35, %v2613_v14 }
 0x235   :  { %v2478_v46 = vsel %vm2457_vm10, %v2402_v58, %v9479_v26  ;;  %v9483_v49 = vpop.permute.xlu0 %2337  ;;  %v7591_v37 = vpack.c.bf16 %v2621_v62, %v2614_v13 }
 0x236   :  { %11626 = vst [vmem:[#allocation38_spill] sm:$0xff] %v9483_v49  ;;  %v2622_v55 = vmul.f32 %v9454_v43, %v2478_v46  ;;  %2876 = vrot.lane.b32.xlu1 %v9129_v56, %s7622_s11  ;;  %5229 = vmatprep.subr.bf16.mxu0 %v7588_v59 }
 0x237   :  { %2918 = vrot.lane.b32.xlu0 %v9141_v60, %s7622_s11  ;;  %5230 = vmatpush2.bf16.msra.mxu0 %v7589_v33 }
 0x238   :  { %v9491_v28 = vpop.permute.xlu1 %2339  ;;  %v7590_v58 = vpack.c.bf16 %v2622_v55, %v2615_v54 }
 0x239   :  { %11627 = vst [vmem:[#allocation39_spill] sm:$0xff] %v9491_v28  ;;  %v2362_v12 = vpop.permute.xlu0 %2361 }
 0x23a   :  { %2920 = vrot.lane.b32.xlu1 %v9139_v51, %s7622_s11  ;;  %v2562_v46 = vsel %vm2457_vm10, %v9483_v49, %v2362_v12  ;;  %5342 = vmatprep.subr.bf16.mxu1 %v7590_v58 }
 0x23b   :  { %2930 = vrot.lane.b32.xlu0 %v9153_v52, %s7622_s11  ;;  %5343 = vmatpush2.bf16.msra.mxu1 %v7591_v37  ;;  %v2598_v35 = vmul.f32 %v9431_v10, %v2562_v46 }
 0x23c   :  { %v2364_v42 = vpop.permute.xlu1 %2363 }
 0x23d   :  { %v2458_v14 = vsel %vm2457_vm10, %v2362_v12, %v2364_v42  ;;  %v2366_v40 = vpop.permute.xlu0 %2365 }
 0x23e   :  { %v2599_v33 = vmul.f32 %v9437_v18, %v2458_v14  ;;  %2932 = vrot.lane.b32.xlu1 %v9151_v22, %s7622_s11  ;;  %v2459_v13 = vsel %vm2457_vm10, %v2364_v42, %v2366_v40 }
 0x23f   :  { %2958 = vrot.lane.b32.xlu0 %v9180_v31, %s7622_s11  ;;  %v2600_v55 = vmul.f32 %v9448_v23, %v2459_v13 }
 0x240   :  { %v9507_v54 = vpop.permute.xlu1 %2367 }
 0x241   :  { %11628 = vst [vmem:[#allocation40_spill] sm:$0xff] %v9507_v54  ;;  %v2460_v62 = vsel %vm2457_vm10, %v2366_v40, %v9507_v54  ;;  %v2374_v12 = vpop.permute.xlu0 %2373 }
 0x242   :  { %v2601_v59 = vmul.f32 %v9454_v43, %v2460_v62  ;;  %2960 = vrot.lane.b32.xlu1 %v9178_v61, %s7622_s11  ;;  %v2563_v58 = vsel %vm2457_vm10, %v9491_v28, %v2374_v12 }
 0x243   :  { %2970 = vrot.lane.b32.xlu0 %v9186_v44, %s7622_s11  ;;  %v2605_v14 = vmul.f32 %v9431_v10, %v2563_v58 }
 0x244   :  { %v2376_v37 = vpop.permute.xlu1 %2375 }
 0x245   :  { %v2464_v46 = vsel %vm2457_vm10, %v2374_v12, %v2376_v37  ;;  %v2378_v42 = vpop.permute.xlu0 %2377 }
 0x246   :  { %v2606_v40 = vmul.f32 %v9437_v18, %v2464_v46  ;;  %2972 = vrot.lane.b32.xlu1 %v9188_v63, %s7622_s11  ;;  %v2465_v13 = vsel %vm2457_vm10, %v2376_v37, %v2378_v42  ;;  %v7593_v37 = vpack.c.bf16 %v2605_v14, %v2598_v35  ;;  %v11629_v35 = vunpack.i.l.bf16 %v8916_v1 }
 0x247   :  { %2870 = vrot.lane.b32.xlu0 %v9218_v39, %s7622_s11  ;;  %v2607_v12 = vmul.f32 %v9448_v23, %v2465_v13 }
 0x248   :  { %v9527_v62 = vpop.permute.xlu1 %2379  ;;  %v7592_v63 = vpack.c.bf16 %v2606_v40, %v2599_v33 }
 0x249   :  { %v2466_v28 = vsel %vm2457_vm10, %v2378_v42, %v9527_v62  ;;  %v9531_v49 = vpop.permute.xlu0 %7136  ;;  %v7245_v42 = vld [vmem:[%s11430_s1] ss:$8 sps:$4 sm:$0xff]   ;;  %v7595_v40 = vpack.c.bf16 %v2607_v12, %v2600_v55 }
 0x24a   :  { %v2608_v58 = vmul.f32 %v9454_v43, %v2466_v28  ;;  %2872 = vrot.lane.b32.xlu1 %v9220_v8, %s7622_s11  ;;  %5231 = vmatprep.subr.bf16.mxu0 %v7592_v63  ;;  %v11630_v63 = vunpack.i.h.bf16 %v8927_v53  ;;  %v7291_v53 = vld [vmem:[%s11430_s1 + $0x14] ss:$8 sps:$4 sm:$0xff]  }
 0x24b   :  { %2894 = vrot.lane.b32.xlu0 %v9214_v27, %s7622_s11  ;;  %5232 = vmatpush2.bf16.msra.mxu0 %v7593_v37  ;;  %v11519_v27 = vunpack.i.l.bf16 %v9531_v49 }
 0x24c   :  { %v7142_v46 = vpop.permute.xlu1 %7141  ;;  %v7594_v33 = vpack.c.bf16 %v2608_v58, %v2601_v59  ;;  %v11632_v59 = vunpack.i.h.bf16 %v8944_v36  ;;  %v11517_v36 = vunpack.i.h.bf16 %v9531_v49 }
 0x24d   :  { %v7144_v54 = vunpack.i.h.bf16 %v7142_v46  ;;  %v7143_v18 = vunpack.i.l.bf16 %v7142_v46  ;;  %v7147_v10 = vpop.permute.xlu0 %7146 }
 0x24e   :  { %v7149_v13 = vunpack.i.h.bf16 %v7147_v10  ;;  %v7148_v28 = vunpack.i.l.bf16 %v7147_v10  ;;  %2896 = vrot.lane.b32.xlu1 %v9212_v57, %s7622_s11  ;;  %v11631_v57 = vunpack.i.h.bf16 %v8916_v1  ;;  %5344 = vmatprep.subr.bf16.mxu1 %v7594_v33 }
 0x24f   :  { %v2034_v14 = vsel %vm2016_vm5, %v7144_v54, %v11629_v35  ;;  %v2032_v37 = vsel %vm2016_vm5, %v11630_v63, %v7143_v18  ;;  %v2033_v46 = vsel %vm2016_vm5, %v7143_v18, %v7144_v54  ;;  %2906 = vrot.lane.b32.xlu0 %v9227_v4, %s7622_s11  ;;  %5345 = vmatpush2.bf16.msra.mxu1 %v7595_v40 }
 0x250   :  { %v6932_v10 = vpack.c.bf16 %v2034_v14, %v2034_v14  ;;  %v2040_v55 = vsel %vm2016_vm5, %v7149_v13, %v11631_v57  ;;  %v2038_v12 = vsel %vm2016_vm5, %v11632_v59, %v7148_v28  ;;  %v9560_v58 = vpop.permute.xlu1 %7151  ;;  %v2039_v54 = vsel %vm2016_vm5, %v7148_v28, %v7149_v13  ;;  %5234 = vmatmul.mubr.bf16.vlgmr.msra.gmra.mxu0 %v7245_v42 }
 0x251   :  { %v6936_v18 = vpack.c.bf16 %v2040_v55, %v2040_v55  ;;  %v11520_v4 = vunpack.i.h.bf16 %v9560_v58  ;;  %v7153_v1 = vunpack.i.l.bf16 %v9560_v58  ;;  %v9568_v35 = vpop.permute.xlu0 %7156  ;;  %6658 = vmatprep.mubr.msk.bf16.mxu0 %vm5176_vm8, %v7291_v53  ;;  %v7596_v57 = vpack.c.bf16 %v2038_v12, %v2032_v37 }
 0x252   :  { %2228 = vst [vmem:[#allocation3 + $0x328] sm:$0xf] %v6932_v10  ;;  %v11518_v33 = vunpack.i.h.bf16 %v9568_v35  ;;  %v7158_v14 = vunpack.i.l.bf16 %v9568_v35  ;;  %2908 = vrot.lane.b32.xlu1 %v9225_v38, %s7622_s11  ;;  %5347 = vmatmul.mubr.bf16.vlgmr.msra.gmra.mxu1 %v7245_v42  ;;  %v11633_v42 = vunpack.i.h.bf16 %v8959_v41  ;;  %v11634_v12 = vunpack.i.l.bf16 %v8948_v47 }
 0x253   :  { %2232 = vst [vmem:[#allocation3 + $0x360] sm:$0xf] %v6936_v18  ;;  %v2053_v13 = vsel %vm2016_vm5, %v7153_v1, %v11520_v4  ;;  %v2127_v28 = vsel %vm2016_vm5, %v11519_v27, %v7153_v1  ;;  %2934 = vrot.lane.b32.xlu0 %v9238_v7, %s7622_s11  ;;  %v7597_v18 = vpack.c.bf16 %v2039_v54, %v2033_v46  ;;  %v7293_v7 = vld [vmem:[%s11430_s1 + $0x10] ss:$8 sps:$4 sm:$0xff]  }
 0x254   :  { %v6945_v40 = vpack.c.bf16 %v2053_v13, %v2127_v28  ;;  %v2059_v63 = vsel %vm2016_vm5, %v7158_v14, %v11518_v33  ;;  %v2128_v38 = vsel %vm2016_vm5, %v11517_v36, %v7158_v14  ;;  %v9590_v10 = vpop.permute.xlu1 %7161  ;;  %6666 = vmatprep.mubr.msk.bf16.mxu1 %vm5176_vm8, %v7291_v53  ;;  %v9860_v27 = vld [vmem:[#allocation2 + $0xf8] sm:$0xff] }
 0x255   :  { %v6949_v55 = vpack.c.bf16 %v2059_v63, %v2128_v38  ;;  %v7167_v59 = vpop.permute.xlu0 %7166  ;;  %5427 = vmatprep.subr.bf16.mxu0 %v7597_v18  ;;  %v11513_v41 = vunpack.i.l.bf16 %v9590_v10  ;;  %v11636_v18 = vunpack.i.h.bf16 %v8948_v47  ;;  %v7264_v4 = vld [vmem:[#allocation3 + $0x80] ss:$56 sps:$4 sm:$0xff]  }
 0x256   :  { %2329 = vst [vmem:[#allocation3 + $0x32c] sm:$0xff] %v6945_v40  ;;  %v7169_v1 = vunpack.i.h.bf16 %v7167_v59  ;;  %v7168_v13 = vunpack.i.l.bf16 %v7167_v59  ;;  %2936 = vrot.lane.b32.xlu1 %v9236_v32, %s7622_s11  ;;  %5428 = vmatpush1.bf16.msra.mxu0 %v7596_v57  ;;  %v7294_v32 = vld [vmem:[%s11430_s1 + $0x24] ss:$8 sps:$4 sm:$0xff]   ;;  %v11635_v57 = vunpack.i.h.bf16 %v8979_v2 }
 0x257   :  { %2333 = vst [vmem:[#allocation3 + $0x364] sm:$0xff] %v6949_v55  ;;  %2946 = vrot.lane.b32.xlu0 %v9251_v3, %s7622_s11 }
 0x258   :  { %v2020_v37 = vsel %vm2016_vm5, %v11633_v42, %v7168_v13  ;;  %v2021_v46 = vsel %vm2016_vm5, %v7168_v13, %v7169_v1  ;;  %v2022_v53 = vsel %vm2016_vm5, %v7169_v1, %v11634_v12  ;;  %v7172_v54 = vpop.permute.xlu1 %7171  ;;  %5244 = vmatmul.mubr.bf16.gmra.mxu0 %v7293_v7 }
 0x259   :  { %v6924_v14 = vpack.c.bf16 %v2022_v53, %v2022_v53  ;;  %v7174_v28 = vunpack.i.h.bf16 %v7172_v54  ;;  %v7173_v3 = vunpack.i.l.bf16 %v7172_v54  ;;  %v9610_v40 = vpop.permute.xlu0 %7176  ;;  %6659 = vmatprep.mubr.msk.bf16.mxu0 %vm5176_vm8, %v7294_v32 }
 0x25a   :  { %v11514_v63 = vunpack.i.h.bf16 %v9610_v40  ;;  %v7178_v38 = vunpack.i.l.bf16 %v9610_v40  ;;  %2948 = vrot.lane.b32.xlu1 %v9249_v24, %s7622_s11  ;;  %v9630_v24 = vld [vmem:[%s11429_s2 + $0x20] sm:$0x7f]  ;;  %5357 = vmatmul.mubr.bf16.gmra.mxu1 %v7293_v7  ;;  %v9656_v7 = vld [vmem:[%s11429_s2 + $0x28] sm:$0x7f] }
 0x25b   :  { %2220 = vst [vmem:[#allocation3 + $0x2b8] sm:$0xf] %v6924_v14  ;;  %v2026_v55 = vsel %vm2016_vm5, %v11635_v57, %v7173_v3  ;;  %v2027_v59 = vsel %vm2016_vm5, %v7173_v3, %v7174_v28  ;;  %v2028_v1 = vsel %vm2016_vm5, %v7174_v28, %v11636_v18  ;;  %2349 = vrot.lane.b32.xlu0 %v9127_v6, %s7623_s12  ;;  %v11515_v6 = vunpack.i.h.bf16 %v9590_v10  ;;  %v7296_v3 = vld [vmem:[%s11430_s1 + $0x20] ss:$8 sps:$4 sm:$0xff]   ;;  %v9665_v57 = vld [vmem:[%s11429_s2 + $0x30] sm:$0x7f] }
 0x25c   :  { %v9634_v13 = vrot.slane %v9630_v24, %v8972_v50  ;;  %v6928_v2 = vpack.c.bf16 %v2028_v1, %v2028_v1  ;;  %v2041_v42 = vsel %vm2016_vm5, %v7178_v38, %v11514_v63  ;;  %v2125_v47 = vsel %vm2016_vm5, %v11513_v41, %v7178_v38  ;;  %v9642_v12 = vpop.permute.xlu1 %7181  ;;  %6667 = vmatprep.mubr.msk.bf16.mxu1 %vm5176_vm8, %v7294_v32  ;;  %v7246_v18 = vld [vmem:[#allocation3 + $0x328] ss:$56 sps:$4 sm:$0xff]  }
 0x25d   :  { %v6937_v53 = vpack.c.bf16 %v2041_v42, %v2125_v47  ;;  %v11516_v54 = vunpack.i.h.bf16 %v9642_v12  ;;  %v7183_v14 = vunpack.i.l.bf16 %v9642_v12  ;;  %v1428_v28 = vpop.permute.xlu0 %1427  ;;  %v9660_v38 = vrot.slane %v9656_v7, %v8972_v50 }
 0x25e   :  { %2224 = vst [vmem:[#allocation3 + $0x2f0] sm:$0xf] %v6928_v2  ;;  %2351 = vrot.lane.b32.xlu1 %v9129_v56, %s7623_s12  ;;  %v9669_v32 = vrot.slane %v9665_v57, %v8972_v50  ;;  %v7248_v56 = vld [vmem:[#allocation3 + $0x32c] ss:$56 sps:$4 sm:$0xff]   ;;  %v7598_v1 = vpack.c.bf16 %v2026_v55, %v2020_v37  ;;  %v7599_v2 = vpack.c.bf16 %v2027_v59, %v2021_v46  ;;  %v7300_v37 = vld [vmem:[%s11430_s1 + $0x34] ss:$8 sps:$4 sm:$0xff]  }
 0x25f   :  { %2321 = vst [vmem:[#allocation3 + $0x2bc] sm:$0xff] %v6937_v53  ;;  %v2047_v42 = vsel %vm2016_vm5, %v7183_v14, %v11516_v54  ;;  %v2126_v47 = vsel %vm2016_vm5, %v11515_v6, %v7183_v14  ;;  %v1507_v41 = vsel %vm1491_vm6, %v9041_v34, %v1428_v28  ;;  %2393 = vrot.lane.b32.xlu0 %v9141_v60, %s7623_s12  ;;  %v9845_v6 = vld [vmem:[#allocation2 + $0x1a8] sm:$0xff] }
 0x260   :  { %11637 = vst [vmem:[#allocation41_spill] sm:$0xff] %v9669_v32  ;;  %v6941_v50 = vpack.c.bf16 %v2047_v42, %v2126_v47  ;;  %v1430_v63 = vpop.permute.xlu1 %1429  ;;  %5540 = vmatprep.subr.bf16.mxu1 %v7248_v56  ;;  %5429 = vmatprep.subr.bf16.mxu0 %v7599_v2  ;;  %v1650_v34 = vmul.f32 %v9634_v13, %v1507_v41 }
 0x261   :  { %v1508_v46 = vsel %vm1491_vm6, %v1428_v28, %v1430_v63  ;;  %v1509_v55 = vsel %vm1491_vm6, %v1430_v63, %v8886_v9  ;;  %v1440_v59 = vpop.permute.xlu0 %1439  ;;  %5541 = vmatpush1.bf16.msra.mxu1 %v7246_v18  ;;  %5430 = vmatpush1.bf16.msra.mxu0 %v7598_v1 }
 0x262   :  { %2325 = vst [vmem:[#allocation3 + $0x2f4] sm:$0xff] %v6941_v50  ;;  %v1651_v60 = vmul.f32 %v9660_v38, %v1508_v46  ;;  %v1652_v53 = vmul.f32 %v9669_v32, %v1509_v55  ;;  %2395 = vrot.lane.b32.xlu1 %v9139_v51, %s7623_s12  ;;  %5254 = vmatmul.mubr.bf16.gmra.mxu0 %v7296_v3  ;;  %v11638_v55 = vld [vmem:[#allocation9_spill] sm:$0xff] }
 0x263   :  { %v1513_v14 = vsel %vm1491_vm6, %v9061_v45, %v1440_v59  ;;  %2405 = vrot.lane.b32.xlu0 %v9153_v52, %s7623_s12  ;;  %6660 = vmatprep.mubr.msk.bf16.mxu0 %vm5176_vm8, %v7300_v37 }
 0x264   :  { %v6900_v9 = vpack.c.bf16 %v1652_v53, %v1652_v53  ;;  %v1442_v63 = vpop.permute.xlu1 %1441  ;;  %5367 = vmatmul.mubr.bf16.gmra.mxu1 %v7296_v3  ;;  %v1657_v51 = vmul.f32 %v9634_v13, %v1513_v14  ;;  %v7303_v53 = vld [vmem:[%s11430_s1 + $0x44] ss:$8 sps:$4 sm:$0xff]  }
 0x265   :  { %v1514_v41 = vsel %vm1491_vm6, %v1440_v59, %v1442_v63  ;;  %v1515_v28 = vsel %vm1491_vm6, %v1442_v63, %v8892_v25  ;;  %v1468_v18 = vpop.permute.xlu0 %1467  ;;  %6668 = vmatprep.mubr.msk.bf16.mxu1 %vm5176_vm8, %v7300_v37  ;;  %v7249_v42 = vld [vmem:[#allocation3 + $0x2b8] ss:$56 sps:$4 sm:$0xff]  }
 0x266   :  { %1787 = vst [vmem:[#allocation3 + $0x248] sm:$0xf] %v6900_v9  ;;  %v1658_v45 = vmul.f32 %v9660_v38, %v1514_v41  ;;  %v1659_v52 = vmul.f32 %v9669_v32, %v1515_v28  ;;  %2407 = vrot.lane.b32.xlu1 %v9151_v22, %s7623_s12  ;;  %v1602_v3 = vsel %vm1491_vm6, %v8902_v48, %v1468_v18  ;;  %v7494_v63 = vld [vmem:[#allocation2 + $0x190] sm:$0xff] }
 0x267   :  { %2433 = vrot.lane.b32.xlu0 %v9180_v31, %s7623_s12  ;;  %v1674_v50 = vmul.f32 %v9007_v17, %v1602_v3  ;;  %v7600_v37 = vpack.c.bf16 %v1657_v51, %v1650_v34  ;;  %v7302_v31 = vld [vmem:[%s11430_s1 + $0x30] ss:$8 sps:$4 sm:$0xff]  }
 0x268   :  { %v6904_v25 = vpack.c.bf16 %v1659_v52, %v1659_v52  ;;  %v9710_v56 = vpop.permute.xlu1 %1469  ;;  %v7601_v46 = vpack.c.bf16 %v1658_v45, %v1651_v60  ;;  %v11640_v41 = vld [vmem:[#allocation10_spill] sm:$0xff] }
 0x269   :  { %v1528_v1 = vsel %vm1491_vm6, %v1468_v18, %v9710_v56  ;;  %v1480_v2 = vpop.permute.xlu0 %1479  ;;  %v7251_v47 = vld [vmem:[#allocation3 + $0x2bc] ss:$56 sps:$4 sm:$0xff]  }
 0x26a   :  { %1791 = vst [vmem:[#allocation3 + $0x280] sm:$0xf] %v6904_v25  ;;  %v1675_v22 = vmul.f32 %v8998_v30, %v1528_v1  ;;  %2435 = vrot.lane.b32.xlu1 %v9178_v61, %s7623_s12  ;;  %v1603_v59 = vsel %vm1491_vm6, %v11638_v55, %v1480_v2  ;;  %5542 = vmatprep.subr.bf16.mxu1 %v7251_v47  ;;  %v11641_v52 = vld [vmem:[#allocation6_spill] sm:$0xff]  ;;  %v11642_v47 = vld [vmem:[#allocation13_spill] sm:$0xff] }
 0x26b   :  { %2445 = vrot.lane.b32.xlu0 %v9186_v44, %s7623_s12  ;;  %5543 = vmatpush1.bf16.msra.mxu1 %v7249_v42  ;;  %v1681_v60 = vmul.f32 %v9007_v17, %v1603_v59 }
 0x26c   :  { %v6913_v14 = vpack.c.bf16 %v1675_v22, %v1674_v50  ;;  %v9728_v9 = vpop.permute.xlu1 %1481  ;;  %5431 = vmatprep.subr.bf16.mxu0 %v7601_v46  ;;  %5377 = vmatmul.mubr.bf16.gmra.mxu1 %v7302_v31  ;;  %v7495_v22 = vld [vmem:[#allocation2 + $0x20] sm:$0xff] }
 0x26d   :  { %11639 = vst [vmem:[#allocation42_spill] sm:$0xff] %v9728_v9  ;;  %v1534_v61 = vsel %vm1491_vm6, %v1480_v2, %v9728_v9  ;;  %v1404_v34 = vpop.permute.xlu0 %1403  ;;  %5432 = vmatpush1.bf16.msra.mxu0 %v7600_v37  ;;  %6669 = vmatprep.mubr.msk.bf16.mxu1 %vm5176_vm8, %v7303_v53  ;;  %v7306_v37 = vld [vmem:[%s11430_s1 + $0x54] ss:$8 sps:$4 sm:$0xff]  }
 0x26e   :  { %1888 = vst [vmem:[#allocation3 + $0x24c] sm:$0xff] %v6913_v14  ;;  %v1682_v44 = vmul.f32 %v8998_v30, %v1534_v61  ;;  %2447 = vrot.lane.b32.xlu1 %v7494_v63, %s7623_s12  ;;  %5264 = vmatmul.mubr.bf16.gmra.mxu0 %v7302_v31  ;;  %v1495_v28 = vsel %vm1491_vm6, %v11640_v41, %v1404_v34  ;;  %v11644_v63 = vld [vmem:[#allocation8_spill] sm:$0xff] }
 0x26f   :  { %2345 = vrot.lane.b32.xlu0 %v9218_v39, %s7623_s12  ;;  %6661 = vmatprep.mubr.msk.bf16.mxu0 %vm5176_vm8, %v7303_v53  ;;  %v1636_v1 = vmul.f32 %v9634_v13, %v1495_v28  ;;  %v7305_v39 = vld [vmem:[%s11430_s1 + $0x40] ss:$8 sps:$4 sm:$0xff]   ;;  %v7497_v28 = vld [vmem:[#allocation2 + $0x58] sm:$0xff] }
 0x270   :  { %v6917_v18 = vpack.c.bf16 %v1682_v44, %v1681_v60  ;;  %v1406_v51 = vpop.permute.xlu1 %1405  ;;  %v11643_v53 = vld [vmem:[#allocation5_spill] sm:$0xff] }
 0x271   :  { %v1496_v45 = vsel %vm1491_vm6, %v1404_v34, %v1406_v51  ;;  %v1497_v3 = vsel %vm1491_vm6, %v1406_v51, %v11641_v52  ;;  %v1416_v25 = vpop.permute.xlu0 %1415  ;;  %v7496_v44 = vld [vmem:[#allocation2 + $0x28] sm:$0xff] }
 0x272   :  { %1892 = vst [vmem:[#allocation3 + $0x284] sm:$0xff] %v6917_v18  ;;  %v1637_v2 = vmul.f32 %v9660_v38, %v1496_v45  ;;  %v1638_v42 = vmul.f32 %v9669_v32, %v1497_v3  ;;  %2347 = vrot.lane.b32.xlu1 %v9220_v8, %s7623_s12  ;;  %v1501_v50 = vsel %vm1491_vm6, %v11642_v47, %v1416_v25  ;;  %v7252_v3 = vld [vmem:[#allocation3 + $0x248] ss:$56 sps:$4 sm:$0xff]  }
 0x273   :  { %2369 = vrot.lane.b32.xlu0 %v7495_v22, %s7623_s12  ;;  %v1643_v61 = vmul.f32 %v9634_v13, %v1501_v50  ;;  %v7498_v47 = vld [vmem:[#allocation2 + $0x60] sm:$0xff] }
 0x274   :  { %v6892_v46 = vpack.c.bf16 %v1638_v42, %v1638_v42  ;;  %v1418_v31 = vpop.permute.xlu1 %1417  ;;  %5387 = vmatmul.mubr.bf16.gmra.mxu1 %v7305_v39 }
 0x275   :  { %v1502_v59 = vsel %vm1491_vm6, %v1416_v25, %v1418_v31  ;;  %v1503_v8 = vsel %vm1491_vm6, %v1418_v31, %v11643_v53  ;;  %v1444_v14 = vpop.permute.xlu0 %1443  ;;  %6670 = vmatprep.mubr.msk.bf16.mxu1 %vm5176_vm8, %v7306_v37  ;;  %v7602_v50 = vpack.c.bf16 %v1643_v61, %v1636_v1  ;;  %v7312_v1 = vld [vmem:[%s11430_s1 + $0x64] ss:$8 sps:$4 sm:$0xff]  }
 0x276   :  { %1779 = vst [vmem:[#allocation3 + $0x1d8] sm:$0xf] %v6892_v46  ;;  %v1644_v34 = vmul.f32 %v9660_v38, %v1502_v59  ;;  %v1645_v60 = vmul.f32 %v9669_v32, %v1503_v8  ;;  %2371 = vrot.lane.b32.xlu1 %v7496_v44, %s7623_s12  ;;  %5274 = vmatmul.mubr.bf16.gmra.mxu0 %v7305_v39  ;;  %v11646_v46 = vld [vmem:[#allocation7_spill] sm:$0xff]  ;;  %v7500_v44 = vld [vmem:[#allocation2 + $0xe8] sm:$0xff] }
 0x277   :  { %v1600_v41 = vsel %vm1491_vm6, %v11644_v63, %v1444_v14  ;;  %2381 = vrot.lane.b32.xlu0 %v7497_v28, %s7623_s12  ;;  %6662 = vmatprep.mubr.msk.bf16.mxu0 %vm5176_vm8, %v7306_v37  ;;  %v7499_v37 = vld [vmem:[#allocation2 + $0xe0] sm:$0xff]  ;;  %v7311_v59 = vld [vmem:[%s11430_s1 + $0x50] ss:$8 sps:$4 sm:$0xff]   ;;  %v9796_v28 = vld [vmem:[#allocation2 + $0x168] sm:$0xff] }
 0x278   :  { %v6896_v18 = vpack.c.bf16 %v1645_v60, %v1645_v60  ;;  %v9769_v51 = vpop.permute.xlu1 %1445  ;;  %v1660_v42 = vmul.f32 %v9007_v17, %v1600_v41  ;;  %v7603_v22 = vpack.c.bf16 %v1644_v34, %v1637_v2  ;;  %v7501_v41 = vld [vmem:[#allocation2 + $0x118] sm:$0xff]  ;;  %v9873_v63 = vld [vmem:[#allocation2 + $0x100] sm:$0xff] }
 0x279   :  { %11645 = vst [vmem:[#allocation10_spill] sm:$0xff] %v9769_v51  ;;  %v1516_v45 = vsel %vm1491_vm6, %v1444_v14, %v9769_v51  ;;  %v1456_v52 = vpop.permute.xlu0 %1455  ;;  %v7254_v25 = vld [vmem:[#allocation3 + $0x24c] ss:$56 sps:$4 sm:$0xff]   ;;  %v7275_v32 = vld [vmem:[#allocation3 + $0xfc] ss:$56 sps:$4 sm:$0xff]  }
 0x27a   :  { %1783 = vst [vmem:[#allocation3 + $0x210] sm:$0xf] %v6896_v18  ;;  %v1661_v39 = vmul.f32 %v8998_v30, %v1516_v45  ;;  %2383 = vrot.lane.b32.xlu1 %v7498_v47, %s7623_s12  ;;  %v1601_v31 = vsel %vm1491_vm6, %v11646_v46, %v1456_v52  ;;  %5544 = vmatprep.subr.bf16.mxu1 %v7254_v25  ;;  %v7257_v14 = vld [vmem:[#allocation3 + $0x164] ss:$56 sps:$4 sm:$0xff]   ;;  %v11649_v25 = vld [vmem:[#allocation14_spill] sm:$0xff]  ;;  %v9886_v51 = vld [vmem:[#allocation2 + $0x128] sm:$0xff] }
 0x27b   :  { %2409 = vrot.lane.b32.xlu0 %v7499_v37, %s7623_s12  ;;  %5545 = vmatpush1.bf16.msra.mxu1 %v7252_v3  ;;  %v1667_v34 = vmul.f32 %v9007_v17, %v1601_v31  ;;  %v9798_v18 = vld [vmem:[#allocation2 + $0x160] sm:$0xff]  ;;  %v9819_v31 = vld [vmem:[#allocation2 + $0x178] sm:$0xff]  ;;  %v9821_v37 = vld [vmem:[#allocation2 + $0x170] sm:$0xff] }
 0x27c   :  { %v6905_v53 = vpack.c.bf16 %v1661_v39, %v1660_v42  ;;  %v9783_v8 = vpop.permute.xlu1 %1457  ;;  %5433 = vmatprep.subr.bf16.mxu0 %v7603_v22  ;;  %5397 = vmatmul.mubr.bf16.gmra.mxu1 %v7311_v59  ;;  %v7185_v45 = vpack.i.bf16 %v9796_v28, %v9798_v18  ;;  %v9808_v42 = vrot.slane %v9630_v24, %v11649_v25  ;;  %v7504_v47 = vld [vmem:[#allocation2 + $0x120] sm:$0xff] }
 0x27d   :  { %11647 = vst [vmem:[#allocation6_spill] sm:$0xff] %v9783_v8  ;;  %v1522_v2 = vsel %vm1491_vm6, %v1456_v52, %v9783_v8  ;;  %v9790_v61 = vpop.permute.xlu0 %3399  ;;  %5434 = vmatpush1.bf16.msra.mxu0 %v7602_v50  ;;  %v7255_v52 = vld [vmem:[#allocation3 + $0x160] ss:$56 sps:$4 sm:$0xff]   ;;  %6671 = vmatprep.mubr.msk.bf16.mxu1 %vm5176_vm8, %v7312_v1  ;;  %v9813_v50 = vrot.slane %v9656_v7, %v11649_v25  ;;  %v9871_v8 = vld [vmem:[#allocation2 + $0x108] sm:$0xff] }
 0x27e   :  { %11648 = vst [vmem:[#allocation13_spill] sm:$0xff] %v9790_v61  ;;  %1880 = vst [vmem:[#allocation3 + $0x1dc] sm:$0xff] %v6905_v53  ;;  %v1668_v60 = vmul.f32 %v8998_v30, %v1522_v2  ;;  %2411 = vrot.lane.b32.xlu1 %v7500_v44, %s7623_s12  ;;  %5435 = vmatprep.subr.bf16.mxu0 %v7257_v14  ;;  %v7260_v30 = vld [vmem:[#allocation3 + $0xf4] ss:$56 sps:$4 sm:$0xff]   ;;  %v9817_v22 = vrot.slane %v9665_v57, %v11649_v25  ;;  %v9830_v2 = vld [vmem:[#allocation2 + $0x1a0] sm:$0xff] }
 0x27f   :  { %2421 = vrot.lane.b32.xlu0 %v7501_v41, %s7623_s12  ;;  %5284 = vmatmul.mubr.bf16.gmra.mxu0 %v7311_v59  ;;  %v7190_v59 = vpack.i.bf16 %v9819_v31, %v9821_v37  ;;  %v11650_v53 = vld [vmem:[#allocation17_spill] sm:$0xff] }
 0x280   :  { %v6909_v3 = vpack.c.bf16 %v1668_v60, %v1667_v34  ;;  %v9802_v17 = vpop.permute.xlu1 %3401  ;;  %6663 = vmatprep.mubr.msk.bf16.mxu0 %vm5176_vm8, %v7312_v1  ;;  %v9828_v1 = vld [vmem:[#allocation2 + $0x198] sm:$0xff]  ;;  %v7258_v60 = vld [vmem:[#allocation3 + $0xf0] ss:$56 sps:$4 sm:$0xff]  }
 0x281   :  { %v3444_v39 = vpop.permute.xlu0 %3443  ;;  %5436 = vmatpush1.bf16.msra.mxu0 %v7255_v52  ;;  %v7195_v34 = vpack.i.bf16 %v9830_v2, %v9828_v1  ;;  %v7314_v44 = vld [vmem:[%s11430_s1 + $0x60] ss:$8 sps:$4 sm:$0xff]   ;;  %v7266_v52 = vld [vmem:[#allocation3 + $0x84] ss:$56 sps:$4 sm:$0xff]   ;;  %v7261_v23 = vld [vmem:[#allocation3 + $0x1d8] ss:$56 sps:$4 sm:$0xff]  }
 0x282   :  { %1884 = vst [vmem:[#allocation3 + $0x214] sm:$0xff] %v6909_v3  ;;  %2423 = vrot.lane.b32.xlu1 %v7504_v47, %s7623_s12  ;;  %5437 = vmatprep.subr.bf16.mxu0 %v7260_v30  ;;  %v3523_v14 = vsel %vm3507_vm7, %v11650_v53, %v3444_v39  ;;  %v7315_v3 = vld [vmem:[%s11430_s1 + $0x74] ss:$8 sps:$4 sm:$0xff]   ;;  %v11651_v30 = vld [vmem:[#allocation12_spill] sm:$0xff] }
 0x283   :  { %7186 = vrot.lane.b32.xlu0 %v7185_v45, %s7620_s9  ;;  %v9843_v53 = vld [vmem:[#allocation2 + $0x1b0] sm:$0xff]  ;;  %v9850_v36 = vmul.f32 %v9808_v42, %v3523_v14 }
 0x284   :  { %v3446_v41 = vpop.permute.xlu1 %3445  ;;  %v7200_v54 = vpack.i.bf16 %v9843_v53, %v9845_v6  ;;  %5407 = vmatmul.mubr.bf16.gmra.mxu1 %v7314_v44 }
 0x285   :  { %v3524_v45 = vsel %vm3507_vm7, %v3444_v39, %v3446_v41  ;;  %v3525_v25 = vsel %vm3507_vm7, %v3446_v41, %v11651_v30  ;;  %v3456_v47 = vpop.permute.xlu0 %3455  ;;  %5438 = vmatpush1.bf16.msra.mxu0 %v7258_v60  ;;  %v11652_v41 = vld [vmem:[#allocation19_spill] sm:$0xff]  ;;  %v9862_v60 = vld [vmem:[#allocation2 + $0xf0] sm:$0xff]  ;;  %6672 = vmatprep.mubr.msk.bf16.mxu1 %vm5176_vm8, %v7315_v3 }
 0x286   :  { %v9853_v33 = vmul.f32 %v9813_v50, %v3524_v45  ;;  %v3668_v39 = vmul.f32 %v9817_v22, %v3525_v25  ;;  %7191 = vrot.lane.b32.xlu1 %v7190_v59, %s7620_s9  ;;  %5439 = vmatprep.subr.bf16.mxu0 %v7266_v52  ;;  %v3529_v30 = vsel %vm3507_vm7, %v11652_v41, %v3456_v47  ;;  %v7272_v25 = vld [vmem:[#allocation3 + $0x14] ss:$56 sps:$4 sm:$0xff]   ;;  %v11653_v52 = vld [vmem:[#allocation15_spill] sm:$0xff] }
 0x287   :  { %7196 = vrot.lane.b32.xlu0 %v7195_v34, %s7620_s9  ;;  %v7205_v14 = vpack.i.bf16 %v9860_v27, %v9862_v60  ;;  %5294 = vmatmul.mubr.bf16.gmra.mxu0 %v7314_v44  ;;  %v7210_v44 = vpack.i.bf16 %v9871_v8, %v9873_v63 }
 0x288   :  { %v7028_v45 = vpack.c.bf16 %v3668_v39, %v3668_v39  ;;  %v3458_v43 = vpop.permute.xlu1 %3457  ;;  %6664 = vmatprep.mubr.msk.bf16.mxu0 %vm5176_vm8, %v7315_v3  ;;  %v3673_v39 = vmul.f32 %v9808_v42, %v3529_v30  ;;  %v7269_v30 = vld [vmem:[#allocation3 + $0x16c] ss:$56 sps:$4 sm:$0xff]  }
 0x289   :  { %v3530_v59 = vsel %vm3507_vm7, %v3456_v47, %v3458_v43  ;;  %v3531_v34 = vsel %vm3507_vm7, %v3458_v43, %v11653_v52  ;;  %v3484_v41 = vpop.permute.xlu0 %3483  ;;  %v7263_v46 = vld [vmem:[#allocation3 + $0x1dc] ss:$56 sps:$4 sm:$0xff]   ;;  %5440 = vmatpush1.bf16.msra.mxu0 %v7264_v4 }
 0x28a   :  { %3803 = vst [vmem:[#allocation3 + $0x5c8] sm:$0xf] %v7028_v45  ;;  %v3674_v3 = vmul.f32 %v9813_v50, %v3530_v59  ;;  %v3675_v47 = vmul.f32 %v9817_v22, %v3531_v34  ;;  %7201 = vrot.lane.b32.xlu1 %v7200_v54, %s7620_s9  ;;  %5441 = vmatprep.subr.bf16.mxu0 %v7272_v25  ;;  %v9884_v52 = vld [vmem:[#allocation2 + $0x130] sm:$0xff]  ;;  %v9897_v34 = vld [vmem:[#allocation2 + $0x140] sm:$0xff] }
 0x28b   :  { %v3618_v43 = vsel %vm3507_vm7, %v9790_v61, %v3484_v41  ;;  %7206 = vrot.lane.b32.xlu0 %v7205_v14, %s7620_s9  ;;  %5546 = vmatprep.subr.bf16.mxu1 %v7263_v46  ;;  %v7215_v4 = vpack.i.bf16 %v9884_v52, %v9886_v51  ;;  %v7270_v45 = vld [vmem:[#allocation3 + $0x10] ss:$56 sps:$4 sm:$0xff]   ;;  %v9899_v61 = vld [vmem:[#allocation2 + $0x138] sm:$0xff] }
 0x28c   :  { %v7317_v54 = vld [vmem:[%s11430_s1 + $0x70] ss:$8 sps:$4 sm:$0xff]   ;;  %v7032_v25 = vpack.c.bf16 %v3675_v47, %v3675_v47  ;;  %v9893_v59 = vpop.permute.xlu1 %3485  ;;  %5547 = vmatpush1.bf16.msra.mxu1 %v7261_v23  ;;  %v7220_v55 = vpack.i.bf16 %v9897_v34, %v9899_v61  ;;  %v3690_v9 = vmul.f32 %v9125_v0, %v3618_v43  ;;  %v7267_v23 = vld [vmem:[#allocation3 + $0x168] ss:$56 sps:$4 sm:$0xff]  }
 0x28d   :  { %11654 = vst [vmem:[#allocation5_spill] sm:$0xff] %v9893_v59  ;;  %v3544_v46 = vsel %vm3507_vm7, %v3484_v41, %v9893_v59  ;;  %v3496_v14 = vpop.permute.xlu0 %3495  ;;  %5548 = vmatprep.subr.bf16.mxu1 %v7269_v30  ;;  %5442 = vmatpush1.bf16.msra.mxu0 %v7270_v45  ;;  %v7604_v41 = vpack.c.bf16 %v3673_v39, %v9850_v36  ;;  %v7273_v39 = vld [vmem:[#allocation3 + $0xf8] ss:$56 sps:$4 sm:$0xff]  }
 0x28e   :  { %3807 = vst [vmem:[#allocation3 + $0x600] sm:$0xf] %v7032_v25  ;;  %v3691_v47 = vmul.f32 %v9135_v16, %v3544_v46  ;;  %7211 = vrot.lane.b32.xlu1 %v7210_v44, %s7620_s9  ;;  %v7605_v30 = vpack.c.bf16 %v3674_v3, %v9853_v33  ;;  %v3619_v59 = vsel %vm3507_vm7, %v9802_v17, %v3496_v14  ;;  %v7519_v3 = vld [vmem:[%s11430_s1 + $0x4] ss:$8 sps:$4 sm:$0xff]   ;;  %v7281_v46 = vld [vmem:[#allocation3 + $0x1c] ss:$56 sps:$4 sm:$0xff]  }
 0x28f   :  { %7216 = vrot.lane.b32.xlu0 %v7215_v4, %s7620_s9  ;;  %5304 = vmatmul.mubr.bf16.gmra.mxu0 %v7317_v54  ;;  %v3697_v36 = vmul.f32 %v9125_v0, %v3619_v59 }
 0x290   :  { %v7041_v45 = vpack.c.bf16 %v3691_v47, %v3690_v9  ;;  %v9911_v25 = vpop.permute.xlu1 %3497  ;;  %5549 = vmatpush1.bf16.msra.mxu1 %v7267_v23  ;;  %5447 = vmatprep.subr.bf16.mxu0 %v7605_v30  ;;  %v7278_v9 = vld [vmem:[#allocation3 + $0x8c] ss:$56 sps:$4 sm:$0xff]  }
 0x291   :  { %v3550_v44 = vsel %vm3507_vm7, %v3496_v14, %v9911_v25  ;;  %v9915_v43 = vpop.permute.xlu0 %3395  ;;  %5550 = vmatprep.subr.bf16.mxu1 %v7275_v32  ;;  %5448 = vmatpush2.bf16.msra.mxu0 %v7604_v41 }
 0x292   :  { %3904 = vst [vmem:[#allocation3 + $0x5cc] sm:$0xff] %v7041_v45  ;;  %v3698_v33 = vmul.f32 %v9135_v16, %v3550_v44  ;;  %7221 = vrot.lane.b32.xlu1 %v7220_v55, %s7620_s9  ;;  %5417 = vmatmul.mubr.bf16.gmra.mxu1 %v7317_v54  ;;  %v7276_v55 = vld [vmem:[#allocation3 + $0x88] ss:$56 sps:$4 sm:$0xff]  }
 0x293   :  { %1471 = vrot.lane.b32.xlu0 %v9798_v18, %s7619_s8  ;;  %6673 = vmatprep.mubr.msk.bf16.mxu0 %vm5176_vm8, %v7519_v3 }
 0x294   :  { %v7045_v32 = vpack.c.bf16 %v3698_v33, %v3697_v36  ;;  %v9926_v4 = vpop.permute.xlu1 %3397  ;;  %5551 = vmatpush1.bf16.msra.mxu1 %v7273_v39  ;;  %6681 = vmatprep.mubr.msk.bf16.mxu1 %vm5176_vm8, %v7519_v3  ;;  %v11656_v36 = vld [vmem:[#allocation26_spill] sm:$0xff]  ;;  %v11657_v3 = vld [vmem:[#allocation23_spill] sm:$0xff] }
 0x295   :  { %11655 = vst [vmem:[#allocation14_spill] sm:$0xff] %v9926_v4  ;;  %v3420_v59 = vpop.permute.xlu0 %3419  ;;  %5552 = vmatprep.subr.bf16.mxu1 %v7278_v9 }
 0x296   :  { %3908 = vst [vmem:[#allocation3 + $0x604] sm:$0xff] %v7045_v32  ;;  %1473 = vrot.lane.b32.xlu1 %v9796_v28, %s7619_s8  ;;  %v3511_v54 = vsel %vm3507_vm7, %v9277_v5, %v3420_v59  ;;  %v7279_v5 = vld [vmem:[#allocation3 + $0x18] ss:$56 sps:$4 sm:$0xff]  }
 0x297   :  { %1475 = vrot.lane.b32.xlu0 %v9821_v37, %s7619_s8  ;;  %v3652_v30 = vmul.f32 %v9808_v42, %v3511_v54 }
 0x298   :  { %v3422_v14 = vpop.permute.xlu1 %3421  ;;  %5553 = vmatpush1.bf16.msra.mxu1 %v7276_v55  ;;  %v7282_v55 = vld [vmem:[#allocation3 + $0x5c8] ss:$56 sps:$4 sm:$0xff]  }
 0x299   :  { %v3512_v47 = vsel %vm3507_vm7, %v3420_v59, %v3422_v14  ;;  %v3513_v23 = vsel %vm3507_vm7, %v3422_v14, %v9247_v21  ;;  %v3432_v41 = vpop.permute.xlu0 %3431  ;;  %5554 = vmatprep.subr.bf16.mxu1 %v7281_v46 }
 0x29a   :  { %v3653_v45 = vmul.f32 %v9813_v50, %v3512_v47  ;;  %v3654_v44 = vmul.f32 %v9817_v22, %v3513_v23  ;;  %1477 = vrot.lane.b32.xlu1 %v9819_v31, %s7619_s8  ;;  %v3517_v33 = vsel %vm3507_vm7, %v11656_v36, %v3432_v41 }
 0x29b   :  { %1483 = vrot.lane.b32.xlu0 %v9828_v1, %s7619_s8  ;;  %v3659_v46 = vmul.f32 %v9808_v42, %v3517_v33 }
 0x29c   :  { %v7020_v39 = vpack.c.bf16 %v3654_v44, %v3654_v44  ;;  %v3434_v21 = vpop.permute.xlu1 %3433  ;;  %5555 = vmatpush1.bf16.msra.mxu1 %v7279_v5 }
 0x29d   :  { %v3518_v9 = vsel %vm3507_vm7, %v3432_v41, %v3434_v21  ;;  %v3519_v32 = vsel %vm3507_vm7, %v3434_v21, %v11657_v3  ;;  %v3460_v59 = vpop.permute.xlu0 %3459  ;;  %v7284_v54 = vld [vmem:[#allocation3 + $0x5cc] ss:$56 sps:$4 sm:$0xff]   ;;  %v7606_v21 = vpack.c.bf16 %v3659_v46, %v3652_v30 }
 0x29e   :  { %3795 = vst [vmem:[#allocation3 + $0x558] sm:$0xf] %v7020_v39  ;;  %v3660_v14 = vmul.f32 %v9813_v50, %v3518_v9  ;;  %v3661_v47 = vmul.f32 %v9817_v22, %v3519_v32  ;;  %1485 = vrot.lane.b32.xlu1 %v9830_v2, %s7619_s8  ;;  %v3616_v23 = vsel %vm3507_vm7, %v9915_v43, %v3460_v59 }
 0x29f   :  { %1487 = vrot.lane.b32.xlu0 %v9845_v6, %s7619_s8  ;;  %5560 = vmatprep.subr.bf16.mxu1 %v7284_v54  ;;  %v3676_v33 = vmul.f32 %v9125_v0, %v3616_v23  ;;  %v11661_v23 = vld [vmem:[#allocation21_spill] sm:$0xff] }
 0x2a0   :  { %v7024_v41 = vpack.c.bf16 %v3661_v47, %v3661_v47  ;;  %v9959_v44 = vpop.permute.xlu1 %3461  ;;  %5561 = vmatpush2.bf16.msra.mxu1 %v7282_v55  ;;  %v7607_v9 = vpack.c.bf16 %v3660_v14, %v3653_v45 }
 0x2a1   :  { %v3532_v5 = vsel %vm3507_vm7, %v3460_v59, %v9959_v44  ;;  %v3472_v36 = vpop.permute.xlu0 %3471 }
 0x2a2   :  { %3799 = vst [vmem:[#allocation3 + $0x590] sm:$0xf] %v7024_v41  ;;  %v3677_v39 = vmul.f32 %v9135_v16, %v3532_v5  ;;  %1489 = vrot.lane.b32.xlu1 %v9843_v53, %s7619_s8  ;;  %v3617_v3 = vsel %vm3507_vm7, %v9926_v4, %v3472_v36  ;;  %5449 = vmatprep.subr.bf16.mxu0 %v7607_v9  ;;  %v11662_v5 = vld [vmem:[#allocation28_spill] sm:$0xff] }
 0x2a3   :  { %1447 = vrot.lane.b32.xlu0 %v9862_v60, %s7619_s8  ;;  %5450 = vmatpush2.bf16.msra.mxu0 %v7606_v21  ;;  %v3683_v30 = vmul.f32 %v9125_v0, %v3617_v3  ;;  %v9987_v41 = vrot.slane %v9630_v24, %v11661_v23  ;;  %v9993_v0 = vrot.slane %v9656_v7, %v11661_v23  ;;  %v11663_v21 = vld [vmem:[#allocation20_spill] sm:$0xff] }
 0x2a4   :  { %v7033_v32 = vpack.c.bf16 %v3677_v39, %v3676_v33  ;;  %v9971_v55 = vpop.permute.xlu1 %3473 }
 0x2a5   :  { %11658 = vst [vmem:[#allocation17_spill] sm:$0xff] %v9971_v55  ;;  %v3538_v59 = vsel %vm3507_vm7, %v3472_v36, %v9971_v55  ;;  %v9975_v54 = vpop.permute.xlu0 %2874 }
 0x2a6   :  { %11659 = vst [vmem:[#allocation12_spill] sm:$0xff] %v9975_v54  ;;  %3896 = vst [vmem:[#allocation3 + $0x55c] sm:$0xff] %v7033_v32  ;;  %v3684_v45 = vmul.f32 %v9135_v16, %v3538_v59  ;;  %1449 = vrot.lane.b32.xlu1 %v9860_v27, %s7619_s8  ;;  %v9997_v16 = vrot.slane %v9665_v57, %v11661_v23 }
 0x2a7   :  { %1451 = vrot.lane.b32.xlu0 %v9873_v63, %s7619_s8 }
 0x2a8   :  { %v7037_v46 = vpack.c.bf16 %v3684_v45, %v3683_v30  ;;  %v9983_v14 = vpop.permute.xlu1 %2876 }
 0x2a9   :  { %11660 = vst [vmem:[#allocation19_spill] sm:$0xff] %v9983_v14  ;;  %v2919_v47 = vpop.permute.xlu0 %2918 }
 0x2aa   :  { %3900 = vst [vmem:[#allocation3 + $0x594] sm:$0xff] %v7037_v46  ;;  %1453 = vrot.lane.b32.xlu1 %v9871_v8, %s7619_s8  ;;  %v2998_v36 = vsel %vm2982_vm9, %v11662_v5, %v2919_v47  ;;  %v11664_v5 = vld [vmem:[#allocation22_spill] sm:$0xff] }
 0x2ab   :  { %1459 = vrot.lane.b32.xlu0 %v9886_v51, %s7619_s8  ;;  %v3141_v32 = vmul.f32 %v9987_v41, %v2998_v36 }
 0x2ac   :  { %v2921_v33 = vpop.permute.xlu1 %2920 }
 0x2ad   :  { %v2999_v39 = vsel %vm2982_vm9, %v2919_v47, %v2921_v33  ;;  %v3000_v9 = vsel %vm2982_vm9, %v2921_v33, %v11663_v21  ;;  %v2931_v3 = vpop.permute.xlu0 %2930 }
 0x2ae   :  { %v3142_v59 = vmul.f32 %v9993_v0, %v2999_v39  ;;  %v3143_v30 = vmul.f32 %v9997_v16, %v3000_v9  ;;  %1461 = vrot.lane.b32.xlu1 %v9884_v52, %s7619_s8  ;;  %v3004_v45 = vsel %vm2982_vm9, %v9364_v19, %v2931_v3  ;;  %v7285_v39 = vld [vmem:[#allocation3 + $0x558] ss:$56 sps:$4 sm:$0xff]  }
 0x2af   :  { %1463 = vrot.lane.b32.xlu0 %v9899_v61, %s7619_s8  ;;  %v3148_v9 = vmul.f32 %v9987_v41, %v3004_v45 }
 0x2b0   :  { %v6996_v46 = vpack.c.bf16 %v3143_v30, %v3143_v30  ;;  %v2933_v47 = vpop.permute.xlu1 %2932 }
 0x2b1   :  { %v3005_v23 = vsel %vm2982_vm9, %v2931_v3, %v2933_v47  ;;  %v3006_v36 = vsel %vm2982_vm9, %v2933_v47, %v11664_v5  ;;  %v2959_v33 = vpop.permute.xlu0 %2958  ;;  %v7287_v21 = vld [vmem:[#allocation3 + $0x55c] ss:$56 sps:$4 sm:$0xff]   ;;  %v11665_v5 = vld [vmem:[#allocation24_spill] sm:$0xff] }
 0x2b2   :  { %3278 = vst [vmem:[#allocation3 + $0x4e8] sm:$0xf] %v6996_v46  ;;  %v3149_v4 = vmul.f32 %v9993_v0, %v3005_v23  ;;  %v3150_v19 = vmul.f32 %v9997_v16, %v3006_v36  ;;  %1465 = vrot.lane.b32.xlu1 %v9897_v34, %s7619_s8  ;;  %v3093_v30 = vsel %vm2982_vm9, %v9975_v54, %v2959_v33 }
 0x2b3   :  { %3487 = vrot.lane.b32.xlu0 %v9798_v18, %s7621_s10  ;;  %5562 = vmatprep.subr.bf16.mxu1 %v7287_v21  ;;  %v3165_v23 = vmul.f32 %v9316_v11, %v3093_v30  ;;  %v7608_v54 = vpack.c.bf16 %v3148_v9, %v3141_v32 }
 0x2b4   :  { %v7000_v3 = vpack.c.bf16 %v3150_v19, %v3150_v19  ;;  %v10027_v47 = vpop.permute.xlu1 %2960  ;;  %5563 = vmatpush2.bf16.msra.mxu1 %v7285_v39  ;;  %v7609_v55 = vpack.c.bf16 %v3149_v4, %v3142_v59 }
 0x2b5   :  { %v3019_v45 = vsel %vm2982_vm9, %v2959_v33, %v10027_v47  ;;  %v2971_v46 = vpop.permute.xlu0 %2970 }
 0x2b6   :  { %3282 = vst [vmem:[#allocation3 + $0x520] sm:$0xf] %v7000_v3  ;;  %v3166_v36 = vmul.f32 %v11665_v5, %v3019_v45  ;;  %3489 = vrot.lane.b32.xlu1 %v9796_v28, %s7621_s10  ;;  %v3094_v21 = vsel %vm2982_vm9, %v9983_v14, %v2971_v46  ;;  %5451 = vmatprep.subr.bf16.mxu0 %v7609_v55 }
 0x2b7   :  { %3491 = vrot.lane.b32.xlu0 %v9821_v37, %s7621_s10  ;;  %5452 = vmatpush2.bf16.msra.mxu0 %v7608_v54  ;;  %v3172_v32 = vmul.f32 %v9316_v11, %v3094_v21  ;;  %v11668_v54 = vld [vmem:[#allocation31_spill] sm:$0xff] }
 0x2b8   :  { %v7009_v39 = vpack.c.bf16 %v3166_v36, %v3165_v23  ;;  %v10039_v19 = vpop.permute.xlu1 %2972  ;;  %v11669_v23 = vld [vmem:[#allocation29_spill] sm:$0xff] }
 0x2b9   :  { %11666 = vst [vmem:[#allocation15_spill] sm:$0xff] %v10039_v19  ;;  %v3025_v33 = vsel %vm2982_vm9, %v2971_v46, %v10039_v19  ;;  %v10043_v30 = vpop.permute.xlu0 %2870 }
 0x2ba   :  { %11667 = vst [vmem:[#allocation26_spill] sm:$0xff] %v10043_v30  ;;  %3379 = vst [vmem:[#allocation3 + $0x4ec] sm:$0xff] %v7009_v39  ;;  %v3173_v4 = vmul.f32 %v11665_v5, %v3025_v33  ;;  %3493 = vrot.lane.b32.xlu1 %v9819_v31, %s7621_s10 }
 0x2bb   :  { %3499 = vrot.lane.b32.xlu0 %v9828_v1, %s7621_s10 }
 0x2bc   :  { %v7013_v59 = vpack.c.bf16 %v3173_v4, %v3172_v32  ;;  %v10051_v9 = vpop.permute.xlu1 %2872 }
 0x2bd   :  { %v2895_v55 = vpop.permute.xlu0 %2894 }
 0x2be   :  { %3383 = vst [vmem:[#allocation3 + $0x524] sm:$0xff] %v7013_v59  ;;  %3501 = vrot.lane.b32.xlu1 %v9830_v2, %s7621_s10  ;;  %v2986_v3 = vsel %vm2982_vm9, %v11668_v54, %v2895_v55 }
 0x2bf   :  { %3503 = vrot.lane.b32.xlu0 %v9845_v6, %s7621_s10  ;;  %v3127_v39 = vmul.f32 %v9987_v41, %v2986_v3 }
 0x2c0   :  { %v2897_v45 = vpop.permute.xlu1 %2896 }
 0x2c1   :  { %v2987_v46 = vsel %vm2982_vm9, %v2895_v55, %v2897_v45  ;;  %v2988_v36 = vsel %vm2982_vm9, %v2897_v45, %v11669_v23  ;;  %v2907_v21 = vpop.permute.xlu0 %2906  ;;  %v11670_v45 = vld [vmem:[#allocation30_spill] sm:$0xff] }
 0x2c2   :  { %v3128_v33 = vmul.f32 %v9993_v0, %v2987_v46  ;;  %v3129_v32 = vmul.f32 %v9997_v16, %v2988_v36  ;;  %3505 = vrot.lane.b32.xlu1 %v9843_v53, %s7621_s10  ;;  %v2992_v4 = vsel %vm2982_vm9, %v9412_v15, %v2907_v21  ;;  %v7288_v46 = vld [vmem:[#allocation3 + $0x4e8] ss:$56 sps:$4 sm:$0xff]  }
 0x2c3   :  { %3463 = vrot.lane.b32.xlu0 %v9862_v60, %s7621_s10  ;;  %v3134_v36 = vmul.f32 %v9987_v41, %v2992_v4 }
 0x2c4   :  { %v6988_v59 = vpack.c.bf16 %v3129_v32, %v3129_v32  ;;  %v2909_v55 = vpop.permute.xlu1 %2908 }
 0x2c5   :  { %v2993_v54 = vsel %vm2982_vm9, %v2907_v21, %v2909_v55  ;;  %v2994_v3 = vsel %vm2982_vm9, %v2909_v55, %v11670_v45  ;;  %v2935_v23 = vpop.permute.xlu0 %2934  ;;  %v7290_v14 = vld [vmem:[#allocation3 + $0x4ec] ss:$56 sps:$4 sm:$0xff]  }
 0x2c6   :  { %3270 = vst [vmem:[#allocation3 + $0x478] sm:$0xf] %v6988_v59  ;;  %v3135_v19 = vmul.f32 %v9993_v0, %v2993_v54  ;;  %v3136_v15 = vmul.f32 %v9997_v16, %v2994_v3  ;;  %3465 = vrot.lane.b32.xlu1 %v9860_v27, %s7621_s10  ;;  %v3091_v32 = vsel %vm2982_vm9, %v10043_v30, %v2935_v23 }
 0x2c7   :  { %3467 = vrot.lane.b32.xlu0 %v9873_v63, %s7621_s10  ;;  %5564 = vmatprep.subr.bf16.mxu1 %v7290_v14  ;;  %v3151_v54 = vmul.f32 %v9316_v11, %v3091_v32  ;;  %v7610_v3 = vpack.c.bf16 %v3134_v36, %v3127_v39 }
 0x2c8   :  { %v6992_v21 = vpack.c.bf16 %v3136_v15, %v3136_v15  ;;  %v10083_v55 = vpop.permute.xlu1 %2936  ;;  %5565 = vmatpush2.bf16.msra.mxu1 %v7288_v46  ;;  %v7611_v30 = vpack.c.bf16 %v3135_v19, %v3128_v33 }
 0x2c9   :  { %v3007_v4 = vsel %vm2982_vm9, %v2935_v23, %v10083_v55  ;;  %v2947_v59 = vpop.permute.xlu0 %2946 }
 0x2ca   :  { %3274 = vst [vmem:[#allocation3 + $0x4b0] sm:$0xf] %v6992_v21  ;;  %v3152_v45 = vmul.f32 %v11665_v5, %v3007_v4  ;;  %3469 = vrot.lane.b32.xlu1 %v9871_v8, %s7621_s10  ;;  %v3092_v14 = vsel %vm2982_vm9, %v10051_v9, %v2947_v59  ;;  %5453 = vmatprep.subr.bf16.mxu0 %v7611_v30 }
 0x2cb   :  { %3475 = vrot.lane.b32.xlu0 %v9886_v51, %s7621_s10  ;;  %5454 = vmatpush2.bf16.msra.mxu0 %v7610_v3  ;;  %v3158_v39 = vmul.f32 %v9316_v11, %v3092_v14  ;;  %v10111_v21 = vrot.slane %v9630_v24, %v9419_v29  ;;  %v10117_v11 = vrot.slane %v9656_v7, %v9419_v29 }
 0x2cc   :  { %v7001_v46 = vpack.c.bf16 %v3152_v45, %v3151_v54  ;;  %v10095_v15 = vpop.permute.xlu1 %2948  ;;  %v11673_v54 = vld [vmem:[#allocation32_spill] sm:$0xff] }
 0x2cd   :  { %v3013_v23 = vsel %vm2982_vm9, %v2947_v59, %v10095_v15  ;;  %v10099_v32 = vpop.permute.xlu0 %2349 }
 0x2ce   :  { %11671 = vst [vmem:[#allocation23_spill] sm:$0xff] %v10099_v32  ;;  %3371 = vst [vmem:[#allocation3 + $0x47c] sm:$0xff] %v7001_v46  ;;  %v3159_v19 = vmul.f32 %v11665_v5, %v3013_v23  ;;  %3477 = vrot.lane.b32.xlu1 %v9884_v52, %s7621_s10  ;;  %v10121_v5 = vrot.slane %v9665_v57, %v9419_v29 }
 0x2cf   :  { %3479 = vrot.lane.b32.xlu0 %v9899_v61, %s7621_s10 }
 0x2d0   :  { %v7005_v33 = vpack.c.bf16 %v3159_v19, %v3158_v39  ;;  %v10107_v36 = vpop.permute.xlu1 %2351  ;;  %v11674_v39 = vld [vmem:[#allocation33_spill] sm:$0xff] }
 0x2d1   :  { %11672 = vst [vmem:[#allocation21_spill] sm:$0xff] %v10107_v36  ;;  %v2394_v30 = vpop.permute.xlu0 %2393 }
 0x2d2   :  { %3375 = vst [vmem:[#allocation3 + $0x4b4] sm:$0xff] %v7005_v33  ;;  %3481 = vrot.lane.b32.xlu1 %v9897_v34, %s7621_s10  ;;  %v2473_v4 = vsel %vm2457_vm10, %v9459_v20, %v2394_v30 }
 0x2d3   :  { %2962 = vrot.lane.b32.xlu0 %v9798_v18, %s7622_s11  ;;  %v2616_v7 = vmul.f32 %v10111_v21, %v2473_v4 }
 0x2d4   :  { %v2396_v59 = vpop.permute.xlu1 %2395 }
 0x2d5   :  { %v2474_v24 = vsel %vm2457_vm10, %v2394_v30, %v2396_v59  ;;  %v2475_v45 = vsel %vm2457_vm10, %v2396_v59, %v11673_v54  ;;  %v2406_v3 = vpop.permute.xlu0 %2405  ;;  %v7297_v30 = vld [vmem:[#allocation3 + $0x478] ss:$56 sps:$4 sm:$0xff]  }
 0x2d6   :  { %v2617_v14 = vmul.f32 %v10117_v11, %v2474_v24  ;;  %v2618_v29 = vmul.f32 %v10121_v5, %v2475_v45  ;;  %2964 = vrot.lane.b32.xlu1 %v9796_v28, %s7622_s11  ;;  %v2479_v20 = vsel %vm2457_vm10, %v9479_v26, %v2406_v3 }
 0x2d7   :  { %2966 = vrot.lane.b32.xlu0 %v9821_v37, %s7622_s11  ;;  %v2623_v59 = vmul.f32 %v10111_v21, %v2479_v20 }
 0x2d8   :  { %v6964_v57 = vpack.c.bf16 %v2618_v29, %v2618_v29  ;;  %v2408_v46 = vpop.permute.xlu1 %2407 }
 0x2d9   :  { %v2480_v23 = vsel %vm2457_vm10, %v2406_v3, %v2408_v46  ;;  %v2481_v19 = vsel %vm2457_vm10, %v2408_v46, %v11674_v39  ;;  %v2434_v33 = vpop.permute.xlu0 %2433  ;;  %v7299_v4 = vld [vmem:[#allocation3 + $0x47c] ss:$56 sps:$4 sm:$0xff]  }
 0x2da   :  { %2753 = vst [vmem:[#allocation3 + $0x408] sm:$0xf] %v6964_v57  ;;  %v2624_v24 = vmul.f32 %v10117_v11, %v2480_v23  ;;  %v2625_v26 = vmul.f32 %v10121_v5, %v2481_v19  ;;  %2968 = vrot.lane.b32.xlu1 %v9819_v31, %s7622_s11  ;;  %v2568_v54 = vsel %vm2457_vm10, %v10099_v32, %v2434_v33  ;;  %v11675_v57 = vld [vmem:[#allocation34_spill] sm:$0xff]  ;;  %v11676_v23 = vld [vmem:[#allocation35_spill] sm:$0xff] }
 0x2db   :  { %2974 = vrot.lane.b32.xlu0 %v9828_v1, %s7622_s11  ;;  %5566 = vmatprep.subr.bf16.mxu1 %v7299_v4  ;;  %v2640_v46 = vmul.f32 %v11675_v57, %v2568_v54  ;;  %v7612_v19 = vpack.c.bf16 %v2623_v59, %v2616_v7 }
 0x2dc   :  { %v6968_v45 = vpack.c.bf16 %v2625_v26, %v2625_v26  ;;  %v10151_v3 = vpop.permute.xlu1 %2435  ;;  %5567 = vmatpush2.bf16.msra.mxu1 %v7297_v30  ;;  %v7613_v32 = vpack.c.bf16 %v2624_v24, %v2617_v14 }
 0x2dd   :  { %v2494_v29 = vsel %vm2457_vm10, %v2434_v33, %v10151_v3  ;;  %v2446_v20 = vpop.permute.xlu0 %2445 }
 0x2de   :  { %2757 = vst [vmem:[#allocation3 + $0x440] sm:$0xf] %v6968_v45  ;;  %v2641_v39 = vmul.f32 %v11676_v23, %v2494_v29  ;;  %2976 = vrot.lane.b32.xlu1 %v9830_v2, %s7622_s11  ;;  %v2569_v4 = vsel %vm2457_vm10, %v10107_v36, %v2446_v20  ;;  %5455 = vmatprep.subr.bf16.mxu0 %v7613_v32  ;;  %v11679_v45 = vld [vmem:[#allocation40_spill] sm:$0xff] }
 0x2df   :  { %2978 = vrot.lane.b32.xlu0 %v9845_v6, %s7622_s11  ;;  %5456 = vmatpush2.bf16.msra.mxu0 %v7612_v19  ;;  %v2647_v7 = vmul.f32 %v11675_v57, %v2569_v4 }
 0x2e0   :  { %v6977_v30 = vpack.c.bf16 %v2641_v39, %v2640_v46  ;;  %v10163_v26 = vpop.permute.xlu1 %2447  ;;  %v11680_v39 = vld [vmem:[#allocation38_spill] sm:$0xff] }
 0x2e1   :  { %11677 = vst [vmem:[#allocation28_spill] sm:$0xff] %v10163_v26  ;;  %v2500_v33 = vsel %vm2457_vm10, %v2446_v20, %v10163_v26  ;;  %v10167_v54 = vpop.permute.xlu0 %2345 }
 0x2e2   :  { %11678 = vst [vmem:[#allocation20_spill] sm:$0xff] %v10167_v54  ;;  %2854 = vst [vmem:[#allocation3 + $0x40c] sm:$0xff] %v6977_v30  ;;  %v2648_v14 = vmul.f32 %v11676_v23, %v2500_v33  ;;  %2980 = vrot.lane.b32.xlu1 %v9843_v53, %s7622_s11 }
 0x2e3   :  { %2938 = vrot.lane.b32.xlu0 %v9862_v60, %s7622_s11 }
 0x2e4   :  { %v6981_v59 = vpack.c.bf16 %v2648_v14, %v2647_v7  ;;  %v10175_v24 = vpop.permute.xlu1 %2347 }
 0x2e5   :  { %v2370_v32 = vpop.permute.xlu0 %2369 }
 0x2e6   :  { %2858 = vst [vmem:[#allocation3 + $0x444] sm:$0xff] %v6981_v59  ;;  %2940 = vrot.lane.b32.xlu1 %v9860_v27, %s7622_s11  ;;  %v2461_v29 = vsel %vm2457_vm10, %v11679_v45, %v2370_v32 }
 0x2e7   :  { %2942 = vrot.lane.b32.xlu0 %v9873_v63, %s7622_s11  ;;  %v2602_v30 = vmul.f32 %v10111_v21, %v2461_v29 }
 0x2e8   :  { %v2372_v20 = vpop.permute.xlu1 %2371 }
 0x2e9   :  { %v2462_v46 = vsel %vm2457_vm10, %v2370_v32, %v2372_v20  ;;  %v2463_v19 = vsel %vm2457_vm10, %v2372_v20, %v11680_v39  ;;  %v2382_v4 = vpop.permute.xlu0 %2381  ;;  %v11681_v20 = vld [vmem:[#allocation39_spill] sm:$0xff] }
 0x2ea   :  { %v2603_v33 = vmul.f32 %v10117_v11, %v2462_v46  ;;  %v2604_v7 = vmul.f32 %v10121_v5, %v2463_v19  ;;  %2944 = vrot.lane.b32.xlu1 %v9871_v8, %s7622_s11  ;;  %v2467_v14 = vsel %vm2457_vm10, %v9527_v62, %v2382_v4  ;;  %v7308_v46 = vld [vmem:[#allocation3 + $0x408] ss:$56 sps:$4 sm:$0xff]  }
 0x2eb   :  { %2950 = vrot.lane.b32.xlu0 %v9886_v51, %s7622_s11  ;;  %v2609_v19 = vmul.f32 %v10111_v21, %v2467_v14 }
 0x2ec   :  { %v6956_v59 = vpack.c.bf16 %v2604_v7, %v2604_v7  ;;  %v2384_v32 = vpop.permute.xlu1 %2383 }
 0x2ed   :  { %v2468_v45 = vsel %vm2457_vm10, %v2382_v4, %v2384_v32  ;;  %v2469_v29 = vsel %vm2457_vm10, %v2384_v32, %v11681_v20  ;;  %v2410_v39 = vpop.permute.xlu0 %2409  ;;  %v7310_v36 = vld [vmem:[#allocation3 + $0x40c] ss:$56 sps:$4 sm:$0xff]  }
 0x2ee   :  { %2745 = vst [vmem:[#allocation3 + $0x398] sm:$0xf] %v6956_v59  ;;  %v2610_v26 = vmul.f32 %v10117_v11, %v2468_v45  ;;  %v2611_v62 = vmul.f32 %v10121_v5, %v2469_v29  ;;  %2952 = vrot.lane.b32.xlu1 %v9884_v52, %s7622_s11  ;;  %v2566_v7 = vsel %vm2457_vm10, %v10167_v54, %v2410_v39 }
 0x2ef   :  { %2954 = vrot.lane.b32.xlu0 %v9899_v61, %s7622_s11  ;;  %5568 = vmatprep.subr.bf16.mxu1 %v7310_v36  ;;  %v2626_v45 = vmul.f32 %v11675_v57, %v2566_v7  ;;  %v7614_v29 = vpack.c.bf16 %v2609_v19, %v2602_v30 }
 0x2f0   :  { %v6960_v4 = vpack.c.bf16 %v2611_v62, %v2611_v62  ;;  %v10207_v32 = vpop.permute.xlu1 %2411  ;;  %5569 = vmatpush2.bf16.msra.mxu1 %v7308_v46  ;;  %v7615_v54 = vpack.c.bf16 %v2610_v26, %v2603_v33 }
 0x2f1   :  { %v2482_v14 = vsel %vm2457_vm10, %v2410_v39, %v10207_v32  ;;  %v2422_v59 = vpop.permute.xlu0 %2421 }
 0x2f2   :  { %2749 = vst [vmem:[#allocation3 + $0x3d0] sm:$0xf] %v6960_v4  ;;  %v2627_v20 = vmul.f32 %v11676_v23, %v2482_v14  ;;  %2956 = vrot.lane.b32.xlu1 %v9897_v34, %s7622_s11  ;;  %v2567_v36 = vsel %vm2457_vm10, %v10175_v24, %v2422_v59  ;;  %5457 = vmatprep.subr.bf16.mxu0 %v7615_v54  ;;  %v11682_v54 = vunpack.i.h.bf16 %v9560_v58  ;;  %v10242_v58 = vld [vmem:[%s11430_s1 + $0x14] ss:$8 sps:$4 sm:$0xff]  }
 0x2f3   :  { %2437 = vrot.lane.b32.xlu0 %v9798_v18, %s7623_s12  ;;  %5458 = vmatpush2.bf16.msra.mxu0 %v7614_v29  ;;  %v2633_v4 = vmul.f32 %v11675_v57, %v2567_v36  ;;  %v10236_v57 = vld [vmem:[%s11430_s1] ss:$8 sps:$4 sm:$0xff]  }
 0x2f4   :  { %v6969_v46 = vpack.c.bf16 %v2627_v20, %v2626_v45  ;;  %v10219_v62 = vpop.permute.xlu1 %2423 }
 0x2f5   :  { %v2488_v39 = vsel %vm2457_vm10, %v2422_v59, %v10219_v62  ;;  %v7187_v7 = vpop.permute.xlu0 %7186 }
 0x2f6   :  { %2846 = vst [vmem:[#allocation3 + $0x39c] sm:$0xff] %v6969_v46  ;;  %v2634_v26 = vmul.f32 %v11676_v23, %v2488_v39  ;;  %v7189_v30 = vunpack.i.h.bf16 %v7187_v7  ;;  %v7188_v33 = vunpack.i.l.bf16 %v7187_v7  ;;  %2439 = vrot.lane.b32.xlu1 %v9796_v28, %s7623_s12  ;;  %5460 = vmatmul.mubr.bf16.vlgmr.msra.gmra.mxu0 %v10236_v57  ;;  %v11683_v39 = vunpack.i.l.bf16 %v9531_v49 }
 0x2f7   :  { %2441 = vrot.lane.b32.xlu0 %v9821_v37, %s7623_s12  ;;  %6674 = vmatprep.mubr.msk.bf16.mxu0 %vm5176_vm8, %v10242_v58 }
 0x2f8   :  { %v6973_v18 = vpack.c.bf16 %v2634_v26, %v2633_v4  ;;  %v2054_v19 = vsel %vm2016_vm5, %v11682_v54, %v7188_v33  ;;  %v2055_v14 = vsel %vm2016_vm5, %v7188_v33, %v7189_v30  ;;  %v7192_v59 = vpop.permute.xlu1 %7191  ;;  %v11684_v33 = vunpack.i.h.bf16 %v9568_v35 }
 0x2f9   :  { %v6946_v23 = vpack.c.bf16 %v2055_v14, %v2054_v19  ;;  %v7194_v28 = vunpack.i.h.bf16 %v7192_v59  ;;  %v7193_v45 = vunpack.i.l.bf16 %v7192_v59  ;;  %v7197_v20 = vpop.permute.xlu0 %7196 }
 0x2fa   :  { %2850 = vst [vmem:[#allocation3 + $0x3d4] sm:$0xff] %v6973_v18  ;;  %v7199_v37 = vunpack.i.h.bf16 %v7197_v20  ;;  %v7198_v29 = vunpack.i.l.bf16 %v7197_v20  ;;  %2443 = vrot.lane.b32.xlu1 %v9819_v31, %s7623_s12 }
 0x2fb   :  { %2330 = vst [vmem:[#allocation3 + $0x334] sm:$0xff] %v6946_v23  ;;  %v2056_v36 = vsel %vm2016_vm5, %v7189_v30, %v7193_v45  ;;  %v2057_v46 = vsel %vm2016_vm5, %v7193_v45, %v7194_v28  ;;  %v2058_v7 = vsel %vm2016_vm5, %v7194_v28, %v11683_v39  ;;  %2449 = vrot.lane.b32.xlu0 %v9828_v1, %s7623_s12  ;;  %v11685_v45 = vunpack.i.h.bf16 %v9531_v49 }
 0x2fc   :  { %v6947_v4 = vpack.c.bf16 %v2057_v46, %v2056_v36  ;;  %v6948_v26 = vpack.c.bf16 %v2058_v7, %v2058_v7  ;;  %v2060_v18 = vsel %vm2016_vm5, %v11684_v33, %v7198_v29  ;;  %v2061_v31 = vsel %vm2016_vm5, %v7198_v29, %v7199_v37  ;;  %v7202_v54 = vpop.permute.xlu1 %7201  ;;  %v7318_v33 = vld [vmem:[#allocation3 + $0x398] ss:$56 sps:$4 sm:$0xff]  }
 0x2fd   :  { %v6950_v19 = vpack.c.bf16 %v2061_v31, %v2060_v18  ;;  %v7204_v30 = vunpack.i.h.bf16 %v7202_v54  ;;  %v7203_v14 = vunpack.i.l.bf16 %v7202_v54  ;;  %v7207_v59 = vpop.permute.xlu0 %7206  ;;  %v11686_v46 = vunpack.i.h.bf16 %v9610_v40  ;;  %v10281_v40 = vld [vmem:[%s11430_s1 + $0x24] ss:$8 sps:$4 sm:$0xff]  }
 0x2fe   :  { %2331 = vst [vmem:[#allocation3 + $0x33c] sm:$0xff] %v6947_v4  ;;  %2332 = vst [vmem:[#allocation3 + $0x344] sm:$0xf] %v6948_v26  ;;  %v7209_v23 = vunpack.i.h.bf16 %v7207_v59  ;;  %v7208_v28 = vunpack.i.l.bf16 %v7207_v59  ;;  %2451 = vrot.lane.b32.xlu1 %v9830_v2, %s7623_s12 }
 0x2ff   :  { %2334 = vst [vmem:[#allocation3 + $0x36c] sm:$0xff] %v6950_v19  ;;  %v2062_v1 = vsel %vm2016_vm5, %v7199_v37, %v7203_v14  ;;  %v2063_v35 = vsel %vm2016_vm5, %v7203_v14, %v7204_v30  ;;  %v2064_v20 = vsel %vm2016_vm5, %v7204_v30, %v11685_v45  ;;  %2453 = vrot.lane.b32.xlu0 %v9845_v6, %s7623_s12  ;;  %v10275_v37 = vld [vmem:[%s11430_s1 + $0x10] ss:$8 sps:$4 sm:$0xff]   ;;  %v11687_v14 = vunpack.i.l.bf16 %v9590_v10 }
 0x300   :  { %v6951_v29 = vpack.c.bf16 %v2063_v35, %v2062_v1  ;;  %v6952_v36 = vpack.c.bf16 %v2064_v20, %v2064_v20  ;;  %v2042_v39 = vsel %vm2016_vm5, %v11686_v46, %v7208_v28  ;;  %v2043_v2 = vsel %vm2016_vm5, %v7208_v28, %v7209_v23  ;;  %v7212_v7 = vpop.permute.xlu1 %7211  ;;  %5470 = vmatmul.mubr.bf16.gmra.mxu0 %v10275_v37 }
 0x301   :  { %v6938_v49 = vpack.c.bf16 %v2043_v2, %v2042_v39  ;;  %v7214_v4 = vunpack.i.h.bf16 %v7212_v7  ;;  %v7213_v26 = vunpack.i.l.bf16 %v7212_v7  ;;  %v7217_v6 = vpop.permute.xlu0 %7216  ;;  %v7320_v18 = vld [vmem:[#allocation3 + $0x39c] ss:$56 sps:$4 sm:$0xff]   ;;  %6675 = vmatprep.mubr.msk.bf16.mxu0 %vm5176_vm8, %v10281_v40  ;;  %v11688_v35 = vunpack.i.h.bf16 %v9642_v12 }
 0x302   :  { %2335 = vst [vmem:[#allocation3 + $0x374] sm:$0xff] %v6951_v29  ;;  %2336 = vst [vmem:[#allocation3 + $0x37c] sm:$0xf] %v6952_v36  ;;  %v7219_v31 = vunpack.i.h.bf16 %v7217_v6  ;;  %v7218_v54 = vunpack.i.l.bf16 %v7217_v6  ;;  %2455 = vrot.lane.b32.xlu1 %v9843_v53, %s7623_s12  ;;  %5570 = vmatprep.subr.bf16.mxu1 %v7320_v18  ;;  %v11689_v7 = vunpack.i.h.bf16 %v9590_v10 }
 0x303   :  { %2322 = vst [vmem:[#allocation3 + $0x2c4] sm:$0xff] %v6938_v49  ;;  %v2044_v19 = vsel %vm2016_vm5, %v7209_v23, %v7213_v26  ;;  %v2045_v30 = vsel %vm2016_vm5, %v7213_v26, %v7214_v4  ;;  %v2046_v59 = vsel %vm2016_vm5, %v7214_v4, %v11687_v14  ;;  %2413 = vrot.lane.b32.xlu0 %v9862_v60, %s7623_s12  ;;  %v7321_v60 = vld [vmem:[#allocation3 + $0x330] ss:$56 sps:$4 sm:$0xff]  }
 0x304   :  { %v6939_v28 = vpack.c.bf16 %v2045_v30, %v2044_v19  ;;  %v6940_v1 = vpack.c.bf16 %v2046_v59, %v2046_v59  ;;  %v2048_v45 = vsel %vm2016_vm5, %v11688_v35, %v7218_v54  ;;  %v2049_v53 = vsel %vm2016_vm5, %v7218_v54, %v7219_v31  ;;  %v7222_v20 = vpop.permute.xlu1 %7221  ;;  %5571 = vmatpush2.bf16.msra.mxu1 %v7318_v33  ;;  %v7525_v59 = vld [vmem:[%s11430_s1 + $0x34] ss:$8 sps:$4 sm:$0xff]  }
 0x305   :  { %v6942_v23 = vpack.c.bf16 %v2049_v53, %v2048_v45  ;;  %v7224_v29 = vunpack.i.h.bf16 %v7222_v20  ;;  %v7223_v36 = vunpack.i.l.bf16 %v7222_v20  ;;  %v1472_v46 = vpop.permute.xlu0 %1471  ;;  %v11692_v45 = vld [vmem:[#allocation41_spill] sm:$0xff]  ;;  %v7327_v20 = vld [vmem:[#allocation3 + $0x2c0] ss:$56 sps:$4 sm:$0xff]  }
 0x306   :  { %2323 = vst [vmem:[#allocation3 + $0x2cc] sm:$0xff] %v6939_v28  ;;  %2324 = vst [vmem:[#allocation3 + $0x2d4] sm:$0xf] %v6940_v1  ;;  %2415 = vrot.lane.b32.xlu1 %v9860_v27, %s7623_s12  ;;  %v7323_v39 = vld [vmem:[#allocation3 + $0x334] ss:$56 sps:$4 sm:$0xff]   ;;  %v1529_v4 = vsel %vm1491_vm6, %v9710_v56, %v1472_v46  ;;  %v11690_v56 = vld [vmem:[#allocation4_spill] sm:$0xff] }
 0x307   :  { %2326 = vst [vmem:[#allocation3 + $0x2fc] sm:$0xff] %v6942_v23  ;;  %v2050_v12 = vsel %vm2016_vm5, %v7219_v31, %v7223_v36  ;;  %v2051_v2 = vsel %vm2016_vm5, %v7223_v36, %v7224_v29  ;;  %v2052_v49 = vsel %vm2016_vm5, %v7224_v29, %v11689_v7  ;;  %2417 = vrot.lane.b32.xlu0 %v9873_v63, %s7623_s12  ;;  %v7324_v31 = vld [vmem:[#allocation3 + $0x338] ss:$56 sps:$4 sm:$0xff]  }
 0x308   :  { %v6943_v26 = vpack.c.bf16 %v2051_v2, %v2050_v12  ;;  %v6944_v6 = vpack.c.bf16 %v2052_v49, %v2052_v49  ;;  %v1474_v27 = vpop.permute.xlu1 %1473  ;;  %5653 = vmatprep.subr.bf16.mxu0 %v7323_v39  ;;  %5573 = vmatmul.mubr.bf16.vlgmr.msra.gmra.mxu1 %v10236_v57  ;;  %v1676_v54 = vmul.f32 %v11690_v56, %v1529_v4  ;;  %v11691_v63 = vld [vmem:[#allocation11_spill] sm:$0xff]  ;;  %v7524_v57 = vld [vmem:[%s11430_s1 + $0x20] ss:$8 sps:$4 sm:$0xff]   ;;  %v11693_v29 = vld [vmem:[#allocation42_spill] sm:$0xff] }
 0x309   :  { %v1530_v33 = vsel %vm1491_vm6, %v1472_v46, %v1474_v27  ;;  %v1476_v18 = vpop.permute.xlu0 %1475  ;;  %5654 = vmatpush1.bf16.msra.mxu0 %v7321_v60  ;;  %v7326_v10 = vld [vmem:[#allocation3 + $0x33c] ss:$56 sps:$4 sm:$0xff]   ;;  %6682 = vmatprep.mubr.msk.bf16.mxu1 %vm5176_vm8, %v10242_v58 }
 0x30a   :  { %2327 = vst [vmem:[#allocation3 + $0x304] sm:$0xff] %v6943_v26  ;;  %2328 = vst [vmem:[#allocation3 + $0x30c] sm:$0xf] %v6944_v6  ;;  %v1677_v19 = vmul.f32 %v11691_v63, %v1530_v33  ;;  %2419 = vrot.lane.b32.xlu1 %v9871_v8, %s7623_s12  ;;  %5480 = vmatmul.mubr.bf16.gmra.mxu0 %v7524_v57  ;;  %v1531_v30 = vsel %vm1491_vm6, %v1474_v27, %v1476_v18 }
 0x30b   :  { %2425 = vrot.lane.b32.xlu0 %v9886_v51, %s7623_s12  ;;  %5766 = vmatprep.subr.bf16.mxu1 %v7326_v10  ;;  %v1678_v35 = vmul.f32 %v9634_v13, %v1531_v30 }
 0x30c   :  { %v6914_v58 = vpack.c.bf16 %v1677_v19, %v1676_v54  ;;  %v1478_v14 = vpop.permute.xlu1 %1477  ;;  %5767 = vmatpush1.bf16.msra.mxu1 %v7324_v31  ;;  %6676 = vmatprep.mubr.msk.bf16.mxu0 %vm5176_vm8, %v7525_v59  ;;  %v11695_v54 = vld [vmem:[#allocation10_spill] sm:$0xff] }
 0x30d   :  { %v1532_v8 = vsel %vm1491_vm6, %v1476_v18, %v1478_v14  ;;  %v1533_v28 = vsel %vm1491_vm6, %v1478_v14, %v8902_v48  ;;  %v1484_v1 = vpop.permute.xlu0 %1483 }
 0x30e   :  { %1889 = vst [vmem:[#allocation3 + $0x254] sm:$0xff] %v6914_v58  ;;  %v1679_v51 = vmul.f32 %v9660_v38, %v1532_v8  ;;  %v1680_v53 = vmul.f32 %v11692_v45, %v1533_v28  ;;  %2427 = vrot.lane.b32.xlu1 %v9884_v52, %s7623_s12  ;;  %v7329_v23 = vld [vmem:[#allocation3 + $0x2c4] ss:$56 sps:$4 sm:$0xff]   ;;  %v1535_v36 = vsel %vm1491_vm6, %v11693_v29, %v1484_v1  ;;  %v7330_v2 = vld [vmem:[#allocation3 + $0x2c8] ss:$56 sps:$4 sm:$0xff]  }
 0x30f   :  { %2429 = vrot.lane.b32.xlu0 %v9899_v61, %s7623_s12  ;;  %5655 = vmatprep.subr.bf16.mxu0 %v7329_v23  ;;  %v1683_v7 = vmul.f32 %v11690_v56, %v1535_v36  ;;  %v11696_v29 = vld [vmem:[#allocation8_spill] sm:$0xff] }
 0x310   :  { %v6915_v48 = vpack.c.bf16 %v1679_v51, %v1678_v35  ;;  %v6916_v46 = vpack.c.bf16 %v1680_v53, %v1680_v53  ;;  %v1486_v60 = vpop.permute.xlu1 %1485  ;;  %5583 = vmatmul.mubr.bf16.gmra.mxu1 %v10275_v37  ;;  %5656 = vmatpush1.bf16.msra.mxu0 %v7327_v20  ;;  %v7526_v37 = vld [vmem:[%s11430_s1 + $0x30] ss:$8 sps:$4 sm:$0xff]   ;;  %v7528_v51 = vld [vmem:[%s11430_s1 + $0x40] ss:$8 sps:$4 sm:$0xff]  }
 0x311   :  { %v1536_v39 = vsel %vm1491_vm6, %v1484_v1, %v1486_v60  ;;  %v1488_v12 = vpop.permute.xlu0 %1487  ;;  %v7332_v52 = vld [vmem:[#allocation3 + $0x2cc] ss:$56 sps:$4 sm:$0xff]   ;;  %6683 = vmatprep.mubr.msk.bf16.mxu1 %vm5176_vm8, %v10281_v40 }
 0x312   :  { %1890 = vst [vmem:[#allocation3 + $0x25c] sm:$0xff] %v6915_v48  ;;  %1891 = vst [vmem:[#allocation3 + $0x264] sm:$0xf] %v6916_v46  ;;  %v1684_v61 = vmul.f32 %v11691_v63, %v1536_v39  ;;  %2431 = vrot.lane.b32.xlu1 %v9897_v34, %s7623_s12  ;;  %5490 = vmatmul.mubr.bf16.gmra.mxu0 %v7526_v37  ;;  %v1537_v49 = vsel %vm1491_vm6, %v1486_v60, %v1488_v12  ;;  %v7527_v40 = vld [vmem:[%s11430_s1 + $0x44] ss:$8 sps:$4 sm:$0xff]  }
 0x313   :  { %5768 = vmatprep.subr.bf16.mxu1 %v7332_v52  ;;  %6677 = vmatprep.mubr.msk.bf16.mxu0 %vm5176_vm8, %v7527_v40  ;;  %v11694_v34 = vld [vmem:[#allocation9_spill] sm:$0xff]  ;;  %v1685_v18 = vmul.f32 %v9634_v13, %v1537_v49  ;;  %v11697_v52 = vld [vmem:[#allocation6_spill] sm:$0xff] }
 0x314   :  { %v6918_v4 = vpack.c.bf16 %v1684_v61, %v1683_v7  ;;  %v1490_v26 = vpop.permute.xlu1 %1489  ;;  %5769 = vmatpush1.bf16.msra.mxu1 %v7330_v2  ;;  %v7333_v46 = vld [vmem:[#allocation3 + $0x250] ss:$56 sps:$4 sm:$0xff]  }
 0x315   :  { %v1538_v6 = vsel %vm1491_vm6, %v1488_v12, %v1490_v26  ;;  %v1539_v27 = vsel %vm1491_vm6, %v1490_v26, %v11694_v34  ;;  %v1448_v33 = vpop.permute.xlu0 %1447 }
 0x316   :  { %1893 = vst [vmem:[#allocation3 + $0x28c] sm:$0xff] %v6918_v4  ;;  %v1686_v31 = vmul.f32 %v9660_v38, %v1538_v6  ;;  %v1687_v10 = vmul.f32 %v11692_v45, %v1539_v27  ;;  %v1517_v19 = vsel %vm1491_vm6, %v11695_v54, %v1448_v33 }
 0x317   :  { %v1662_v1 = vmul.f32 %v11690_v56, %v1517_v19 }
 0x318   :  { %v6919_v30 = vpack.c.bf16 %v1686_v31, %v1685_v18  ;;  %v6920_v58 = vpack.c.bf16 %v1687_v10, %v1687_v10  ;;  %v1450_v14 = vpop.permute.xlu1 %1449  ;;  %5593 = vmatmul.mubr.bf16.gmra.mxu1 %v7524_v57  ;;  %v7529_v57 = vld [vmem:[%s11430_s1 + $0x54] ss:$8 sps:$4 sm:$0xff]   ;;  %v7530_v31 = vld [vmem:[%s11430_s1 + $0x50] ss:$8 sps:$4 sm:$0xff]   ;;  %v7531_v10 = vld [vmem:[%s11430_s1 + $0x64] ss:$8 sps:$4 sm:$0xff]  }
 0x319   :  { %v1518_v8 = vsel %vm1491_vm6, %v1448_v33, %v1450_v14  ;;  %v1452_v28 = vpop.permute.xlu0 %1451  ;;  %6684 = vmatprep.mubr.msk.bf16.mxu1 %vm5176_vm8, %v7525_v59 }
 0x31a   :  { %1894 = vst [vmem:[#allocation3 + $0x294] sm:$0xff] %v6919_v30  ;;  %1895 = vst [vmem:[#allocation3 + $0x29c] sm:$0xf] %v6920_v58  ;;  %v1663_v35 = vmul.f32 %v11691_v63, %v1518_v8  ;;  %5500 = vmatmul.mubr.bf16.gmra.mxu0 %v7528_v51  ;;  %v1519_v53 = vsel %vm1491_vm6, %v1450_v14, %v1452_v28 }
 0x31b   :  { %6678 = vmatprep.mubr.msk.bf16.mxu0 %vm5176_vm8, %v7529_v57  ;;  %v1664_v39 = vmul.f32 %v9634_v13, %v1519_v53 }
 0x31c   :  { %v6906_v59 = vpack.c.bf16 %v1663_v35, %v1662_v1  ;;  %v1454_v20 = vpop.permute.xlu1 %1453 }
 0x31d   :  { %v1520_v23 = vsel %vm1491_vm6, %v1452_v28, %v1454_v20  ;;  %v1521_v36 = vsel %vm1491_vm6, %v1454_v20, %v11696_v29  ;;  %v1460_v48 = vpop.permute.xlu0 %1459  ;;  %v7335_v60 = vld [vmem:[#allocation3 + $0x254] ss:$56 sps:$4 sm:$0xff]   ;;  %v7336_v34 = vld [vmem:[#allocation3 + $0x258] ss:$56 sps:$4 sm:$0xff]   ;;  %v11700_v29 = vld [vmem:[#allocation16_spill] sm:$0xff] }
 0x31e   :  { %1881 = vst [vmem:[#allocation3 + $0x1e4] sm:$0xff] %v6906_v59  ;;  %v1665_v12 = vmul.f32 %v9660_v38, %v1520_v23  ;;  %v1666_v2 = vmul.f32 %v11692_v45, %v1521_v36  ;;  %v1523_v7 = vsel %vm1491_vm6, %v11697_v52, %v1460_v48  ;;  %5657 = vmatprep.subr.bf16.mxu0 %v7335_v60  ;;  %v11699_v28 = vld [vmem:[#allocation5_spill] sm:$0xff]  ;;  %v11701_v36 = vld [vmem:[#allocation18_spill] sm:$0xff]  ;;  %v7339_v52 = vld [vmem:[#allocation3 + $0x1e0] ss:$56 sps:$4 sm:$0xff]  }
 0x31f   :  { %5658 = vmatpush1.bf16.msra.mxu0 %v7333_v46  ;;  %v1669_v33 = vmul.f32 %v11690_v56, %v1523_v7 }
 0x320   :  { %v6907_v61 = vpack.c.bf16 %v1665_v12, %v1664_v39  ;;  %v6908_v49 = vpack.c.bf16 %v1666_v2, %v1666_v2  ;;  %v1462_v4 = vpop.permute.xlu1 %1461  ;;  %5603 = vmatmul.mubr.bf16.gmra.mxu1 %v7526_v37  ;;  %v11702_v39 = vld [vmem:[#allocation13_spill] sm:$0xff] }
 0x321   :  { %v1524_v26 = vsel %vm1491_vm6, %v1460_v48, %v1462_v4  ;;  %v1464_v6 = vpop.permute.xlu0 %1463  ;;  %v7338_v27 = vld [vmem:[#allocation3 + $0x25c] ss:$56 sps:$4 sm:$0xff]   ;;  %6685 = vmatprep.mubr.msk.bf16.mxu1 %vm5176_vm8, %v7527_v40 }
 0x322   :  { %1882 = vst [vmem:[#allocation3 + $0x1ec] sm:$0xff] %v6907_v61  ;;  %1883 = vst [vmem:[#allocation3 + $0x1f4] sm:$0xf] %v6908_v49  ;;  %v1670_v18 = vmul.f32 %v11691_v63, %v1524_v26  ;;  %5510 = vmatmul.mubr.bf16.gmra.mxu0 %v7530_v31  ;;  %v1525_v37 = vsel %vm1491_vm6, %v1462_v4, %v1464_v6  ;;  %5770 = vmatprep.subr.bf16.mxu1 %v7338_v27  ;;  %v11698_v63 = vld [vmem:[#allocation7_spill] sm:$0xff] }
 0x323   :  { %6679 = vmatprep.mubr.msk.bf16.mxu0 %vm5176_vm8, %v7531_v10  ;;  %5771 = vmatpush1.bf16.msra.mxu1 %v7336_v34  ;;  %v1671_v58 = vmul.f32 %v9634_v13, %v1525_v37  ;;  %v10417_v48 = vld [vmem:[%s11430_s1 + $0x74] ss:$8 sps:$4 sm:$0xff]  }
 0x324   :  { %v6910_v40 = vpack.c.bf16 %v1670_v18, %v1669_v33  ;;  %v1466_v54 = vpop.permute.xlu1 %1465 }
 0x325   :  { %v1526_v56 = vsel %vm1491_vm6, %v1464_v6, %v1466_v54  ;;  %v1527_v19 = vsel %vm1491_vm6, %v1466_v54, %v11698_v63  ;;  %v3488_v30 = vpop.permute.xlu0 %3487  ;;  %v7344_v6 = vld [vmem:[#allocation3 + $0x174] ss:$56 sps:$4 sm:$0xff]   ;;  %v7342_v63 = vld [vmem:[#allocation3 + $0x170] ss:$56 sps:$4 sm:$0xff]  }
 0x326   :  { %1885 = vst [vmem:[#allocation3 + $0x21c] sm:$0xff] %v6910_v40  ;;  %v1672_v14 = vmul.f32 %v9660_v38, %v1526_v56  ;;  %v1673_v8 = vmul.f32 %v11692_v45, %v1527_v19  ;;  %v3545_v1 = vsel %vm3507_vm7, %v11699_v28, %v3488_v30  ;;  %v10410_v45 = vld [vmem:[%s11430_s1 + $0x60] ss:$8 sps:$4 sm:$0xff]   ;;  %v10436_v19 = vld [vmem:[%s11430_s1 + $0x70] ss:$8 sps:$4 sm:$0xff]  }
 0x327   :  { %v3692_v13 = vmul.f32 %v11700_v29, %v3545_v1 }
 0x328   :  { %v6911_v35 = vpack.c.bf16 %v1672_v14, %v1671_v58  ;;  %v6912_v53 = vpack.c.bf16 %v1673_v8, %v1673_v8  ;;  %v3490_v59 = vpop.permute.xlu1 %3489  ;;  %5613 = vmatmul.mubr.bf16.gmra.mxu1 %v7528_v51  ;;  %v7353_v58 = vld [vmem:[#allocation3 + $0x17c] ss:$56 sps:$4 sm:$0xff]  }
 0x329   :  { %v3546_v20 = vsel %vm3507_vm7, %v3488_v30, %v3490_v59  ;;  %v3492_v23 = vpop.permute.xlu0 %3491  ;;  %6686 = vmatprep.mubr.msk.bf16.mxu1 %vm5176_vm8, %v7529_v57  ;;  %v7350_v30 = vld [vmem:[#allocation3 + $0x104] ss:$56 sps:$4 sm:$0xff]  }
 0x32a   :  { %1886 = vst [vmem:[#allocation3 + $0x224] sm:$0xff] %v6911_v35  ;;  %1887 = vst [vmem:[#allocation3 + $0x22c] sm:$0xf] %v6912_v53  ;;  %v3693_v38 = vmul.f32 %v11701_v36, %v3546_v20  ;;  %5520 = vmatmul.mubr.bf16.gmra.mxu0 %v10410_v45  ;;  %v3547_v51 = vsel %vm3507_vm7, %v3490_v59, %v3492_v23 }
 0x32b   :  { %6680 = vmatprep.mubr.msk.bf16.mxu0 %vm5176_vm8, %v10417_v48  ;;  %v3694_v61 = vmul.f32 %v9808_v42, %v3547_v51  ;;  %v7356_v51 = vld [vmem:[#allocation3 + $0x94] ss:$56 sps:$4 sm:$0xff]  }
 0x32c   :  { %v7042_v57 = vpack.c.bf16 %v3693_v38, %v3692_v13  ;;  %v3494_v46 = vpop.permute.xlu1 %3493  ;;  %v7351_v13 = vld [vmem:[#allocation3 + $0x178] ss:$56 sps:$4 sm:$0xff]  }
 0x32d   :  { %v3548_v60 = vsel %vm3507_vm7, %v3492_v23, %v3494_v46  ;;  %v3549_v12 = vsel %vm3507_vm7, %v3494_v46, %v11702_v39  ;;  %v3500_v2 = vpop.permute.xlu0 %3499  ;;  %v7341_v7 = vld [vmem:[#allocation3 + $0x1e4] ss:$56 sps:$4 sm:$0xff]   ;;  %v7345_v40 = vld [vmem:[#allocation3 + $0x1e8] ss:$56 sps:$4 sm:$0xff]  }
 0x32e   :  { %3905 = vst [vmem:[#allocation3 + $0x5d4] sm:$0xff] %v7042_v57  ;;  %v3695_v49 = vmul.f32 %v9813_v50, %v3548_v60  ;;  %v3696_v4 = vmul.f32 %v9817_v22, %v3549_v12  ;;  %v3551_v26 = vsel %vm3507_vm7, %v9911_v25, %v3500_v2  ;;  %5659 = vmatprep.subr.bf16.mxu0 %v7341_v7  ;;  %v7348_v23 = vld [vmem:[#allocation3 + $0x100] ss:$56 sps:$4 sm:$0xff]   ;;  %v7359_v57 = vld [vmem:[#allocation3 + $0x10c] ss:$56 sps:$4 sm:$0xff]  }
 0x32f   :  { %5660 = vmatpush1.bf16.msra.mxu0 %v7339_v52  ;;  %v3699_v56 = vmul.f32 %v11700_v29, %v3551_v26  ;;  %v7354_v7 = vld [vmem:[#allocation3 + $0x90] ss:$56 sps:$4 sm:$0xff]  }
 0x330   :  { %v7043_v34 = vpack.c.bf16 %v3695_v49, %v3694_v61  ;;  %v7044_v27 = vpack.c.bf16 %v3696_v4, %v3696_v4  ;;  %v3502_v33 = vpop.permute.xlu1 %3501  ;;  %5623 = vmatmul.mubr.bf16.gmra.mxu1 %v7530_v31  ;;  %5661 = vmatprep.subr.bf16.mxu0 %v7344_v6  ;;  %v7362_v49 = vld [vmem:[#allocation3 + $0x24] ss:$56 sps:$4 sm:$0xff]  }
 0x331   :  { %v3552_v18 = vsel %vm3507_vm7, %v3500_v2, %v3502_v33  ;;  %v3504_v37 = vpop.permute.xlu0 %3503  ;;  %v7347_v54 = vld [vmem:[#allocation3 + $0x1ec] ss:$56 sps:$4 sm:$0xff]   ;;  %6687 = vmatprep.mubr.msk.bf16.mxu1 %vm5176_vm8, %v7531_v10  ;;  %v7365_v4 = vld [vmem:[#allocation3 + $0x9c] ss:$56 sps:$4 sm:$0xff]  }
 0x332   :  { %3906 = vst [vmem:[#allocation3 + $0x5dc] sm:$0xff] %v7043_v34  ;;  %3907 = vst [vmem:[#allocation3 + $0x5e4] sm:$0xf] %v7044_v27  ;;  %v3700_v25 = vmul.f32 %v11701_v36, %v3552_v18  ;;  %5530 = vmatmul.mubr.bf16.gmra.mxu0 %v10436_v19  ;;  %v3553_v31 = vsel %vm3507_vm7, %v3502_v33, %v3504_v37  ;;  %5772 = vmatprep.subr.bf16.mxu1 %v7347_v54  ;;  %v10443_v10 = vld [vmem:[%s11430_s1 + $0x4] ss:$8 sps:$4 sm:$0xff]  }
 0x333   :  { %6689 = vmatprep.mubr.msk.bf16.mxu0 %vm5176_vm8, %v10443_v10  ;;  %5662 = vmatpush1.bf16.msra.mxu0 %v7342_v63  ;;  %v3701_v53 = vmul.f32 %v9808_v42, %v3553_v31  ;;  %v11703_v54 = vld [vmem:[#allocation17_spill] sm:$0xff] }
 0x334   :  { %v7046_v14 = vpack.c.bf16 %v3700_v25, %v3699_v56  ;;  %v3506_v8 = vpop.permute.xlu1 %3505  ;;  %5773 = vmatpush1.bf16.msra.mxu1 %v7345_v40  ;;  %5663 = vmatprep.subr.bf16.mxu0 %v7350_v30  ;;  %v7363_v40 = vld [vmem:[#allocation3 + $0x98] ss:$56 sps:$4 sm:$0xff]   ;;  %v7371_v63 = vld [vmem:[#allocation3 + $0x2c] ss:$56 sps:$4 sm:$0xff]  }
 0x335   :  { %v3554_v28 = vsel %vm3507_vm7, %v3504_v37, %v3506_v8  ;;  %v3555_v1 = vsel %vm3507_vm7, %v3506_v8, %v9802_v17  ;;  %v3464_v35 = vpop.permute.xlu0 %3463  ;;  %5774 = vmatprep.subr.bf16.mxu1 %v7353_v58 }
 0x336   :  { %3909 = vst [vmem:[#allocation3 + $0x60c] sm:$0xff] %v7046_v14  ;;  %v3702_v59 = vmul.f32 %v9813_v50, %v3554_v28  ;;  %v3703_v20 = vmul.f32 %v9817_v22, %v3555_v1  ;;  %v3533_v38 = vsel %vm3507_vm7, %v9959_v44, %v3464_v35  ;;  %v7357_v44 = vld [vmem:[#allocation3 + $0x108] ss:$56 sps:$4 sm:$0xff]  }
 0x337   :  { %5664 = vmatpush1.bf16.msra.mxu0 %v7348_v23  ;;  %v3678_v2 = vmul.f32 %v11700_v29, %v3533_v38  ;;  %v7366_v1 = vld [vmem:[#allocation3 + $0x5d0] ss:$56 sps:$4 sm:$0xff]  }
 0x338   :  { %v7047_v46 = vpack.c.bf16 %v3702_v59, %v3701_v53  ;;  %v7048_v60 = vpack.c.bf16 %v3703_v20, %v3703_v20  ;;  %v3466_v17 = vpop.permute.xlu1 %3465  ;;  %5775 = vmatpush1.bf16.msra.mxu1 %v7351_v13  ;;  %5665 = vmatprep.subr.bf16.mxu0 %v7356_v51  ;;  %v11704_v38 = vld [vmem:[#allocation14_spill] sm:$0xff] }
 0x339   :  { %v3534_v39 = vsel %vm3507_vm7, %v3464_v35, %v3466_v17  ;;  %v3468_v12 = vpop.permute.xlu0 %3467  ;;  %5776 = vmatprep.subr.bf16.mxu1 %v7359_v57  ;;  %5633 = vmatmul.mubr.bf16.gmra.mxu1 %v10410_v45  ;;  %v7369_v35 = vld [vmem:[#allocation3 + $0x28] ss:$56 sps:$4 sm:$0xff]  }
 0x33a   :  { %3910 = vst [vmem:[#allocation3 + $0x614] sm:$0xff] %v7047_v46  ;;  %3911 = vst [vmem:[#allocation3 + $0x61c] sm:$0xf] %v7048_v60  ;;  %v3679_v52 = vmul.f32 %v11701_v36, %v3534_v39  ;;  %v3535_v61 = vsel %vm3507_vm7, %v3466_v17, %v3468_v12  ;;  %6688 = vmatprep.mubr.msk.bf16.mxu1 %vm5176_vm8, %v10417_v48  ;;  %v7360_v48 = vld [vmem:[#allocation3 + $0x20] ss:$56 sps:$4 sm:$0xff]  }
 0x33b   :  { %5666 = vmatpush1.bf16.msra.mxu0 %v7354_v7  ;;  %v3680_v45 = vmul.f32 %v9808_v42, %v3535_v61 }
 0x33c   :  { %v7034_v26 = vpack.c.bf16 %v3679_v52, %v3678_v2  ;;  %v3470_v6 = vpop.permute.xlu1 %3469  ;;  %5777 = vmatpush1.bf16.msra.mxu1 %v7357_v44  ;;  %5667 = vmatprep.subr.bf16.mxu0 %v7362_v49  ;;  %v11705_v52 = vld [vmem:[#allocation25_spill] sm:$0xff] }
 0x33d   :  { %v3536_v34 = vsel %vm3507_vm7, %v3468_v12, %v3470_v6  ;;  %v3537_v27 = vsel %vm3507_vm7, %v3470_v6, %v9915_v43  ;;  %v3476_v33 = vpop.permute.xlu0 %3475  ;;  %5778 = vmatprep.subr.bf16.mxu1 %v7365_v4  ;;  %v7368_v25 = vld [vmem:[#allocation3 + $0x5d4] ss:$56 sps:$4 sm:$0xff]   ;;  %v7372_v46 = vld [vmem:[#allocation3 + $0x5d8] ss:$56 sps:$4 sm:$0xff]  }
 0x33e   :  { %3897 = vst [vmem:[#allocation3 + $0x564] sm:$0xff] %v7034_v26  ;;  %v3681_v18 = vmul.f32 %v9813_v50, %v3536_v34  ;;  %v3682_v37 = vmul.f32 %v9817_v22, %v3537_v27  ;;  %v3539_v56 = vsel %vm3507_vm7, %v11703_v54, %v3476_v33  ;;  %v7375_v6 = vld [vmem:[#allocation3 + $0x560] ss:$56 sps:$4 sm:$0xff]  }
 0x33f   :  { %5668 = vmatpush1.bf16.msra.mxu0 %v7360_v48  ;;  %v3685_v8 = vmul.f32 %v11700_v29, %v3539_v56  ;;  %v5235_v48 = vpop.f32.mrf.mxu0 }
 0x340   :  { %v7035_v31 = vpack.c.bf16 %v3681_v18, %v3680_v45  ;;  %v7036_v30 = vpack.c.bf16 %v3682_v37, %v3682_v37  ;;  %v3478_v43 = vpop.permute.xlu1 %3477  ;;  %5779 = vmatpush1.bf16.msra.mxu1 %v7363_v40  ;;  %5673 = vmatprep.subr.bf16.mxu0 %v7368_v25  ;;  %v11708_v18 = vld [vmem:[#allocation15_spill] sm:$0xff]  ;;  %v5348_v40 = vpop.f32.mrf.mxu1  ;;  %5992 = vst [vmem:[%s11431_s3] sm:$0xff] %v5235_v48 }
 0x341   :  { %v3540_v58 = vsel %vm3507_vm7, %v3476_v33, %v3478_v43  ;;  %v3480_v14 = vpop.permute.xlu0 %3479  ;;  %5780 = vmatprep.subr.bf16.mxu1 %v7371_v63  ;;  %5643 = vmatmul.mubr.bf16.gmra.mxu1 %v10436_v19  ;;  %v7374_v59 = vld [vmem:[#allocation3 + $0x5dc] ss:$56 sps:$4 sm:$0xff]   ;;  %5994 = vst [vmem:[%s11431_s3 + $0x10] sm:$0xff] %v5348_v40 }
 0x342   :  { %3898 = vst [vmem:[#allocation3 + $0x56c] sm:$0xff] %v7035_v31  ;;  %3899 = vst [vmem:[#allocation3 + $0x574] sm:$0xf] %v7036_v30  ;;  %v3686_v28 = vmul.f32 %v11701_v36, %v3540_v58  ;;  %v3541_v53 = vsel %vm3507_vm7, %v3478_v43, %v3480_v14  ;;  %6697 = vmatprep.mubr.msk.bf16.mxu1 %vm5176_vm8, %v10443_v10 }
 0x343   :  { %5674 = vmatpush2.bf16.msra.mxu0 %v7366_v1  ;;  %v3687_v19 = vmul.f32 %v9808_v42, %v3541_v53  ;;  %v11706_v42 = vld [vmem:[#allocation27_spill] sm:$0xff]  ;;  %v5350_v1 = vpop.f32.mrf.mxu1 }
 0x344   :  { %v7038_v20 = vpack.c.bf16 %v3686_v28, %v3685_v8  ;;  %v3482_v23 = vpop.permute.xlu1 %3481  ;;  %5781 = vmatpush1.bf16.msra.mxu1 %v7369_v35  ;;  %v5237_v28 = vpop.f32.mrf.mxu0  ;;  %5995 = vst [vmem:[%s11431_s3 + $0x18] sm:$0xff] %v5350_v1 }
 0x345   :  { %v3542_v13 = vsel %vm3507_vm7, %v3480_v14, %v3482_v23  ;;  %v3543_v29 = vsel %vm3507_vm7, %v3482_v23, %v11704_v38  ;;  %v2963_v36 = vpop.permute.xlu0 %2962  ;;  %5786 = vmatprep.subr.bf16.mxu1 %v7374_v59  ;;  %5993 = vst [vmem:[%s11431_s3 + $0x8] sm:$0xff] %v5237_v28 }
 0x346   :  { %3901 = vst [vmem:[#allocation3 + $0x59c] sm:$0xff] %v7038_v20  ;;  %v3688_v51 = vmul.f32 %v9813_v50, %v3542_v13  ;;  %v3689_v57 = vmul.f32 %v9817_v22, %v3543_v29  ;;  %v3020_v10 = vsel %vm2982_vm9, %v10027_v47, %v2963_v36  ;;  %v11707_v47 = vld [vmem:[#allocation12_spill] sm:$0xff]  ;;  %v11709_v20 = vld [vmem:[#allocation19_spill] sm:$0xff]  ;;  %v5239_v38 = vpop.f32.mrf.mxu0 }
 0x347   :  { %v3167_v7 = vmul.f32 %v11705_v52, %v3020_v10  ;;  %5999 = vst [vmem:[%s11431_s3 + $0x38] sm:$0xff] %v5239_v38 }
 0x348   :  { %v7039_v60 = vpack.c.bf16 %v3688_v51, %v3687_v19  ;;  %v7040_v17 = vpack.c.bf16 %v3689_v57, %v3689_v57  ;;  %v2965_v39 = vpop.permute.xlu1 %2964  ;;  %5787 = vmatpush2.bf16.msra.mxu1 %v7372_v46  ;;  %v5352_v51 = vpop.f32.mrf.mxu1 }
 0x349   :  { %v3021_v12 = vsel %vm2982_vm9, %v2963_v36, %v2965_v39  ;;  %v2967_v2 = vpop.permute.xlu0 %2966  ;;  %6001 = vst [vmem:[%s11431_s3 + $0x48] sm:$0xff] %v5352_v51  ;;  %v5241_v46 = vpop.f32.mrf.mxu0 }
 0x34a   :  { %3902 = vst [vmem:[#allocation3 + $0x5a4] sm:$0xff] %v7039_v60  ;;  %3903 = vst [vmem:[#allocation3 + $0x5ac] sm:$0xf] %v7040_v17  ;;  %v3168_v44 = vmul.f32 %v11706_v42, %v3021_v12  ;;  %v3022_v50 = vsel %vm2982_vm9, %v2965_v39, %v2967_v2  ;;  %v5354_v39 = vpop.f32.mrf.mxu1 }
 0x34b   :  { %v3169_v27 = vmul.f32 %v9987_v41, %v3022_v50  ;;  %6000 = vst [vmem:[%s11431_s3 + $0x40] sm:$0xff] %v5241_v46  ;;  %6002 = vst [vmem:[%s11431_s3 + $0x50] sm:$0xff] %v5354_v39 }
 0x34c   :  { %v7010_v22 = vpack.c.bf16 %v3168_v44, %v3167_v7  ;;  %v2969_v61 = vpop.permute.xlu1 %2968  ;;  %v5358_v50 = vpop.f32.mrf.mxu1 }
 0x34d   :  { %v3023_v49 = vsel %vm2982_vm9, %v2967_v2, %v2969_v61  ;;  %v3024_v4 = vsel %vm2982_vm9, %v2969_v61, %v11707_v47  ;;  %v2975_v26 = vpop.permute.xlu0 %2974  ;;  %v7377_v34 = vld [vmem:[#allocation3 + $0x564] ss:$56 sps:$4 sm:$0xff]   ;;  %v7378_v30 = vld [vmem:[#allocation3 + $0x568] ss:$56 sps:$4 sm:$0xff]   ;;  %6008 = vst [vmem:[%s11431_s3 + $0x80] sm:$0xff] %v5358_v50 }
 0x34e   :  { %3380 = vst [vmem:[#allocation3 + $0x4f4] sm:$0xff] %v7010_v22  ;;  %v3170_v33 = vmul.f32 %v9993_v0, %v3023_v49  ;;  %v3171_v45 = vmul.f32 %v9997_v16, %v3024_v4  ;;  %v3026_v37 = vsel %vm2982_vm9, %v11708_v18, %v2975_v26  ;;  %5675 = vmatprep.subr.bf16.mxu0 %v7377_v34  ;;  %v5360_v4 = vpop.f32.mrf.mxu1 }
 0x34f   :  { %5676 = vmatpush2.bf16.msra.mxu0 %v7375_v6  ;;  %v3174_v58 = vmul.f32 %v11705_v52, %v3026_v37  ;;  %v11710_v6 = vld [vmem:[#allocation26_spill] sm:$0xff]  ;;  %6009 = vst [vmem:[%s11431_s3 + $0x88] sm:$0xff] %v5360_v4 }
 0x350   :  { %v7011_v54 = vpack.c.bf16 %v3170_v33, %v3169_v27  ;;  %v7012_v56 = vpack.c.bf16 %v3171_v45, %v3171_v45  ;;  %v2977_v25 = vpop.permute.xlu1 %2976  ;;  %v7381_v33 = vld [vmem:[#allocation3 + $0x4f0] ss:$56 sps:$4 sm:$0xff]  }
 0x351   :  { %v3027_v63 = vsel %vm2982_vm9, %v2975_v26, %v2977_v25  ;;  %v2979_v31 = vpop.permute.xlu0 %2978  ;;  %v7380_v43 = vld [vmem:[#allocation3 + $0x56c] ss:$56 sps:$4 sm:$0xff]  }
 0x352   :  { %3381 = vst [vmem:[#allocation3 + $0x4fc] sm:$0xff] %v7011_v54  ;;  %3382 = vst [vmem:[#allocation3 + $0x504] sm:$0xf] %v7012_v56  ;;  %v3175_v14 = vmul.f32 %v11706_v42, %v3027_v63  ;;  %v3028_v8 = vsel %vm2982_vm9, %v2977_v25, %v2979_v31  ;;  %5788 = vmatprep.subr.bf16.mxu1 %v7380_v43  ;;  %v5362_v54 = vpop.f32.mrf.mxu1 }
 0x353   :  { %5789 = vmatpush2.bf16.msra.mxu1 %v7378_v30  ;;  %v3176_v29 = vmul.f32 %v9987_v41, %v3028_v8  ;;  %6015 = vst [vmem:[%s11431_s3 + $0xb8] sm:$0xff] %v5362_v54  ;;  %v11714_v54 = vld [vmem:[#allocation28_spill] sm:$0xff] }
 0x354   :  { %v7014_v35 = vpack.c.bf16 %v3175_v14, %v3174_v58  ;;  %v2981_v53 = vpop.permute.xlu1 %2980  ;;  %v5364_v43 = vpop.f32.mrf.mxu1 }
 0x355   :  { %v3029_v59 = vsel %vm2982_vm9, %v2979_v31, %v2981_v53  ;;  %v3030_v23 = vsel %vm2982_vm9, %v2981_v53, %v11709_v20  ;;  %v2939_v13 = vpop.permute.xlu0 %2938  ;;  %6016 = vst [vmem:[%s11431_s3 + $0xc0] sm:$0xff] %v5364_v43 }
 0x356   :  { %3384 = vst [vmem:[#allocation3 + $0x52c] sm:$0xff] %v7014_v35  ;;  %v3177_v36 = vmul.f32 %v9993_v0, %v3029_v59  ;;  %v3178_v19 = vmul.f32 %v9997_v16, %v3030_v23  ;;  %v3008_v57 = vsel %vm2982_vm9, %v10083_v55, %v2939_v13  ;;  %v5245_v55 = vpop.f32.mrf.mxu0  ;;  %v5368_v53 = vpop.f32.mrf.mxu1 }
 0x357   :  { %v3153_v7 = vmul.f32 %v11705_v52, %v3008_v57  ;;  %6006 = vst [vmem:[%s11431_s3 + $0x70] sm:$0xff] %v5245_v55  ;;  %6022 = vst [vmem:[%s11431_s3 + $0xf0] sm:$0xff] %v5368_v53  ;;  %v11712_v55 = vld [vmem:[#allocation37_spill] sm:$0xff] }
 0x358   :  { %v7015_v10 = vpack.c.bf16 %v3177_v36, %v3176_v29  ;;  %v7016_v60 = vpack.c.bf16 %v3178_v19, %v3178_v19  ;;  %v2941_v17 = vpop.permute.xlu1 %2940  ;;  %v5247_v61 = vpop.f32.mrf.mxu0 }
 0x359   :  { %v3009_v12 = vsel %vm2982_vm9, %v2939_v13, %v2941_v17  ;;  %v2943_v2 = vpop.permute.xlu0 %2942  ;;  %6007 = vst [vmem:[%s11431_s3 + $0x78] sm:$0xff] %v5247_v61 }
 0x35a   :  { %3385 = vst [vmem:[#allocation3 + $0x534] sm:$0xff] %v7015_v10  ;;  %3386 = vst [vmem:[#allocation3 + $0x53c] sm:$0xf] %v7016_v60  ;;  %v3154_v44 = vmul.f32 %v11706_v42, %v3009_v12  ;;  %v3010_v22 = vsel %vm2982_vm9, %v2941_v17, %v2943_v2  ;;  %v5249_v18 = vpop.f32.mrf.mxu0  ;;  %v11711_v12 = vld [vmem:[#allocation36_spill] sm:$0xff] }
 0x35b   :  { %v3155_v37 = vmul.f32 %v9987_v41, %v3010_v22  ;;  %6013 = vst [vmem:[%s11431_s3 + $0xa8] sm:$0xff] %v5249_v18 }
 0x35c   :  { %v7002_v49 = vpack.c.bf16 %v3154_v44, %v3153_v7  ;;  %v2945_v47 = vpop.permute.xlu1 %2944  ;;  %v5251_v25 = vpop.f32.mrf.mxu0 }
 0x35d   :  { %v3011_v26 = vsel %vm2982_vm9, %v2943_v2, %v2945_v47  ;;  %v3012_v34 = vsel %vm2982_vm9, %v2945_v47, %v11710_v6  ;;  %v2951_v27 = vpop.permute.xlu0 %2950  ;;  %v7383_v45 = vld [vmem:[#allocation3 + $0x4f4] ss:$56 sps:$4 sm:$0xff]   ;;  %6014 = vst [vmem:[%s11431_s3 + $0xb0] sm:$0xff] %v5251_v25  ;;  %v7384_v8 = vld [vmem:[#allocation3 + $0x4f8] ss:$56 sps:$4 sm:$0xff]  }
 0x35e   :  { %3372 = vst [vmem:[#allocation3 + $0x484] sm:$0xff] %v7002_v49  ;;  %v3156_v48 = vmul.f32 %v9993_v0, %v3011_v26  ;;  %v3157_v40 = vmul.f32 %v9997_v16, %v3012_v34  ;;  %v3014_v56 = vsel %vm2982_vm9, %v10095_v15, %v2951_v27  ;;  %5677 = vmatprep.subr.bf16.mxu0 %v7383_v45  ;;  %v5255_v28 = vpop.f32.mrf.mxu0  ;;  %v11713_v26 = vld [vmem:[#allocation23_spill] sm:$0xff] }
 0x35f   :  { %5678 = vmatpush2.bf16.msra.mxu0 %v7381_v33  ;;  %v3160_v1 = vmul.f32 %v11705_v52, %v3014_v56  ;;  %6020 = vst [vmem:[%s11431_s3 + $0xe0] sm:$0xff] %v5255_v28  ;;  %v5370_v52 = vpop.f32.mrf.mxu1 }
 0x360   :  { %v7003_v63 = vpack.c.bf16 %v3156_v48, %v3155_v37  ;;  %v7004_v31 = vpack.c.bf16 %v3157_v40, %v3157_v40  ;;  %v2953_v30 = vpop.permute.xlu1 %2952  ;;  %v5257_v20 = vpop.f32.mrf.mxu0  ;;  %6023 = vst [vmem:[%s11431_s3 + $0xf8] sm:$0xff] %v5370_v52 }
 0x361   :  { %v3015_v58 = vsel %vm2982_vm9, %v2951_v27, %v2953_v30  ;;  %v2955_v14 = vpop.permute.xlu0 %2954  ;;  %v7386_v15 = vld [vmem:[#allocation3 + $0x4fc] ss:$56 sps:$4 sm:$0xff]   ;;  %6021 = vst [vmem:[%s11431_s3 + $0xe8] sm:$0xff] %v5257_v20  ;;  %v5372_v46 = vpop.f32.mrf.mxu1  ;;  %v7387_v27 = vld [vmem:[#allocation3 + $0x480] ss:$56 sps:$4 sm:$0xff]  }
 0x362   :  { %3373 = vst [vmem:[#allocation3 + $0x48c] sm:$0xff] %v7003_v63  ;;  %3374 = vst [vmem:[#allocation3 + $0x494] sm:$0xf] %v7004_v31  ;;  %v3161_v35 = vmul.f32 %v11706_v42, %v3015_v58  ;;  %v3016_v59 = vsel %vm2982_vm9, %v2953_v30, %v2955_v14  ;;  %5790 = vmatprep.subr.bf16.mxu1 %v7386_v15  ;;  %v5259_v36 = vpop.f32.mrf.mxu0 }
 0x363   :  { %5791 = vmatpush2.bf16.msra.mxu1 %v7384_v8  ;;  %v3162_v19 = vmul.f32 %v9987_v41, %v3016_v59  ;;  %6027 = vst [vmem:[%s11431_s3 + $0x118] sm:$0xff] %v5259_v36  ;;  %6029 = vst [vmem:[%s11431_s3 + $0x128] sm:$0xff] %v5372_v46 }
 0x364   :  { %v7006_v23 = vpack.c.bf16 %v3161_v35, %v3160_v1  ;;  %v2957_v13 = vpop.permute.xlu1 %2956  ;;  %v5261_v10 = vpop.f32.mrf.mxu0 }
 0x365   :  { %v3017_v42 = vsel %vm2982_vm9, %v2955_v14, %v2957_v13  ;;  %v3018_v38 = vsel %vm2982_vm9, %v2957_v13, %v10051_v9  ;;  %v2438_v29 = vpop.permute.xlu0 %2437  ;;  %6028 = vst [vmem:[%s11431_s3 + $0x120] sm:$0xff] %v5261_v10 }
 0x366   :  { %3376 = vst [vmem:[#allocation3 + $0x4bc] sm:$0xff] %v7006_v23  ;;  %v3163_v51 = vmul.f32 %v9993_v0, %v3017_v42  ;;  %v3164_v57 = vmul.f32 %v9997_v16, %v3018_v38  ;;  %v2495_v9 = vsel %vm2457_vm10, %v10151_v3, %v2438_v29  ;;  %v5374_v0 = vpop.f32.mrf.mxu1  ;;  %v5265_v3 = vpop.f32.mrf.mxu0  ;;  %v11715_v38 = vld [vmem:[#allocation21_spill] sm:$0xff] }
 0x367   :  { %6030 = vst [vmem:[%s11431_s3 + $0x130] sm:$0xff] %v5374_v0  ;;  %v2642_v2 = vmul.f32 %v11711_v12, %v2495_v9  ;;  %6034 = vst [vmem:[%s11431_s3 + $0x150] sm:$0xff] %v5265_v3 }
 0x368   :  { %v7007_v60 = vpack.c.bf16 %v3163_v51, %v3162_v19  ;;  %v7008_v17 = vpack.c.bf16 %v3164_v57, %v3164_v57  ;;  %v2440_v41 = vpop.permute.xlu1 %2439  ;;  %v5378_v44 = vpop.f32.mrf.mxu1 }
 0x369   :  { %v2496_v16 = vsel %vm2457_vm10, %v2438_v29, %v2440_v41  ;;  %v2442_v39 = vpop.permute.xlu0 %2441  ;;  %6036 = vst [vmem:[%s11431_s3 + $0x160] sm:$0xff] %v5378_v44  ;;  %v5267_v22 = vpop.f32.mrf.mxu0 }
 0x36a   :  { %3377 = vst [vmem:[#allocation3 + $0x4c4] sm:$0xff] %v7007_v60  ;;  %3378 = vst [vmem:[#allocation3 + $0x4cc] sm:$0xf] %v7008_v17  ;;  %v2643_v7 = vmul.f32 %v11712_v55, %v2496_v16  ;;  %v2497_v50 = vsel %vm2457_vm10, %v2440_v41, %v2442_v39  ;;  %v5380_v47 = vpop.f32.mrf.mxu1 }
 0x36b   :  { %6035 = vst [vmem:[%s11431_s3 + $0x158] sm:$0xff] %v5267_v22  ;;  %6037 = vst [vmem:[%s11431_s3 + $0x168] sm:$0xff] %v5380_v47  ;;  %v5269_v45 = vpop.f32.mrf.mxu0  ;;  %v2644_v18 = vmul.f32 %v10111_v21, %v2497_v50 }
 0x36c   :  { %v6978_v61 = vpack.c.bf16 %v2643_v7, %v2642_v2  ;;  %v2444_v49 = vpop.permute.xlu1 %2443  ;;  %6041 = vst [vmem:[%s11431_s3 + $0x188] sm:$0xff] %v5269_v45  ;;  %v5382_v40 = vpop.f32.mrf.mxu1 }
 0x36d   :  { %v2498_v4 = vsel %vm2457_vm10, %v2442_v39, %v2444_v49  ;;  %v2499_v6 = vsel %vm2457_vm10, %v2444_v49, %v11713_v26  ;;  %v2450_v34 = vpop.permute.xlu0 %2449  ;;  %v7389_v33 = vld [vmem:[#allocation3 + $0x484] ss:$56 sps:$4 sm:$0xff]   ;;  %6043 = vst [vmem:[%s11431_s3 + $0x198] sm:$0xff] %v5382_v40  ;;  %v5271_v25 = vpop.f32.mrf.mxu0  ;;  %v7390_v8 = vld [vmem:[#allocation3 + $0x488] ss:$56 sps:$4 sm:$0xff]  }
 0x36e   :  { %2855 = vst [vmem:[#allocation3 + $0x414] sm:$0xff] %v6978_v61  ;;  %v2645_v37 = vmul.f32 %v10117_v11, %v2498_v4  ;;  %v2646_v48 = vmul.f32 %v10121_v5, %v2499_v6  ;;  %v2501_v56 = vsel %vm2457_vm10, %v11714_v54, %v2450_v34  ;;  %5679 = vmatprep.subr.bf16.mxu0 %v7389_v33  ;;  %6042 = vst [vmem:[%s11431_s3 + $0x190] sm:$0xff] %v5271_v25  ;;  %v5384_v43 = vpop.f32.mrf.mxu1  ;;  %v11716_v26 = vld [vmem:[#allocation20_spill] sm:$0xff] }
 0x36f   :  { %5680 = vmatpush2.bf16.msra.mxu0 %v7387_v27  ;;  %6044 = vst [vmem:[%s11431_s3 + $0x1a0] sm:$0xff] %v5384_v43  ;;  %v5275_v28 = vpop.f32.mrf.mxu0  ;;  %v2649_v1 = vmul.f32 %v11711_v12, %v2501_v56  ;;  %v7393_v27 = vld [vmem:[#allocation3 + $0x410] ss:$56 sps:$4 sm:$0xff]  }
 0x370   :  { %v6979_v63 = vpack.c.bf16 %v2645_v37, %v2644_v18  ;;  %v6980_v31 = vpack.c.bf16 %v2646_v48, %v2646_v48  ;;  %v2452_v30 = vpop.permute.xlu1 %2451  ;;  %6048 = vst [vmem:[%s11431_s3 + $0x1c0] sm:$0xff] %v5275_v28  ;;  %v5388_v53 = vpop.f32.mrf.mxu1 }
 0x371   :  { %v2502_v58 = vsel %vm2457_vm10, %v2450_v34, %v2452_v30  ;;  %v2454_v14 = vpop.permute.xlu0 %2453  ;;  %v7392_v15 = vld [vmem:[#allocation3 + $0x48c] ss:$56 sps:$4 sm:$0xff]   ;;  %6050 = vst [vmem:[%s11431_s3 + $0x1d0] sm:$0xff] %v5388_v53  ;;  %v5277_v20 = vpop.f32.mrf.mxu0 }
 0x372   :  { %2856 = vst [vmem:[#allocation3 + $0x41c] sm:$0xff] %v6979_v63  ;;  %2857 = vst [vmem:[#allocation3 + $0x424] sm:$0xf] %v6980_v31  ;;  %v2650_v35 = vmul.f32 %v11712_v55, %v2502_v58  ;;  %v2503_v59 = vsel %vm2457_vm10, %v2452_v30, %v2454_v14  ;;  %5792 = vmatprep.subr.bf16.mxu1 %v7392_v15  ;;  %v5390_v52 = vpop.f32.mrf.mxu1 }
 0x373   :  { %5793 = vmatpush2.bf16.msra.mxu1 %v7390_v8  ;;  %6049 = vst [vmem:[%s11431_s3 + $0x1c8] sm:$0xff] %v5277_v20  ;;  %6051 = vst [vmem:[%s11431_s3 + $0x1d8] sm:$0xff] %v5390_v52  ;;  %v5279_v19 = vpop.f32.mrf.mxu0  ;;  %v2651_v51 = vmul.f32 %v10111_v21, %v2503_v59 }
 0x374   :  { %v6982_v23 = vpack.c.bf16 %v2650_v35, %v2649_v1  ;;  %v2456_v13 = vpop.permute.xlu1 %2455  ;;  %6055 = vst [vmem:[%s11431_s3 + $0x1f8] sm:$0xff] %v5279_v19  ;;  %v5392_v9 = vpop.f32.mrf.mxu1 }
 0x375   :  { %v2504_v42 = vsel %vm2457_vm10, %v2454_v14, %v2456_v13  ;;  %v2505_v29 = vsel %vm2457_vm10, %v2456_v13, %v11715_v38  ;;  %v2414_v36 = vpop.permute.xlu0 %2413  ;;  %6057 = vst [vmem:[%s11431_s3 + $0x208] sm:$0xff] %v5392_v9  ;;  %v5281_v60 = vpop.f32.mrf.mxu0 }
 0x376   :  { %2859 = vst [vmem:[#allocation3 + $0x44c] sm:$0xff] %v6982_v23  ;;  %v2652_v57 = vmul.f32 %v10117_v11, %v2504_v42  ;;  %v2653_v46 = vmul.f32 %v10121_v5, %v2505_v29  ;;  %v2483_v10 = vsel %vm2457_vm10, %v10207_v32, %v2414_v36  ;;  %6056 = vst [vmem:[%s11431_s3 + $0x200] sm:$0xff] %v5281_v60  ;;  %v5394_v16 = vpop.f32.mrf.mxu1 }
 0x377   :  { %6058 = vst [vmem:[%s11431_s3 + $0x210] sm:$0xff] %v5394_v16  ;;  %v5285_v32 = vpop.f32.mrf.mxu0  ;;  %v2628_v2 = vmul.f32 %v11711_v12, %v2483_v10 }
 0x378   :  { %v6983_v17 = vpack.c.bf16 %v2652_v57, %v2651_v51  ;;  %v6984_v41 = vpack.c.bf16 %v2653_v46, %v2653_v46  ;;  %v2416_v0 = vpop.permute.xlu1 %2415  ;;  %6062 = vst [vmem:[%s11431_s3 + $0x230] sm:$0xff] %v5285_v32  ;;  %v5398_v44 = vpop.f32.mrf.mxu1  ;;  %v7399_v46 = vld [vmem:[#allocation3 + $0x3a0] ss:$56 sps:$4 sm:$0xff]  }
 0x379   :  { %v2484_v39 = vsel %vm2457_vm10, %v2414_v36, %v2416_v0  ;;  %v2418_v3 = vpop.permute.xlu0 %2417  ;;  %6064 = vst [vmem:[%s11431_s3 + $0x240] sm:$0xff] %v5398_v44  ;;  %v5287_v22 = vpop.f32.mrf.mxu0  ;;  %v10774_v32 = vld [vmem:[%s11430_s1] ss:$8 sps:$4 sm:$0xff]   ;;  %v10780_v44 = vld [vmem:[%s11430_s1 + $0x14] ss:$8 sps:$4 sm:$0xff]  }
 0x37a   :  { %2860 = vst [vmem:[#allocation3 + $0x454] sm:$0xff] %v6983_v17  ;;  %2861 = vst [vmem:[#allocation3 + $0x45c] sm:$0xf] %v6984_v41  ;;  %v2629_v7 = vmul.f32 %v11712_v55, %v2484_v39  ;;  %v2485_v50 = vsel %vm2457_vm10, %v2416_v0, %v2418_v3  ;;  %v5400_v47 = vpop.f32.mrf.mxu1  ;;  %v7404_v17 = vld [vmem:[#allocation3 + $0x344] ss:$56 sps:$4 sm:$0xff]  }
 0x37b   :  { %6063 = vst [vmem:[%s11431_s3 + $0x238] sm:$0xff] %v5287_v22  ;;  %6065 = vst [vmem:[%s11431_s3 + $0x248] sm:$0xff] %v5400_v47  ;;  %v5289_v45 = vpop.f32.mrf.mxu0  ;;  %v2630_v18 = vmul.f32 %v10111_v21, %v2485_v50  ;;  %v7413_v50 = vld [vmem:[#allocation3 + $0x264] ss:$56 sps:$4 sm:$0xff]   ;;  %v7411_v22 = vld [vmem:[#allocation3 + $0x260] ss:$56 sps:$4 sm:$0xff]  }
 0x37c   :  { %v6970_v61 = vpack.c.bf16 %v2629_v7, %v2628_v2  ;;  %v2420_v49 = vpop.permute.xlu1 %2419  ;;  %6069 = vst [vmem:[%s11431_s3 + $0x268] sm:$0xff] %v5289_v45  ;;  %v5402_v40 = vpop.f32.mrf.mxu1  ;;  %v7410_v2 = vld [vmem:[#allocation3 + $0x2d4] ss:$56 sps:$4 sm:$0xff]   ;;  %v7408_v7 = vld [vmem:[#allocation3 + $0x2d0] ss:$56 sps:$4 sm:$0xff]  }
 0x37d   :  { %v2486_v4 = vsel %vm2457_vm10, %v2418_v3, %v2420_v49  ;;  %v2487_v6 = vsel %vm2457_vm10, %v2420_v49, %v11716_v26  ;;  %v2426_v34 = vpop.permute.xlu0 %2425  ;;  %v7395_v33 = vld [vmem:[#allocation3 + $0x414] ss:$56 sps:$4 sm:$0xff]   ;;  %6071 = vst [vmem:[%s11431_s3 + $0x278] sm:$0xff] %v5402_v40  ;;  %v5291_v56 = vpop.f32.mrf.mxu0  ;;  %v7396_v14 = vld [vmem:[#allocation3 + $0x418] ss:$56 sps:$4 sm:$0xff]  }
 0x37e   :  { %2847 = vst [vmem:[#allocation3 + $0x3a4] sm:$0xff] %v6970_v61  ;;  %v2631_v37 = vmul.f32 %v10117_v11, %v2486_v4  ;;  %v2632_v48 = vmul.f32 %v10121_v5, %v2487_v6  ;;  %v2489_v54 = vsel %vm2457_vm10, %v10219_v62, %v2426_v34  ;;  %5681 = vmatprep.subr.bf16.mxu0 %v7395_v33  ;;  %6070 = vst [vmem:[%s11431_s3 + $0x270] sm:$0xff] %v5291_v56  ;;  %v5404_v30 = vpop.f32.mrf.mxu1  ;;  %v7402_v3 = vld [vmem:[#allocation3 + $0x340] ss:$56 sps:$4 sm:$0xff]   ;;  %v7416_v49 = vld [vmem:[#allocation3 + $0x1f4] ss:$56 sps:$4 sm:$0xff]  }
 0x37f   :  { %5682 = vmatpush2.bf16.msra.mxu0 %v7393_v27  ;;  %6072 = vst [vmem:[%s11431_s3 + $0x280] sm:$0xff] %v5404_v30  ;;  %v5295_v8 = vpop.f32.mrf.mxu0  ;;  %v2635_v15 = vmul.f32 %v11711_v12, %v2489_v54  ;;  %v10790_v61 = vld [vmem:[%s11430_s1 + $0x10] ss:$8 sps:$4 sm:$0xff]   ;;  %v10796_v4 = vld [vmem:[%s11430_s1 + $0x24] ss:$8 sps:$4 sm:$0xff]  }
 0x380   :  { %v6971_v25 = vpack.c.bf16 %v2631_v37, %v2630_v18  ;;  %v6972_v63 = vpack.c.bf16 %v2632_v48, %v2632_v48  ;;  %v2428_v31 = vpop.permute.xlu1 %2427  ;;  %6076 = vst [vmem:[%s11431_s3 + $0x2a0] sm:$0xff] %v5295_v8  ;;  %v5408_v1 = vpop.f32.mrf.mxu1  ;;  %v7414_v47 = vld [vmem:[#allocation3 + $0x1f0] ss:$56 sps:$4 sm:$0xff]   ;;  %v7419_v26 = vld [vmem:[#allocation3 + $0x184] ss:$56 sps:$4 sm:$0xff]  }
 0x381   :  { %v2490_v43 = vsel %vm2457_vm10, %v2426_v34, %v2428_v31  ;;  %v2430_v58 = vpop.permute.xlu0 %2429  ;;  %v7398_v62 = vld [vmem:[#allocation3 + $0x41c] ss:$56 sps:$4 sm:$0xff]   ;;  %6078 = vst [vmem:[%s11431_s3 + $0x2b0] sm:$0xff] %v5408_v1  ;;  %v5297_v53 = vpop.f32.mrf.mxu0  ;;  %v7417_v6 = vld [vmem:[#allocation3 + $0x180] ss:$56 sps:$4 sm:$0xff]  }
 0x382   :  { %2848 = vst [vmem:[#allocation3 + $0x3ac] sm:$0xff] %v6971_v25  ;;  %2849 = vst [vmem:[#allocation3 + $0x3b4] sm:$0xf] %v6972_v63  ;;  %v2636_v28 = vmul.f32 %v11712_v55, %v2490_v43  ;;  %v2491_v35 = vsel %vm2457_vm10, %v2428_v31, %v2430_v58  ;;  %5794 = vmatprep.subr.bf16.mxu1 %v7398_v62  ;;  %v5410_v12 = vpop.f32.mrf.mxu1  ;;  %v10806_v34 = vld [vmem:[%s11430_s1 + $0x20] ss:$8 sps:$4 sm:$0xff]  }
 0x383   :  { %5795 = vmatpush2.bf16.msra.mxu1 %v7396_v14  ;;  %6077 = vst [vmem:[%s11431_s3 + $0x2a8] sm:$0xff] %v5297_v53  ;;  %6079 = vst [vmem:[%s11431_s3 + $0x2b8] sm:$0xff] %v5410_v12  ;;  %v5299_v13 = vpop.f32.mrf.mxu0  ;;  %v2637_v52 = vmul.f32 %v10111_v21, %v2491_v35  ;;  %v7422_v27 = vld [vmem:[#allocation3 + $0x114] ss:$56 sps:$4 sm:$0xff]   ;;  %v7420_v33 = vld [vmem:[#allocation3 + $0x110] ss:$56 sps:$4 sm:$0xff]  }
 0x384   :  { %v6974_v59 = vpack.c.bf16 %v2636_v28, %v2635_v15  ;;  %v2432_v20 = vpop.permute.xlu1 %2431  ;;  %6083 = vst [vmem:[%s11431_s3 + $0x2d8] sm:$0xff] %v5299_v13  ;;  %v5412_v29 = vpop.f32.mrf.mxu1  ;;  %v10812_v45 = vld [vmem:[%s11430_s1 + $0x34] ss:$8 sps:$4 sm:$0xff]   ;;  %v7423_v37 = vld [vmem:[#allocation3 + $0xa0] ss:$56 sps:$4 sm:$0xff]  }
 0x385   :  { %v2492_v55 = vsel %vm2457_vm10, %v2430_v58, %v2432_v20  ;;  %v2493_v23 = vsel %vm2457_vm10, %v2432_v20, %v10175_v24  ;;  %6085 = vst [vmem:[%s11431_s3 + $0x2e8] sm:$0xff] %v5412_v29  ;;  %v5301_v24 = vpop.f32.mrf.mxu0  ;;  %v7425_v18 = vld [vmem:[#allocation3 + $0xa4] ss:$56 sps:$4 sm:$0xff]   ;;  %v10822_v48 = vld [vmem:[%s11430_s1 + $0x30] ss:$8 sps:$4 sm:$0xff]  }
 0x386   :  { %2851 = vst [vmem:[#allocation3 + $0x3dc] sm:$0xff] %v6974_v59  ;;  %v2638_v42 = vmul.f32 %v10117_v11, %v2492_v55  ;;  %v2639_v38 = vmul.f32 %v10121_v5, %v2493_v23  ;;  %6084 = vst [vmem:[%s11431_s3 + $0x2e0] sm:$0xff] %v5301_v24  ;;  %v5414_v21 = vpop.f32.mrf.mxu1  ;;  %v7428_v40 = vld [vmem:[#allocation3 + $0x34] ss:$56 sps:$4 sm:$0xff]   ;;  %v7426_v54 = vld [vmem:[#allocation3 + $0x30] ss:$56 sps:$4 sm:$0xff]  }
 0x387   :  { %6086 = vst [vmem:[%s11431_s3 + $0x2f0] sm:$0xff] %v5414_v21  ;;  %v5305_v11 = vpop.f32.mrf.mxu0  ;;  %v10828_v56 = vld [vmem:[%s11430_s1 + $0x44] ss:$8 sps:$4 sm:$0xff]   ;;  %v7429_v63 = vld [vmem:[#allocation3 + $0x5e0] ss:$56 sps:$4 sm:$0xff]  }
 0x388   :  { %v6975_v36 = vpack.c.bf16 %v2638_v42, %v2637_v52  ;;  %v6976_v19 = vpack.c.bf16 %v2639_v38, %v2639_v38  ;;  %6090 = vst [vmem:[%s11431_s3 + $0x310] sm:$0xff] %v5305_v11  ;;  %v5418_v5 = vpop.f32.mrf.mxu1  ;;  %v7431_v25 = vld [vmem:[#allocation3 + $0x5e4] ss:$56 sps:$4 sm:$0xff]   ;;  %v10838_v31 = vld [vmem:[%s11430_s1 + $0x40] ss:$8 sps:$4 sm:$0xff]  }
 0x389   :  { %6092 = vst [vmem:[%s11431_s3 + $0x320] sm:$0xff] %v5418_v5  ;;  %v5307_v51 = vpop.f32.mrf.mxu0  ;;  %v7434_v30 = vld [vmem:[#allocation3 + $0x574] ss:$56 sps:$4 sm:$0xff]   ;;  %v7432_v43 = vld [vmem:[#allocation3 + $0x570] ss:$56 sps:$4 sm:$0xff]  }
 0x38a   :  { %2852 = vst [vmem:[#allocation3 + $0x3e4] sm:$0xff] %v6975_v36  ;;  %2853 = vst [vmem:[#allocation3 + $0x3ec] sm:$0xf] %v6976_v19  ;;  %v5420_v57 = vpop.f32.mrf.mxu1  ;;  %v10844_v58 = vld [vmem:[%s11430_s1 + $0x54] ss:$8 sps:$4 sm:$0xff]  }
 0x38b   :  { %6091 = vst [vmem:[%s11431_s3 + $0x318] sm:$0xff] %v5307_v51  ;;  %6093 = vst [vmem:[%s11431_s3 + $0x328] sm:$0xff] %v5420_v57  ;;  %v5309_v10 = vpop.f32.mrf.mxu0  ;;  %v7437_v14 = vld [vmem:[#allocation3 + $0x504] ss:$56 sps:$4 sm:$0xff]   ;;  %v7435_v8 = vld [vmem:[#allocation3 + $0x500] ss:$56 sps:$4 sm:$0xff]  }
 0x38c   :  { %6097 = vst [vmem:[%s11431_s3 + $0x348] sm:$0xff] %v5309_v10  ;;  %v5422_v60 = vpop.f32.mrf.mxu1  ;;  %v10857_v28 = vld [vmem:[%s11430_s1 + $0x50] ss:$8 sps:$4 sm:$0xff]   ;;  %v7440_v1 = vld [vmem:[#allocation3 + $0x494] ss:$56 sps:$4 sm:$0xff]  }
 0x38d   :  { %v7401_v9 = vld [vmem:[#allocation3 + $0x3a4] ss:$56 sps:$4 sm:$0xff]   ;;  %6099 = vst [vmem:[%s11431_s3 + $0x358] sm:$0xff] %v5422_v60  ;;  %v5311_v41 = vpop.f32.mrf.mxu0  ;;  %v7405_v16 = vld [vmem:[#allocation3 + $0x3a8] ss:$56 sps:$4 sm:$0xff]  }
 0x38e   :  { %5683 = vmatprep.subr.bf16.mxu0 %v7401_v9  ;;  %6098 = vst [vmem:[%s11431_s3 + $0x350] sm:$0xff] %v5311_v41  ;;  %v5424_v0 = vpop.f32.mrf.mxu1  ;;  %v7438_v53 = vld [vmem:[#allocation3 + $0x490] ss:$56 sps:$4 sm:$0xff]   ;;  %v10869_v59 = vld [vmem:[%s11430_s1 + $0x64] ss:$8 sps:$4 sm:$0xff]  }
 0x38f   :  { %5684 = vmatpush2.bf16.msra.mxu0 %v7399_v46  ;;  %6100 = vst [vmem:[%s11431_s3 + $0x360] sm:$0xff] %v5424_v0  ;;  %v7443_v12 = vld [vmem:[#allocation3 + $0x424] ss:$56 sps:$4 sm:$0xff]   ;;  %v7441_v23 = vld [vmem:[#allocation3 + $0x420] ss:$56 sps:$4 sm:$0xff]  }
 0x390   :  { %5879 = vmatprep.subr.bf16.mxu0 %v7404_v17  ;;  %v10885_v52 = vld [vmem:[%s11430_s1 + $0x60] ss:$8 sps:$4 sm:$0xff]   ;;  %v10897_v24 = vld [vmem:[%s11430_s1 + $0x74] ss:$8 sps:$4 sm:$0xff]   ;;  %v10914_v5 = vld [vmem:[%s11430_s1 + $0x70] ss:$8 sps:$4 sm:$0xff]  }
 0x391   :  { %v7407_v39 = vld [vmem:[#allocation3 + $0x3ac] ss:$56 sps:$4 sm:$0xff]   ;;  %v7444_v29 = vld [vmem:[#allocation3 + $0x3b0] ss:$56 sps:$4 sm:$0xff]  }
 0x392   :  { %5686 = vmatmul.mubr.bf16.vlgmr.msra.gmra.mxu0 %v10774_v32  ;;  %5796 = vmatprep.subr.bf16.mxu1 %v7407_v39  ;;  %v7446_v42 = vld [vmem:[#allocation3 + $0x3b4] ss:$56 sps:$4 sm:$0xff]  }
 0x393   :  { %5797 = vmatpush2.bf16.msra.mxu1 %v7405_v16  ;;  %5880 = vmatpush1.bf16.msra.mxu0 %v7402_v3  ;;  %v7551_v51 = vld [vmem:[%s11430_s1 + $0x4] ss:$8 sps:$4 sm:$0xff]  }
 0x394   :  { %7049 = vmatprep.subr.bf16.mxu1 %v7404_v17  ;;  %5881 = vmatprep.subr.bf16.mxu0 %v7410_v2 }
 0x395   :  { %6690 = vmatprep.mubr.msk.bf16.mxu0 %vm5176_vm8, %v10780_v44 }
 0x396   :  { %5799 = vmatmul.mubr.bf16.vlgmr.msra.gmra.mxu1 %v10774_v32 }
 0x397   :  { %7063 = vmatpush1.bf16.msra.mxu1 %v7402_v3  ;;  %5882 = vmatpush1.bf16.msra.mxu0 %v7408_v7 }
 0x398   :  { %7050 = vmatprep.subr.bf16.mxu1 %v7410_v2  ;;  %5883 = vmatprep.subr.bf16.mxu0 %v7413_v50 }
 0x399   :  { %6698 = vmatprep.mubr.msk.bf16.mxu1 %vm5176_vm8, %v10780_v44 }
 0x39a   :  { %5696 = vmatmul.mubr.bf16.gmra.mxu0 %v10790_v61 }
 0x39b   :  { %7064 = vmatpush1.bf16.msra.mxu1 %v7408_v7  ;;  %5884 = vmatpush1.bf16.msra.mxu0 %v7411_v22 }
 0x39c   :  { %7051 = vmatprep.subr.bf16.mxu1 %v7413_v50  ;;  %5885 = vmatprep.subr.bf16.mxu0 %v7416_v49 }
 0x39d   :  { %6691 = vmatprep.mubr.msk.bf16.mxu0 %vm5176_vm8, %v10796_v4 }
 0x39e   :  { %5809 = vmatmul.mubr.bf16.gmra.mxu1 %v10790_v61 }
 0x39f   :  { %7065 = vmatpush1.bf16.msra.mxu1 %v7411_v22  ;;  %5886 = vmatpush1.bf16.msra.mxu0 %v7414_v47 }
 0x3a0   :  { %7052 = vmatprep.subr.bf16.mxu1 %v7416_v49  ;;  %5887 = vmatprep.subr.bf16.mxu0 %v7419_v26 }
 0x3a1   :  { %6699 = vmatprep.mubr.msk.bf16.mxu1 %vm5176_vm8, %v10796_v4 }
 0x3a2   :  { %5706 = vmatmul.mubr.bf16.gmra.mxu0 %v10806_v34 }
 0x3a3   :  { %7066 = vmatpush1.bf16.msra.mxu1 %v7414_v47  ;;  %5888 = vmatpush1.bf16.msra.mxu0 %v7417_v6 }
 0x3a4   :  { %7053 = vmatprep.subr.bf16.mxu1 %v7419_v26  ;;  %5889 = vmatprep.subr.bf16.mxu0 %v7422_v27 }
 0x3a5   :  { %6692 = vmatprep.mubr.msk.bf16.mxu0 %vm5176_vm8, %v10812_v45 }
 0x3a6   :  { %5819 = vmatmul.mubr.bf16.gmra.mxu1 %v10806_v34 }
 0x3a7   :  { %7067 = vmatpush1.bf16.msra.mxu1 %v7417_v6  ;;  %5890 = vmatpush1.bf16.msra.mxu0 %v7420_v33 }
 0x3a8   :  { %7054 = vmatprep.subr.bf16.mxu1 %v7422_v27  ;;  %5891 = vmatprep.subr.bf16.mxu0 %v7425_v18 }
 0x3a9   :  { %6700 = vmatprep.mubr.msk.bf16.mxu1 %vm5176_vm8, %v10812_v45 }
 0x3aa   :  { %5716 = vmatmul.mubr.bf16.gmra.mxu0 %v10822_v48 }
 0x3ab   :  { %7068 = vmatpush1.bf16.msra.mxu1 %v7420_v33  ;;  %5892 = vmatpush1.bf16.msra.mxu0 %v7423_v37 }
 0x3ac   :  { %7055 = vmatprep.subr.bf16.mxu1 %v7425_v18  ;;  %5893 = vmatprep.subr.bf16.mxu0 %v7428_v40 }
 0x3ad   :  { %6693 = vmatprep.mubr.msk.bf16.mxu0 %vm5176_vm8, %v10828_v56 }
 0x3ae   :  { %5829 = vmatmul.mubr.bf16.gmra.mxu1 %v10822_v48 }
 0x3af   :  { %7069 = vmatpush1.bf16.msra.mxu1 %v7423_v37  ;;  %5894 = vmatpush1.bf16.msra.mxu0 %v7426_v54 }
 0x3b0   :  { %7056 = vmatprep.subr.bf16.mxu1 %v7428_v40  ;;  %5899 = vmatprep.subr.bf16.mxu0 %v7431_v25 }
 0x3b1   :  { %6701 = vmatprep.mubr.msk.bf16.mxu1 %vm5176_vm8, %v10828_v56 }
 0x3b2   :  { %5726 = vmatmul.mubr.bf16.gmra.mxu0 %v10838_v31 }
 0x3b3   :  { %7070 = vmatpush1.bf16.msra.mxu1 %v7426_v54  ;;  %5900 = vmatpush2.bf16.msra.mxu0 %v7429_v63 }
 0x3b4   :  { %7057 = vmatprep.subr.bf16.mxu1 %v7431_v25  ;;  %5901 = vmatprep.subr.bf16.mxu0 %v7434_v30 }
 0x3b5   :  { %6694 = vmatprep.mubr.msk.bf16.mxu0 %vm5176_vm8, %v10844_v58 }
 0x3b6   :  { %5839 = vmatmul.mubr.bf16.gmra.mxu1 %v10838_v31  ;;  %v5461_v62 = vpop.f32.mrf.mxu0 }
 0x3b7   :  { %7071 = vmatpush2.bf16.msra.mxu1 %v7429_v63  ;;  %5902 = vmatpush2.bf16.msra.mxu0 %v7432_v43  ;;  %5996 = vst [vmem:[%s11431_s3 + $0x20] sm:$0xff] %v5461_v62 }
 0x3b8   :  { %7058 = vmatprep.subr.bf16.mxu1 %v7434_v30  ;;  %5903 = vmatprep.subr.bf16.mxu0 %v7437_v14  ;;  %v5463_v15 = vpop.f32.mrf.mxu0 }
 0x3b9   :  { %6702 = vmatprep.mubr.msk.bf16.mxu1 %vm5176_vm8, %v10844_v58  ;;  %5997 = vst [vmem:[%s11431_s3 + $0x28] sm:$0xff] %v5463_v15 }
 0x3ba   :  { %5736 = vmatmul.mubr.bf16.gmra.mxu0 %v10857_v28  ;;  %v5465_v35 = vpop.f32.mrf.mxu0 }
 0x3bb   :  { %7072 = vmatpush2.bf16.msra.mxu1 %v7432_v43  ;;  %5904 = vmatpush2.bf16.msra.mxu0 %v7435_v8  ;;  %6003 = vst [vmem:[%s11431_s3 + $0x58] sm:$0xff] %v5465_v35 }
 0x3bc   :  { %7059 = vmatprep.subr.bf16.mxu1 %v7437_v14  ;;  %5905 = vmatprep.subr.bf16.mxu0 %v7440_v1  ;;  %v5467_v20 = vpop.f32.mrf.mxu0 }
 0x3bd   :  { %6695 = vmatprep.mubr.msk.bf16.mxu0 %vm5176_vm8, %v10869_v59  ;;  %6004 = vst [vmem:[%s11431_s3 + $0x60] sm:$0xff] %v5467_v20 }
 0x3be   :  { %5849 = vmatmul.mubr.bf16.gmra.mxu1 %v10857_v28 }
 0x3bf   :  { %7073 = vmatpush2.bf16.msra.mxu1 %v7435_v8  ;;  %5906 = vmatpush2.bf16.msra.mxu0 %v7438_v53 }
 0x3c0   :  { %v5471_v55 = vpop.f32.mrf.mxu0  ;;  %7060 = vmatprep.subr.bf16.mxu1 %v7440_v1  ;;  %5907 = vmatprep.subr.bf16.mxu0 %v7443_v12 }
 0x3c1   :  { %6010 = vst [vmem:[%s11431_s3 + $0x90] sm:$0xff] %v5471_v55  ;;  %6703 = vmatprep.mubr.msk.bf16.mxu1 %vm5176_vm8, %v10869_v59 }
 0x3c2   :  { %v5473_v13 = vpop.f32.mrf.mxu0  ;;  %5746 = vmatmul.mubr.bf16.gmra.mxu0 %v10885_v52 }
 0x3c3   :  { %6011 = vst [vmem:[%s11431_s3 + $0x98] sm:$0xff] %v5473_v13  ;;  %7074 = vmatpush2.bf16.msra.mxu1 %v7438_v53  ;;  %5908 = vmatpush2.bf16.msra.mxu0 %v7441_v23 }
 0x3c4   :  { %v5475_v38 = vpop.f32.mrf.mxu0  ;;  %7061 = vmatprep.subr.bf16.mxu1 %v7443_v12  ;;  %5909 = vmatprep.subr.bf16.mxu0 %v7446_v42 }
 0x3c5   :  { %6017 = vst [vmem:[%s11431_s3 + $0xc8] sm:$0xff] %v5475_v38  ;;  %6696 = vmatprep.mubr.msk.bf16.mxu0 %vm5176_vm8, %v10897_v24 }
 0x3c6   :  { %v5477_v36 = vpop.f32.mrf.mxu0  ;;  %5859 = vmatmul.mubr.bf16.gmra.mxu1 %v10885_v52 }
 0x3c7   :  { %6018 = vst [vmem:[%s11431_s3 + $0xd0] sm:$0xff] %v5477_v36  ;;  %7075 = vmatpush2.bf16.msra.mxu1 %v7441_v23  ;;  %5910 = vmatpush2.bf16.msra.mxu0 %v7444_v29 }
 0x3c8   :  { %v5574_v19 = vpop.f32.mrf.mxu1  ;;  %7062 = vmatprep.subr.bf16.mxu1 %v7446_v42  ;;  %6704 = vmatprep.mubr.msk.bf16.mxu1 %vm5176_vm8, %v10897_v24 }
 0x3c9   :  { %5998 = vst.msk [vmem:[%s11431_s3 + $0x30] sm:$0xff] %vm77_vm0, %v5574_v19 }
 0x3ca   :  { %v5576_v21 = vpop.f32.mrf.mxu1  ;;  %v5481_v11 = vpop.f32.mrf.mxu0  ;;  %5756 = vmatmul.mubr.bf16.gmra.mxu0 %v10914_v5 }
 0x3cb   :  { %6713 = vst [vmem:[%s11431_s3 + $0x380] sm:$0xff] %v5576_v21  ;;  %6024 = vst [vmem:[%s11431_s3 + $0x100] sm:$0xff] %v5481_v11  ;;  %7076 = vmatpush2.bf16.msra.mxu1 %v7444_v29  ;;  %6705 = vmatprep.mubr.msk.bf16.mxu0 %vm5176_vm8, %v7551_v51 }
 0x3cc   :  { %v5578_v57 = vpop.f32.mrf.mxu1  ;;  %v5483_v46 = vpop.f32.mrf.mxu0 }
 0x3cd   :  { %6005 = vst.msk [vmem:[%s11431_s3 + $0x68] sm:$0xff] %vm77_vm0, %v5578_v57  ;;  %6025 = vst [vmem:[%s11431_s3 + $0x108] sm:$0xff] %v5483_v46 }
 0x3ce   :  { %v5580_v9 = vpop.f32.mrf.mxu1  ;;  %v5485_v10 = vpop.f32.mrf.mxu0  ;;  %5869 = vmatmul.mubr.bf16.gmra.mxu1 %v10914_v5 }
 0x3cf   :  { %6720 = vst [vmem:[%s11431_s3 + $0x3b8] sm:$0xff] %v5580_v9  ;;  %6031 = vst [vmem:[%s11431_s3 + $0x138] sm:$0xff] %v5485_v10  ;;  %6709 = vmatprep.mubr.msk.bf16.mxu1 %vm5176_vm8, %v10828_v56 }
 0x3d0   :  { %v5584_v60 = vpop.f32.mrf.mxu1  ;;  %v5487_v17 = vpop.f32.mrf.mxu0 }
 0x3d1   :  { %6012 = vst.msk [vmem:[%s11431_s3 + $0xa0] sm:$0xff] %vm77_vm0, %v5584_v60  ;;  %6032 = vst [vmem:[%s11431_s3 + $0x140] sm:$0xff] %v5487_v17 }
 0x3d2   :  { %v5586_v41 = vpop.f32.mrf.mxu1  ;;  %v5491_v0 = vpop.f32.mrf.mxu0  ;;  %5912 = vmatmul.mubr.bf16.vlgmr.msra.gmra.mxu0 %v10774_v32 }
 0x3d3   :  { %6727 = vst [vmem:[%s11431_s3 + $0x3f0] sm:$0xff] %v5586_v41  ;;  %6038 = vst [vmem:[%s11431_s3 + $0x170] sm:$0xff] %v5491_v0  ;;  %6706 = vmatprep.mubr.msk.bf16.mxu0 %vm5176_vm8, %v10780_v44 }
 0x3d4   :  { %v5588_v16 = vpop.f32.mrf.mxu1  ;;  %v5493_v39 = vpop.f32.mrf.mxu0 }
 0x3d5   :  { %6019 = vst.msk [vmem:[%s11431_s3 + $0xd8] sm:$0xff] %vm77_vm0, %v5588_v16  ;;  %6039 = vst [vmem:[%s11431_s3 + $0x178] sm:$0xff] %v5493_v39 }
 0x3d6   :  { %v5590_v3 = vpop.f32.mrf.mxu1  ;;  %v5495_v32 = vpop.f32.mrf.mxu0  ;;  %5952 = vmatmul.mubr.bf16.vlgmr.msra.gmra.mxu1 %v10838_v31 }
 0x3d7   :  { %6734 = vst [vmem:[%s11431_s3 + $0x428] sm:$0xff] %v5590_v3  ;;  %6045 = vst [vmem:[%s11431_s3 + $0x1a8] sm:$0xff] %v5495_v32  ;;  %6710 = vmatprep.mubr.msk.bf16.mxu1 %vm5176_vm8, %v10844_v58 }
 0x3d8   :  { %v5594_v2 = vpop.f32.mrf.mxu1  ;;  %v5497_v7 = vpop.f32.mrf.mxu0 }
 0x3d9   :  { %6026 = vst.msk [vmem:[%s11431_s3 + $0x110] sm:$0xff] %vm77_vm0, %v5594_v2  ;;  %6046 = vst [vmem:[%s11431_s3 + $0x1b0] sm:$0xff] %v5497_v7 }
 0x3da   :  { %v5596_v44 = vpop.f32.mrf.mxu1  ;;  %v5501_v50 = vpop.f32.mrf.mxu0  ;;  %5922 = vmatmul.mubr.bf16.gmra.mxu0 %v10790_v61 }
 0x3db   :  { %6741 = vst [vmem:[%s11431_s3 + $0x460] sm:$0xff] %v5596_v44  ;;  %6052 = vst [vmem:[%s11431_s3 + $0x1e0] sm:$0xff] %v5501_v50  ;;  %6707 = vmatprep.mubr.msk.bf16.mxu0 %vm5176_vm8, %v10796_v4 }
 0x3dc   :  { %v5598_v22 = vpop.f32.mrf.mxu1  ;;  %v5503_v49 = vpop.f32.mrf.mxu0 }
 0x3dd   :  { %6033 = vst.msk [vmem:[%s11431_s3 + $0x148] sm:$0xff] %vm77_vm0, %v5598_v22  ;;  %6053 = vst [vmem:[%s11431_s3 + $0x1e8] sm:$0xff] %v5503_v49 }
 0x3de   :  { %v5600_v61 = vpop.f32.mrf.mxu1  ;;  %v5505_v47 = vpop.f32.mrf.mxu0  ;;  %5962 = vmatmul.mubr.bf16.gmra.mxu1 %v10857_v28 }
 0x3df   :  { %6748 = vst [vmem:[%s11431_s3 + $0x498] sm:$0xff] %v5600_v61  ;;  %6059 = vst [vmem:[%s11431_s3 + $0x218] sm:$0xff] %v5505_v47  ;;  %6711 = vmatprep.mubr.msk.bf16.mxu1 %vm5176_vm8, %v10869_v59 }
 0x3e0   :  { %v5604_v4 = vpop.f32.mrf.mxu1  ;;  %v5507_v26 = vpop.f32.mrf.mxu0 }
 0x3e1   :  { %6040 = vst.msk [vmem:[%s11431_s3 + $0x180] sm:$0xff] %vm77_vm0, %v5604_v4  ;;  %6060 = vst [vmem:[%s11431_s3 + $0x220] sm:$0xff] %v5507_v26 }
 0x3e2   :  { %v5606_v6 = vpop.f32.mrf.mxu1  ;;  %v5511_v27 = vpop.f32.mrf.mxu0  ;;  %5932 = vmatmul.mubr.bf16.gmra.mxu0 %v10806_v34 }
 0x3e3   :  { %6755 = vst [vmem:[%s11431_s3 + $0x4d0] sm:$0xff] %v5606_v6  ;;  %6066 = vst [vmem:[%s11431_s3 + $0x250] sm:$0xff] %v5511_v27  ;;  %6708 = vmatprep.mubr.msk.bf16.mxu0 %vm5176_vm8, %v10812_v45 }
 0x3e4   :  { %v5608_v33 = vpop.f32.mrf.mxu1  ;;  %v5513_v18 = vpop.f32.mrf.mxu0 }
 0x3e5   :  { %6047 = vst.msk [vmem:[%s11431_s3 + $0x1b8] sm:$0xff] %vm77_vm0, %v5608_v33  ;;  %6067 = vst [vmem:[%s11431_s3 + $0x258] sm:$0xff] %v5513_v18 }
 0x3e6   :  { %v5610_v34 = vpop.f32.mrf.mxu1  ;;  %v5515_v37 = vpop.f32.mrf.mxu0  ;;  %5972 = vmatmul.mubr.bf16.gmra.mxu1 %v10885_v52 }
 0x3e7   :  { %6762 = vst [vmem:[%s11431_s3 + $0x508] sm:$0xff] %v5610_v34  ;;  %6073 = vst [vmem:[%s11431_s3 + $0x288] sm:$0xff] %v5515_v37  ;;  %6712 = vmatprep.mubr.msk.bf16.mxu1 %vm5176_vm8, %v10897_v24 }
 0x3e8   :  { %v5614_v45 = vpop.f32.mrf.mxu1  ;;  %v5517_v40 = vpop.f32.mrf.mxu0 }
 0x3e9   :  { %6054 = vst.msk [vmem:[%s11431_s3 + $0x1f0] sm:$0xff] %vm77_vm0, %v5614_v45  ;;  %6074 = vst [vmem:[%s11431_s3 + $0x290] sm:$0xff] %v5517_v40 }
 0x3ea   :  { %v5616_v54 = vpop.f32.mrf.mxu1  ;;  %v5521_v56 = vpop.f32.mrf.mxu0  ;;  %5942 = vmatmul.mubr.bf16.gmra.mxu0 %v10822_v48 }
 0x3eb   :  { %6769 = vst [vmem:[%s11431_s3 + $0x540] sm:$0xff] %v5616_v54  ;;  %6080 = vst [vmem:[%s11431_s3 + $0x2c0] sm:$0xff] %v5521_v56 }
 0x3ec   :  { %v5618_v25 = vpop.f32.mrf.mxu1  ;;  %v5523_v63 = vpop.f32.mrf.mxu0 }
 0x3ed   :  { %6061 = vst.msk [vmem:[%s11431_s3 + $0x228] sm:$0xff] %vm77_vm0, %v5618_v25  ;;  %6081 = vst [vmem:[%s11431_s3 + $0x2c8] sm:$0xff] %v5523_v63 }
 0x3ee   :  { %v5620_v48 = vpop.f32.mrf.mxu1  ;;  %v5525_v31 = vpop.f32.mrf.mxu0  ;;  %5982 = vmatmul.mubr.bf16.gmra.mxu1 %v10914_v5 }
 0x3ef   :  { %6776 = vst [vmem:[%s11431_s3 + $0x578] sm:$0xff] %v5620_v48  ;;  %6087 = vst [vmem:[%s11431_s3 + $0x2f8] sm:$0xff] %v5525_v31 }
 0x3f0   :  { %v5624_v30 = vpop.f32.mrf.mxu1  ;;  %v5527_v43 = vpop.f32.mrf.mxu0 }
 0x3f1   :  { %6068 = vst.msk [vmem:[%s11431_s3 + $0x260] sm:$0xff] %vm77_vm0, %v5624_v30  ;;  %6088 = vst [vmem:[%s11431_s3 + $0x300] sm:$0xff] %v5527_v43 }
 0x3f2   :  { %v5626_v58 = vpop.f32.mrf.mxu1  ;;  %v5531_v14 = vpop.f32.mrf.mxu0 }
 0x3f3   :  { %6783 = vst [vmem:[%s11431_s3 + $0x5b0] sm:$0xff] %v5626_v58  ;;  %6094 = vst [vmem:[%s11431_s3 + $0x330] sm:$0xff] %v5531_v14 }
 0x3f4   :  { %v5628_v62 = vpop.f32.mrf.mxu1  ;;  %v5533_v8 = vpop.f32.mrf.mxu0 }
 0x3f5   :  { %6075 = vst.msk [vmem:[%s11431_s3 + $0x298] sm:$0xff] %vm77_vm0, %v5628_v62  ;;  %6095 = vst [vmem:[%s11431_s3 + $0x338] sm:$0xff] %v5533_v8 }
 0x3f6   :  { %v5630_v15 = vpop.f32.mrf.mxu1  ;;  %v5535_v28 = vpop.f32.mrf.mxu0 }
 0x3f7   :  { %6790 = vst [vmem:[%s11431_s3 + $0x5e8] sm:$0xff] %v5630_v15  ;;  %6101 = vst [vmem:[%s11431_s3 + $0x368] sm:$0xff] %v5535_v28 }
 0x3f8   :  { %v5537_v1 = vpop.f32.mrf.mxu0 }
 0x3f9   :  { %6102 = vst [vmem:[%s11431_s3 + $0x370] sm:$0xff] %v5537_v1  ;;  %v5634_v35 = vpop.f32.mrf.mxu1 }
 0x3fa   :  { %6082 = vst.msk [vmem:[%s11431_s3 + $0x2d0] sm:$0xff] %vm77_vm0, %v5634_v35 }
 0x3fb   :  { %v5636_v53 = vpop.f32.mrf.mxu1 }
 0x3fc   :  { %6797 = vst [vmem:[%s11431_s3 + $0x620] sm:$0xff] %v5636_v53 }
 0x3fd   :  { %v5638_v59 = vpop.f32.mrf.mxu1 }
 0x3fe   :  { %6089 = vst.msk [vmem:[%s11431_s3 + $0x308] sm:$0xff] %vm77_vm0, %v5638_v59 }
 0x3ff   :  { %v5640_v20 = vpop.f32.mrf.mxu1 }
 0x400   :  { %6804 = vst [vmem:[%s11431_s3 + $0x658] sm:$0xff] %v5640_v20 }
 0x401   :  { %v5644_v12 = vpop.f32.mrf.mxu1 }
 0x402   :  { %6096 = vst.msk [vmem:[%s11431_s3 + $0x340] sm:$0xff] %vm77_vm0, %v5644_v12 }
 0x403   :  { %v5646_v55 = vpop.f32.mrf.mxu1 }
 0x404   :  { %6811 = vst [vmem:[%s11431_s3 + $0x690] sm:$0xff] %v5646_v55 }
 0x405   :  { %v5648_v23 = vpop.f32.mrf.mxu1 }
 0x406   :  { %6103 = vst.msk [vmem:[%s11431_s3 + $0x378] sm:$0xff] %vm77_vm0, %v5648_v23 }
 0x407   :  { %v5650_v13 = vpop.f32.mrf.mxu1 }
 0x408   :  { %6818 = vst [vmem:[%s11431_s3 + $0x6c8] sm:$0xff] %v5650_v13 }
 0x452   :  { %v5687_v52 = vpop.f32.mrf.mxu0 }
 0x453   :  { %6714 = vst [vmem:[%s11431_s3 + $0x388] sm:$0xff] %v5687_v52 }
 0x454   :  { %v5689_v42 = vpop.f32.mrf.mxu0 }
 0x455   :  { %6715 = vst [vmem:[%s11431_s3 + $0x390] sm:$0xff] %v5689_v42 }
 0x456   :  { %v5691_v38 = vpop.f32.mrf.mxu0  ;;  %v5800_v29 = vpop.f32.mrf.mxu1 }
 0x457   :  { %6721 = vst [vmem:[%s11431_s3 + $0x3c0] sm:$0xff] %v5691_v38  ;;  %6716 = vst [vmem:[%s11431_s3 + $0x398] sm:$0xff] %v5800_v29 }
 0x458   :  { %v5693_v24 = vpop.f32.mrf.mxu0  ;;  %v5802_v36 = vpop.f32.mrf.mxu1 }
 0x459   :  { %6722 = vst [vmem:[%s11431_s3 + $0x3c8] sm:$0xff] %v5693_v24  ;;  %6717 = vst [vmem:[%s11431_s3 + $0x3a0] sm:$0xff] %v5802_v36 }
 0x45a   :  { %v5697_v19 = vpop.f32.mrf.mxu0  ;;  %v5804_v21 = vpop.f32.mrf.mxu1 }
 0x45b   :  { %6728 = vst [vmem:[%s11431_s3 + $0x3f8] sm:$0xff] %v5697_v19  ;;  %6723 = vst [vmem:[%s11431_s3 + $0x3d0] sm:$0xff] %v5804_v21 }
 0x45c   :  { %v5699_v11 = vpop.f32.mrf.mxu0  ;;  %v5806_v5 = vpop.f32.mrf.mxu1 }
 0x45d   :  { %6729 = vst [vmem:[%s11431_s3 + $0x400] sm:$0xff] %v5699_v11  ;;  %6724 = vst [vmem:[%s11431_s3 + $0x3d8] sm:$0xff] %v5806_v5 }
 0x45e   :  { %v5701_v51 = vpop.f32.mrf.mxu0  ;;  %v5810_v57 = vpop.f32.mrf.mxu1 }
 0x45f   :  { %6735 = vst [vmem:[%s11431_s3 + $0x430] sm:$0xff] %v5701_v51  ;;  %6730 = vst [vmem:[%s11431_s3 + $0x408] sm:$0xff] %v5810_v57 }
 0x460   :  { %v5703_v46 = vpop.f32.mrf.mxu0  ;;  %v5812_v9 = vpop.f32.mrf.mxu1 }
 0x461   :  { %6736 = vst [vmem:[%s11431_s3 + $0x438] sm:$0xff] %v5703_v46  ;;  %6731 = vst [vmem:[%s11431_s3 + $0x410] sm:$0xff] %v5812_v9 }
 0x462   :  { %v5707_v10 = vpop.f32.mrf.mxu0  ;;  %v5814_v60 = vpop.f32.mrf.mxu1 }
 0x463   :  { %6742 = vst [vmem:[%s11431_s3 + $0x468] sm:$0xff] %v5707_v10  ;;  %6737 = vst [vmem:[%s11431_s3 + $0x440] sm:$0xff] %v5814_v60 }
 0x464   :  { %v5709_v17 = vpop.f32.mrf.mxu0  ;;  %v5816_v41 = vpop.f32.mrf.mxu1 }
 0x465   :  { %6743 = vst [vmem:[%s11431_s3 + $0x470] sm:$0xff] %v5709_v17  ;;  %6738 = vst [vmem:[%s11431_s3 + $0x448] sm:$0xff] %v5816_v41 }
 0x466   :  { %v5711_v0 = vpop.f32.mrf.mxu0  ;;  %v5820_v16 = vpop.f32.mrf.mxu1 }
 0x467   :  { %6749 = vst [vmem:[%s11431_s3 + $0x4a0] sm:$0xff] %v5711_v0  ;;  %6744 = vst [vmem:[%s11431_s3 + $0x478] sm:$0xff] %v5820_v16 }
 0x468   :  { %v5713_v39 = vpop.f32.mrf.mxu0  ;;  %v5822_v3 = vpop.f32.mrf.mxu1 }
 0x469   :  { %6750 = vst [vmem:[%s11431_s3 + $0x4a8] sm:$0xff] %v5713_v39  ;;  %6745 = vst [vmem:[%s11431_s3 + $0x480] sm:$0xff] %v5822_v3 }
 0x46a   :  { %v5717_v32 = vpop.f32.mrf.mxu0  ;;  %v5824_v2 = vpop.f32.mrf.mxu1 }
 0x46b   :  { %6756 = vst [vmem:[%s11431_s3 + $0x4d8] sm:$0xff] %v5717_v32  ;;  %6751 = vst [vmem:[%s11431_s3 + $0x4b0] sm:$0xff] %v5824_v2 }
 0x46c   :  { %v5719_v7 = vpop.f32.mrf.mxu0  ;;  %v5826_v44 = vpop.f32.mrf.mxu1 }
 0x46d   :  { %6757 = vst [vmem:[%s11431_s3 + $0x4e0] sm:$0xff] %v5719_v7  ;;  %6752 = vst [vmem:[%s11431_s3 + $0x4b8] sm:$0xff] %v5826_v44 }
 0x46e   :  { %v5721_v50 = vpop.f32.mrf.mxu0  ;;  %v5830_v22 = vpop.f32.mrf.mxu1 }
 0x46f   :  { %6763 = vst [vmem:[%s11431_s3 + $0x510] sm:$0xff] %v5721_v50  ;;  %6758 = vst [vmem:[%s11431_s3 + $0x4e8] sm:$0xff] %v5830_v22 }
 0x470   :  { %v5723_v49 = vpop.f32.mrf.mxu0  ;;  %v5832_v61 = vpop.f32.mrf.mxu1 }
 0x471   :  { %6764 = vst [vmem:[%s11431_s3 + $0x518] sm:$0xff] %v5723_v49  ;;  %6759 = vst [vmem:[%s11431_s3 + $0x4f0] sm:$0xff] %v5832_v61 }
 0x472   :  { %v5727_v47 = vpop.f32.mrf.mxu0  ;;  %v5834_v4 = vpop.f32.mrf.mxu1 }
 0x473   :  { %6770 = vst [vmem:[%s11431_s3 + $0x548] sm:$0xff] %v5727_v47  ;;  %6765 = vst [vmem:[%s11431_s3 + $0x520] sm:$0xff] %v5834_v4 }
 0x474   :  { %v5729_v26 = vpop.f32.mrf.mxu0  ;;  %v5836_v6 = vpop.f32.mrf.mxu1 }
 0x475   :  { %6771 = vst [vmem:[%s11431_s3 + $0x550] sm:$0xff] %v5729_v26  ;;  %6766 = vst [vmem:[%s11431_s3 + $0x528] sm:$0xff] %v5836_v6 }
 0x476   :  { %v5731_v27 = vpop.f32.mrf.mxu0  ;;  %v5840_v33 = vpop.f32.mrf.mxu1 }
 0x477   :  { %6777 = vst [vmem:[%s11431_s3 + $0x580] sm:$0xff] %v5731_v27  ;;  %6772 = vst [vmem:[%s11431_s3 + $0x558] sm:$0xff] %v5840_v33 }
 0x478   :  { %v5733_v18 = vpop.f32.mrf.mxu0  ;;  %v5842_v34 = vpop.f32.mrf.mxu1 }
 0x479   :  { %6778 = vst [vmem:[%s11431_s3 + $0x588] sm:$0xff] %v5733_v18  ;;  %6773 = vst [vmem:[%s11431_s3 + $0x560] sm:$0xff] %v5842_v34 }
 0x47a   :  { %v5737_v37 = vpop.f32.mrf.mxu0  ;;  %v5844_v45 = vpop.f32.mrf.mxu1 }
 0x47b   :  { %6784 = vst [vmem:[%s11431_s3 + $0x5b8] sm:$0xff] %v5737_v37  ;;  %6779 = vst [vmem:[%s11431_s3 + $0x590] sm:$0xff] %v5844_v45 }
 0x47c   :  { %v5739_v40 = vpop.f32.mrf.mxu0  ;;  %v5846_v54 = vpop.f32.mrf.mxu1 }
 0x47d   :  { %6785 = vst [vmem:[%s11431_s3 + $0x5c0] sm:$0xff] %v5739_v40  ;;  %6780 = vst [vmem:[%s11431_s3 + $0x598] sm:$0xff] %v5846_v54 }
 0x47e   :  { %v5741_v56 = vpop.f32.mrf.mxu0  ;;  %v5850_v25 = vpop.f32.mrf.mxu1 }
 0x47f   :  { %6791 = vst [vmem:[%s11431_s3 + $0x5f0] sm:$0xff] %v5741_v56  ;;  %6786 = vst [vmem:[%s11431_s3 + $0x5c8] sm:$0xff] %v5850_v25 }
 0x480   :  { %v5743_v63 = vpop.f32.mrf.mxu0  ;;  %v5852_v48 = vpop.f32.mrf.mxu1 }
 0x481   :  { %6792 = vst [vmem:[%s11431_s3 + $0x5f8] sm:$0xff] %v5743_v63  ;;  %6787 = vst [vmem:[%s11431_s3 + $0x5d0] sm:$0xff] %v5852_v48 }
 0x482   :  { %v5747_v31 = vpop.f32.mrf.mxu0  ;;  %v5854_v30 = vpop.f32.mrf.mxu1 }
 0x483   :  { %6798 = vst [vmem:[%s11431_s3 + $0x628] sm:$0xff] %v5747_v31  ;;  %6793 = vst [vmem:[%s11431_s3 + $0x600] sm:$0xff] %v5854_v30 }
 0x484   :  { %v5749_v43 = vpop.f32.mrf.mxu0  ;;  %v5856_v58 = vpop.f32.mrf.mxu1 }
 0x485   :  { %6799 = vst [vmem:[%s11431_s3 + $0x630] sm:$0xff] %v5749_v43  ;;  %6794 = vst [vmem:[%s11431_s3 + $0x608] sm:$0xff] %v5856_v58 }
 0x486   :  { %v5751_v14 = vpop.f32.mrf.mxu0  ;;  %v5860_v62 = vpop.f32.mrf.mxu1 }
 0x487   :  { %6805 = vst [vmem:[%s11431_s3 + $0x660] sm:$0xff] %v5751_v14  ;;  %6800 = vst [vmem:[%s11431_s3 + $0x638] sm:$0xff] %v5860_v62 }
 0x488   :  { %v5753_v8 = vpop.f32.mrf.mxu0  ;;  %v5862_v15 = vpop.f32.mrf.mxu1 }
 0x489   :  { %6806 = vst [vmem:[%s11431_s3 + $0x668] sm:$0xff] %v5753_v8  ;;  %6801 = vst [vmem:[%s11431_s3 + $0x640] sm:$0xff] %v5862_v15 }
 0x48a   :  { %v5757_v28 = vpop.f32.mrf.mxu0  ;;  %v5864_v1 = vpop.f32.mrf.mxu1 }
 0x48b   :  { %6812 = vst [vmem:[%s11431_s3 + $0x698] sm:$0xff] %v5757_v28  ;;  %6807 = vst [vmem:[%s11431_s3 + $0x670] sm:$0xff] %v5864_v1 }
 0x48c   :  { %v5759_v35 = vpop.f32.mrf.mxu0  ;;  %v5866_v53 = vpop.f32.mrf.mxu1 }
 0x48d   :  { %6813 = vst [vmem:[%s11431_s3 + $0x6a0] sm:$0xff] %v5759_v35  ;;  %6808 = vst [vmem:[%s11431_s3 + $0x678] sm:$0xff] %v5866_v53 }
 0x48e   :  { %v5761_v59 = vpop.f32.mrf.mxu0  ;;  %v5870_v20 = vpop.f32.mrf.mxu1 }
 0x48f   :  { %6819 = vst [vmem:[%s11431_s3 + $0x6d0] sm:$0xff] %v5761_v59  ;;  %6814 = vst [vmem:[%s11431_s3 + $0x6a8] sm:$0xff] %v5870_v20 }
 0x490   :  { %v5763_v12 = vpop.f32.mrf.mxu0  ;;  %v5872_v55 = vpop.f32.mrf.mxu1 }
 0x491   :  { %6820 = vst [vmem:[%s11431_s3 + $0x6d8] sm:$0xff] %v5763_v12  ;;  %6815 = vst [vmem:[%s11431_s3 + $0x6b0] sm:$0xff] %v5872_v55 }
 0x492   :  { %v5874_v23 = vpop.f32.mrf.mxu1  ;;  %v5913_v13 = vpop.f32.mrf.mxu0 }
 0x493   :  { %6821 = vst [vmem:[%s11431_s3 + $0x6e0] sm:$0xff] %v5874_v23  ;;  %6718 = vst [vmem:[%s11431_s3 + $0x3a8] sm:$0xff] %v5913_v13 }
 0x494   :  { %v5876_v52 = vpop.f32.mrf.mxu1  ;;  %v5915_v42 = vpop.f32.mrf.mxu0 }
 0x495   :  { %6822 = vst [vmem:[%s11431_s3 + $0x6e8] sm:$0xff] %v5876_v52  ;;  %6719 = vst.msk [vmem:[%s11431_s3 + $0x3b0] sm:$0xff] %vm77_vm0, %v5915_v42 }
 0x496   :  { %v5917_v38 = vpop.f32.mrf.mxu0  ;;  %v5953_v29 = vpop.f32.mrf.mxu1 }
 0x497   :  { %6725 = vst [vmem:[%s11431_s3 + $0x3e0] sm:$0xff] %v5917_v38  ;;  %6774 = vst [vmem:[%s11431_s3 + $0x568] sm:$0xff] %v5953_v29 }
 0x498   :  { %v5919_v24 = vpop.f32.mrf.mxu0  ;;  %v5955_v36 = vpop.f32.mrf.mxu1 }
 0x499   :  { %6726 = vst.msk [vmem:[%s11431_s3 + $0x3e8] sm:$0xff] %vm77_vm0, %v5919_v24  ;;  %6775 = vst.msk [vmem:[%s11431_s3 + $0x570] sm:$0xff] %vm77_vm0, %v5955_v36 }
 0x49a   :  { %v5923_v19 = vpop.f32.mrf.mxu0  ;;  %v5957_v21 = vpop.f32.mrf.mxu1 }
 0x49b   :  { %6732 = vst [vmem:[%s11431_s3 + $0x418] sm:$0xff] %v5923_v19  ;;  %6781 = vst [vmem:[%s11431_s3 + $0x5a0] sm:$0xff] %v5957_v21 }
 0x49c   :  { %v5925_v11 = vpop.f32.mrf.mxu0  ;;  %v5959_v5 = vpop.f32.mrf.mxu1 }
 0x49d   :  { %6733 = vst.msk [vmem:[%s11431_s3 + $0x420] sm:$0xff] %vm77_vm0, %v5925_v11  ;;  %6782 = vst.msk [vmem:[%s11431_s3 + $0x5a8] sm:$0xff] %vm77_vm0, %v5959_v5 }
 0x49e   :  { %v5927_v51 = vpop.f32.mrf.mxu0  ;;  %v5963_v57 = vpop.f32.mrf.mxu1 }
 0x49f   :  { %6739 = vst [vmem:[%s11431_s3 + $0x450] sm:$0xff] %v5927_v51  ;;  %6788 = vst [vmem:[%s11431_s3 + $0x5d8] sm:$0xff] %v5963_v57 }
 0x4a0   :  { %v5929_v46 = vpop.f32.mrf.mxu0  ;;  %v5965_v9 = vpop.f32.mrf.mxu1 }
 0x4a1   :  { %6740 = vst.msk [vmem:[%s11431_s3 + $0x458] sm:$0xff] %vm77_vm0, %v5929_v46  ;;  %6789 = vst.msk [vmem:[%s11431_s3 + $0x5e0] sm:$0xff] %vm77_vm0, %v5965_v9 }
 0x4a2   :  { %v5933_v10 = vpop.f32.mrf.mxu0  ;;  %v5967_v60 = vpop.f32.mrf.mxu1 }
 0x4a3   :  { %6746 = vst [vmem:[%s11431_s3 + $0x488] sm:$0xff] %v5933_v10  ;;  %6795 = vst [vmem:[%s11431_s3 + $0x610] sm:$0xff] %v5967_v60 }
 0x4a4   :  { %v5935_v17 = vpop.f32.mrf.mxu0  ;;  %v5969_v41 = vpop.f32.mrf.mxu1 }
 0x4a5   :  { %6747 = vst.msk [vmem:[%s11431_s3 + $0x490] sm:$0xff] %vm77_vm0, %v5935_v17  ;;  %6796 = vst.msk [vmem:[%s11431_s3 + $0x618] sm:$0xff] %vm77_vm0, %v5969_v41 }
 0x4a6   :  { %v5937_v0 = vpop.f32.mrf.mxu0  ;;  %v5973_v16 = vpop.f32.mrf.mxu1 }
 0x4a7   :  { %6753 = vst [vmem:[%s11431_s3 + $0x4c0] sm:$0xff] %v5937_v0  ;;  %6802 = vst [vmem:[%s11431_s3 + $0x648] sm:$0xff] %v5973_v16 }
 0x4a8   :  { %v5939_v39 = vpop.f32.mrf.mxu0  ;;  %v5975_v3 = vpop.f32.mrf.mxu1 }
 0x4a9   :  { %6754 = vst.msk [vmem:[%s11431_s3 + $0x4c8] sm:$0xff] %vm77_vm0, %v5939_v39  ;;  %6803 = vst.msk [vmem:[%s11431_s3 + $0x650] sm:$0xff] %vm77_vm0, %v5975_v3 }
 0x4aa   :  { %v5943_v32 = vpop.f32.mrf.mxu0  ;;  %v5977_v2 = vpop.f32.mrf.mxu1 }
 0x4ab   :  { %6760 = vst [vmem:[%s11431_s3 + $0x4f8] sm:$0xff] %v5943_v32  ;;  %6809 = vst [vmem:[%s11431_s3 + $0x680] sm:$0xff] %v5977_v2 }
 0x4ac   :  { %v5945_v7 = vpop.f32.mrf.mxu0  ;;  %v5979_v44 = vpop.f32.mrf.mxu1 }
 0x4ad   :  { %6761 = vst.msk [vmem:[%s11431_s3 + $0x500] sm:$0xff] %vm77_vm0, %v5945_v7  ;;  %6810 = vst.msk [vmem:[%s11431_s3 + $0x688] sm:$0xff] %vm77_vm0, %v5979_v44 }
 0x4ae   :  { %v5947_v50 = vpop.f32.mrf.mxu0  ;;  %v5983_v22 = vpop.f32.mrf.mxu1 }
 0x4af   :  { %6767 = vst [vmem:[%s11431_s3 + $0x530] sm:$0xff] %v5947_v50  ;;  %6816 = vst [vmem:[%s11431_s3 + $0x6b8] sm:$0xff] %v5983_v22 }
 0x4b0   :  { %v5949_v49 = vpop.f32.mrf.mxu0  ;;  %v5985_v61 = vpop.f32.mrf.mxu1 }
 0x4b1   :  { %6768 = vst.msk [vmem:[%s11431_s3 + $0x538] sm:$0xff] %vm77_vm0, %v5949_v49  ;;  %6817 = vst.msk [vmem:[%s11431_s3 + $0x6c0] sm:$0xff] %vm77_vm0, %v5985_v61 }
 0x4b2   :  { %v5987_v47 = vpop.f32.mrf.mxu1 }
 0x4b3   :  { %6823 = vst [vmem:[%s11431_s3 + $0x6f0] sm:$0xff] %v5987_v47 }
 0x4b4   :  { %v5989_v4 = vpop.f32.mrf.mxu1 }
 0x4b5   :  { %6824 = vst.msk [vmem:[%s11431_s3 + $0x6f8] sm:$0xff] %vm77_vm0, %v5989_v4 }

</bundles_post_ra>
